<compile_context>
chip_gen: v7x
topology: tpu7x:2x2x1
jax: 0.10.0
libtpu: 0.0.40
codegen_flags: <defaults>
</compile_context>

<pallas_src>
import functools

import jax
import jax.numpy as jnp
from jax import lax
from jax.experimental import pallas as pl
from jax.experimental.pallas import tpu as pltpu

KH = KW = 5  # both convs / conv-transposes in AE_baseline use 5x5 kernels


# ---------------------------------------------------------------------------
# Fused forward kernel (one grid step == one image).
# ---------------------------------------------------------------------------
def _fused_ae_kernel(x_ref,
                     w1_ref, b1_ref, w2_ref, b2_ref,
                     wehl_ref, behl_ref, weol_ref, beol_ref,
                     wdhl_ref, bdhl_ref, wdol_ref, bdol_ref,
                     wd1_ref, bd1_ref, wd2_ref, bd2_ref,
                     out_ref, emb_ref,
                     dec_seed_ref, pad1_ref, pad2_ref, obuf_ref,
                     *, H, W):
    f32, bf16 = jnp.float32, jnp.bfloat16

    def conv_taps(x_bf, win, w_ref, b_ref, n_out):
        """Valid stride-1 conv, channel-major row-flattened layout.

        x_bf : (Cin, Min) bf16, column index = h*win + w  (junk-preserving).
        w_ref: (kh*kw, Cout, Cin) bf16.   b_ref: (Cout, 1) f32.
        Returns (Cout, n_out) f32 after bias + ReLU.  Columns h*win+w with
        h < Hout, w < Wout hold the conv result; other columns are junk
        (always finite) and are never read as valid data downstream.
        """
        acc = None  # register-resident f32 accumulation (no ref RMW)
        for di in range(KH):
            for dj in range(KW):
                s = di * win + dj
                t = jnp.dot(w_ref[di * KW + dj], x_bf[:, s:s + n_out],
                            preferred_element_type=f32)
                acc = t if acc is None else acc + t
        return jnp.maximum(acc + b_ref[...], 0.0)

    shift = (KH - 1) * W + (KW - 1)

    # ---------------- encoder convs ----------------
    x0 = x_ref[0].astype(bf16)                        # (Cin, H*W), cast once
    m1 = H * W - shift
    a1 = conv_taps(x0, W, w1_ref, b1_ref, m1)         # (6,  m1)  conv + ReLU
    m2 = m1 - shift
    a2 = conv_taps(a1.astype(bf16), W, w2_ref, b2_ref, m2)   # (16, m2)

    # ------------- dense chain (flatten folded into wehl) -------------
    a2b = a2.astype(bf16)
    h = None
    for c in range(a2.shape[0]):                      # 16 accumulated matmuls
        t = jnp.dot(a2b[c:c + 1, :], wehl_ref[c], preferred_element_type=f32)
        h = t if h is None else h + t
    h = jnp.tanh(h + behl_ref[...])                                  # (1, hid)
    # TODO(synk): F.dropout is stochastic in training mode; identity (eval).
    emb = jnp.tanh(jnp.dot(h.astype(bf16), weol_ref[...],
                           preferred_element_type=f32) + beol_ref[...])
    emb_ref[0] = emb                                                 # (1, bott)
    h = jnp.tanh(jnp.dot(emb.astype(bf16), wdhl_ref[...],
                         preferred_element_type=f32) + bdhl_ref[...])
    d = jnp.tanh(jnp.dot(h.astype(bf16), wdol_ref[...],
                         preferred_element_type=f32) + bdol_ref[...])  # (1,enc)

    # ---- unflatten + ConvTranspose zero halo, all in VMEM scratch ----
    He, We = H - 2 * (KH - 1), W - 2 * (KW - 1)       # 8, 8
    Ce = dec_seed_ref.shape[0]                        # 16
    for c in range(Ce):                               # (1, enc) -> (Ce, He*We)
        dec_seed_ref[pl.ds(c, 1), :] = d[:, c * He * We:(c + 1) * He * We]
    pad1_ref[...] = jnp.zeros(pad1_ref.shape, f32)    # halo stays exactly zero
    for r in range(He):
        pad1_ref[:, pl.ds((r + KH - 1) * W + (KW - 1), We)] = \
            dec_seed_ref[:, pl.ds(r * We, We)]

    # ---------------- decoder convs ----------------
    md1 = H * W - shift
    r1 = conv_taps(pad1_ref[...].astype(bf16), W, wd1_ref, bd1_ref, md1)

    Hm, Wm = He + KH - 1, We + KW - 1                 # 12, 12
    Wp2 = Wm + 2 * (KW - 1)                           # 20
    pad2_ref[...] = jnp.zeros(pad2_ref.shape, f32)
    for r in range(Hm):
        pad2_ref[:, pl.ds((r + KH - 1) * Wp2 + (KW - 1), Wm)] = \
            r1[:, r * W:r * W + Wm]

    md2 = (Hm + 2 * (KH - 1)) * Wp2 - ((KH - 1) * Wp2 + (KW - 1))
    r2 = conv_taps(pad2_ref[...].astype(bf16), Wp2, wd2_ref, bd2_ref, md2)

    # repack the 20-wide junk layout into a lane-dense (C, H*W) block
    for r in range(H):
        obuf_ref[:, pl.ds(r * W, W)] = r2[:, r * Wp2:r * Wp2 + W]
    out_ref[0] = obuf_ref[...]


# ---------------------------------------------------------------------------
# Wrapper: one pallas_call for the whole forward.
# ---------------------------------------------------------------------------
_WEIGHT_ORDER = ("w1", "b1", "w2", "b2", "wehl", "behl", "weol", "beol",
                 "wdhl", "bdhl", "wdol", "bdol", "wd1", "bd1", "wd2", "bd2")


def ae_baseline_forward(x_nchw, p):
    B, C, H, W = x_nchw.shape
    assert H > 2 * (KH - 1) and W > 2 * (KW - 1), "input too small for two 5x5 convs"
    He, We = H - 2 * (KH - 1), W - 2 * (KW - 1)
    Hm, Wm = He + KH - 1, We + KW - 1
    Hp2, Wp2 = Hm + 2 * (KH - 1), Wm + 2 * (KW - 1)
    Ce = p["w2"].shape[1]                # 16
    Cd1 = p["wd1"].shape[1]              # 6
    bott = p["weol"].shape[1]

    x2 = x_nchw.reshape(B, C, H * W)     # contiguous view of NCHW (free)
    weights = [p[k] for k in _WEIGHT_ORDER]

    in_specs = [pl.BlockSpec((1, C, H * W), lambda i: (i, 0, 0))]
    in_specs += [pl.BlockSpec(w.shape, lambda i, n=w.ndim: (0,) * n)
                 for w in weights]

    out, emb = pl.pallas_call(
        functools.partial(_fused_ae_kernel, H=H, W=W),
        out_shape=(jax.ShapeDtypeStruct((B, C, H * W), jnp.float32),
                   jax.ShapeDtypeStruct((B, 1, bott), jnp.float32)),
        grid=(B,),
        in_specs=in_specs,
        out_specs=(pl.BlockSpec((1, C, H * W), lambda i: (i, 0, 0)),
                   pl.BlockSpec((1, 1, bott), lambda i: (i, 0, 0))),
        scratch_shapes=[
            pltpu.VMEM((Ce, He * We), jnp.float32),    # decoder seed (16, 64)
            pltpu.VMEM((Ce, H * W), jnp.float32),      # convT1 padded input
            pltpu.VMEM((Cd1, Hp2 * Wp2), jnp.float32),  # convT2 padded input
            pltpu.VMEM((C, H * W), jnp.float32),       # lane-dense output slab
        ],
        compiler_params=pltpu.CompilerParams(
            dimension_semantics=("parallel",)),
    )(x2, *weights)
    return out.reshape(B, C, H, W), emb.reshape(B, bott)


# ---------------------------------------------------------------------------
# Parameter construction + hoisted (init-time) weight preparation.
# ---------------------------------------------------------------------------
def _prep_conv_weight(w):   # torch Conv2d weight (Cout, Cin, kh, kw)
    co, ci, kh, kw = w.shape
    return (jnp.transpose(w, (2, 3, 0, 1))
            .reshape(kh * kw, co, ci).astype(jnp.bfloat16))


def _prep_convT_weight(w):  # torch ConvTranspose2d weight (Cin, Cout, kh, kw)
    ci, co, kh, kw = w.shape
    wf = jnp.flip(w, axis=(2, 3))        # equivalent valid-conv weight
    return (jnp.transpose(wf, (2, 3, 1, 0))
            .reshape(kh * kw, co, ci).astype(jnp.bfloat16))


def init_params(input_shape, bottleneck_size, hidden_size, key):
    C, H, W = input_shape
    He, We = H - 2 * (KH - 1), W - 2 * (KW - 1)
    enc_shape = (16, He, We)
    enc_size = 16 * He * We

    def uni(k, shape, fan_in):
        bound = 1.0 / jnp.sqrt(float(fan_in))
        return jax.random.uniform(k, shape, jnp.float32, -bound, bound)

    ks = jax.random.split(key, 16)
    raw = {
        "enc0_w": uni(ks[0], (6, C, KH, KW), C * KH * KW),
        "enc0_b": uni(ks[1], (6,), C * KH * KW),
        "enc1_w": uni(ks[2], (16, 6, KH, KW), 6 * KH * KW),
        "enc1_b": uni(ks[3], (16,), 6 * KH * KW),
        "ehl_w": uni(ks[4], (enc_size, hidden_size), enc_size),   # (in, out)
        "ehl_b": uni(ks[5], (hidden_size,), enc_size),
        "eol_w": uni(ks[6], (hidden_size, bottleneck_size), hidden_size),
        "eol_b": uni(ks[7], (bottleneck_size,), hidden_size),
        "dhl_w": uni(ks[8], (bottleneck_size, hidden_size), bottleneck_size),
        "dhl_b": uni(ks[9], (hidden_size,), bottleneck_size),
        "dol_w": uni(ks[10], (hidden_size, enc_size), hidden_size),
        "dol_b": uni(ks[11], (enc_size,), hidden_size),
        "dec0_w": uni(ks[12], (16, 6, KH, KW), 16 * KH * KW),
        "dec0_b": uni(ks[13], (6,), 16 * KH * KW),
        "dec1_w": uni(ks[14], (6, C, KH, KW), 6 * KH * KW),
        "dec1_b": uni(ks[15], (C,), 6 * KH * KW),
    }

    # encoder_hidden_layer: fold PyTorch's CHW flatten AND the junk (w >= We)
    # columns of the kernel's W-wide conv2 layout into the weight itself:
    # prepped[c, h*W + w, :] = raw[(c*He + h)*We + w, :], zeros at junk columns.
    m2 = H * W - 2 * ((KH - 1) * W + (KW - 1))
    we_r = raw["ehl_w"].reshape(16, He, We, hidden_size)
    we_pad = jnp.zeros((16, He, W, hidden_size), jnp.float32)
    we_pad = we_pad.at[:, :, :We, :].set(we_r)
    wehl = we_pad.reshape(16, He * W, hidden_size)[:, :m2, :].astype(jnp.bfloat16)

    prepped = {
        "w1": _prep_conv_weight(raw["enc0_w"]),
        "b1": raw["enc0_b"].reshape(-1, 1).astype(jnp.float32),
        "w2": _prep_conv_weight(raw["enc1_w"]),
        "b2": raw["enc1_b"].reshape(-1, 1).astype(jnp.float32),
        "wehl": wehl,
        "behl": raw["ehl_b"].reshape(1, -1).astype(jnp.float32),
        "weol": raw["eol_w"].astype(jnp.bfloat16),
        "beol": raw["eol_b"].reshape(1, -1).astype(jnp.float32),
        "wdhl": raw["dhl_w"].astype(jnp.bfloat16),
        "bdhl": raw["dhl_b"].reshape(1, -1).astype(jnp.float32),
        "wdol": raw["dol_w"].astype(jnp.bfloat16),
        "bdol": raw["dol_b"].reshape(1, -1).astype(jnp.float32),
        "wd1": _prep_convT_weight(raw["dec0_w"]),
        "bd1": raw["dec0_b"].reshape(-1, 1).astype(jnp.float32),
        "wd2": _prep_convT_weight(raw["dec1_w"]),
        "bd2": raw["dec1_b"].reshape(-1, 1).astype(jnp.float32),
    }
    return raw, prepped, enc_shape


# ---------------------------------------------------------------------------
# Plain-JAX f32 reference (validation of the Pallas path).
# ---------------------------------------------------------------------------
def reference_forward(x, raw, enc_shape):
    def conv(x, w, b):
        y = lax.conv_general_dilated(x, w, (1, 1), "VALID",
                                     dimension_numbers=("NCHW", "OIHW", "NCHW"))
        return y + b[None, :, None, None]

    def convT(x, w, b):
        wc = jnp.transpose(jnp.flip(w, (2, 3)), (1, 0, 2, 3))
        xp = jnp.pad(x, ((0, 0), (0, 0), (KH - 1, KH - 1), (KW - 1, KW - 1)))
        return conv(xp, wc, b)

    B = x.shape[0]
    h = jax.nn.relu(conv(x, raw["enc0_w"], raw["enc0_b"]))
    h = jax.nn.relu(conv(h, raw["enc1_w"], raw["enc1_b"]))
    h = h.reshape(B, -1)                                   # CHW flatten (view)
    h = jnp.tanh(h @ raw["ehl_w"] + raw["ehl_b"])
    emb = jnp.tanh(h @ raw["eol_w"] + raw["eol_b"])
    h = jnp.tanh(emb @ raw["dhl_w"] + raw["dhl_b"])
    h = jnp.tanh(h @ raw["dol_w"] + raw["dol_b"])
    h = h.reshape(B, *enc_shape)
    h = jax.nn.relu(convT(h, raw["dec0_w"], raw["dec0_b"]))
    h = jax.nn.relu(convT(h, raw["dec1_w"], raw["dec1_b"]))
    return h, emb


if __name__ == "__main__":
    B = 2
    input_shape = (4, 16, 16)       # (C, H, W) -> enc_shape (16, 8, 8)
    bottleneck_size = 10
    hidden_size = 32

    key = jax.random.PRNGKey(0)
    kx, kp = jax.random.split(key)
    x = jax.random.normal(kx, (B,) + input_shape, dtype=jnp.float32)

    raw, params, enc_shape = init_params(input_shape, bottleneck_size,
                                         hidden_size, kp)

    fwd = jax.jit(ae_baseline_forward)
    out, emb = fwd(x, params)
    out = jax.block_until_ready(out)
    emb = jax.block_until_ready(emb)

    assert out.shape == (B,) + input_shape, out.shape
    assert emb.shape == (B, bottleneck_size), emb.shape
    assert bool(jnp.all(jnp.isfinite(out)))

    # Numerical check vs plain-JAX f32 reference (bf16 MXU operands -> loose tol)
    ref_out, ref_emb = reference_forward(x, raw, enc_shape)
    assert float(jnp.max(jnp.abs(out - ref_out))) < 5e-2
    assert float(jnp.max(jnp.abs(emb - ref_emb))) < 5e-2

    print("KERNEL_OK")
</pallas_src>

<mosaic_0001>
module attributes {stable_mosaic.version = 11 : i64} {
  func.func @_fused_ae_kernel(%arg0: i32, %arg1: memref<1x4x256xf32, #tpu.memory_space<vmem>>, %arg2: memref<25x6x4xbf16, #tpu.memory_space<vmem>>, %arg3: memref<6x1xf32, #tpu.memory_space<vmem>>, %arg4: memref<25x16x6xbf16, #tpu.memory_space<vmem>>, %arg5: memref<16x1xf32, #tpu.memory_space<vmem>>, %arg6: memref<16x120x32xbf16, #tpu.memory_space<vmem>>, %arg7: memref<1x32xf32, #tpu.memory_space<vmem>>, %arg8: memref<32x10xbf16, #tpu.memory_space<vmem>>, %arg9: memref<1x10xf32, #tpu.memory_space<vmem>>, %arg10: memref<10x32xbf16, #tpu.memory_space<vmem>>, %arg11: memref<1x32xf32, #tpu.memory_space<vmem>>, %arg12: memref<32x1024xbf16, #tpu.memory_space<vmem>>, %arg13: memref<1x1024xf32, #tpu.memory_space<vmem>>, %arg14: memref<25x6x16xbf16, #tpu.memory_space<vmem>>, %arg15: memref<6x1xf32, #tpu.memory_space<vmem>>, %arg16: memref<25x4x6xbf16, #tpu.memory_space<vmem>>, %arg17: memref<4x1xf32, #tpu.memory_space<vmem>>, %arg18: memref<1x4x256xf32, #tpu.memory_space<vmem>>, %arg19: memref<1x1x10xf32, #tpu.memory_space<vmem>>, %arg20: memref<16x64xf32, #tpu.memory_space<vmem>>, %arg21: memref<16x256xf32, #tpu.memory_space<vmem>>, %arg22: memref<6x400xf32, #tpu.memory_space<vmem>>, %arg23: memref<4x256xf32, #tpu.memory_space<vmem>>) attributes {dimension_semantics = [#tpu.dimension_semantics<parallel>], iteration_bounds = array<i64: 2>, scalar_prefetch = 0 : i64, scratch_operands = 4 : i64, tpu.core_type = #tpu.core_type<tc>, window_params = [{transform_indices = @transform_0, window_bounds = array<i64: 1, 4, 256>}, {pipeline_mode = #tpu.pipeline_mode<synchronous>, transform_indices = @transform_1, window_bounds = array<i64: 25, 6, 4>}, {pipeline_mode = #tpu.pipeline_mode<synchronous>, transform_indices = @transform_2, window_bounds = array<i64: 6, 1>}, {pipeline_mode = #tpu.pipeline_mode<synchronous>, transform_indices = @transform_3, window_bounds = array<i64: 25, 16, 6>}, {pipeline_mode = #tpu.pipeline_mode<synchronous>, transform_indices = @transform_4, window_bounds = array<i64: 16, 1>}, {pipeline_mode = #tpu.pipeline_mode<synchronous>, transform_indices = @transform_5, window_bounds = array<i64: 16, 120, 32>}, {pipeline_mode = #tpu.pipeline_mode<synchronous>, transform_indices = @transform_6, window_bounds = array<i64: 1, 32>}, {pipeline_mode = #tpu.pipeline_mode<synchronous>, transform_indices = @transform_7, window_bounds = array<i64: 32, 10>}, {pipeline_mode = #tpu.pipeline_mode<synchronous>, transform_indices = @transform_8, window_bounds = array<i64: 1, 10>}, {pipeline_mode = #tpu.pipeline_mode<synchronous>, transform_indices = @transform_9, window_bounds = array<i64: 10, 32>}, {pipeline_mode = #tpu.pipeline_mode<synchronous>, transform_indices = @transform_10, window_bounds = array<i64: 1, 32>}, {pipeline_mode = #tpu.pipeline_mode<synchronous>, transform_indices = @transform_11, window_bounds = array<i64: 32, 1024>}, {pipeline_mode = #tpu.pipeline_mode<synchronous>, transform_indices = @transform_12, window_bounds = array<i64: 1, 1024>}, {pipeline_mode = #tpu.pipeline_mode<synchronous>, transform_indices = @transform_13, window_bounds = array<i64: 25, 6, 16>}, {pipeline_mode = #tpu.pipeline_mode<synchronous>, transform_indices = @transform_14, window_bounds = array<i64: 6, 1>}, {pipeline_mode = #tpu.pipeline_mode<synchronous>, transform_indices = @transform_15, window_bounds = array<i64: 25, 4, 6>}, {pipeline_mode = #tpu.pipeline_mode<synchronous>, transform_indices = @transform_16, window_bounds = array<i64: 4, 1>}, {transform_indices = @transform_17, window_bounds = array<i64: 1, 4, 256>}, {transform_indices = @transform_18, window_bounds = array<i64: 1, 1, 10>}]} {
    %c0 = arith.constant 0 : index
    %c0_0 = arith.constant 0 : index
    %c0_1 = arith.constant 0 : index
    %0 = vector.load %arg1[%c0, %c0_0, %c0_1] : memref<1x4x256xf32, #tpu.memory_space<vmem>>, vector<1x4x256xf32>
    %1 = vector.shape_cast %0 : vector<1x4x256xf32> to vector<4x256xf32>
    %2 = arith.truncf %1 : vector<4x256xf32> to vector<4x256xbf16>
    %c0_2 = arith.constant 0 : index
    %c0_3 = arith.constant 0 : index
    %c0_4 = arith.constant 0 : index
    %3 = vector.load %arg2[%c0_2, %c0_3, %c0_4] : memref<25x6x4xbf16, #tpu.memory_space<vmem>>, vector<1x6x4xbf16>
    %4 = vector.shape_cast %3 : vector<1x6x4xbf16> to vector<6x4xbf16>
    %5 = vector.extract_strided_slice %2 {offsets = [0, 0], sizes = [4, 188], strides = [1, 1]} : vector<4x256xbf16> to vector<4x188xbf16>
    %cst = arith.constant dense<0.000000e+00> : vector<6x188xf32>
    %6 = tpu.matmul %4, %5, %cst {dimension_numbers = #tpu.dot_dimension_numbers<[1], [0], [0], [1], [0, 0, 1, 1], [], []>} : vector<6x4xbf16>, vector<4x188xbf16>, vector<6x188xf32> -> vector<6x188xf32>
    %c1 = arith.constant 1 : index
    %c0_5 = arith.constant 0 : index
    %c0_6 = arith.constant 0 : index
    %7 = vector.load %arg2[%c1, %c0_5, %c0_6] : memref<25x6x4xbf16, #tpu.memory_space<vmem>>, vector<1x6x4xbf16>
    %8 = vector.shape_cast %7 : vector<1x6x4xbf16> to vector<6x4xbf16>
    %9 = vector.extract_strided_slice %2 {offsets = [0, 1], sizes = [4, 188], strides = [1, 1]} : vector<4x256xbf16> to vector<4x188xbf16>
    %cst_7 = arith.constant dense<0.000000e+00> : vector<6x188xf32>
    %10 = tpu.matmul %8, %9, %cst_7 {dimension_numbers = #tpu.dot_dimension_numbers<[1], [0], [0], [1], [0, 0, 1, 1], [], []>} : vector<6x4xbf16>, vector<4x188xbf16>, vector<6x188xf32> -> vector<6x188xf32>
    %11 = arith.addf %6, %10 : vector<6x188xf32>
    %c2 = arith.constant 2 : index
    %c0_8 = arith.constant 0 : index
    %c0_9 = arith.constant 0 : index
    %12 = vector.load %arg2[%c2, %c0_8, %c0_9] : memref<25x6x4xbf16, #tpu.memory_space<vmem>>, vector<1x6x4xbf16>
    %13 = vector.shape_cast %12 : vector<1x6x4xbf16> to vector<6x4xbf16>
    %14 = vector.extract_strided_slice %2 {offsets = [0, 2], sizes = [4, 188], strides = [1, 1]} : vector<4x256xbf16> to vector<4x188xbf16>
    %cst_10 = arith.constant dense<0.000000e+00> : vector<6x188xf32>
    %15 = tpu.matmul %13, %14, %cst_10 {dimension_numbers = #tpu.dot_dimension_numbers<[1], [0], [0], [1], [0, 0, 1, 1], [], []>} : vector<6x4xbf16>, vector<4x188xbf16>, vector<6x188xf32> -> vector<6x188xf32>
    %16 = arith.addf %11, %15 : vector<6x188xf32>
    %c3 = arith.constant 3 : index
    %c0_11 = arith.constant 0 : index
    %c0_12 = arith.constant 0 : index
    %17 = vector.load %arg2[%c3, %c0_11, %c0_12] : memref<25x6x4xbf16, #tpu.memory_space<vmem>>, vector<1x6x4xbf16>
    %18 = vector.shape_cast %17 : vector<1x6x4xbf16> to vector<6x4xbf16>
    %19 = vector.extract_strided_slice %2 {offsets = [0, 3], sizes = [4, 188], strides = [1, 1]} : vector<4x256xbf16> to vector<4x188xbf16>
    %cst_13 = arith.constant dense<0.000000e+00> : vector<6x188xf32>
    %20 = tpu.matmul %18, %19, %cst_13 {dimension_numbers = #tpu.dot_dimension_numbers<[1], [0], [0], [1], [0, 0, 1, 1], [], []>} : vector<6x4xbf16>, vector<4x188xbf16>, vector<6x188xf32> -> vector<6x188xf32>
    %21 = arith.addf %16, %20 : vector<6x188xf32>
    %c4 = arith.constant 4 : index
    %c0_14 = arith.constant 0 : index
    %c0_15 = arith.constant 0 : index
    %22 = vector.load %arg2[%c4, %c0_14, %c0_15] : memref<25x6x4xbf16, #tpu.memory_space<vmem>>, vector<1x6x4xbf16>
    %23 = vector.shape_cast %22 : vector<1x6x4xbf16> to vector<6x4xbf16>
    %24 = vector.extract_strided_slice %2 {offsets = [0, 4], sizes = [4, 188], strides = [1, 1]} : vector<4x256xbf16> to vector<4x188xbf16>
    %cst_16 = arith.constant dense<0.000000e+00> : vector<6x188xf32>
    %25 = tpu.matmul %23, %24, %cst_16 {dimension_numbers = #tpu.dot_dimension_numbers<[1], [0], [0], [1], [0, 0, 1, 1], [], []>} : vector<6x4xbf16>, vector<4x188xbf16>, vector<6x188xf32> -> vector<6x188xf32>
    %26 = arith.addf %21, %25 : vector<6x188xf32>
    %c5 = arith.constant 5 : index
    %c0_17 = arith.constant 0 : index
    %c0_18 = arith.constant 0 : index
    %27 = vector.load %arg2[%c5, %c0_17, %c0_18] : memref<25x6x4xbf16, #tpu.memory_space<vmem>>, vector<1x6x4xbf16>
    %28 = vector.shape_cast %27 : vector<1x6x4xbf16> to vector<6x4xbf16>
    %29 = vector.extract_strided_slice %2 {offsets = [0, 16], sizes = [4, 188], strides = [1, 1]} : vector<4x256xbf16> to vector<4x188xbf16>
    %cst_19 = arith.constant dense<0.000000e+00> : vector<6x188xf32>
    %30 = tpu.matmul %28, %29, %cst_19 {dimension_numbers = #tpu.dot_dimension_numbers<[1], [0], [0], [1], [0, 0, 1, 1], [], []>} : vector<6x4xbf16>, vector<4x188xbf16>, vector<6x188xf32> -> vector<6x188xf32>
    %31 = arith.addf %26, %30 : vector<6x188xf32>
    %c6 = arith.constant 6 : index
    %c0_20 = arith.constant 0 : index
    %c0_21 = arith.constant 0 : index
    %32 = vector.load %arg2[%c6, %c0_20, %c0_21] : memref<25x6x4xbf16, #tpu.memory_space<vmem>>, vector<1x6x4xbf16>
    %33 = vector.shape_cast %32 : vector<1x6x4xbf16> to vector<6x4xbf16>
    %34 = vector.extract_strided_slice %2 {offsets = [0, 17], sizes = [4, 188], strides = [1, 1]} : vector<4x256xbf16> to vector<4x188xbf16>
    %cst_22 = arith.constant dense<0.000000e+00> : vector<6x188xf32>
    %35 = tpu.matmul %33, %34, %cst_22 {dimension_numbers = #tpu.dot_dimension_numbers<[1], [0], [0], [1], [0, 0, 1, 1], [], []>} : vector<6x4xbf16>, vector<4x188xbf16>, vector<6x188xf32> -> vector<6x188xf32>
    %36 = arith.addf %31, %35 : vector<6x188xf32>
    %c7 = arith.constant 7 : index
    %c0_23 = arith.constant 0 : index
    %c0_24 = arith.constant 0 : index
    %37 = vector.load %arg2[%c7, %c0_23, %c0_24] : memref<25x6x4xbf16, #tpu.memory_space<vmem>>, vector<1x6x4xbf16>
    %38 = vector.shape_cast %37 : vector<1x6x4xbf16> to vector<6x4xbf16>
    %39 = vector.extract_strided_slice %2 {offsets = [0, 18], sizes = [4, 188], strides = [1, 1]} : vector<4x256xbf16> to vector<4x188xbf16>
    %cst_25 = arith.constant dense<0.000000e+00> : vector<6x188xf32>
    %40 = tpu.matmul %38, %39, %cst_25 {dimension_numbers = #tpu.dot_dimension_numbers<[1], [0], [0], [1], [0, 0, 1, 1], [], []>} : vector<6x4xbf16>, vector<4x188xbf16>, vector<6x188xf32> -> vector<6x188xf32>
    %41 = arith.addf %36, %40 : vector<6x188xf32>
    %c8 = arith.constant 8 : index
    %c0_26 = arith.constant 0 : index
    %c0_27 = arith.constant 0 : index
    %42 = vector.load %arg2[%c8, %c0_26, %c0_27] : memref<25x6x4xbf16, #tpu.memory_space<vmem>>, vector<1x6x4xbf16>
    %43 = vector.shape_cast %42 : vector<1x6x4xbf16> to vector<6x4xbf16>
    %44 = vector.extract_strided_slice %2 {offsets = [0, 19], sizes = [4, 188], strides = [1, 1]} : vector<4x256xbf16> to vector<4x188xbf16>
    %cst_28 = arith.constant dense<0.000000e+00> : vector<6x188xf32>
    %45 = tpu.matmul %43, %44, %cst_28 {dimension_numbers = #tpu.dot_dimension_numbers<[1], [0], [0], [1], [0, 0, 1, 1], [], []>} : vector<6x4xbf16>, vector<4x188xbf16>, vector<6x188xf32> -> vector<6x188xf32>
    %46 = arith.addf %41, %45 : vector<6x188xf32>
    %c9 = arith.constant 9 : index
    %c0_29 = arith.constant 0 : index
    %c0_30 = arith.constant 0 : index
    %47 = vector.load %arg2[%c9, %c0_29, %c0_30] : memref<25x6x4xbf16, #tpu.memory_space<vmem>>, vector<1x6x4xbf16>
    %48 = vector.shape_cast %47 : vector<1x6x4xbf16> to vector<6x4xbf16>
    %49 = vector.extract_strided_slice %2 {offsets = [0, 20], sizes = [4, 188], strides = [1, 1]} : vector<4x256xbf16> to vector<4x188xbf16>
    %cst_31 = arith.constant dense<0.000000e+00> : vector<6x188xf32>
    %50 = tpu.matmul %48, %49, %cst_31 {dimension_numbers = #tpu.dot_dimension_numbers<[1], [0], [0], [1], [0, 0, 1, 1], [], []>} : vector<6x4xbf16>, vector<4x188xbf16>, vector<6x188xf32> -> vector<6x188xf32>
    %51 = arith.addf %46, %50 : vector<6x188xf32>
    %c10 = arith.constant 10 : index
    %c0_32 = arith.constant 0 : index
    %c0_33 = arith.constant 0 : index
    %52 = vector.load %arg2[%c10, %c0_32, %c0_33] : memref<25x6x4xbf16, #tpu.memory_space<vmem>>, vector<1x6x4xbf16>
    %53 = vector.shape_cast %52 : vector<1x6x4xbf16> to vector<6x4xbf16>
    %54 = vector.extract_strided_slice %2 {offsets = [0, 32], sizes = [4, 188], strides = [1, 1]} : vector<4x256xbf16> to vector<4x188xbf16>
    %cst_34 = arith.constant dense<0.000000e+00> : vector<6x188xf32>
    %55 = tpu.matmul %53, %54, %cst_34 {dimension_numbers = #tpu.dot_dimension_numbers<[1], [0], [0], [1], [0, 0, 1, 1], [], []>} : vector<6x4xbf16>, vector<4x188xbf16>, vector<6x188xf32> -> vector<6x188xf32>
    %56 = arith.addf %51, %55 : vector<6x188xf32>
    %c11 = arith.constant 11 : index
    %c0_35 = arith.constant 0 : index
    %c0_36 = arith.constant 0 : index
    %57 = vector.load %arg2[%c11, %c0_35, %c0_36] : memref<25x6x4xbf16, #tpu.memory_space<vmem>>, vector<1x6x4xbf16>
    %58 = vector.shape_cast %57 : vector<1x6x4xbf16> to vector<6x4xbf16>
    %59 = vector.extract_strided_slice %2 {offsets = [0, 33], sizes = [4, 188], strides = [1, 1]} : vector<4x256xbf16> to vector<4x188xbf16>
    %cst_37 = arith.constant dense<0.000000e+00> : vector<6x188xf32>
    %60 = tpu.matmul %58, %59, %cst_37 {dimension_numbers = #tpu.dot_dimension_numbers<[1], [0], [0], [1], [0, 0, 1, 1], [], []>} : vector<6x4xbf16>, vector<4x188xbf16>, vector<6x188xf32> -> vector<6x188xf32>
    %61 = arith.addf %56, %60 : vector<6x188xf32>
    %c12 = arith.constant 12 : index
    %c0_38 = arith.constant 0 : index
    %c0_39 = arith.constant 0 : index
    %62 = vector.load %arg2[%c12, %c0_38, %c0_39] : memref<25x6x4xbf16, #tpu.memory_space<vmem>>, vector<1x6x4xbf16>
    %63 = vector.shape_cast %62 : vector<1x6x4xbf16> to vector<6x4xbf16>
    %64 = vector.extract_strided_slice %2 {offsets = [0, 34], sizes = [4, 188], strides = [1, 1]} : vector<4x256xbf16> to vector<4x188xbf16>
    %cst_40 = arith.constant dense<0.000000e+00> : vector<6x188xf32>
    %65 = tpu.matmul %63, %64, %cst_40 {dimension_numbers = #tpu.dot_dimension_numbers<[1], [0], [0], [1], [0, 0, 1, 1], [], []>} : vector<6x4xbf16>, vector<4x188xbf16>, vector<6x188xf32> -> vector<6x188xf32>
    %66 = arith.addf %61, %65 : vector<6x188xf32>
    %c13 = arith.constant 13 : index
    %c0_41 = arith.constant 0 : index
    %c0_42 = arith.constant 0 : index
    %67 = vector.load %arg2[%c13, %c0_41, %c0_42] : memref<25x6x4xbf16, #tpu.memory_space<vmem>>, vector<1x6x4xbf16>
    %68 = vector.shape_cast %67 : vector<1x6x4xbf16> to vector<6x4xbf16>
    %69 = vector.extract_strided_slice %2 {offsets = [0, 35], sizes = [4, 188], strides = [1, 1]} : vector<4x256xbf16> to vector<4x188xbf16>
    %cst_43 = arith.constant dense<0.000000e+00> : vector<6x188xf32>
    %70 = tpu.matmul %68, %69, %cst_43 {dimension_numbers = #tpu.dot_dimension_numbers<[1], [0], [0], [1], [0, 0, 1, 1], [], []>} : vector<6x4xbf16>, vector<4x188xbf16>, vector<6x188xf32> -> vector<6x188xf32>
    %71 = arith.addf %66, %70 : vector<6x188xf32>
    %c14 = arith.constant 14 : index
    %c0_44 = arith.constant 0 : index
    %c0_45 = arith.constant 0 : index
    %72 = vector.load %arg2[%c14, %c0_44, %c0_45] : memref<25x6x4xbf16, #tpu.memory_space<vmem>>, vector<1x6x4xbf16>
    %73 = vector.shape_cast %72 : vector<1x6x4xbf16> to vector<6x4xbf16>
    %74 = vector.extract_strided_slice %2 {offsets = [0, 36], sizes = [4, 188], strides = [1, 1]} : vector<4x256xbf16> to vector<4x188xbf16>
    %cst_46 = arith.constant dense<0.000000e+00> : vector<6x188xf32>
    %75 = tpu.matmul %73, %74, %cst_46 {dimension_numbers = #tpu.dot_dimension_numbers<[1], [0], [0], [1], [0, 0, 1, 1], [], []>} : vector<6x4xbf16>, vector<4x188xbf16>, vector<6x188xf32> -> vector<6x188xf32>
    %76 = arith.addf %71, %75 : vector<6x188xf32>
    %c15 = arith.constant 15 : index
    %c0_47 = arith.constant 0 : index
    %c0_48 = arith.constant 0 : index
    %77 = vector.load %arg2[%c15, %c0_47, %c0_48] : memref<25x6x4xbf16, #tpu.memory_space<vmem>>, vector<1x6x4xbf16>
    %78 = vector.shape_cast %77 : vector<1x6x4xbf16> to vector<6x4xbf16>
    %79 = vector.extract_strided_slice %2 {offsets = [0, 48], sizes = [4, 188], strides = [1, 1]} : vector<4x256xbf16> to vector<4x188xbf16>
    %cst_49 = arith.constant dense<0.000000e+00> : vector<6x188xf32>
    %80 = tpu.matmul %78, %79, %cst_49 {dimension_numbers = #tpu.dot_dimension_numbers<[1], [0], [0], [1], [0, 0, 1, 1], [], []>} : vector<6x4xbf16>, vector<4x188xbf16>, vector<6x188xf32> -> vector<6x188xf32>
    %81 = arith.addf %76, %80 : vector<6x188xf32>
    %c16 = arith.constant 16 : index
    %c0_50 = arith.constant 0 : index
    %c0_51 = arith.constant 0 : index
    %82 = vector.load %arg2[%c16, %c0_50, %c0_51] : memref<25x6x4xbf16, #tpu.memory_space<vmem>>, vector<1x6x4xbf16>
    %83 = vector.shape_cast %82 : vector<1x6x4xbf16> to vector<6x4xbf16>
    %84 = vector.extract_strided_slice %2 {offsets = [0, 49], sizes = [4, 188], strides = [1, 1]} : vector<4x256xbf16> to vector<4x188xbf16>
    %cst_52 = arith.constant dense<0.000000e+00> : vector<6x188xf32>
    %85 = tpu.matmul %83, %84, %cst_52 {dimension_numbers = #tpu.dot_dimension_numbers<[1], [0], [0], [1], [0, 0, 1, 1], [], []>} : vector<6x4xbf16>, vector<4x188xbf16>, vector<6x188xf32> -> vector<6x188xf32>
    %86 = arith.addf %81, %85 : vector<6x188xf32>
    %c17 = arith.constant 17 : index
    %c0_53 = arith.constant 0 : index
    %c0_54 = arith.constant 0 : index
    %87 = vector.load %arg2[%c17, %c0_53, %c0_54] : memref<25x6x4xbf16, #tpu.memory_space<vmem>>, vector<1x6x4xbf16>
    %88 = vector.shape_cast %87 : vector<1x6x4xbf16> to vector<6x4xbf16>
    %89 = vector.extract_strided_slice %2 {offsets = [0, 50], sizes = [4, 188], strides = [1, 1]} : vector<4x256xbf16> to vector<4x188xbf16>
    %cst_55 = arith.constant dense<0.000000e+00> : vector<6x188xf32>
    %90 = tpu.matmul %88, %89, %cst_55 {dimension_numbers = #tpu.dot_dimension_numbers<[1], [0], [0], [1], [0, 0, 1, 1], [], []>} : vector<6x4xbf16>, vector<4x188xbf16>, vector<6x188xf32> -> vector<6x188xf32>
    %91 = arith.addf %86, %90 : vector<6x188xf32>
    %c18 = arith.constant 18 : index
    %c0_56 = arith.constant 0 : index
    %c0_57 = arith.constant 0 : index
    %92 = vector.load %arg2[%c18, %c0_56, %c0_57] : memref<25x6x4xbf16, #tpu.memory_space<vmem>>, vector<1x6x4xbf16>
    %93 = vector.shape_cast %92 : vector<1x6x4xbf16> to vector<6x4xbf16>
    %94 = vector.extract_strided_slice %2 {offsets = [0, 51], sizes = [4, 188], strides = [1, 1]} : vector<4x256xbf16> to vector<4x188xbf16>
    %cst_58 = arith.constant dense<0.000000e+00> : vector<6x188xf32>
    %95 = tpu.matmul %93, %94, %cst_58 {dimension_numbers = #tpu.dot_dimension_numbers<[1], [0], [0], [1], [0, 0, 1, 1], [], []>} : vector<6x4xbf16>, vector<4x188xbf16>, vector<6x188xf32> -> vector<6x188xf32>
    %96 = arith.addf %91, %95 : vector<6x188xf32>
    %c19 = arith.constant 19 : index
    %c0_59 = arith.constant 0 : index
    %c0_60 = arith.constant 0 : index
    %97 = vector.load %arg2[%c19, %c0_59, %c0_60] : memref<25x6x4xbf16, #tpu.memory_space<vmem>>, vector<1x6x4xbf16>
    %98 = vector.shape_cast %97 : vector<1x6x4xbf16> to vector<6x4xbf16>
    %99 = vector.extract_strided_slice %2 {offsets = [0, 52], sizes = [4, 188], strides = [1, 1]} : vector<4x256xbf16> to vector<4x188xbf16>
    %cst_61 = arith.constant dense<0.000000e+00> : vector<6x188xf32>
    %100 = tpu.matmul %98, %99, %cst_61 {dimension_numbers = #tpu.dot_dimension_numbers<[1], [0], [0], [1], [0, 0, 1, 1], [], []>} : vector<6x4xbf16>, vector<4x188xbf16>, vector<6x188xf32> -> vector<6x188xf32>
    %101 = arith.addf %96, %100 : vector<6x188xf32>
    %c20 = arith.constant 20 : index
    %c0_62 = arith.constant 0 : index
    %c0_63 = arith.constant 0 : index
    %102 = vector.load %arg2[%c20, %c0_62, %c0_63] : memref<25x6x4xbf16, #tpu.memory_space<vmem>>, vector<1x6x4xbf16>
    %103 = vector.shape_cast %102 : vector<1x6x4xbf16> to vector<6x4xbf16>
    %104 = vector.extract_strided_slice %2 {offsets = [0, 64], sizes = [4, 188], strides = [1, 1]} : vector<4x256xbf16> to vector<4x188xbf16>
    %cst_64 = arith.constant dense<0.000000e+00> : vector<6x188xf32>
    %105 = tpu.matmul %103, %104, %cst_64 {dimension_numbers = #tpu.dot_dimension_numbers<[1], [0], [0], [1], [0, 0, 1, 1], [], []>} : vector<6x4xbf16>, vector<4x188xbf16>, vector<6x188xf32> -> vector<6x188xf32>
    %106 = arith.addf %101, %105 : vector<6x188xf32>
    %c21 = arith.constant 21 : index
    %c0_65 = arith.constant 0 : index
    %c0_66 = arith.constant 0 : index
    %107 = vector.load %arg2[%c21, %c0_65, %c0_66] : memref<25x6x4xbf16, #tpu.memory_space<vmem>>, vector<1x6x4xbf16>
    %108 = vector.shape_cast %107 : vector<1x6x4xbf16> to vector<6x4xbf16>
    %109 = vector.extract_strided_slice %2 {offsets = [0, 65], sizes = [4, 188], strides = [1, 1]} : vector<4x256xbf16> to vector<4x188xbf16>
    %cst_67 = arith.constant dense<0.000000e+00> : vector<6x188xf32>
    %110 = tpu.matmul %108, %109, %cst_67 {dimension_numbers = #tpu.dot_dimension_numbers<[1], [0], [0], [1], [0, 0, 1, 1], [], []>} : vector<6x4xbf16>, vector<4x188xbf16>, vector<6x188xf32> -> vector<6x188xf32>
    %111 = arith.addf %106, %110 : vector<6x188xf32>
    %c22 = arith.constant 22 : index
    %c0_68 = arith.constant 0 : index
    %c0_69 = arith.constant 0 : index
    %112 = vector.load %arg2[%c22, %c0_68, %c0_69] : memref<25x6x4xbf16, #tpu.memory_space<vmem>>, vector<1x6x4xbf16>
    %113 = vector.shape_cast %112 : vector<1x6x4xbf16> to vector<6x4xbf16>
    %114 = vector.extract_strided_slice %2 {offsets = [0, 66], sizes = [4, 188], strides = [1, 1]} : vector<4x256xbf16> to vector<4x188xbf16>
    %cst_70 = arith.constant dense<0.000000e+00> : vector<6x188xf32>
    %115 = tpu.matmul %113, %114, %cst_70 {dimension_numbers = #tpu.dot_dimension_numbers<[1], [0], [0], [1], [0, 0, 1, 1], [], []>} : vector<6x4xbf16>, vector<4x188xbf16>, vector<6x188xf32> -> vector<6x188xf32>
    %116 = arith.addf %111, %115 : vector<6x188xf32>
    %c23 = arith.constant 23 : index
    %c0_71 = arith.constant 0 : index
    %c0_72 = arith.constant 0 : index
    %117 = vector.load %arg2[%c23, %c0_71, %c0_72] : memref<25x6x4xbf16, #tpu.memory_space<vmem>>, vector<1x6x4xbf16>
    %118 = vector.shape_cast %117 : vector<1x6x4xbf16> to vector<6x4xbf16>
    %119 = vector.extract_strided_slice %2 {offsets = [0, 67], sizes = [4, 188], strides = [1, 1]} : vector<4x256xbf16> to vector<4x188xbf16>
    %cst_73 = arith.constant dense<0.000000e+00> : vector<6x188xf32>
    %120 = tpu.matmul %118, %119, %cst_73 {dimension_numbers = #tpu.dot_dimension_numbers<[1], [0], [0], [1], [0, 0, 1, 1], [], []>} : vector<6x4xbf16>, vector<4x188xbf16>, vector<6x188xf32> -> vector<6x188xf32>
    %121 = arith.addf %116, %120 : vector<6x188xf32>
    %c24 = arith.constant 24 : index
    %c0_74 = arith.constant 0 : index
    %c0_75 = arith.constant 0 : index
    %122 = vector.load %arg2[%c24, %c0_74, %c0_75] : memref<25x6x4xbf16, #tpu.memory_space<vmem>>, vector<1x6x4xbf16>
    %123 = vector.shape_cast %122 : vector<1x6x4xbf16> to vector<6x4xbf16>
    %124 = vector.extract_strided_slice %2 {offsets = [0, 68], sizes = [4, 188], strides = [1, 1]} : vector<4x256xbf16> to vector<4x188xbf16>
    %cst_76 = arith.constant dense<0.000000e+00> : vector<6x188xf32>
    %125 = tpu.matmul %123, %124, %cst_76 {dimension_numbers = #tpu.dot_dimension_numbers<[1], [0], [0], [1], [0, 0, 1, 1], [], []>} : vector<6x4xbf16>, vector<4x188xbf16>, vector<6x188xf32> -> vector<6x188xf32>
    %126 = arith.addf %121, %125 : vector<6x188xf32>
    %c0_77 = arith.constant 0 : index
    %c0_78 = arith.constant 0 : index
    %127 = vector.load %arg3[%c0_77, %c0_78] : memref<6x1xf32, #tpu.memory_space<vmem>>, vector<6x1xf32>
    %128 = vector.broadcast %127 : vector<6x1xf32> to vector<6x188xf32>
    %129 = arith.addf %126, %128 : vector<6x188xf32>
    %cst_79 = arith.constant 0.000000e+00 : f32
    %130 = vector.broadcast %cst_79 : f32 to vector<6x188xf32>
    %131 = arith.maximumf %129, %130 : vector<6x188xf32>
    %132 = arith.truncf %131 : vector<6x188xf32> to vector<6x188xbf16>
    %c0_80 = arith.constant 0 : index
    %c0_81 = arith.constant 0 : index
    %c0_82 = arith.constant 0 : index
    %133 = vector.load %arg4[%c0_80, %c0_81, %c0_82] : memref<25x16x6xbf16, #tpu.memory_space<vmem>>, vector<1x16x6xbf16>
    %134 = vector.shape_cast %133 : vector<1x16x6xbf16> to vector<16x6xbf16>
    %135 = vector.extract_strided_slice %132 {offsets = [0, 0], sizes = [6, 120], strides = [1, 1]} : vector<6x188xbf16> to vector<6x120xbf16>
    %cst_83 = arith.constant dense<0.000000e+00> : vector<16x120xf32>
    %136 = tpu.matmul %134, %135, %cst_83 {dimension_numbers = #tpu.dot_dimension_numbers<[1], [0], [0], [1], [0, 0, 1, 1], [], []>} : vector<16x6xbf16>, vector<6x120xbf16>, vector<16x120xf32> -> vector<16x120xf32>
    %c1_84 = arith.constant 1 : index
    %c0_85 = arith.constant 0 : index
    %c0_86 = arith.constant 0 : index
    %137 = vector.load %arg4[%c1_84, %c0_85, %c0_86] : memref<25x16x6xbf16, #tpu.memory_space<vmem>>, vector<1x16x6xbf16>
    %138 = vector.shape_cast %137 : vector<1x16x6xbf16> to vector<16x6xbf16>
    %139 = vector.extract_strided_slice %132 {offsets = [0, 1], sizes = [6, 120], strides = [1, 1]} : vector<6x188xbf16> to vector<6x120xbf16>
    %cst_87 = arith.constant dense<0.000000e+00> : vector<16x120xf32>
    %140 = tpu.matmul %138, %139, %cst_87 {dimension_numbers = #tpu.dot_dimension_numbers<[1], [0], [0], [1], [0, 0, 1, 1], [], []>} : vector<16x6xbf16>, vector<6x120xbf16>, vector<16x120xf32> -> vector<16x120xf32>
    %141 = arith.addf %136, %140 : vector<16x120xf32>
    %c2_88 = arith.constant 2 : index
    %c0_89 = arith.constant 0 : index
    %c0_90 = arith.constant 0 : index
    %142 = vector.load %arg4[%c2_88, %c0_89, %c0_90] : memref<25x16x6xbf16, #tpu.memory_space<vmem>>, vector<1x16x6xbf16>
    %143 = vector.shape_cast %142 : vector<1x16x6xbf16> to vector<16x6xbf16>
    %144 = vector.extract_strided_slice %132 {offsets = [0, 2], sizes = [6, 120], strides = [1, 1]} : vector<6x188xbf16> to vector<6x120xbf16>
    %cst_91 = arith.constant dense<0.000000e+00> : vector<16x120xf32>
    %145 = tpu.matmul %143, %144, %cst_91 {dimension_numbers = #tpu.dot_dimension_numbers<[1], [0], [0], [1], [0, 0, 1, 1], [], []>} : vector<16x6xbf16>, vector<6x120xbf16>, vector<16x120xf32> -> vector<16x120xf32>
    %146 = arith.addf %141, %145 : vector<16x120xf32>
    %c3_92 = arith.constant 3 : index
    %c0_93 = arith.constant 0 : index
    %c0_94 = arith.constant 0 : index
    %147 = vector.load %arg4[%c3_92, %c0_93, %c0_94] : memref<25x16x6xbf16, #tpu.memory_space<vmem>>, vector<1x16x6xbf16>
    %148 = vector.shape_cast %147 : vector<1x16x6xbf16> to vector<16x6xbf16>
    %149 = vector.extract_strided_slice %132 {offsets = [0, 3], sizes = [6, 120], strides = [1, 1]} : vector<6x188xbf16> to vector<6x120xbf16>
    %cst_95 = arith.constant dense<0.000000e+00> : vector<16x120xf32>
    %150 = tpu.matmul %148, %149, %cst_95 {dimension_numbers = #tpu.dot_dimension_numbers<[1], [0], [0], [1], [0, 0, 1, 1], [], []>} : vector<16x6xbf16>, vector<6x120xbf16>, vector<16x120xf32> -> vector<16x120xf32>
    %151 = arith.addf %146, %150 : vector<16x120xf32>
    %c4_96 = arith.constant 4 : index
    %c0_97 = arith.constant 0 : index
    %c0_98 = arith.constant 0 : index
    %152 = vector.load %arg4[%c4_96, %c0_97, %c0_98] : memref<25x16x6xbf16, #tpu.memory_space<vmem>>, vector<1x16x6xbf16>
    %153 = vector.shape_cast %152 : vector<1x16x6xbf16> to vector<16x6xbf16>
    %154 = vector.extract_strided_slice %132 {offsets = [0, 4], sizes = [6, 120], strides = [1, 1]} : vector<6x188xbf16> to vector<6x120xbf16>
    %cst_99 = arith.constant dense<0.000000e+00> : vector<16x120xf32>
    %155 = tpu.matmul %153, %154, %cst_99 {dimension_numbers = #tpu.dot_dimension_numbers<[1], [0], [0], [1], [0, 0, 1, 1], [], []>} : vector<16x6xbf16>, vector<6x120xbf16>, vector<16x120xf32> -> vector<16x120xf32>
    %156 = arith.addf %151, %155 : vector<16x120xf32>
    %c5_100 = arith.constant 5 : index
    %c0_101 = arith.constant 0 : index
    %c0_102 = arith.constant 0 : index
    %157 = vector.load %arg4[%c5_100, %c0_101, %c0_102] : memref<25x16x6xbf16, #tpu.memory_space<vmem>>, vector<1x16x6xbf16>
    %158 = vector.shape_cast %157 : vector<1x16x6xbf16> to vector<16x6xbf16>
    %159 = vector.extract_strided_slice %132 {offsets = [0, 16], sizes = [6, 120], strides = [1, 1]} : vector<6x188xbf16> to vector<6x120xbf16>
    %cst_103 = arith.constant dense<0.000000e+00> : vector<16x120xf32>
    %160 = tpu.matmul %158, %159, %cst_103 {dimension_numbers = #tpu.dot_dimension_numbers<[1], [0], [0], [1], [0, 0, 1, 1], [], []>} : vector<16x6xbf16>, vector<6x120xbf16>, vector<16x120xf32> -> vector<16x120xf32>
    %161 = arith.addf %156, %160 : vector<16x120xf32>
    %c6_104 = arith.constant 6 : index
    %c0_105 = arith.constant 0 : index
    %c0_106 = arith.constant 0 : index
    %162 = vector.load %arg4[%c6_104, %c0_105, %c0_106] : memref<25x16x6xbf16, #tpu.memory_space<vmem>>, vector<1x16x6xbf16>
    %163 = vector.shape_cast %162 : vector<1x16x6xbf16> to vector<16x6xbf16>
    %164 = vector.extract_strided_slice %132 {offsets = [0, 17], sizes = [6, 120], strides = [1, 1]} : vector<6x188xbf16> to vector<6x120xbf16>
    %cst_107 = arith.constant dense<0.000000e+00> : vector<16x120xf32>
    %165 = tpu.matmul %163, %164, %cst_107 {dimension_numbers = #tpu.dot_dimension_numbers<[1], [0], [0], [1], [0, 0, 1, 1], [], []>} : vector<16x6xbf16>, vector<6x120xbf16>, vector<16x120xf32> -> vector<16x120xf32>
    %166 = arith.addf %161, %165 : vector<16x120xf32>
    %c7_108 = arith.constant 7 : index
    %c0_109 = arith.constant 0 : index
    %c0_110 = arith.constant 0 : index
    %167 = vector.load %arg4[%c7_108, %c0_109, %c0_110] : memref<25x16x6xbf16, #tpu.memory_space<vmem>>, vector<1x16x6xbf16>
    %168 = vector.shape_cast %167 : vector<1x16x6xbf16> to vector<16x6xbf16>
    %169 = vector.extract_strided_slice %132 {offsets = [0, 18], sizes = [6, 120], strides = [1, 1]} : vector<6x188xbf16> to vector<6x120xbf16>
    %cst_111 = arith.constant dense<0.000000e+00> : vector<16x120xf32>
    %170 = tpu.matmul %168, %169, %cst_111 {dimension_numbers = #tpu.dot_dimension_numbers<[1], [0], [0], [1], [0, 0, 1, 1], [], []>} : vector<16x6xbf16>, vector<6x120xbf16>, vector<16x120xf32> -> vector<16x120xf32>
    %171 = arith.addf %166, %170 : vector<16x120xf32>
    %c8_112 = arith.constant 8 : index
    %c0_113 = arith.constant 0 : index
    %c0_114 = arith.constant 0 : index
    %172 = vector.load %arg4[%c8_112, %c0_113, %c0_114] : memref<25x16x6xbf16, #tpu.memory_space<vmem>>, vector<1x16x6xbf16>
    %173 = vector.shape_cast %172 : vector<1x16x6xbf16> to vector<16x6xbf16>
    %174 = vector.extract_strided_slice %132 {offsets = [0, 19], sizes = [6, 120], strides = [1, 1]} : vector<6x188xbf16> to vector<6x120xbf16>
    %cst_115 = arith.constant dense<0.000000e+00> : vector<16x120xf32>
    %175 = tpu.matmul %173, %174, %cst_115 {dimension_numbers = #tpu.dot_dimension_numbers<[1], [0], [0], [1], [0, 0, 1, 1], [], []>} : vector<16x6xbf16>, vector<6x120xbf16>, vector<16x120xf32> -> vector<16x120xf32>
    %176 = arith.addf %171, %175 : vector<16x120xf32>
    %c9_116 = arith.constant 9 : index
    %c0_117 = arith.constant 0 : index
    %c0_118 = arith.constant 0 : index
    %177 = vector.load %arg4[%c9_116, %c0_117, %c0_118] : memref<25x16x6xbf16, #tpu.memory_space<vmem>>, vector<1x16x6xbf16>
    %178 = vector.shape_cast %177 : vector<1x16x6xbf16> to vector<16x6xbf16>
    %179 = vector.extract_strided_slice %132 {offsets = [0, 20], sizes = [6, 120], strides = [1, 1]} : vector<6x188xbf16> to vector<6x120xbf16>
    %cst_119 = arith.constant dense<0.000000e+00> : vector<16x120xf32>
    %180 = tpu.matmul %178, %179, %cst_119 {dimension_numbers = #tpu.dot_dimension_numbers<[1], [0], [0], [1], [0, 0, 1, 1], [], []>} : vector<16x6xbf16>, vector<6x120xbf16>, vector<16x120xf32> -> vector<16x120xf32>
    %181 = arith.addf %176, %180 : vector<16x120xf32>
    %c10_120 = arith.constant 10 : index
    %c0_121 = arith.constant 0 : index
    %c0_122 = arith.constant 0 : index
    %182 = vector.load %arg4[%c10_120, %c0_121, %c0_122] : memref<25x16x6xbf16, #tpu.memory_space<vmem>>, vector<1x16x6xbf16>
    %183 = vector.shape_cast %182 : vector<1x16x6xbf16> to vector<16x6xbf16>
    %184 = vector.extract_strided_slice %132 {offsets = [0, 32], sizes = [6, 120], strides = [1, 1]} : vector<6x188xbf16> to vector<6x120xbf16>
    %cst_123 = arith.constant dense<0.000000e+00> : vector<16x120xf32>
    %185 = tpu.matmul %183, %184, %cst_123 {dimension_numbers = #tpu.dot_dimension_numbers<[1], [0], [0], [1], [0, 0, 1, 1], [], []>} : vector<16x6xbf16>, vector<6x120xbf16>, vector<16x120xf32> -> vector<16x120xf32>
    %186 = arith.addf %181, %185 : vector<16x120xf32>
    %c11_124 = arith.constant 11 : index
    %c0_125 = arith.constant 0 : index
    %c0_126 = arith.constant 0 : index
    %187 = vector.load %arg4[%c11_124, %c0_125, %c0_126] : memref<25x16x6xbf16, #tpu.memory_space<vmem>>, vector<1x16x6xbf16>
    %188 = vector.shape_cast %187 : vector<1x16x6xbf16> to vector<16x6xbf16>
    %189 = vector.extract_strided_slice %132 {offsets = [0, 33], sizes = [6, 120], strides = [1, 1]} : vector<6x188xbf16> to vector<6x120xbf16>
    %cst_127 = arith.constant dense<0.000000e+00> : vector<16x120xf32>
    %190 = tpu.matmul %188, %189, %cst_127 {dimension_numbers = #tpu.dot_dimension_numbers<[1], [0], [0], [1], [0, 0, 1, 1], [], []>} : vector<16x6xbf16>, vector<6x120xbf16>, vector<16x120xf32> -> vector<16x120xf32>
    %191 = arith.addf %186, %190 : vector<16x120xf32>
    %c12_128 = arith.constant 12 : index
    %c0_129 = arith.constant 0 : index
    %c0_130 = arith.constant 0 : index
    %192 = vector.load %arg4[%c12_128, %c0_129, %c0_130] : memref<25x16x6xbf16, #tpu.memory_space<vmem>>, vector<1x16x6xbf16>
    %193 = vector.shape_cast %192 : vector<1x16x6xbf16> to vector<16x6xbf16>
    %194 = vector.extract_strided_slice %132 {offsets = [0, 34], sizes = [6, 120], strides = [1, 1]} : vector<6x188xbf16> to vector<6x120xbf16>
    %cst_131 = arith.constant dense<0.000000e+00> : vector<16x120xf32>
    %195 = tpu.matmul %193, %194, %cst_131 {dimension_numbers = #tpu.dot_dimension_numbers<[1], [0], [0], [1], [0, 0, 1, 1], [], []>} : vector<16x6xbf16>, vector<6x120xbf16>, vector<16x120xf32> -> vector<16x120xf32>
    %196 = arith.addf %191, %195 : vector<16x120xf32>
    %c13_132 = arith.constant 13 : index
    %c0_133 = arith.constant 0 : index
    %c0_134 = arith.constant 0 : index
    %197 = vector.load %arg4[%c13_132, %c0_133, %c0_134] : memref<25x16x6xbf16, #tpu.memory_space<vmem>>, vector<1x16x6xbf16>
    %198 = vector.shape_cast %197 : vector<1x16x6xbf16> to vector<16x6xbf16>
    %199 = vector.extract_strided_slice %132 {offsets = [0, 35], sizes = [6, 120], strides = [1, 1]} : vector<6x188xbf16> to vector<6x120xbf16>
    %cst_135 = arith.constant dense<0.000000e+00> : vector<16x120xf32>
    %200 = tpu.matmul %198, %199, %cst_135 {dimension_numbers = #tpu.dot_dimension_numbers<[1], [0], [0], [1], [0, 0, 1, 1], [], []>} : vector<16x6xbf16>, vector<6x120xbf16>, vector<16x120xf32> -> vector<16x120xf32>
    %201 = arith.addf %196, %200 : vector<16x120xf32>
    %c14_136 = arith.constant 14 : index
    %c0_137 = arith.constant 0 : index
    %c0_138 = arith.constant 0 : index
    %202 = vector.load %arg4[%c14_136, %c0_137, %c0_138] : memref<25x16x6xbf16, #tpu.memory_space<vmem>>, vector<1x16x6xbf16>
    %203 = vector.shape_cast %202 : vector<1x16x6xbf16> to vector<16x6xbf16>
    %204 = vector.extract_strided_slice %132 {offsets = [0, 36], sizes = [6, 120], strides = [1, 1]} : vector<6x188xbf16> to vector<6x120xbf16>
    %cst_139 = arith.constant dense<0.000000e+00> : vector<16x120xf32>
    %205 = tpu.matmul %203, %204, %cst_139 {dimension_numbers = #tpu.dot_dimension_numbers<[1], [0], [0], [1], [0, 0, 1, 1], [], []>} : vector<16x6xbf16>, vector<6x120xbf16>, vector<16x120xf32> -> vector<16x120xf32>
    %206 = arith.addf %201, %205 : vector<16x120xf32>
    %c15_140 = arith.constant 15 : index
    %c0_141 = arith.constant 0 : index
    %c0_142 = arith.constant 0 : index
    %207 = vector.load %arg4[%c15_140, %c0_141, %c0_142] : memref<25x16x6xbf16, #tpu.memory_space<vmem>>, vector<1x16x6xbf16>
    %208 = vector.shape_cast %207 : vector<1x16x6xbf16> to vector<16x6xbf16>
    %209 = vector.extract_strided_slice %132 {offsets = [0, 48], sizes = [6, 120], strides = [1, 1]} : vector<6x188xbf16> to vector<6x120xbf16>
    %cst_143 = arith.constant dense<0.000000e+00> : vector<16x120xf32>
    %210 = tpu.matmul %208, %209, %cst_143 {dimension_numbers = #tpu.dot_dimension_numbers<[1], [0], [0], [1], [0, 0, 1, 1], [], []>} : vector<16x6xbf16>, vector<6x120xbf16>, vector<16x120xf32> -> vector<16x120xf32>
    %211 = arith.addf %206, %210 : vector<16x120xf32>
    %c16_144 = arith.constant 16 : index
    %c0_145 = arith.constant 0 : index
    %c0_146 = arith.constant 0 : index
    %212 = vector.load %arg4[%c16_144, %c0_145, %c0_146] : memref<25x16x6xbf16, #tpu.memory_space<vmem>>, vector<1x16x6xbf16>
    %213 = vector.shape_cast %212 : vector<1x16x6xbf16> to vector<16x6xbf16>
    %214 = vector.extract_strided_slice %132 {offsets = [0, 49], sizes = [6, 120], strides = [1, 1]} : vector<6x188xbf16> to vector<6x120xbf16>
    %cst_147 = arith.constant dense<0.000000e+00> : vector<16x120xf32>
    %215 = tpu.matmul %213, %214, %cst_147 {dimension_numbers = #tpu.dot_dimension_numbers<[1], [0], [0], [1], [0, 0, 1, 1], [], []>} : vector<16x6xbf16>, vector<6x120xbf16>, vector<16x120xf32> -> vector<16x120xf32>
    %216 = arith.addf %211, %215 : vector<16x120xf32>
    %c17_148 = arith.constant 17 : index
    %c0_149 = arith.constant 0 : index
    %c0_150 = arith.constant 0 : index
    %217 = vector.load %arg4[%c17_148, %c0_149, %c0_150] : memref<25x16x6xbf16, #tpu.memory_space<vmem>>, vector<1x16x6xbf16>
    %218 = vector.shape_cast %217 : vector<1x16x6xbf16> to vector<16x6xbf16>
    %219 = vector.extract_strided_slice %132 {offsets = [0, 50], sizes = [6, 120], strides = [1, 1]} : vector<6x188xbf16> to vector<6x120xbf16>
    %cst_151 = arith.constant dense<0.000000e+00> : vector<16x120xf32>
    %220 = tpu.matmul %218, %219, %cst_151 {dimension_numbers = #tpu.dot_dimension_numbers<[1], [0], [0], [1], [0, 0, 1, 1], [], []>} : vector<16x6xbf16>, vector<6x120xbf16>, vector<16x120xf32> -> vector<16x120xf32>
    %221 = arith.addf %216, %220 : vector<16x120xf32>
    %c18_152 = arith.constant 18 : index
    %c0_153 = arith.constant 0 : index
    %c0_154 = arith.constant 0 : index
    %222 = vector.load %arg4[%c18_152, %c0_153, %c0_154] : memref<25x16x6xbf16, #tpu.memory_space<vmem>>, vector<1x16x6xbf16>
    %223 = vector.shape_cast %222 : vector<1x16x6xbf16> to vector<16x6xbf16>
    %224 = vector.extract_strided_slice %132 {offsets = [0, 51], sizes = [6, 120], strides = [1, 1]} : vector<6x188xbf16> to vector<6x120xbf16>
    %cst_155 = arith.constant dense<0.000000e+00> : vector<16x120xf32>
    %225 = tpu.matmul %223, %224, %cst_155 {dimension_numbers = #tpu.dot_dimension_numbers<[1], [0], [0], [1], [0, 0, 1, 1], [], []>} : vector<16x6xbf16>, vector<6x120xbf16>, vector<16x120xf32> -> vector<16x120xf32>
    %226 = arith.addf %221, %225 : vector<16x120xf32>
    %c19_156 = arith.constant 19 : index
    %c0_157 = arith.constant 0 : index
    %c0_158 = arith.constant 0 : index
    %227 = vector.load %arg4[%c19_156, %c0_157, %c0_158] : memref<25x16x6xbf16, #tpu.memory_space<vmem>>, vector<1x16x6xbf16>
    %228 = vector.shape_cast %227 : vector<1x16x6xbf16> to vector<16x6xbf16>
    %229 = vector.extract_strided_slice %132 {offsets = [0, 52], sizes = [6, 120], strides = [1, 1]} : vector<6x188xbf16> to vector<6x120xbf16>
    %cst_159 = arith.constant dense<0.000000e+00> : vector<16x120xf32>
    %230 = tpu.matmul %228, %229, %cst_159 {dimension_numbers = #tpu.dot_dimension_numbers<[1], [0], [0], [1], [0, 0, 1, 1], [], []>} : vector<16x6xbf16>, vector<6x120xbf16>, vector<16x120xf32> -> vector<16x120xf32>
    %231 = arith.addf %226, %230 : vector<16x120xf32>
    %c20_160 = arith.constant 20 : index
    %c0_161 = arith.constant 0 : index
    %c0_162 = arith.constant 0 : index
    %232 = vector.load %arg4[%c20_160, %c0_161, %c0_162] : memref<25x16x6xbf16, #tpu.memory_space<vmem>>, vector<1x16x6xbf16>
    %233 = vector.shape_cast %232 : vector<1x16x6xbf16> to vector<16x6xbf16>
    %234 = vector.extract_strided_slice %132 {offsets = [0, 64], sizes = [6, 120], strides = [1, 1]} : vector<6x188xbf16> to vector<6x120xbf16>
    %cst_163 = arith.constant dense<0.000000e+00> : vector<16x120xf32>
    %235 = tpu.matmul %233, %234, %cst_163 {dimension_numbers = #tpu.dot_dimension_numbers<[1], [0], [0], [1], [0, 0, 1, 1], [], []>} : vector<16x6xbf16>, vector<6x120xbf16>, vector<16x120xf32> -> vector<16x120xf32>
    %236 = arith.addf %231, %235 : vector<16x120xf32>
    %c21_164 = arith.constant 21 : index
    %c0_165 = arith.constant 0 : index
    %c0_166 = arith.constant 0 : index
    %237 = vector.load %arg4[%c21_164, %c0_165, %c0_166] : memref<25x16x6xbf16, #tpu.memory_space<vmem>>, vector<1x16x6xbf16>
    %238 = vector.shape_cast %237 : vector<1x16x6xbf16> to vector<16x6xbf16>
    %239 = vector.extract_strided_slice %132 {offsets = [0, 65], sizes = [6, 120], strides = [1, 1]} : vector<6x188xbf16> to vector<6x120xbf16>
    %cst_167 = arith.constant dense<0.000000e+00> : vector<16x120xf32>
    %240 = tpu.matmul %238, %239, %cst_167 {dimension_numbers = #tpu.dot_dimension_numbers<[1], [0], [0], [1], [0, 0, 1, 1], [], []>} : vector<16x6xbf16>, vector<6x120xbf16>, vector<16x120xf32> -> vector<16x120xf32>
    %241 = arith.addf %236, %240 : vector<16x120xf32>
    %c22_168 = arith.constant 22 : index
    %c0_169 = arith.constant 0 : index
    %c0_170 = arith.constant 0 : index
    %242 = vector.load %arg4[%c22_168, %c0_169, %c0_170] : memref<25x16x6xbf16, #tpu.memory_space<vmem>>, vector<1x16x6xbf16>
    %243 = vector.shape_cast %242 : vector<1x16x6xbf16> to vector<16x6xbf16>
    %244 = vector.extract_strided_slice %132 {offsets = [0, 66], sizes = [6, 120], strides = [1, 1]} : vector<6x188xbf16> to vector<6x120xbf16>
    %cst_171 = arith.constant dense<0.000000e+00> : vector<16x120xf32>
    %245 = tpu.matmul %243, %244, %cst_171 {dimension_numbers = #tpu.dot_dimension_numbers<[1], [0], [0], [1], [0, 0, 1, 1], [], []>} : vector<16x6xbf16>, vector<6x120xbf16>, vector<16x120xf32> -> vector<16x120xf32>
    %246 = arith.addf %241, %245 : vector<16x120xf32>
    %c23_172 = arith.constant 23 : index
    %c0_173 = arith.constant 0 : index
    %c0_174 = arith.constant 0 : index
    %247 = vector.load %arg4[%c23_172, %c0_173, %c0_174] : memref<25x16x6xbf16, #tpu.memory_space<vmem>>, vector<1x16x6xbf16>
    %248 = vector.shape_cast %247 : vector<1x16x6xbf16> to vector<16x6xbf16>
    %249 = vector.extract_strided_slice %132 {offsets = [0, 67], sizes = [6, 120], strides = [1, 1]} : vector<6x188xbf16> to vector<6x120xbf16>
    %cst_175 = arith.constant dense<0.000000e+00> : vector<16x120xf32>
    %250 = tpu.matmul %248, %249, %cst_175 {dimension_numbers = #tpu.dot_dimension_numbers<[1], [0], [0], [1], [0, 0, 1, 1], [], []>} : vector<16x6xbf16>, vector<6x120xbf16>, vector<16x120xf32> -> vector<16x120xf32>
    %251 = arith.addf %246, %250 : vector<16x120xf32>
    %c24_176 = arith.constant 24 : index
    %c0_177 = arith.constant 0 : index
    %c0_178 = arith.constant 0 : index
    %252 = vector.load %arg4[%c24_176, %c0_177, %c0_178] : memref<25x16x6xbf16, #tpu.memory_space<vmem>>, vector<1x16x6xbf16>
    %253 = vector.shape_cast %252 : vector<1x16x6xbf16> to vector<16x6xbf16>
    %254 = vector.extract_strided_slice %132 {offsets = [0, 68], sizes = [6, 120], strides = [1, 1]} : vector<6x188xbf16> to vector<6x120xbf16>
    %cst_179 = arith.constant dense<0.000000e+00> : vector<16x120xf32>
    %255 = tpu.matmul %253, %254, %cst_179 {dimension_numbers = #tpu.dot_dimension_numbers<[1], [0], [0], [1], [0, 0, 1, 1], [], []>} : vector<16x6xbf16>, vector<6x120xbf16>, vector<16x120xf32> -> vector<16x120xf32>
    %256 = arith.addf %251, %255 : vector<16x120xf32>
    %c0_180 = arith.constant 0 : index
    %c0_181 = arith.constant 0 : index
    %257 = vector.load %arg5[%c0_180, %c0_181] : memref<16x1xf32, #tpu.memory_space<vmem>>, vector<16x1xf32>
    %258 = vector.broadcast %257 : vector<16x1xf32> to vector<16x120xf32>
    %259 = arith.addf %256, %258 : vector<16x120xf32>
    %cst_182 = arith.constant 0.000000e+00 : f32
    %260 = vector.broadcast %cst_182 : f32 to vector<16x120xf32>
    %261 = arith.maximumf %259, %260 : vector<16x120xf32>
    %262 = arith.truncf %261 : vector<16x120xf32> to vector<16x120xbf16>
    %263 = vector.extract_strided_slice %262 {offsets = [0, 0], sizes = [1, 120], strides = [1, 1]} : vector<16x120xbf16> to vector<1x120xbf16>
    %c0_183 = arith.constant 0 : index
    %c0_184 = arith.constant 0 : index
    %c0_185 = arith.constant 0 : index
    %264 = vector.load %arg6[%c0_183, %c0_184, %c0_185] : memref<16x120x32xbf16, #tpu.memory_space<vmem>>, vector<1x120x32xbf16>
    %265 = vector.shape_cast %264 : vector<1x120x32xbf16> to vector<120x32xbf16>
    %cst_186 = arith.constant dense<0.000000e+00> : vector<1x32xf32>
    %266 = tpu.matmul %263, %265, %cst_186 {dimension_numbers = #tpu.dot_dimension_numbers<[1], [0], [0], [1], [0, 0, 1, 1], [], []>} : vector<1x120xbf16>, vector<120x32xbf16>, vector<1x32xf32> -> vector<1x32xf32>
    %267 = vector.extract_strided_slice %262 {offsets = [1, 0], sizes = [1, 120], strides = [1, 1]} : vector<16x120xbf16> to vector<1x120xbf16>
    %c1_187 = arith.constant 1 : index
    %c0_188 = arith.constant 0 : index
    %c0_189 = arith.constant 0 : index
    %268 = vector.load %arg6[%c1_187, %c0_188, %c0_189] : memref<16x120x32xbf16, #tpu.memory_space<vmem>>, vector<1x120x32xbf16>
    %269 = vector.shape_cast %268 : vector<1x120x32xbf16> to vector<120x32xbf16>
    %cst_190 = arith.constant dense<0.000000e+00> : vector<1x32xf32>
    %270 = tpu.matmul %267, %269, %cst_190 {dimension_numbers = #tpu.dot_dimension_numbers<[1], [0], [0], [1], [0, 0, 1, 1], [], []>} : vector<1x120xbf16>, vector<120x32xbf16>, vector<1x32xf32> -> vector<1x32xf32>
    %271 = arith.addf %266, %270 : vector<1x32xf32>
    %272 = vector.extract_strided_slice %262 {offsets = [2, 0], sizes = [1, 120], strides = [1, 1]} : vector<16x120xbf16> to vector<1x120xbf16>
    %c2_191 = arith.constant 2 : index
    %c0_192 = arith.constant 0 : index
    %c0_193 = arith.constant 0 : index
    %273 = vector.load %arg6[%c2_191, %c0_192, %c0_193] : memref<16x120x32xbf16, #tpu.memory_space<vmem>>, vector<1x120x32xbf16>
    %274 = vector.shape_cast %273 : vector<1x120x32xbf16> to vector<120x32xbf16>
    %cst_194 = arith.constant dense<0.000000e+00> : vector<1x32xf32>
    %275 = tpu.matmul %272, %274, %cst_194 {dimension_numbers = #tpu.dot_dimension_numbers<[1], [0], [0], [1], [0, 0, 1, 1], [], []>} : vector<1x120xbf16>, vector<120x32xbf16>, vector<1x32xf32> -> vector<1x32xf32>
    %276 = arith.addf %271, %275 : vector<1x32xf32>
    %277 = vector.extract_strided_slice %262 {offsets = [3, 0], sizes = [1, 120], strides = [1, 1]} : vector<16x120xbf16> to vector<1x120xbf16>
    %c3_195 = arith.constant 3 : index
    %c0_196 = arith.constant 0 : index
    %c0_197 = arith.constant 0 : index
    %278 = vector.load %arg6[%c3_195, %c0_196, %c0_197] : memref<16x120x32xbf16, #tpu.memory_space<vmem>>, vector<1x120x32xbf16>
    %279 = vector.shape_cast %278 : vector<1x120x32xbf16> to vector<120x32xbf16>
    %cst_198 = arith.constant dense<0.000000e+00> : vector<1x32xf32>
    %280 = tpu.matmul %277, %279, %cst_198 {dimension_numbers = #tpu.dot_dimension_numbers<[1], [0], [0], [1], [0, 0, 1, 1], [], []>} : vector<1x120xbf16>, vector<120x32xbf16>, vector<1x32xf32> -> vector<1x32xf32>
    %281 = arith.addf %276, %280 : vector<1x32xf32>
    %282 = vector.extract_strided_slice %262 {offsets = [4, 0], sizes = [1, 120], strides = [1, 1]} : vector<16x120xbf16> to vector<1x120xbf16>
    %c4_199 = arith.constant 4 : index
    %c0_200 = arith.constant 0 : index
    %c0_201 = arith.constant 0 : index
    %283 = vector.load %arg6[%c4_199, %c0_200, %c0_201] : memref<16x120x32xbf16, #tpu.memory_space<vmem>>, vector<1x120x32xbf16>
    %284 = vector.shape_cast %283 : vector<1x120x32xbf16> to vector<120x32xbf16>
    %cst_202 = arith.constant dense<0.000000e+00> : vector<1x32xf32>
    %285 = tpu.matmul %282, %284, %cst_202 {dimension_numbers = #tpu.dot_dimension_numbers<[1], [0], [0], [1], [0, 0, 1, 1], [], []>} : vector<1x120xbf16>, vector<120x32xbf16>, vector<1x32xf32> -> vector<1x32xf32>
    %286 = arith.addf %281, %285 : vector<1x32xf32>
    %287 = vector.extract_strided_slice %262 {offsets = [5, 0], sizes = [1, 120], strides = [1, 1]} : vector<16x120xbf16> to vector<1x120xbf16>
    %c5_203 = arith.constant 5 : index
    %c0_204 = arith.constant 0 : index
    %c0_205 = arith.constant 0 : index
    %288 = vector.load %arg6[%c5_203, %c0_204, %c0_205] : memref<16x120x32xbf16, #tpu.memory_space<vmem>>, vector<1x120x32xbf16>
    %289 = vector.shape_cast %288 : vector<1x120x32xbf16> to vector<120x32xbf16>
    %cst_206 = arith.constant dense<0.000000e+00> : vector<1x32xf32>
    %290 = tpu.matmul %287, %289, %cst_206 {dimension_numbers = #tpu.dot_dimension_numbers<[1], [0], [0], [1], [0, 0, 1, 1], [], []>} : vector<1x120xbf16>, vector<120x32xbf16>, vector<1x32xf32> -> vector<1x32xf32>
    %291 = arith.addf %286, %290 : vector<1x32xf32>
    %292 = vector.extract_strided_slice %262 {offsets = [6, 0], sizes = [1, 120], strides = [1, 1]} : vector<16x120xbf16> to vector<1x120xbf16>
    %c6_207 = arith.constant 6 : index
    %c0_208 = arith.constant 0 : index
    %c0_209 = arith.constant 0 : index
    %293 = vector.load %arg6[%c6_207, %c0_208, %c0_209] : memref<16x120x32xbf16, #tpu.memory_space<vmem>>, vector<1x120x32xbf16>
    %294 = vector.shape_cast %293 : vector<1x120x32xbf16> to vector<120x32xbf16>
    %cst_210 = arith.constant dense<0.000000e+00> : vector<1x32xf32>
    %295 = tpu.matmul %292, %294, %cst_210 {dimension_numbers = #tpu.dot_dimension_numbers<[1], [0], [0], [1], [0, 0, 1, 1], [], []>} : vector<1x120xbf16>, vector<120x32xbf16>, vector<1x32xf32> -> vector<1x32xf32>
    %296 = arith.addf %291, %295 : vector<1x32xf32>
    %297 = vector.extract_strided_slice %262 {offsets = [7, 0], sizes = [1, 120], strides = [1, 1]} : vector<16x120xbf16> to vector<1x120xbf16>
    %c7_211 = arith.constant 7 : index
    %c0_212 = arith.constant 0 : index
    %c0_213 = arith.constant 0 : index
    %298 = vector.load %arg6[%c7_211, %c0_212, %c0_213] : memref<16x120x32xbf16, #tpu.memory_space<vmem>>, vector<1x120x32xbf16>
    %299 = vector.shape_cast %298 : vector<1x120x32xbf16> to vector<120x32xbf16>
    %cst_214 = arith.constant dense<0.000000e+00> : vector<1x32xf32>
    %300 = tpu.matmul %297, %299, %cst_214 {dimension_numbers = #tpu.dot_dimension_numbers<[1], [0], [0], [1], [0, 0, 1, 1], [], []>} : vector<1x120xbf16>, vector<120x32xbf16>, vector<1x32xf32> -> vector<1x32xf32>
    %301 = arith.addf %296, %300 : vector<1x32xf32>
    %302 = vector.extract_strided_slice %262 {offsets = [8, 0], sizes = [1, 120], strides = [1, 1]} : vector<16x120xbf16> to vector<1x120xbf16>
    %c8_215 = arith.constant 8 : index
    %c0_216 = arith.constant 0 : index
    %c0_217 = arith.constant 0 : index
    %303 = vector.load %arg6[%c8_215, %c0_216, %c0_217] : memref<16x120x32xbf16, #tpu.memory_space<vmem>>, vector<1x120x32xbf16>
    %304 = vector.shape_cast %303 : vector<1x120x32xbf16> to vector<120x32xbf16>
    %cst_218 = arith.constant dense<0.000000e+00> : vector<1x32xf32>
    %305 = tpu.matmul %302, %304, %cst_218 {dimension_numbers = #tpu.dot_dimension_numbers<[1], [0], [0], [1], [0, 0, 1, 1], [], []>} : vector<1x120xbf16>, vector<120x32xbf16>, vector<1x32xf32> -> vector<1x32xf32>
    %306 = arith.addf %301, %305 : vector<1x32xf32>
    %307 = vector.extract_strided_slice %262 {offsets = [9, 0], sizes = [1, 120], strides = [1, 1]} : vector<16x120xbf16> to vector<1x120xbf16>
    %c9_219 = arith.constant 9 : index
    %c0_220 = arith.constant 0 : index
    %c0_221 = arith.constant 0 : index
    %308 = vector.load %arg6[%c9_219, %c0_220, %c0_221] : memref<16x120x32xbf16, #tpu.memory_space<vmem>>, vector<1x120x32xbf16>
    %309 = vector.shape_cast %308 : vector<1x120x32xbf16> to vector<120x32xbf16>
    %cst_222 = arith.constant dense<0.000000e+00> : vector<1x32xf32>
    %310 = tpu.matmul %307, %309, %cst_222 {dimension_numbers = #tpu.dot_dimension_numbers<[1], [0], [0], [1], [0, 0, 1, 1], [], []>} : vector<1x120xbf16>, vector<120x32xbf16>, vector<1x32xf32> -> vector<1x32xf32>
    %311 = arith.addf %306, %310 : vector<1x32xf32>
    %312 = vector.extract_strided_slice %262 {offsets = [10, 0], sizes = [1, 120], strides = [1, 1]} : vector<16x120xbf16> to vector<1x120xbf16>
    %c10_223 = arith.constant 10 : index
    %c0_224 = arith.constant 0 : index
    %c0_225 = arith.constant 0 : index
    %313 = vector.load %arg6[%c10_223, %c0_224, %c0_225] : memref<16x120x32xbf16, #tpu.memory_space<vmem>>, vector<1x120x32xbf16>
    %314 = vector.shape_cast %313 : vector<1x120x32xbf16> to vector<120x32xbf16>
    %cst_226 = arith.constant dense<0.000000e+00> : vector<1x32xf32>
    %315 = tpu.matmul %312, %314, %cst_226 {dimension_numbers = #tpu.dot_dimension_numbers<[1], [0], [0], [1], [0, 0, 1, 1], [], []>} : vector<1x120xbf16>, vector<120x32xbf16>, vector<1x32xf32> -> vector<1x32xf32>
    %316 = arith.addf %311, %315 : vector<1x32xf32>
    %317 = vector.extract_strided_slice %262 {offsets = [11, 0], sizes = [1, 120], strides = [1, 1]} : vector<16x120xbf16> to vector<1x120xbf16>
    %c11_227 = arith.constant 11 : index
    %c0_228 = arith.constant 0 : index
    %c0_229 = arith.constant 0 : index
    %318 = vector.load %arg6[%c11_227, %c0_228, %c0_229] : memref<16x120x32xbf16, #tpu.memory_space<vmem>>, vector<1x120x32xbf16>
    %319 = vector.shape_cast %318 : vector<1x120x32xbf16> to vector<120x32xbf16>
    %cst_230 = arith.constant dense<0.000000e+00> : vector<1x32xf32>
    %320 = tpu.matmul %317, %319, %cst_230 {dimension_numbers = #tpu.dot_dimension_numbers<[1], [0], [0], [1], [0, 0, 1, 1], [], []>} : vector<1x120xbf16>, vector<120x32xbf16>, vector<1x32xf32> -> vector<1x32xf32>
    %321 = arith.addf %316, %320 : vector<1x32xf32>
    %322 = vector.extract_strided_slice %262 {offsets = [12, 0], sizes = [1, 120], strides = [1, 1]} : vector<16x120xbf16> to vector<1x120xbf16>
    %c12_231 = arith.constant 12 : index
    %c0_232 = arith.constant 0 : index
    %c0_233 = arith.constant 0 : index
    %323 = vector.load %arg6[%c12_231, %c0_232, %c0_233] : memref<16x120x32xbf16, #tpu.memory_space<vmem>>, vector<1x120x32xbf16>
    %324 = vector.shape_cast %323 : vector<1x120x32xbf16> to vector<120x32xbf16>
    %cst_234 = arith.constant dense<0.000000e+00> : vector<1x32xf32>
    %325 = tpu.matmul %322, %324, %cst_234 {dimension_numbers = #tpu.dot_dimension_numbers<[1], [0], [0], [1], [0, 0, 1, 1], [], []>} : vector<1x120xbf16>, vector<120x32xbf16>, vector<1x32xf32> -> vector<1x32xf32>
    %326 = arith.addf %321, %325 : vector<1x32xf32>
    %327 = vector.extract_strided_slice %262 {offsets = [13, 0], sizes = [1, 120], strides = [1, 1]} : vector<16x120xbf16> to vector<1x120xbf16>
    %c13_235 = arith.constant 13 : index
    %c0_236 = arith.constant 0 : index
    %c0_237 = arith.constant 0 : index
    %328 = vector.load %arg6[%c13_235, %c0_236, %c0_237] : memref<16x120x32xbf16, #tpu.memory_space<vmem>>, vector<1x120x32xbf16>
    %329 = vector.shape_cast %328 : vector<1x120x32xbf16> to vector<120x32xbf16>
    %cst_238 = arith.constant dense<0.000000e+00> : vector<1x32xf32>
    %330 = tpu.matmul %327, %329, %cst_238 {dimension_numbers = #tpu.dot_dimension_numbers<[1], [0], [0], [1], [0, 0, 1, 1], [], []>} : vector<1x120xbf16>, vector<120x32xbf16>, vector<1x32xf32> -> vector<1x32xf32>
    %331 = arith.addf %326, %330 : vector<1x32xf32>
    %332 = vector.extract_strided_slice %262 {offsets = [14, 0], sizes = [1, 120], strides = [1, 1]} : vector<16x120xbf16> to vector<1x120xbf16>
    %c14_239 = arith.constant 14 : index
    %c0_240 = arith.constant 0 : index
    %c0_241 = arith.constant 0 : index
    %333 = vector.load %arg6[%c14_239, %c0_240, %c0_241] : memref<16x120x32xbf16, #tpu.memory_space<vmem>>, vector<1x120x32xbf16>
    %334 = vector.shape_cast %333 : vector<1x120x32xbf16> to vector<120x32xbf16>
    %cst_242 = arith.constant dense<0.000000e+00> : vector<1x32xf32>
    %335 = tpu.matmul %332, %334, %cst_242 {dimension_numbers = #tpu.dot_dimension_numbers<[1], [0], [0], [1], [0, 0, 1, 1], [], []>} : vector<1x120xbf16>, vector<120x32xbf16>, vector<1x32xf32> -> vector<1x32xf32>
    %336 = arith.addf %331, %335 : vector<1x32xf32>
    %337 = vector.extract_strided_slice %262 {offsets = [15, 0], sizes = [1, 120], strides = [1, 1]} : vector<16x120xbf16> to vector<1x120xbf16>
    %c15_243 = arith.constant 15 : index
    %c0_244 = arith.constant 0 : index
    %c0_245 = arith.constant 0 : index
    %338 = vector.load %arg6[%c15_243, %c0_244, %c0_245] : memref<16x120x32xbf16, #tpu.memory_space<vmem>>, vector<1x120x32xbf16>
    %339 = vector.shape_cast %338 : vector<1x120x32xbf16> to vector<120x32xbf16>
    %cst_246 = arith.constant dense<0.000000e+00> : vector<1x32xf32>
    %340 = tpu.matmul %337, %339, %cst_246 {dimension_numbers = #tpu.dot_dimension_numbers<[1], [0], [0], [1], [0, 0, 1, 1], [], []>} : vector<1x120xbf16>, vector<120x32xbf16>, vector<1x32xf32> -> vector<1x32xf32>
    %341 = arith.addf %336, %340 : vector<1x32xf32>
    %c0_247 = arith.constant 0 : index
    %c0_248 = arith.constant 0 : index
    %342 = vector.load %arg7[%c0_247, %c0_248] : memref<1x32xf32, #tpu.memory_space<vmem>>, vector<1x32xf32>
    %343 = arith.addf %341, %342 : vector<1x32xf32>
    %344 = math.tanh %343 : vector<1x32xf32>
    %345 = arith.truncf %344 : vector<1x32xf32> to vector<1x32xbf16>
    %c0_249 = arith.constant 0 : index
    %c0_250 = arith.constant 0 : index
    %346 = vector.load %arg8[%c0_249, %c0_250] : memref<32x10xbf16, #tpu.memory_space<vmem>>, vector<32x10xbf16>
    %cst_251 = arith.constant dense<0.000000e+00> : vector<1x10xf32>
    %347 = tpu.matmul %345, %346, %cst_251 {dimension_numbers = #tpu.dot_dimension_numbers<[1], [0], [0], [1], [0, 0, 1, 1], [], []>} : vector<1x32xbf16>, vector<32x10xbf16>, vector<1x10xf32> -> vector<1x10xf32>
    %c0_252 = arith.constant 0 : index
    %c0_253 = arith.constant 0 : index
    %348 = vector.load %arg9[%c0_252, %c0_253] : memref<1x10xf32, #tpu.memory_space<vmem>>, vector<1x10xf32>
    %349 = arith.addf %347, %348 : vector<1x10xf32>
    %350 = math.tanh %349 : vector<1x10xf32>
    %c0_254 = arith.constant 0 : index
    %c0_255 = arith.constant 0 : index
    %c0_256 = arith.constant 0 : index
    %351 = vector.load %arg19[%c0_254, %c0_255, %c0_256] : memref<1x1x10xf32, #tpu.memory_space<vmem>>, vector<1x1x10xf32>
    %352 = vector.shape_cast %351 : vector<1x1x10xf32> to vector<1x10xf32>
    %353 = vector.shape_cast %350 : vector<1x10xf32> to vector<1x1x10xf32>
    tpu.vector_store %arg19[%c0_254, %c0_255, %c0_256], %353 {strides = array<i32>} : memref<1x1x10xf32, #tpu.memory_space<vmem>>, vector<1x1x10xf32>,
    %354 = arith.truncf %350 : vector<1x10xf32> to vector<1x10xbf16>
    %c0_257 = arith.constant 0 : index
    %c0_258 = arith.constant 0 : index
    %355 = vector.load %arg10[%c0_257, %c0_258] : memref<10x32xbf16, #tpu.memory_space<vmem>>, vector<10x32xbf16>
    %cst_259 = arith.constant dense<0.000000e+00> : vector<1x32xf32>
    %356 = tpu.matmul %354, %355, %cst_259 {dimension_numbers = #tpu.dot_dimension_numbers<[1], [0], [0], [1], [0, 0, 1, 1], [], []>} : vector<1x10xbf16>, vector<10x32xbf16>, vector<1x32xf32> -> vector<1x32xf32>
    %c0_260 = arith.constant 0 : index
    %c0_261 = arith.constant 0 : index
    %357 = vector.load %arg11[%c0_260, %c0_261] : memref<1x32xf32, #tpu.memory_space<vmem>>, vector<1x32xf32>
    %358 = arith.addf %356, %357 : vector<1x32xf32>
    %359 = math.tanh %358 : vector<1x32xf32>
    %360 = arith.truncf %359 : vector<1x32xf32> to vector<1x32xbf16>
    %c0_262 = arith.constant 0 : index
    %c0_263 = arith.constant 0 : index
    %361 = vector.load %arg12[%c0_262, %c0_263] : memref<32x1024xbf16, #tpu.memory_space<vmem>>, vector<32x1024xbf16>
    %cst_264 = arith.constant dense<0.000000e+00> : vector<1x1024xf32>
    %362 = tpu.matmul %360, %361, %cst_264 {dimension_numbers = #tpu.dot_dimension_numbers<[1], [0], [0], [1], [0, 0, 1, 1], [], []>} : vector<1x32xbf16>, vector<32x1024xbf16>, vector<1x1024xf32> -> vector<1x1024xf32>
    %c0_265 = arith.constant 0 : index
    %c0_266 = arith.constant 0 : index
    %363 = vector.load %arg13[%c0_265, %c0_266] : memref<1x1024xf32, #tpu.memory_space<vmem>>, vector<1x1024xf32>
    %364 = arith.addf %362, %363 : vector<1x1024xf32>
    %365 = math.tanh %364 : vector<1x1024xf32>
    %366 = vector.extract_strided_slice %365 {offsets = [0, 0], sizes = [1, 64], strides = [1, 1]} : vector<1x1024xf32> to vector<1x64xf32>
    %c0_267 = arith.constant 0 : index
    %c0_268 = arith.constant 0 : index
    %367 = vector.load %arg20[%c0_267, %c0_268] : memref<16x64xf32, #tpu.memory_space<vmem>>, vector<1x64xf32>
    tpu.vector_store %arg20[%c0_267, %c0_268], %366 {strides = array<i32>} : memref<16x64xf32, #tpu.memory_space<vmem>>, vector<1x64xf32>,
    %368 = vector.extract_strided_slice %365 {offsets = [0, 64], sizes = [1, 64], strides = [1, 1]} : vector<1x1024xf32> to vector<1x64xf32>
    %c1_269 = arith.constant 1 : index
    %c0_270 = arith.constant 0 : index
    %369 = vector.load %arg20[%c1_269, %c0_270] : memref<16x64xf32, #tpu.memory_space<vmem>>, vector<1x64xf32>
    tpu.vector_store %arg20[%c1_269, %c0_270], %368 {strides = array<i32>} : memref<16x64xf32, #tpu.memory_space<vmem>>, vector<1x64xf32>,
    %370 = vector.extract_strided_slice %365 {offsets = [0, 128], sizes = [1, 64], strides = [1, 1]} : vector<1x1024xf32> to vector<1x64xf32>
    %c2_271 = arith.constant 2 : index
    %c0_272 = arith.constant 0 : index
    %371 = vector.load %arg20[%c2_271, %c0_272] : memref<16x64xf32, #tpu.memory_space<vmem>>, vector<1x64xf32>
    tpu.vector_store %arg20[%c2_271, %c0_272], %370 {strides = array<i32>} : memref<16x64xf32, #tpu.memory_space<vmem>>, vector<1x64xf32>,
    %372 = vector.extract_strided_slice %365 {offsets = [0, 192], sizes = [1, 64], strides = [1, 1]} : vector<1x1024xf32> to vector<1x64xf32>
    %c3_273 = arith.constant 3 : index
    %c0_274 = arith.constant 0 : index
    %373 = vector.load %arg20[%c3_273, %c0_274] : memref<16x64xf32, #tpu.memory_space<vmem>>, vector<1x64xf32>
    tpu.vector_store %arg20[%c3_273, %c0_274], %372 {strides = array<i32>} : memref<16x64xf32, #tpu.memory_space<vmem>>, vector<1x64xf32>,
    %374 = vector.extract_strided_slice %365 {offsets = [0, 256], sizes = [1, 64], strides = [1, 1]} : vector<1x1024xf32> to vector<1x64xf32>
    %c4_275 = arith.constant 4 : index
    %c0_276 = arith.constant 0 : index
    %375 = vector.load %arg20[%c4_275, %c0_276] : memref<16x64xf32, #tpu.memory_space<vmem>>, vector<1x64xf32>
    tpu.vector_store %arg20[%c4_275, %c0_276], %374 {strides = array<i32>} : memref<16x64xf32, #tpu.memory_space<vmem>>, vector<1x64xf32>,
    %376 = vector.extract_strided_slice %365 {offsets = [0, 320], sizes = [1, 64], strides = [1, 1]} : vector<1x1024xf32> to vector<1x64xf32>
    %c5_277 = arith.constant 5 : index
    %c0_278 = arith.constant 0 : index
    %377 = vector.load %arg20[%c5_277, %c0_278] : memref<16x64xf32, #tpu.memory_space<vmem>>, vector<1x64xf32>
    tpu.vector_store %arg20[%c5_277, %c0_278], %376 {strides = array<i32>} : memref<16x64xf32, #tpu.memory_space<vmem>>, vector<1x64xf32>,
    %378 = vector.extract_strided_slice %365 {offsets = [0, 384], sizes = [1, 64], strides = [1, 1]} : vector<1x1024xf32> to vector<1x64xf32>
    %c6_279 = arith.constant 6 : index
    %c0_280 = arith.constant 0 : index
    %379 = vector.load %arg20[%c6_279, %c0_280] : memref<16x64xf32, #tpu.memory_space<vmem>>, vector<1x64xf32>
    tpu.vector_store %arg20[%c6_279, %c0_280], %378 {strides = array<i32>} : memref<16x64xf32, #tpu.memory_space<vmem>>, vector<1x64xf32>,
    %380 = vector.extract_strided_slice %365 {offsets = [0, 448], sizes = [1, 64], strides = [1, 1]} : vector<1x1024xf32> to vector<1x64xf32>
    %c7_281 = arith.constant 7 : index
    %c0_282 = arith.constant 0 : index
    %381 = vector.load %arg20[%c7_281, %c0_282] : memref<16x64xf32, #tpu.memory_space<vmem>>, vector<1x64xf32>
    tpu.vector_store %arg20[%c7_281, %c0_282], %380 {strides = array<i32>} : memref<16x64xf32, #tpu.memory_space<vmem>>, vector<1x64xf32>,
    %382 = vector.extract_strided_slice %365 {offsets = [0, 512], sizes = [1, 64], strides = [1, 1]} : vector<1x1024xf32> to vector<1x64xf32>
    %c8_283 = arith.constant 8 : index
    %c0_284 = arith.constant 0 : index
    %383 = vector.load %arg20[%c8_283, %c0_284] : memref<16x64xf32, #tpu.memory_space<vmem>>, vector<1x64xf32>
    tpu.vector_store %arg20[%c8_283, %c0_284], %382 {strides = array<i32>} : memref<16x64xf32, #tpu.memory_space<vmem>>, vector<1x64xf32>,
    %384 = vector.extract_strided_slice %365 {offsets = [0, 576], sizes = [1, 64], strides = [1, 1]} : vector<1x1024xf32> to vector<1x64xf32>
    %c9_285 = arith.constant 9 : index
    %c0_286 = arith.constant 0 : index
    %385 = vector.load %arg20[%c9_285, %c0_286] : memref<16x64xf32, #tpu.memory_space<vmem>>, vector<1x64xf32>
    tpu.vector_store %arg20[%c9_285, %c0_286], %384 {strides = array<i32>} : memref<16x64xf32, #tpu.memory_space<vmem>>, vector<1x64xf32>,
    %386 = vector.extract_strided_slice %365 {offsets = [0, 640], sizes = [1, 64], strides = [1, 1]} : vector<1x1024xf32> to vector<1x64xf32>
    %c10_287 = arith.constant 10 : index
    %c0_288 = arith.constant 0 : index
    %387 = vector.load %arg20[%c10_287, %c0_288] : memref<16x64xf32, #tpu.memory_space<vmem>>, vector<1x64xf32>
    tpu.vector_store %arg20[%c10_287, %c0_288], %386 {strides = array<i32>} : memref<16x64xf32, #tpu.memory_space<vmem>>, vector<1x64xf32>,
    %388 = vector.extract_strided_slice %365 {offsets = [0, 704], sizes = [1, 64], strides = [1, 1]} : vector<1x1024xf32> to vector<1x64xf32>
    %c11_289 = arith.constant 11 : index
    %c0_290 = arith.constant 0 : index
    %389 = vector.load %arg20[%c11_289, %c0_290] : memref<16x64xf32, #tpu.memory_space<vmem>>, vector<1x64xf32>
    tpu.vector_store %arg20[%c11_289, %c0_290], %388 {strides = array<i32>} : memref<16x64xf32, #tpu.memory_space<vmem>>, vector<1x64xf32>,
    %390 = vector.extract_strided_slice %365 {offsets = [0, 768], sizes = [1, 64], strides = [1, 1]} : vector<1x1024xf32> to vector<1x64xf32>
    %c12_291 = arith.constant 12 : index
    %c0_292 = arith.constant 0 : index
    %391 = vector.load %arg20[%c12_291, %c0_292] : memref<16x64xf32, #tpu.memory_space<vmem>>, vector<1x64xf32>
    tpu.vector_store %arg20[%c12_291, %c0_292], %390 {strides = array<i32>} : memref<16x64xf32, #tpu.memory_space<vmem>>, vector<1x64xf32>,
    %392 = vector.extract_strided_slice %365 {offsets = [0, 832], sizes = [1, 64], strides = [1, 1]} : vector<1x1024xf32> to vector<1x64xf32>
    %c13_293 = arith.constant 13 : index
    %c0_294 = arith.constant 0 : index
    %393 = vector.load %arg20[%c13_293, %c0_294] : memref<16x64xf32, #tpu.memory_space<vmem>>, vector<1x64xf32>
    tpu.vector_store %arg20[%c13_293, %c0_294], %392 {strides = array<i32>} : memref<16x64xf32, #tpu.memory_space<vmem>>, vector<1x64xf32>,
    %394 = vector.extract_strided_slice %365 {offsets = [0, 896], sizes = [1, 64], strides = [1, 1]} : vector<1x1024xf32> to vector<1x64xf32>
    %c14_295 = arith.constant 14 : index
    %c0_296 = arith.constant 0 : index
    %395 = vector.load %arg20[%c14_295, %c0_296] : memref<16x64xf32, #tpu.memory_space<vmem>>, vector<1x64xf32>
    tpu.vector_store %arg20[%c14_295, %c0_296], %394 {strides = array<i32>} : memref<16x64xf32, #tpu.memory_space<vmem>>, vector<1x64xf32>,
    %396 = vector.extract_strided_slice %365 {offsets = [0, 960], sizes = [1, 64], strides = [1, 1]} : vector<1x1024xf32> to vector<1x64xf32>
    %c15_297 = arith.constant 15 : index
    %c0_298 = arith.constant 0 : index
    %397 = vector.load %arg20[%c15_297, %c0_298] : memref<16x64xf32, #tpu.memory_space<vmem>>, vector<1x64xf32>
    tpu.vector_store %arg20[%c15_297, %c0_298], %396 {strides = array<i32>} : memref<16x64xf32, #tpu.memory_space<vmem>>, vector<1x64xf32>,
    %cst_299 = arith.constant 0.000000e+00 : f32
    %398 = vector.broadcast %cst_299 : f32 to vector<16x256xf32>
    %c0_300 = arith.constant 0 : index
    %c0_301 = arith.constant 0 : index
    %399 = vector.load %arg21[%c0_300, %c0_301] : memref<16x256xf32, #tpu.memory_space<vmem>>, vector<16x256xf32>
    tpu.vector_store %arg21[%c0_300, %c0_301], %398 {strides = array<i32>} : memref<16x256xf32, #tpu.memory_space<vmem>>, vector<16x256xf32>,
    %c0_302 = arith.constant 0 : index
    %c0_303 = arith.constant 0 : index
    %400 = vector.load %arg20[%c0_302, %c0_303] : memref<16x64xf32, #tpu.memory_space<vmem>>, vector<16x8xf32>
    %c0_304 = arith.constant 0 : index
    %c68 = arith.constant 68 : index
    %401 = vector.load %arg21[%c0_304, %c68] : memref<16x256xf32, #tpu.memory_space<vmem>>, vector<16x8xf32>
    tpu.vector_store %arg21[%c0_304, %c68], %400 {strides = array<i32>} : memref<16x256xf32, #tpu.memory_space<vmem>>, vector<16x8xf32>,
    %c0_305 = arith.constant 0 : index
    %c8_306 = arith.constant 8 : index
    %402 = vector.load %arg20[%c0_305, %c8_306] : memref<16x64xf32, #tpu.memory_space<vmem>>, vector<16x8xf32>
    %c0_307 = arith.constant 0 : index
    %c84 = arith.constant 84 : index
    %403 = vector.load %arg21[%c0_307, %c84] : memref<16x256xf32, #tpu.memory_space<vmem>>, vector<16x8xf32>
    tpu.vector_store %arg21[%c0_307, %c84], %402 {strides = array<i32>} : memref<16x256xf32, #tpu.memory_space<vmem>>, vector<16x8xf32>,
    %c0_308 = arith.constant 0 : index
    %c16_309 = arith.constant 16 : index
    %404 = vector.load %arg20[%c0_308, %c16_309] : memref<16x64xf32, #tpu.memory_space<vmem>>, vector<16x8xf32>
    %c0_310 = arith.constant 0 : index
    %c100 = arith.constant 100 : index
    %405 = vector.load %arg21[%c0_310, %c100] : memref<16x256xf32, #tpu.memory_space<vmem>>, vector<16x8xf32>
    tpu.vector_store %arg21[%c0_310, %c100], %404 {strides = array<i32>} : memref<16x256xf32, #tpu.memory_space<vmem>>, vector<16x8xf32>,
    %c0_311 = arith.constant 0 : index
    %c24_312 = arith.constant 24 : index
    %406 = vector.load %arg20[%c0_311, %c24_312] : memref<16x64xf32, #tpu.memory_space<vmem>>, vector<16x8xf32>
    %c0_313 = arith.constant 0 : index
    %c116 = arith.constant 116 : index
    %407 = vector.load %arg21[%c0_313, %c116] : memref<16x256xf32, #tpu.memory_space<vmem>>, vector<16x8xf32>
    tpu.vector_store %arg21[%c0_313, %c116], %406 {strides = array<i32>} : memref<16x256xf32, #tpu.memory_space<vmem>>, vector<16x8xf32>,
    %c0_314 = arith.constant 0 : index
    %c32 = arith.constant 32 : index
    %408 = vector.load %arg20[%c0_314, %c32] : memref<16x64xf32, #tpu.memory_space<vmem>>, vector<16x8xf32>
    %c0_315 = arith.constant 0 : index
    %c132 = arith.constant 132 : index
    %409 = vector.load %arg21[%c0_315, %c132] : memref<16x256xf32, #tpu.memory_space<vmem>>, vector<16x8xf32>
    tpu.vector_store %arg21[%c0_315, %c132], %408 {strides = array<i32>} : memref<16x256xf32, #tpu.memory_space<vmem>>, vector<16x8xf32>,
    %c0_316 = arith.constant 0 : index
    %c40 = arith.constant 40 : index
    %410 = vector.load %arg20[%c0_316, %c40] : memref<16x64xf32, #tpu.memory_space<vmem>>, vector<16x8xf32>
    %c0_317 = arith.constant 0 : index
    %c148 = arith.constant 148 : index
    %411 = vector.load %arg21[%c0_317, %c148] : memref<16x256xf32, #tpu.memory_space<vmem>>, vector<16x8xf32>
    tpu.vector_store %arg21[%c0_317, %c148], %410 {strides = array<i32>} : memref<16x256xf32, #tpu.memory_space<vmem>>, vector<16x8xf32>,
    %c0_318 = arith.constant 0 : index
    %c48 = arith.constant 48 : index
    %412 = vector.load %arg20[%c0_318, %c48] : memref<16x64xf32, #tpu.memory_space<vmem>>, vector<16x8xf32>
    %c0_319 = arith.constant 0 : index
    %c164 = arith.constant 164 : index
    %413 = vector.load %arg21[%c0_319, %c164] : memref<16x256xf32, #tpu.memory_space<vmem>>, vector<16x8xf32>
    tpu.vector_store %arg21[%c0_319, %c164], %412 {strides = array<i32>} : memref<16x256xf32, #tpu.memory_space<vmem>>, vector<16x8xf32>,
    %c0_320 = arith.constant 0 : index
    %c56 = arith.constant 56 : index
    %414 = vector.load %arg20[%c0_320, %c56] : memref<16x64xf32, #tpu.memory_space<vmem>>, vector<16x8xf32>
    %c0_321 = arith.constant 0 : index
    %c180 = arith.constant 180 : index
    %415 = vector.load %arg21[%c0_321, %c180] : memref<16x256xf32, #tpu.memory_space<vmem>>, vector<16x8xf32>
    tpu.vector_store %arg21[%c0_321, %c180], %414 {strides = array<i32>} : memref<16x256xf32, #tpu.memory_space<vmem>>, vector<16x8xf32>,
    %c0_322 = arith.constant 0 : index
    %c0_323 = arith.constant 0 : index
    %416 = vector.load %arg21[%c0_322, %c0_323] : memref<16x256xf32, #tpu.memory_space<vmem>>, vector<16x256xf32>
    %417 = arith.truncf %416 : vector<16x256xf32> to vector<16x256xbf16>
    %c0_324 = arith.constant 0 : index
    %c0_325 = arith.constant 0 : index
    %c0_326 = arith.constant 0 : index
    %418 = vector.load %arg14[%c0_324, %c0_325, %c0_326] : memref<25x6x16xbf16, #tpu.memory_space<vmem>>, vector<1x6x16xbf16>
    %419 = vector.shape_cast %418 : vector<1x6x16xbf16> to vector<6x16xbf16>
    %420 = vector.extract_strided_slice %417 {offsets = [0, 0], sizes = [16, 188], strides = [1, 1]} : vector<16x256xbf16> to vector<16x188xbf16>
    %cst_327 = arith.constant dense<0.000000e+00> : vector<6x188xf32>
    %421 = tpu.matmul %419, %420, %cst_327 {dimension_numbers = #tpu.dot_dimension_numbers<[1], [0], [0], [1], [0, 0, 1, 1], [], []>} : vector<6x16xbf16>, vector<16x188xbf16>, vector<6x188xf32> -> vector<6x188xf32>
    %c1_328 = arith.constant 1 : index
    %c0_329 = arith.constant 0 : index
    %c0_330 = arith.constant 0 : index
    %422 = vector.load %arg14[%c1_328, %c0_329, %c0_330] : memref<25x6x16xbf16, #tpu.memory_space<vmem>>, vector<1x6x16xbf16>
    %423 = vector.shape_cast %422 : vector<1x6x16xbf16> to vector<6x16xbf16>
    %424 = vector.extract_strided_slice %417 {offsets = [0, 1], sizes = [16, 188], strides = [1, 1]} : vector<16x256xbf16> to vector<16x188xbf16>
    %cst_331 = arith.constant dense<0.000000e+00> : vector<6x188xf32>
    %425 = tpu.matmul %423, %424, %cst_331 {dimension_numbers = #tpu.dot_dimension_numbers<[1], [0], [0], [1], [0, 0, 1, 1], [], []>} : vector<6x16xbf16>, vector<16x188xbf16>, vector<6x188xf32> -> vector<6x188xf32>
    %426 = arith.addf %421, %425 : vector<6x188xf32>
    %c2_332 = arith.constant 2 : index
    %c0_333 = arith.constant 0 : index
    %c0_334 = arith.constant 0 : index
    %427 = vector.load %arg14[%c2_332, %c0_333, %c0_334] : memref<25x6x16xbf16, #tpu.memory_space<vmem>>, vector<1x6x16xbf16>
    %428 = vector.shape_cast %427 : vector<1x6x16xbf16> to vector<6x16xbf16>
    %429 = vector.extract_strided_slice %417 {offsets = [0, 2], sizes = [16, 188], strides = [1, 1]} : vector<16x256xbf16> to vector<16x188xbf16>
    %cst_335 = arith.constant dense<0.000000e+00> : vector<6x188xf32>
    %430 = tpu.matmul %428, %429, %cst_335 {dimension_numbers = #tpu.dot_dimension_numbers<[1], [0], [0], [1], [0, 0, 1, 1], [], []>} : vector<6x16xbf16>, vector<16x188xbf16>, vector<6x188xf32> -> vector<6x188xf32>
    %431 = arith.addf %426, %430 : vector<6x188xf32>
    %c3_336 = arith.constant 3 : index
    %c0_337 = arith.constant 0 : index
    %c0_338 = arith.constant 0 : index
    %432 = vector.load %arg14[%c3_336, %c0_337, %c0_338] : memref<25x6x16xbf16, #tpu.memory_space<vmem>>, vector<1x6x16xbf16>
    %433 = vector.shape_cast %432 : vector<1x6x16xbf16> to vector<6x16xbf16>
    %434 = vector.extract_strided_slice %417 {offsets = [0, 3], sizes = [16, 188], strides = [1, 1]} : vector<16x256xbf16> to vector<16x188xbf16>
    %cst_339 = arith.constant dense<0.000000e+00> : vector<6x188xf32>
    %435 = tpu.matmul %433, %434, %cst_339 {dimension_numbers = #tpu.dot_dimension_numbers<[1], [0], [0], [1], [0, 0, 1, 1], [], []>} : vector<6x16xbf16>, vector<16x188xbf16>, vector<6x188xf32> -> vector<6x188xf32>
    %436 = arith.addf %431, %435 : vector<6x188xf32>
    %c4_340 = arith.constant 4 : index
    %c0_341 = arith.constant 0 : index
    %c0_342 = arith.constant 0 : index
    %437 = vector.load %arg14[%c4_340, %c0_341, %c0_342] : memref<25x6x16xbf16, #tpu.memory_space<vmem>>, vector<1x6x16xbf16>
    %438 = vector.shape_cast %437 : vector<1x6x16xbf16> to vector<6x16xbf16>
    %439 = vector.extract_strided_slice %417 {offsets = [0, 4], sizes = [16, 188], strides = [1, 1]} : vector<16x256xbf16> to vector<16x188xbf16>
    %cst_343 = arith.constant dense<0.000000e+00> : vector<6x188xf32>
    %440 = tpu.matmul %438, %439, %cst_343 {dimension_numbers = #tpu.dot_dimension_numbers<[1], [0], [0], [1], [0, 0, 1, 1], [], []>} : vector<6x16xbf16>, vector<16x188xbf16>, vector<6x188xf32> -> vector<6x188xf32>
    %441 = arith.addf %436, %440 : vector<6x188xf32>
    %c5_344 = arith.constant 5 : index
    %c0_345 = arith.constant 0 : index
    %c0_346 = arith.constant 0 : index
    %442 = vector.load %arg14[%c5_344, %c0_345, %c0_346] : memref<25x6x16xbf16, #tpu.memory_space<vmem>>, vector<1x6x16xbf16>
    %443 = vector.shape_cast %442 : vector<1x6x16xbf16> to vector<6x16xbf16>
    %444 = vector.extract_strided_slice %417 {offsets = [0, 16], sizes = [16, 188], strides = [1, 1]} : vector<16x256xbf16> to vector<16x188xbf16>
    %cst_347 = arith.constant dense<0.000000e+00> : vector<6x188xf32>
    %445 = tpu.matmul %443, %444, %cst_347 {dimension_numbers = #tpu.dot_dimension_numbers<[1], [0], [0], [1], [0, 0, 1, 1], [], []>} : vector<6x16xbf16>, vector<16x188xbf16>, vector<6x188xf32> -> vector<6x188xf32>
    %446 = arith.addf %441, %445 : vector<6x188xf32>
    %c6_348 = arith.constant 6 : index
    %c0_349 = arith.constant 0 : index
    %c0_350 = arith.constant 0 : index
    %447 = vector.load %arg14[%c6_348, %c0_349, %c0_350] : memref<25x6x16xbf16, #tpu.memory_space<vmem>>, vector<1x6x16xbf16>
    %448 = vector.shape_cast %447 : vector<1x6x16xbf16> to vector<6x16xbf16>
    %449 = vector.extract_strided_slice %417 {offsets = [0, 17], sizes = [16, 188], strides = [1, 1]} : vector<16x256xbf16> to vector<16x188xbf16>
    %cst_351 = arith.constant dense<0.000000e+00> : vector<6x188xf32>
    %450 = tpu.matmul %448, %449, %cst_351 {dimension_numbers = #tpu.dot_dimension_numbers<[1], [0], [0], [1], [0, 0, 1, 1], [], []>} : vector<6x16xbf16>, vector<16x188xbf16>, vector<6x188xf32> -> vector<6x188xf32>
    %451 = arith.addf %446, %450 : vector<6x188xf32>
    %c7_352 = arith.constant 7 : index
    %c0_353 = arith.constant 0 : index
    %c0_354 = arith.constant 0 : index
    %452 = vector.load %arg14[%c7_352, %c0_353, %c0_354] : memref<25x6x16xbf16, #tpu.memory_space<vmem>>, vector<1x6x16xbf16>
    %453 = vector.shape_cast %452 : vector<1x6x16xbf16> to vector<6x16xbf16>
    %454 = vector.extract_strided_slice %417 {offsets = [0, 18], sizes = [16, 188], strides = [1, 1]} : vector<16x256xbf16> to vector<16x188xbf16>
    %cst_355 = arith.constant dense<0.000000e+00> : vector<6x188xf32>
    %455 = tpu.matmul %453, %454, %cst_355 {dimension_numbers = #tpu.dot_dimension_numbers<[1], [0], [0], [1], [0, 0, 1, 1], [], []>} : vector<6x16xbf16>, vector<16x188xbf16>, vector<6x188xf32> -> vector<6x188xf32>
    %456 = arith.addf %451, %455 : vector<6x188xf32>
    %c8_356 = arith.constant 8 : index
    %c0_357 = arith.constant 0 : index
    %c0_358 = arith.constant 0 : index
    %457 = vector.load %arg14[%c8_356, %c0_357, %c0_358] : memref<25x6x16xbf16, #tpu.memory_space<vmem>>, vector<1x6x16xbf16>
    %458 = vector.shape_cast %457 : vector<1x6x16xbf16> to vector<6x16xbf16>
    %459 = vector.extract_strided_slice %417 {offsets = [0, 19], sizes = [16, 188], strides = [1, 1]} : vector<16x256xbf16> to vector<16x188xbf16>
    %cst_359 = arith.constant dense<0.000000e+00> : vector<6x188xf32>
    %460 = tpu.matmul %458, %459, %cst_359 {dimension_numbers = #tpu.dot_dimension_numbers<[1], [0], [0], [1], [0, 0, 1, 1], [], []>} : vector<6x16xbf16>, vector<16x188xbf16>, vector<6x188xf32> -> vector<6x188xf32>
    %461 = arith.addf %456, %460 : vector<6x188xf32>
    %c9_360 = arith.constant 9 : index
    %c0_361 = arith.constant 0 : index
    %c0_362 = arith.constant 0 : index
    %462 = vector.load %arg14[%c9_360, %c0_361, %c0_362] : memref<25x6x16xbf16, #tpu.memory_space<vmem>>, vector<1x6x16xbf16>
    %463 = vector.shape_cast %462 : vector<1x6x16xbf16> to vector<6x16xbf16>
    %464 = vector.extract_strided_slice %417 {offsets = [0, 20], sizes = [16, 188], strides = [1, 1]} : vector<16x256xbf16> to vector<16x188xbf16>
    %cst_363 = arith.constant dense<0.000000e+00> : vector<6x188xf32>
    %465 = tpu.matmul %463, %464, %cst_363 {dimension_numbers = #tpu.dot_dimension_numbers<[1], [0], [0], [1], [0, 0, 1, 1], [], []>} : vector<6x16xbf16>, vector<16x188xbf16>, vector<6x188xf32> -> vector<6x188xf32>
    %466 = arith.addf %461, %465 : vector<6x188xf32>
    %c10_364 = arith.constant 10 : index
    %c0_365 = arith.constant 0 : index
    %c0_366 = arith.constant 0 : index
    %467 = vector.load %arg14[%c10_364, %c0_365, %c0_366] : memref<25x6x16xbf16, #tpu.memory_space<vmem>>, vector<1x6x16xbf16>
    %468 = vector.shape_cast %467 : vector<1x6x16xbf16> to vector<6x16xbf16>
    %469 = vector.extract_strided_slice %417 {offsets = [0, 32], sizes = [16, 188], strides = [1, 1]} : vector<16x256xbf16> to vector<16x188xbf16>
    %cst_367 = arith.constant dense<0.000000e+00> : vector<6x188xf32>
    %470 = tpu.matmul %468, %469, %cst_367 {dimension_numbers = #tpu.dot_dimension_numbers<[1], [0], [0], [1], [0, 0, 1, 1], [], []>} : vector<6x16xbf16>, vector<16x188xbf16>, vector<6x188xf32> -> vector<6x188xf32>
    %471 = arith.addf %466, %470 : vector<6x188xf32>
    %c11_368 = arith.constant 11 : index
    %c0_369 = arith.constant 0 : index
    %c0_370 = arith.constant 0 : index
    %472 = vector.load %arg14[%c11_368, %c0_369, %c0_370] : memref<25x6x16xbf16, #tpu.memory_space<vmem>>, vector<1x6x16xbf16>
    %473 = vector.shape_cast %472 : vector<1x6x16xbf16> to vector<6x16xbf16>
    %474 = vector.extract_strided_slice %417 {offsets = [0, 33], sizes = [16, 188], strides = [1, 1]} : vector<16x256xbf16> to vector<16x188xbf16>
    %cst_371 = arith.constant dense<0.000000e+00> : vector<6x188xf32>
    %475 = tpu.matmul %473, %474, %cst_371 {dimension_numbers = #tpu.dot_dimension_numbers<[1], [0], [0], [1], [0, 0, 1, 1], [], []>} : vector<6x16xbf16>, vector<16x188xbf16>, vector<6x188xf32> -> vector<6x188xf32>
    %476 = arith.addf %471, %475 : vector<6x188xf32>
    %c12_372 = arith.constant 12 : index
    %c0_373 = arith.constant 0 : index
    %c0_374 = arith.constant 0 : index
    %477 = vector.load %arg14[%c12_372, %c0_373, %c0_374] : memref<25x6x16xbf16, #tpu.memory_space<vmem>>, vector<1x6x16xbf16>
    %478 = vector.shape_cast %477 : vector<1x6x16xbf16> to vector<6x16xbf16>
    %479 = vector.extract_strided_slice %417 {offsets = [0, 34], sizes = [16, 188], strides = [1, 1]} : vector<16x256xbf16> to vector<16x188xbf16>
    %cst_375 = arith.constant dense<0.000000e+00> : vector<6x188xf32>
    %480 = tpu.matmul %478, %479, %cst_375 {dimension_numbers = #tpu.dot_dimension_numbers<[1], [0], [0], [1], [0, 0, 1, 1], [], []>} : vector<6x16xbf16>, vector<16x188xbf16>, vector<6x188xf32> -> vector<6x188xf32>
    %481 = arith.addf %476, %480 : vector<6x188xf32>
    %c13_376 = arith.constant 13 : index
    %c0_377 = arith.constant 0 : index
    %c0_378 = arith.constant 0 : index
    %482 = vector.load %arg14[%c13_376, %c0_377, %c0_378] : memref<25x6x16xbf16, #tpu.memory_space<vmem>>, vector<1x6x16xbf16>
    %483 = vector.shape_cast %482 : vector<1x6x16xbf16> to vector<6x16xbf16>
    %484 = vector.extract_strided_slice %417 {offsets = [0, 35], sizes = [16, 188], strides = [1, 1]} : vector<16x256xbf16> to vector<16x188xbf16>
    %cst_379 = arith.constant dense<0.000000e+00> : vector<6x188xf32>
    %485 = tpu.matmul %483, %484, %cst_379 {dimension_numbers = #tpu.dot_dimension_numbers<[1], [0], [0], [1], [0, 0, 1, 1], [], []>} : vector<6x16xbf16>, vector<16x188xbf16>, vector<6x188xf32> -> vector<6x188xf32>
    %486 = arith.addf %481, %485 : vector<6x188xf32>
    %c14_380 = arith.constant 14 : index
    %c0_381 = arith.constant 0 : index
    %c0_382 = arith.constant 0 : index
    %487 = vector.load %arg14[%c14_380, %c0_381, %c0_382] : memref<25x6x16xbf16, #tpu.memory_space<vmem>>, vector<1x6x16xbf16>
    %488 = vector.shape_cast %487 : vector<1x6x16xbf16> to vector<6x16xbf16>
    %489 = vector.extract_strided_slice %417 {offsets = [0, 36], sizes = [16, 188], strides = [1, 1]} : vector<16x256xbf16> to vector<16x188xbf16>
    %cst_383 = arith.constant dense<0.000000e+00> : vector<6x188xf32>
    %490 = tpu.matmul %488, %489, %cst_383 {dimension_numbers = #tpu.dot_dimension_numbers<[1], [0], [0], [1], [0, 0, 1, 1], [], []>} : vector<6x16xbf16>, vector<16x188xbf16>, vector<6x188xf32> -> vector<6x188xf32>
    %491 = arith.addf %486, %490 : vector<6x188xf32>
    %c15_384 = arith.constant 15 : index
    %c0_385 = arith.constant 0 : index
    %c0_386 = arith.constant 0 : index
    %492 = vector.load %arg14[%c15_384, %c0_385, %c0_386] : memref<25x6x16xbf16, #tpu.memory_space<vmem>>, vector<1x6x16xbf16>
    %493 = vector.shape_cast %492 : vector<1x6x16xbf16> to vector<6x16xbf16>
    %494 = vector.extract_strided_slice %417 {offsets = [0, 48], sizes = [16, 188], strides = [1, 1]} : vector<16x256xbf16> to vector<16x188xbf16>
    %cst_387 = arith.constant dense<0.000000e+00> : vector<6x188xf32>
    %495 = tpu.matmul %493, %494, %cst_387 {dimension_numbers = #tpu.dot_dimension_numbers<[1], [0], [0], [1], [0, 0, 1, 1], [], []>} : vector<6x16xbf16>, vector<16x188xbf16>, vector<6x188xf32> -> vector<6x188xf32>
    %496 = arith.addf %491, %495 : vector<6x188xf32>
    %c16_388 = arith.constant 16 : index
    %c0_389 = arith.constant 0 : index
    %c0_390 = arith.constant 0 : index
    %497 = vector.load %arg14[%c16_388, %c0_389, %c0_390] : memref<25x6x16xbf16, #tpu.memory_space<vmem>>, vector<1x6x16xbf16>
    %498 = vector.shape_cast %497 : vector<1x6x16xbf16> to vector<6x16xbf16>
    %499 = vector.extract_strided_slice %417 {offsets = [0, 49], sizes = [16, 188], strides = [1, 1]} : vector<16x256xbf16> to vector<16x188xbf16>
    %cst_391 = arith.constant dense<0.000000e+00> : vector<6x188xf32>
    %500 = tpu.matmul %498, %499, %cst_391 {dimension_numbers = #tpu.dot_dimension_numbers<[1], [0], [0], [1], [0, 0, 1, 1], [], []>} : vector<6x16xbf16>, vector<16x188xbf16>, vector<6x188xf32> -> vector<6x188xf32>
    %501 = arith.addf %496, %500 : vector<6x188xf32>
    %c17_392 = arith.constant 17 : index
    %c0_393 = arith.constant 0 : index
    %c0_394 = arith.constant 0 : index
    %502 = vector.load %arg14[%c17_392, %c0_393, %c0_394] : memref<25x6x16xbf16, #tpu.memory_space<vmem>>, vector<1x6x16xbf16>
    %503 = vector.shape_cast %502 : vector<1x6x16xbf16> to vector<6x16xbf16>
    %504 = vector.extract_strided_slice %417 {offsets = [0, 50], sizes = [16, 188], strides = [1, 1]} : vector<16x256xbf16> to vector<16x188xbf16>
    %cst_395 = arith.constant dense<0.000000e+00> : vector<6x188xf32>
    %505 = tpu.matmul %503, %504, %cst_395 {dimension_numbers = #tpu.dot_dimension_numbers<[1], [0], [0], [1], [0, 0, 1, 1], [], []>} : vector<6x16xbf16>, vector<16x188xbf16>, vector<6x188xf32> -> vector<6x188xf32>
    %506 = arith.addf %501, %505 : vector<6x188xf32>
    %c18_396 = arith.constant 18 : index
    %c0_397 = arith.constant 0 : index
    %c0_398 = arith.constant 0 : index
    %507 = vector.load %arg14[%c18_396, %c0_397, %c0_398] : memref<25x6x16xbf16, #tpu.memory_space<vmem>>, vector<1x6x16xbf16>
    %508 = vector.shape_cast %507 : vector<1x6x16xbf16> to vector<6x16xbf16>
    %509 = vector.extract_strided_slice %417 {offsets = [0, 51], sizes = [16, 188], strides = [1, 1]} : vector<16x256xbf16> to vector<16x188xbf16>
    %cst_399 = arith.constant dense<0.000000e+00> : vector<6x188xf32>
    %510 = tpu.matmul %508, %509, %cst_399 {dimension_numbers = #tpu.dot_dimension_numbers<[1], [0], [0], [1], [0, 0, 1, 1], [], []>} : vector<6x16xbf16>, vector<16x188xbf16>, vector<6x188xf32> -> vector<6x188xf32>
    %511 = arith.addf %506, %510 : vector<6x188xf32>
    %c19_400 = arith.constant 19 : index
    %c0_401 = arith.constant 0 : index
    %c0_402 = arith.constant 0 : index
    %512 = vector.load %arg14[%c19_400, %c0_401, %c0_402] : memref<25x6x16xbf16, #tpu.memory_space<vmem>>, vector<1x6x16xbf16>
    %513 = vector.shape_cast %512 : vector<1x6x16xbf16> to vector<6x16xbf16>
    %514 = vector.extract_strided_slice %417 {offsets = [0, 52], sizes = [16, 188], strides = [1, 1]} : vector<16x256xbf16> to vector<16x188xbf16>
    %cst_403 = arith.constant dense<0.000000e+00> : vector<6x188xf32>
    %515 = tpu.matmul %513, %514, %cst_403 {dimension_numbers = #tpu.dot_dimension_numbers<[1], [0], [0], [1], [0, 0, 1, 1], [], []>} : vector<6x16xbf16>, vector<16x188xbf16>, vector<6x188xf32> -> vector<6x188xf32>
    %516 = arith.addf %511, %515 : vector<6x188xf32>
    %c20_404 = arith.constant 20 : index
    %c0_405 = arith.constant 0 : index
    %c0_406 = arith.constant 0 : index
    %517 = vector.load %arg14[%c20_404, %c0_405, %c0_406] : memref<25x6x16xbf16, #tpu.memory_space<vmem>>, vector<1x6x16xbf16>
    %518 = vector.shape_cast %517 : vector<1x6x16xbf16> to vector<6x16xbf16>
    %519 = vector.extract_strided_slice %417 {offsets = [0, 64], sizes = [16, 188], strides = [1, 1]} : vector<16x256xbf16> to vector<16x188xbf16>
    %cst_407 = arith.constant dense<0.000000e+00> : vector<6x188xf32>
    %520 = tpu.matmul %518, %519, %cst_407 {dimension_numbers = #tpu.dot_dimension_numbers<[1], [0], [0], [1], [0, 0, 1, 1], [], []>} : vector<6x16xbf16>, vector<16x188xbf16>, vector<6x188xf32> -> vector<6x188xf32>
    %521 = arith.addf %516, %520 : vector<6x188xf32>
    %c21_408 = arith.constant 21 : index
    %c0_409 = arith.constant 0 : index
    %c0_410 = arith.constant 0 : index
    %522 = vector.load %arg14[%c21_408, %c0_409, %c0_410] : memref<25x6x16xbf16, #tpu.memory_space<vmem>>, vector<1x6x16xbf16>
    %523 = vector.shape_cast %522 : vector<1x6x16xbf16> to vector<6x16xbf16>
    %524 = vector.extract_strided_slice %417 {offsets = [0, 65], sizes = [16, 188], strides = [1, 1]} : vector<16x256xbf16> to vector<16x188xbf16>
    %cst_411 = arith.constant dense<0.000000e+00> : vector<6x188xf32>
    %525 = tpu.matmul %523, %524, %cst_411 {dimension_numbers = #tpu.dot_dimension_numbers<[1], [0], [0], [1], [0, 0, 1, 1], [], []>} : vector<6x16xbf16>, vector<16x188xbf16>, vector<6x188xf32> -> vector<6x188xf32>
    %526 = arith.addf %521, %525 : vector<6x188xf32>
    %c22_412 = arith.constant 22 : index
    %c0_413 = arith.constant 0 : index
    %c0_414 = arith.constant 0 : index
    %527 = vector.load %arg14[%c22_412, %c0_413, %c0_414] : memref<25x6x16xbf16, #tpu.memory_space<vmem>>, vector<1x6x16xbf16>
    %528 = vector.shape_cast %527 : vector<1x6x16xbf16> to vector<6x16xbf16>
    %529 = vector.extract_strided_slice %417 {offsets = [0, 66], sizes = [16, 188], strides = [1, 1]} : vector<16x256xbf16> to vector<16x188xbf16>
    %cst_415 = arith.constant dense<0.000000e+00> : vector<6x188xf32>
    %530 = tpu.matmul %528, %529, %cst_415 {dimension_numbers = #tpu.dot_dimension_numbers<[1], [0], [0], [1], [0, 0, 1, 1], [], []>} : vector<6x16xbf16>, vector<16x188xbf16>, vector<6x188xf32> -> vector<6x188xf32>
    %531 = arith.addf %526, %530 : vector<6x188xf32>
    %c23_416 = arith.constant 23 : index
    %c0_417 = arith.constant 0 : index
    %c0_418 = arith.constant 0 : index
    %532 = vector.load %arg14[%c23_416, %c0_417, %c0_418] : memref<25x6x16xbf16, #tpu.memory_space<vmem>>, vector<1x6x16xbf16>
    %533 = vector.shape_cast %532 : vector<1x6x16xbf16> to vector<6x16xbf16>
    %534 = vector.extract_strided_slice %417 {offsets = [0, 67], sizes = [16, 188], strides = [1, 1]} : vector<16x256xbf16> to vector<16x188xbf16>
    %cst_419 = arith.constant dense<0.000000e+00> : vector<6x188xf32>
    %535 = tpu.matmul %533, %534, %cst_419 {dimension_numbers = #tpu.dot_dimension_numbers<[1], [0], [0], [1], [0, 0, 1, 1], [], []>} : vector<6x16xbf16>, vector<16x188xbf16>, vector<6x188xf32> -> vector<6x188xf32>
    %536 = arith.addf %531, %535 : vector<6x188xf32>
    %c24_420 = arith.constant 24 : index
    %c0_421 = arith.constant 0 : index
    %c0_422 = arith.constant 0 : index
    %537 = vector.load %arg14[%c24_420, %c0_421, %c0_422] : memref<25x6x16xbf16, #tpu.memory_space<vmem>>, vector<1x6x16xbf16>
    %538 = vector.shape_cast %537 : vector<1x6x16xbf16> to vector<6x16xbf16>
    %539 = vector.extract_strided_slice %417 {offsets = [0, 68], sizes = [16, 188], strides = [1, 1]} : vector<16x256xbf16> to vector<16x188xbf16>
    %cst_423 = arith.constant dense<0.000000e+00> : vector<6x188xf32>
    %540 = tpu.matmul %538, %539, %cst_423 {dimension_numbers = #tpu.dot_dimension_numbers<[1], [0], [0], [1], [0, 0, 1, 1], [], []>} : vector<6x16xbf16>, vector<16x188xbf16>, vector<6x188xf32> -> vector<6x188xf32>
    %541 = arith.addf %536, %540 : vector<6x188xf32>
    %c0_424 = arith.constant 0 : index
    %c0_425 = arith.constant 0 : index
    %542 = vector.load %arg15[%c0_424, %c0_425] : memref<6x1xf32, #tpu.memory_space<vmem>>, vector<6x1xf32>
    %543 = vector.broadcast %542 : vector<6x1xf32> to vector<6x188xf32>
    %544 = arith.addf %541, %543 : vector<6x188xf32>
    %cst_426 = arith.constant 0.000000e+00 : f32
    %545 = vector.broadcast %cst_426 : f32 to vector<6x188xf32>
    %546 = arith.maximumf %544, %545 : vector<6x188xf32>
    %cst_427 = arith.constant 0.000000e+00 : f32
    %547 = vector.broadcast %cst_427 : f32 to vector<6x400xf32>
    %c0_428 = arith.constant 0 : index
    %c0_429 = arith.constant 0 : index
    %548 = vector.load %arg22[%c0_428, %c0_429] : memref<6x400xf32, #tpu.memory_space<vmem>>, vector<6x400xf32>
    tpu.vector_store %arg22[%c0_428, %c0_429], %547 {strides = array<i32>} : memref<6x400xf32, #tpu.memory_space<vmem>>, vector<6x400xf32>,
    %549 = vector.extract_strided_slice %546 {offsets = [0, 0], sizes = [6, 12], strides = [1, 1]} : vector<6x188xf32> to vector<6x12xf32>
    %c0_430 = arith.constant 0 : index
    %c84_431 = arith.constant 84 : index
    %550 = vector.load %arg22[%c0_430, %c84_431] : memref<6x400xf32, #tpu.memory_space<vmem>>, vector<6x12xf32>
    tpu.vector_store %arg22[%c0_430, %c84_431], %549 {strides = array<i32>} : memref<6x400xf32, #tpu.memory_space<vmem>>, vector<6x12xf32>,
    %551 = vector.extract_strided_slice %546 {offsets = [0, 16], sizes = [6, 12], strides = [1, 1]} : vector<6x188xf32> to vector<6x12xf32>
    %c0_432 = arith.constant 0 : index
    %c104 = arith.constant 104 : index
    %552 = vector.load %arg22[%c0_432, %c104] : memref<6x400xf32, #tpu.memory_space<vmem>>, vector<6x12xf32>
    tpu.vector_store %arg22[%c0_432, %c104], %551 {strides = array<i32>} : memref<6x400xf32, #tpu.memory_space<vmem>>, vector<6x12xf32>,
    %553 = vector.extract_strided_slice %546 {offsets = [0, 32], sizes = [6, 12], strides = [1, 1]} : vector<6x188xf32> to vector<6x12xf32>
    %c0_433 = arith.constant 0 : index
    %c124 = arith.constant 124 : index
    %554 = vector.load %arg22[%c0_433, %c124] : memref<6x400xf32, #tpu.memory_space<vmem>>, vector<6x12xf32>
    tpu.vector_store %arg22[%c0_433, %c124], %553 {strides = array<i32>} : memref<6x400xf32, #tpu.memory_space<vmem>>, vector<6x12xf32>,
    %555 = vector.extract_strided_slice %546 {offsets = [0, 48], sizes = [6, 12], strides = [1, 1]} : vector<6x188xf32> to vector<6x12xf32>
    %c0_434 = arith.constant 0 : index
    %c144 = arith.constant 144 : index
    %556 = vector.load %arg22[%c0_434, %c144] : memref<6x400xf32, #tpu.memory_space<vmem>>, vector<6x12xf32>
    tpu.vector_store %arg22[%c0_434, %c144], %555 {strides = array<i32>} : memref<6x400xf32, #tpu.memory_space<vmem>>, vector<6x12xf32>,
    %557 = vector.extract_strided_slice %546 {offsets = [0, 64], sizes = [6, 12], strides = [1, 1]} : vector<6x188xf32> to vector<6x12xf32>
    %c0_435 = arith.constant 0 : index
    %c164_436 = arith.constant 164 : index
    %558 = vector.load %arg22[%c0_435, %c164_436] : memref<6x400xf32, #tpu.memory_space<vmem>>, vector<6x12xf32>
    tpu.vector_store %arg22[%c0_435, %c164_436], %557 {strides = array<i32>} : memref<6x400xf32, #tpu.memory_space<vmem>>, vector<6x12xf32>,
    %559 = vector.extract_strided_slice %546 {offsets = [0, 80], sizes = [6, 12], strides = [1, 1]} : vector<6x188xf32> to vector<6x12xf32>
    %c0_437 = arith.constant 0 : index
    %c184 = arith.constant 184 : index
    %560 = vector.load %arg22[%c0_437, %c184] : memref<6x400xf32, #tpu.memory_space<vmem>>, vector<6x12xf32>
    tpu.vector_store %arg22[%c0_437, %c184], %559 {strides = array<i32>} : memref<6x400xf32, #tpu.memory_space<vmem>>, vector<6x12xf32>,
    %561 = vector.extract_strided_slice %546 {offsets = [0, 96], sizes = [6, 12], strides = [1, 1]} : vector<6x188xf32> to vector<6x12xf32>
    %c0_438 = arith.constant 0 : index
    %c204 = arith.constant 204 : index
    %562 = vector.load %arg22[%c0_438, %c204] : memref<6x400xf32, #tpu.memory_space<vmem>>, vector<6x12xf32>
    tpu.vector_store %arg22[%c0_438, %c204], %561 {strides = array<i32>} : memref<6x400xf32, #tpu.memory_space<vmem>>, vector<6x12xf32>,
    %563 = vector.extract_strided_slice %546 {offsets = [0, 112], sizes = [6, 12], strides = [1, 1]} : vector<6x188xf32> to vector<6x12xf32>
    %c0_439 = arith.constant 0 : index
    %c224 = arith.constant 224 : index
    %564 = vector.load %arg22[%c0_439, %c224] : memref<6x400xf32, #tpu.memory_space<vmem>>, vector<6x12xf32>
    tpu.vector_store %arg22[%c0_439, %c224], %563 {strides = array<i32>} : memref<6x400xf32, #tpu.memory_space<vmem>>, vector<6x12xf32>,
    %565 = vector.extract_strided_slice %546 {offsets = [0, 128], sizes = [6, 12], strides = [1, 1]} : vector<6x188xf32> to vector<6x12xf32>
    %c0_440 = arith.constant 0 : index
    %c244 = arith.constant 244 : index
    %566 = vector.load %arg22[%c0_440, %c244] : memref<6x400xf32, #tpu.memory_space<vmem>>, vector<6x12xf32>
    tpu.vector_store %arg22[%c0_440, %c244], %565 {strides = array<i32>} : memref<6x400xf32, #tpu.memory_space<vmem>>, vector<6x12xf32>,
    %567 = vector.extract_strided_slice %546 {offsets = [0, 144], sizes = [6, 12], strides = [1, 1]} : vector<6x188xf32> to vector<6x12xf32>
    %c0_441 = arith.constant 0 : index
    %c264 = arith.constant 264 : index
    %568 = vector.load %arg22[%c0_441, %c264] : memref<6x400xf32, #tpu.memory_space<vmem>>, vector<6x12xf32>
    tpu.vector_store %arg22[%c0_441, %c264], %567 {strides = array<i32>} : memref<6x400xf32, #tpu.memory_space<vmem>>, vector<6x12xf32>,
    %569 = vector.extract_strided_slice %546 {offsets = [0, 160], sizes = [6, 12], strides = [1, 1]} : vector<6x188xf32> to vector<6x12xf32>
    %c0_442 = arith.constant 0 : index
    %c284 = arith.constant 284 : index
    %570 = vector.load %arg22[%c0_442, %c284] : memref<6x400xf32, #tpu.memory_space<vmem>>, vector<6x12xf32>
    tpu.vector_store %arg22[%c0_442, %c284], %569 {strides = array<i32>} : memref<6x400xf32, #tpu.memory_space<vmem>>, vector<6x12xf32>,
    %571 = vector.extract_strided_slice %546 {offsets = [0, 176], sizes = [6, 12], strides = [1, 1]} : vector<6x188xf32> to vector<6x12xf32>
    %c0_443 = arith.constant 0 : index
    %c304 = arith.constant 304 : index
    %572 = vector.load %arg22[%c0_443, %c304] : memref<6x400xf32, #tpu.memory_space<vmem>>, vector<6x12xf32>
    tpu.vector_store %arg22[%c0_443, %c304], %571 {strides = array<i32>} : memref<6x400xf32, #tpu.memory_space<vmem>>, vector<6x12xf32>,
    %c0_444 = arith.constant 0 : index
    %c0_445 = arith.constant 0 : index
    %573 = vector.load %arg22[%c0_444, %c0_445] : memref<6x400xf32, #tpu.memory_space<vmem>>, vector<6x400xf32>
    %574 = arith.truncf %573 : vector<6x400xf32> to vector<6x400xbf16>
    %c0_446 = arith.constant 0 : index
    %c0_447 = arith.constant 0 : index
    %c0_448 = arith.constant 0 : index
    %575 = vector.load %arg16[%c0_446, %c0_447, %c0_448] : memref<25x4x6xbf16, #tpu.memory_space<vmem>>, vector<1x4x6xbf16>
    %576 = vector.shape_cast %575 : vector<1x4x6xbf16> to vector<4x6xbf16>
    %577 = vector.extract_strided_slice %574 {offsets = [0, 0], sizes = [6, 316], strides = [1, 1]} : vector<6x400xbf16> to vector<6x316xbf16>
    %cst_449 = arith.constant dense<0.000000e+00> : vector<4x316xf32>
    %578 = tpu.matmul %576, %577, %cst_449 {dimension_numbers = #tpu.dot_dimension_numbers<[1], [0], [0], [1], [0, 0, 1, 1], [], []>} : vector<4x6xbf16>, vector<6x316xbf16>, vector<4x316xf32> -> vector<4x316xf32>
    %c1_450 = arith.constant 1 : index
    %c0_451 = arith.constant 0 : index
    %c0_452 = arith.constant 0 : index
    %579 = vector.load %arg16[%c1_450, %c0_451, %c0_452] : memref<25x4x6xbf16, #tpu.memory_space<vmem>>, vector<1x4x6xbf16>
    %580 = vector.shape_cast %579 : vector<1x4x6xbf16> to vector<4x6xbf16>
    %581 = vector.extract_strided_slice %574 {offsets = [0, 1], sizes = [6, 316], strides = [1, 1]} : vector<6x400xbf16> to vector<6x316xbf16>
    %cst_453 = arith.constant dense<0.000000e+00> : vector<4x316xf32>
    %582 = tpu.matmul %580, %581, %cst_453 {dimension_numbers = #tpu.dot_dimension_numbers<[1], [0], [0], [1], [0, 0, 1, 1], [], []>} : vector<4x6xbf16>, vector<6x316xbf16>, vector<4x316xf32> -> vector<4x316xf32>
    %583 = arith.addf %578, %582 : vector<4x316xf32>
    %c2_454 = arith.constant 2 : index
    %c0_455 = arith.constant 0 : index
    %c0_456 = arith.constant 0 : index
    %584 = vector.load %arg16[%c2_454, %c0_455, %c0_456] : memref<25x4x6xbf16, #tpu.memory_space<vmem>>, vector<1x4x6xbf16>
    %585 = vector.shape_cast %584 : vector<1x4x6xbf16> to vector<4x6xbf16>
    %586 = vector.extract_strided_slice %574 {offsets = [0, 2], sizes = [6, 316], strides = [1, 1]} : vector<6x400xbf16> to vector<6x316xbf16>
    %cst_457 = arith.constant dense<0.000000e+00> : vector<4x316xf32>
    %587 = tpu.matmul %585, %586, %cst_457 {dimension_numbers = #tpu.dot_dimension_numbers<[1], [0], [0], [1], [0, 0, 1, 1], [], []>} : vector<4x6xbf16>, vector<6x316xbf16>, vector<4x316xf32> -> vector<4x316xf32>
    %588 = arith.addf %583, %587 : vector<4x316xf32>
    %c3_458 = arith.constant 3 : index
    %c0_459 = arith.constant 0 : index
    %c0_460 = arith.constant 0 : index
    %589 = vector.load %arg16[%c3_458, %c0_459, %c0_460] : memref<25x4x6xbf16, #tpu.memory_space<vmem>>, vector<1x4x6xbf16>
    %590 = vector.shape_cast %589 : vector<1x4x6xbf16> to vector<4x6xbf16>
    %591 = vector.extract_strided_slice %574 {offsets = [0, 3], sizes = [6, 316], strides = [1, 1]} : vector<6x400xbf16> to vector<6x316xbf16>
    %cst_461 = arith.constant dense<0.000000e+00> : vector<4x316xf32>
    %592 = tpu.matmul %590, %591, %cst_461 {dimension_numbers = #tpu.dot_dimension_numbers<[1], [0], [0], [1], [0, 0, 1, 1], [], []>} : vector<4x6xbf16>, vector<6x316xbf16>, vector<4x316xf32> -> vector<4x316xf32>
    %593 = arith.addf %588, %592 : vector<4x316xf32>
    %c4_462 = arith.constant 4 : index
    %c0_463 = arith.constant 0 : index
    %c0_464 = arith.constant 0 : index
    %594 = vector.load %arg16[%c4_462, %c0_463, %c0_464] : memref<25x4x6xbf16, #tpu.memory_space<vmem>>, vector<1x4x6xbf16>
    %595 = vector.shape_cast %594 : vector<1x4x6xbf16> to vector<4x6xbf16>
    %596 = vector.extract_strided_slice %574 {offsets = [0, 4], sizes = [6, 316], strides = [1, 1]} : vector<6x400xbf16> to vector<6x316xbf16>
    %cst_465 = arith.constant dense<0.000000e+00> : vector<4x316xf32>
    %597 = tpu.matmul %595, %596, %cst_465 {dimension_numbers = #tpu.dot_dimension_numbers<[1], [0], [0], [1], [0, 0, 1, 1], [], []>} : vector<4x6xbf16>, vector<6x316xbf16>, vector<4x316xf32> -> vector<4x316xf32>
    %598 = arith.addf %593, %597 : vector<4x316xf32>
    %c5_466 = arith.constant 5 : index
    %c0_467 = arith.constant 0 : index
    %c0_468 = arith.constant 0 : index
    %599 = vector.load %arg16[%c5_466, %c0_467, %c0_468] : memref<25x4x6xbf16, #tpu.memory_space<vmem>>, vector<1x4x6xbf16>
    %600 = vector.shape_cast %599 : vector<1x4x6xbf16> to vector<4x6xbf16>
    %601 = vector.extract_strided_slice %574 {offsets = [0, 20], sizes = [6, 316], strides = [1, 1]} : vector<6x400xbf16> to vector<6x316xbf16>
    %cst_469 = arith.constant dense<0.000000e+00> : vector<4x316xf32>
    %602 = tpu.matmul %600, %601, %cst_469 {dimension_numbers = #tpu.dot_dimension_numbers<[1], [0], [0], [1], [0, 0, 1, 1], [], []>} : vector<4x6xbf16>, vector<6x316xbf16>, vector<4x316xf32> -> vector<4x316xf32>
    %603 = arith.addf %598, %602 : vector<4x316xf32>
    %c6_470 = arith.constant 6 : index
    %c0_471 = arith.constant 0 : index
    %c0_472 = arith.constant 0 : index
    %604 = vector.load %arg16[%c6_470, %c0_471, %c0_472] : memref<25x4x6xbf16, #tpu.memory_space<vmem>>, vector<1x4x6xbf16>
    %605 = vector.shape_cast %604 : vector<1x4x6xbf16> to vector<4x6xbf16>
    %606 = vector.extract_strided_slice %574 {offsets = [0, 21], sizes = [6, 316], strides = [1, 1]} : vector<6x400xbf16> to vector<6x316xbf16>
    %cst_473 = arith.constant dense<0.000000e+00> : vector<4x316xf32>
    %607 = tpu.matmul %605, %606, %cst_473 {dimension_numbers = #tpu.dot_dimension_numbers<[1], [0], [0], [1], [0, 0, 1, 1], [], []>} : vector<4x6xbf16>, vector<6x316xbf16>, vector<4x316xf32> -> vector<4x316xf32>
    %608 = arith.addf %603, %607 : vector<4x316xf32>
    %c7_474 = arith.constant 7 : index
    %c0_475 = arith.constant 0 : index
    %c0_476 = arith.constant 0 : index
    %609 = vector.load %arg16[%c7_474, %c0_475, %c0_476] : memref<25x4x6xbf16, #tpu.memory_space<vmem>>, vector<1x4x6xbf16>
    %610 = vector.shape_cast %609 : vector<1x4x6xbf16> to vector<4x6xbf16>
    %611 = vector.extract_strided_slice %574 {offsets = [0, 22], sizes = [6, 316], strides = [1, 1]} : vector<6x400xbf16> to vector<6x316xbf16>
    %cst_477 = arith.constant dense<0.000000e+00> : vector<4x316xf32>
    %612 = tpu.matmul %610, %611, %cst_477 {dimension_numbers = #tpu.dot_dimension_numbers<[1], [0], [0], [1], [0, 0, 1, 1], [], []>} : vector<4x6xbf16>, vector<6x316xbf16>, vector<4x316xf32> -> vector<4x316xf32>
    %613 = arith.addf %608, %612 : vector<4x316xf32>
    %c8_478 = arith.constant 8 : index
    %c0_479 = arith.constant 0 : index
    %c0_480 = arith.constant 0 : index
    %614 = vector.load %arg16[%c8_478, %c0_479, %c0_480] : memref<25x4x6xbf16, #tpu.memory_space<vmem>>, vector<1x4x6xbf16>
    %615 = vector.shape_cast %614 : vector<1x4x6xbf16> to vector<4x6xbf16>
    %616 = vector.extract_strided_slice %574 {offsets = [0, 23], sizes = [6, 316], strides = [1, 1]} : vector<6x400xbf16> to vector<6x316xbf16>
    %cst_481 = arith.constant dense<0.000000e+00> : vector<4x316xf32>
    %617 = tpu.matmul %615, %616, %cst_481 {dimension_numbers = #tpu.dot_dimension_numbers<[1], [0], [0], [1], [0, 0, 1, 1], [], []>} : vector<4x6xbf16>, vector<6x316xbf16>, vector<4x316xf32> -> vector<4x316xf32>
    %618 = arith.addf %613, %617 : vector<4x316xf32>
    %c9_482 = arith.constant 9 : index
    %c0_483 = arith.constant 0 : index
    %c0_484 = arith.constant 0 : index
    %619 = vector.load %arg16[%c9_482, %c0_483, %c0_484] : memref<25x4x6xbf16, #tpu.memory_space<vmem>>, vector<1x4x6xbf16>
    %620 = vector.shape_cast %619 : vector<1x4x6xbf16> to vector<4x6xbf16>
    %621 = vector.extract_strided_slice %574 {offsets = [0, 24], sizes = [6, 316], strides = [1, 1]} : vector<6x400xbf16> to vector<6x316xbf16>
    %cst_485 = arith.constant dense<0.000000e+00> : vector<4x316xf32>
    %622 = tpu.matmul %620, %621, %cst_485 {dimension_numbers = #tpu.dot_dimension_numbers<[1], [0], [0], [1], [0, 0, 1, 1], [], []>} : vector<4x6xbf16>, vector<6x316xbf16>, vector<4x316xf32> -> vector<4x316xf32>
    %623 = arith.addf %618, %622 : vector<4x316xf32>
    %c10_486 = arith.constant 10 : index
    %c0_487 = arith.constant 0 : index
    %c0_488 = arith.constant 0 : index
    %624 = vector.load %arg16[%c10_486, %c0_487, %c0_488] : memref<25x4x6xbf16, #tpu.memory_space<vmem>>, vector<1x4x6xbf16>
    %625 = vector.shape_cast %624 : vector<1x4x6xbf16> to vector<4x6xbf16>
    %626 = vector.extract_strided_slice %574 {offsets = [0, 40], sizes = [6, 316], strides = [1, 1]} : vector<6x400xbf16> to vector<6x316xbf16>
    %cst_489 = arith.constant dense<0.000000e+00> : vector<4x316xf32>
    %627 = tpu.matmul %625, %626, %cst_489 {dimension_numbers = #tpu.dot_dimension_numbers<[1], [0], [0], [1], [0, 0, 1, 1], [], []>} : vector<4x6xbf16>, vector<6x316xbf16>, vector<4x316xf32> -> vector<4x316xf32>
    %628 = arith.addf %623, %627 : vector<4x316xf32>
    %c11_490 = arith.constant 11 : index
    %c0_491 = arith.constant 0 : index
    %c0_492 = arith.constant 0 : index
    %629 = vector.load %arg16[%c11_490, %c0_491, %c0_492] : memref<25x4x6xbf16, #tpu.memory_space<vmem>>, vector<1x4x6xbf16>
    %630 = vector.shape_cast %629 : vector<1x4x6xbf16> to vector<4x6xbf16>
    %631 = vector.extract_strided_slice %574 {offsets = [0, 41], sizes = [6, 316], strides = [1, 1]} : vector<6x400xbf16> to vector<6x316xbf16>
    %cst_493 = arith.constant dense<0.000000e+00> : vector<4x316xf32>
    %632 = tpu.matmul %630, %631, %cst_493 {dimension_numbers = #tpu.dot_dimension_numbers<[1], [0], [0], [1], [0, 0, 1, 1], [], []>} : vector<4x6xbf16>, vector<6x316xbf16>, vector<4x316xf32> -> vector<4x316xf32>
    %633 = arith.addf %628, %632 : vector<4x316xf32>
    %c12_494 = arith.constant 12 : index
    %c0_495 = arith.constant 0 : index
    %c0_496 = arith.constant 0 : index
    %634 = vector.load %arg16[%c12_494, %c0_495, %c0_496] : memref<25x4x6xbf16, #tpu.memory_space<vmem>>, vector<1x4x6xbf16>
    %635 = vector.shape_cast %634 : vector<1x4x6xbf16> to vector<4x6xbf16>
    %636 = vector.extract_strided_slice %574 {offsets = [0, 42], sizes = [6, 316], strides = [1, 1]} : vector<6x400xbf16> to vector<6x316xbf16>
    %cst_497 = arith.constant dense<0.000000e+00> : vector<4x316xf32>
    %637 = tpu.matmul %635, %636, %cst_497 {dimension_numbers = #tpu.dot_dimension_numbers<[1], [0], [0], [1], [0, 0, 1, 1], [], []>} : vector<4x6xbf16>, vector<6x316xbf16>, vector<4x316xf32> -> vector<4x316xf32>
    %638 = arith.addf %633, %637 : vector<4x316xf32>
    %c13_498 = arith.constant 13 : index
    %c0_499 = arith.constant 0 : index
    %c0_500 = arith.constant 0 : index
    %639 = vector.load %arg16[%c13_498, %c0_499, %c0_500] : memref<25x4x6xbf16, #tpu.memory_space<vmem>>, vector<1x4x6xbf16>
    %640 = vector.shape_cast %639 : vector<1x4x6xbf16> to vector<4x6xbf16>
    %641 = vector.extract_strided_slice %574 {offsets = [0, 43], sizes = [6, 316], strides = [1, 1]} : vector<6x400xbf16> to vector<6x316xbf16>
    %cst_501 = arith.constant dense<0.000000e+00> : vector<4x316xf32>
    %642 = tpu.matmul %640, %641, %cst_501 {dimension_numbers = #tpu.dot_dimension_numbers<[1], [0], [0], [1], [0, 0, 1, 1], [], []>} : vector<4x6xbf16>, vector<6x316xbf16>, vector<4x316xf32> -> vector<4x316xf32>
    %643 = arith.addf %638, %642 : vector<4x316xf32>
    %c14_502 = arith.constant 14 : index
    %c0_503 = arith.constant 0 : index
    %c0_504 = arith.constant 0 : index
    %644 = vector.load %arg16[%c14_502, %c0_503, %c0_504] : memref<25x4x6xbf16, #tpu.memory_space<vmem>>, vector<1x4x6xbf16>
    %645 = vector.shape_cast %644 : vector<1x4x6xbf16> to vector<4x6xbf16>
    %646 = vector.extract_strided_slice %574 {offsets = [0, 44], sizes = [6, 316], strides = [1, 1]} : vector<6x400xbf16> to vector<6x316xbf16>
    %cst_505 = arith.constant dense<0.000000e+00> : vector<4x316xf32>
    %647 = tpu.matmul %645, %646, %cst_505 {dimension_numbers = #tpu.dot_dimension_numbers<[1], [0], [0], [1], [0, 0, 1, 1], [], []>} : vector<4x6xbf16>, vector<6x316xbf16>, vector<4x316xf32> -> vector<4x316xf32>
    %648 = arith.addf %643, %647 : vector<4x316xf32>
    %c15_506 = arith.constant 15 : index
    %c0_507 = arith.constant 0 : index
    %c0_508 = arith.constant 0 : index
    %649 = vector.load %arg16[%c15_506, %c0_507, %c0_508] : memref<25x4x6xbf16, #tpu.memory_space<vmem>>, vector<1x4x6xbf16>
    %650 = vector.shape_cast %649 : vector<1x4x6xbf16> to vector<4x6xbf16>
    %651 = vector.extract_strided_slice %574 {offsets = [0, 60], sizes = [6, 316], strides = [1, 1]} : vector<6x400xbf16> to vector<6x316xbf16>
    %cst_509 = arith.constant dense<0.000000e+00> : vector<4x316xf32>
    %652 = tpu.matmul %650, %651, %cst_509 {dimension_numbers = #tpu.dot_dimension_numbers<[1], [0], [0], [1], [0, 0, 1, 1], [], []>} : vector<4x6xbf16>, vector<6x316xbf16>, vector<4x316xf32> -> vector<4x316xf32>
    %653 = arith.addf %648, %652 : vector<4x316xf32>
    %c16_510 = arith.constant 16 : index
    %c0_511 = arith.constant 0 : index
    %c0_512 = arith.constant 0 : index
    %654 = vector.load %arg16[%c16_510, %c0_511, %c0_512] : memref<25x4x6xbf16, #tpu.memory_space<vmem>>, vector<1x4x6xbf16>
    %655 = vector.shape_cast %654 : vector<1x4x6xbf16> to vector<4x6xbf16>
    %656 = vector.extract_strided_slice %574 {offsets = [0, 61], sizes = [6, 316], strides = [1, 1]} : vector<6x400xbf16> to vector<6x316xbf16>
    %cst_513 = arith.constant dense<0.000000e+00> : vector<4x316xf32>
    %657 = tpu.matmul %655, %656, %cst_513 {dimension_numbers = #tpu.dot_dimension_numbers<[1], [0], [0], [1], [0, 0, 1, 1], [], []>} : vector<4x6xbf16>, vector<6x316xbf16>, vector<4x316xf32> -> vector<4x316xf32>
    %658 = arith.addf %653, %657 : vector<4x316xf32>
    %c17_514 = arith.constant 17 : index
    %c0_515 = arith.constant 0 : index
    %c0_516 = arith.constant 0 : index
    %659 = vector.load %arg16[%c17_514, %c0_515, %c0_516] : memref<25x4x6xbf16, #tpu.memory_space<vmem>>, vector<1x4x6xbf16>
    %660 = vector.shape_cast %659 : vector<1x4x6xbf16> to vector<4x6xbf16>
    %661 = vector.extract_strided_slice %574 {offsets = [0, 62], sizes = [6, 316], strides = [1, 1]} : vector<6x400xbf16> to vector<6x316xbf16>
    %cst_517 = arith.constant dense<0.000000e+00> : vector<4x316xf32>
    %662 = tpu.matmul %660, %661, %cst_517 {dimension_numbers = #tpu.dot_dimension_numbers<[1], [0], [0], [1], [0, 0, 1, 1], [], []>} : vector<4x6xbf16>, vector<6x316xbf16>, vector<4x316xf32> -> vector<4x316xf32>
    %663 = arith.addf %658, %662 : vector<4x316xf32>
    %c18_518 = arith.constant 18 : index
    %c0_519 = arith.constant 0 : index
    %c0_520 = arith.constant 0 : index
    %664 = vector.load %arg16[%c18_518, %c0_519, %c0_520] : memref<25x4x6xbf16, #tpu.memory_space<vmem>>, vector<1x4x6xbf16>
    %665 = vector.shape_cast %664 : vector<1x4x6xbf16> to vector<4x6xbf16>
    %666 = vector.extract_strided_slice %574 {offsets = [0, 63], sizes = [6, 316], strides = [1, 1]} : vector<6x400xbf16> to vector<6x316xbf16>
    %cst_521 = arith.constant dense<0.000000e+00> : vector<4x316xf32>
    %667 = tpu.matmul %665, %666, %cst_521 {dimension_numbers = #tpu.dot_dimension_numbers<[1], [0], [0], [1], [0, 0, 1, 1], [], []>} : vector<4x6xbf16>, vector<6x316xbf16>, vector<4x316xf32> -> vector<4x316xf32>
    %668 = arith.addf %663, %667 : vector<4x316xf32>
    %c19_522 = arith.constant 19 : index
    %c0_523 = arith.constant 0 : index
    %c0_524 = arith.constant 0 : index
    %669 = vector.load %arg16[%c19_522, %c0_523, %c0_524] : memref<25x4x6xbf16, #tpu.memory_space<vmem>>, vector<1x4x6xbf16>
    %670 = vector.shape_cast %669 : vector<1x4x6xbf16> to vector<4x6xbf16>
    %671 = vector.extract_strided_slice %574 {offsets = [0, 64], sizes = [6, 316], strides = [1, 1]} : vector<6x400xbf16> to vector<6x316xbf16>
    %cst_525 = arith.constant dense<0.000000e+00> : vector<4x316xf32>
    %672 = tpu.matmul %670, %671, %cst_525 {dimension_numbers = #tpu.dot_dimension_numbers<[1], [0], [0], [1], [0, 0, 1, 1], [], []>} : vector<4x6xbf16>, vector<6x316xbf16>, vector<4x316xf32> -> vector<4x316xf32>
    %673 = arith.addf %668, %672 : vector<4x316xf32>
    %c20_526 = arith.constant 20 : index
    %c0_527 = arith.constant 0 : index
    %c0_528 = arith.constant 0 : index
    %674 = vector.load %arg16[%c20_526, %c0_527, %c0_528] : memref<25x4x6xbf16, #tpu.memory_space<vmem>>, vector<1x4x6xbf16>
    %675 = vector.shape_cast %674 : vector<1x4x6xbf16> to vector<4x6xbf16>
    %676 = vector.extract_strided_slice %574 {offsets = [0, 80], sizes = [6, 316], strides = [1, 1]} : vector<6x400xbf16> to vector<6x316xbf16>
    %cst_529 = arith.constant dense<0.000000e+00> : vector<4x316xf32>
    %677 = tpu.matmul %675, %676, %cst_529 {dimension_numbers = #tpu.dot_dimension_numbers<[1], [0], [0], [1], [0, 0, 1, 1], [], []>} : vector<4x6xbf16>, vector<6x316xbf16>, vector<4x316xf32> -> vector<4x316xf32>
    %678 = arith.addf %673, %677 : vector<4x316xf32>
    %c21_530 = arith.constant 21 : index
    %c0_531 = arith.constant 0 : index
    %c0_532 = arith.constant 0 : index
    %679 = vector.load %arg16[%c21_530, %c0_531, %c0_532] : memref<25x4x6xbf16, #tpu.memory_space<vmem>>, vector<1x4x6xbf16>
    %680 = vector.shape_cast %679 : vector<1x4x6xbf16> to vector<4x6xbf16>
    %681 = vector.extract_strided_slice %574 {offsets = [0, 81], sizes = [6, 316], strides = [1, 1]} : vector<6x400xbf16> to vector<6x316xbf16>
    %cst_533 = arith.constant dense<0.000000e+00> : vector<4x316xf32>
    %682 = tpu.matmul %680, %681, %cst_533 {dimension_numbers = #tpu.dot_dimension_numbers<[1], [0], [0], [1], [0, 0, 1, 1], [], []>} : vector<4x6xbf16>, vector<6x316xbf16>, vector<4x316xf32> -> vector<4x316xf32>
    %683 = arith.addf %678, %682 : vector<4x316xf32>
    %c22_534 = arith.constant 22 : index
    %c0_535 = arith.constant 0 : index
    %c0_536 = arith.constant 0 : index
    %684 = vector.load %arg16[%c22_534, %c0_535, %c0_536] : memref<25x4x6xbf16, #tpu.memory_space<vmem>>, vector<1x4x6xbf16>
    %685 = vector.shape_cast %684 : vector<1x4x6xbf16> to vector<4x6xbf16>
    %686 = vector.extract_strided_slice %574 {offsets = [0, 82], sizes = [6, 316], strides = [1, 1]} : vector<6x400xbf16> to vector<6x316xbf16>
    %cst_537 = arith.constant dense<0.000000e+00> : vector<4x316xf32>
    %687 = tpu.matmul %685, %686, %cst_537 {dimension_numbers = #tpu.dot_dimension_numbers<[1], [0], [0], [1], [0, 0, 1, 1], [], []>} : vector<4x6xbf16>, vector<6x316xbf16>, vector<4x316xf32> -> vector<4x316xf32>
    %688 = arith.addf %683, %687 : vector<4x316xf32>
    %c23_538 = arith.constant 23 : index
    %c0_539 = arith.constant 0 : index
    %c0_540 = arith.constant 0 : index
    %689 = vector.load %arg16[%c23_538, %c0_539, %c0_540] : memref<25x4x6xbf16, #tpu.memory_space<vmem>>, vector<1x4x6xbf16>
    %690 = vector.shape_cast %689 : vector<1x4x6xbf16> to vector<4x6xbf16>
    %691 = vector.extract_strided_slice %574 {offsets = [0, 83], sizes = [6, 316], strides = [1, 1]} : vector<6x400xbf16> to vector<6x316xbf16>
    %cst_541 = arith.constant dense<0.000000e+00> : vector<4x316xf32>
    %692 = tpu.matmul %690, %691, %cst_541 {dimension_numbers = #tpu.dot_dimension_numbers<[1], [0], [0], [1], [0, 0, 1, 1], [], []>} : vector<4x6xbf16>, vector<6x316xbf16>, vector<4x316xf32> -> vector<4x316xf32>
    %693 = arith.addf %688, %692 : vector<4x316xf32>
    %c24_542 = arith.constant 24 : index
    %c0_543 = arith.constant 0 : index
    %c0_544 = arith.constant 0 : index
    %694 = vector.load %arg16[%c24_542, %c0_543, %c0_544] : memref<25x4x6xbf16, #tpu.memory_space<vmem>>, vector<1x4x6xbf16>
    %695 = vector.shape_cast %694 : vector<1x4x6xbf16> to vector<4x6xbf16>
    %696 = vector.extract_strided_slice %574 {offsets = [0, 84], sizes = [6, 316], strides = [1, 1]} : vector<6x400xbf16> to vector<6x316xbf16>
    %cst_545 = arith.constant dense<0.000000e+00> : vector<4x316xf32>
    %697 = tpu.matmul %695, %696, %cst_545 {dimension_numbers = #tpu.dot_dimension_numbers<[1], [0], [0], [1], [0, 0, 1, 1], [], []>} : vector<4x6xbf16>, vector<6x316xbf16>, vector<4x316xf32> -> vector<4x316xf32>
    %698 = arith.addf %693, %697 : vector<4x316xf32>
    %c0_546 = arith.constant 0 : index
    %c0_547 = arith.constant 0 : index
    %699 = vector.load %arg17[%c0_546, %c0_547] : memref<4x1xf32, #tpu.memory_space<vmem>>, vector<4x1xf32>
    %700 = vector.broadcast %699 : vector<4x1xf32> to vector<4x316xf32>
    %701 = arith.addf %698, %700 : vector<4x316xf32>
    %cst_548 = arith.constant 0.000000e+00 : f32
    %702 = vector.broadcast %cst_548 : f32 to vector<4x316xf32>
    %703 = arith.maximumf %701, %702 : vector<4x316xf32>
    %704 = vector.extract_strided_slice %703 {offsets = [0, 0], sizes = [4, 16], strides = [1, 1]} : vector<4x316xf32> to vector<4x16xf32>
    %c0_549 = arith.constant 0 : index
    %c0_550 = arith.constant 0 : index
    %705 = vector.load %arg23[%c0_549, %c0_550] : memref<4x256xf32, #tpu.memory_space<vmem>>, vector<4x16xf32>
    tpu.vector_store %arg23[%c0_549, %c0_550], %704 {strides = array<i32>} : memref<4x256xf32, #tpu.memory_space<vmem>>, vector<4x16xf32>,
    %706 = vector.extract_strided_slice %703 {offsets = [0, 20], sizes = [4, 16], strides = [1, 1]} : vector<4x316xf32> to vector<4x16xf32>
    %c0_551 = arith.constant 0 : index
    %c16_552 = arith.constant 16 : index
    %707 = vector.load %arg23[%c0_551, %c16_552] : memref<4x256xf32, #tpu.memory_space<vmem>>, vector<4x16xf32>
    tpu.vector_store %arg23[%c0_551, %c16_552], %706 {strides = array<i32>} : memref<4x256xf32, #tpu.memory_space<vmem>>, vector<4x16xf32>,
    %708 = vector.extract_strided_slice %703 {offsets = [0, 40], sizes = [4, 16], strides = [1, 1]} : vector<4x316xf32> to vector<4x16xf32>
    %c0_553 = arith.constant 0 : index
    %c32_554 = arith.constant 32 : index
    %709 = vector.load %arg23[%c0_553, %c32_554] : memref<4x256xf32, #tpu.memory_space<vmem>>, vector<4x16xf32>
    tpu.vector_store %arg23[%c0_553, %c32_554], %708 {strides = array<i32>} : memref<4x256xf32, #tpu.memory_space<vmem>>, vector<4x16xf32>,
    %710 = vector.extract_strided_slice %703 {offsets = [0, 60], sizes = [4, 16], strides = [1, 1]} : vector<4x316xf32> to vector<4x16xf32>
    %c0_555 = arith.constant 0 : index
    %c48_556 = arith.constant 48 : index
    %711 = vector.load %arg23[%c0_555, %c48_556] : memref<4x256xf32, #tpu.memory_space<vmem>>, vector<4x16xf32>
    tpu.vector_store %arg23[%c0_555, %c48_556], %710 {strides = array<i32>} : memref<4x256xf32, #tpu.memory_space<vmem>>, vector<4x16xf32>,
    %712 = vector.extract_strided_slice %703 {offsets = [0, 80], sizes = [4, 16], strides = [1, 1]} : vector<4x316xf32> to vector<4x16xf32>
    %c0_557 = arith.constant 0 : index
    %c64 = arith.constant 64 : index
    %713 = vector.load %arg23[%c0_557, %c64] : memref<4x256xf32, #tpu.memory_space<vmem>>, vector<4x16xf32>
    tpu.vector_store %arg23[%c0_557, %c64], %712 {strides = array<i32>} : memref<4x256xf32, #tpu.memory_space<vmem>>, vector<4x16xf32>,
    %714 = vector.extract_strided_slice %703 {offsets = [0, 100], sizes = [4, 16], strides = [1, 1]} : vector<4x316xf32> to vector<4x16xf32>
    %c0_558 = arith.constant 0 : index
    %c80 = arith.constant 80 : index
    %715 = vector.load %arg23[%c0_558, %c80] : memref<4x256xf32, #tpu.memory_space<vmem>>, vector<4x16xf32>
    tpu.vector_store %arg23[%c0_558, %c80], %714 {strides = array<i32>} : memref<4x256xf32, #tpu.memory_space<vmem>>, vector<4x16xf32>,
    %716 = vector.extract_strided_slice %703 {offsets = [0, 120], sizes = [4, 16], strides = [1, 1]} : vector<4x316xf32> to vector<4x16xf32>
    %c0_559 = arith.constant 0 : index
    %c96 = arith.constant 96 : index
    %717 = vector.load %arg23[%c0_559, %c96] : memref<4x256xf32, #tpu.memory_space<vmem>>, vector<4x16xf32>
    tpu.vector_store %arg23[%c0_559, %c96], %716 {strides = array<i32>} : memref<4x256xf32, #tpu.memory_space<vmem>>, vector<4x16xf32>,
    %718 = vector.extract_strided_slice %703 {offsets = [0, 140], sizes = [4, 16], strides = [1, 1]} : vector<4x316xf32> to vector<4x16xf32>
    %c0_560 = arith.constant 0 : index
    %c112 = arith.constant 112 : index
    %719 = vector.load %arg23[%c0_560, %c112] : memref<4x256xf32, #tpu.memory_space<vmem>>, vector<4x16xf32>
    tpu.vector_store %arg23[%c0_560, %c112], %718 {strides = array<i32>} : memref<4x256xf32, #tpu.memory_space<vmem>>, vector<4x16xf32>,
    %720 = vector.extract_strided_slice %703 {offsets = [0, 160], sizes = [4, 16], strides = [1, 1]} : vector<4x316xf32> to vector<4x16xf32>
    %c0_561 = arith.constant 0 : index
    %c128 = arith.constant 128 : index
    %721 = vector.load %arg23[%c0_561, %c128] : memref<4x256xf32, #tpu.memory_space<vmem>>, vector<4x16xf32>
    tpu.vector_store %arg23[%c0_561, %c128], %720 {strides = array<i32>} : memref<4x256xf32, #tpu.memory_space<vmem>>, vector<4x16xf32>,
    %722 = vector.extract_strided_slice %703 {offsets = [0, 180], sizes = [4, 16], strides = [1, 1]} : vector<4x316xf32> to vector<4x16xf32>
    %c0_562 = arith.constant 0 : index
    %c144_563 = arith.constant 144 : index
    %723 = vector.load %arg23[%c0_562, %c144_563] : memref<4x256xf32, #tpu.memory_space<vmem>>, vector<4x16xf32>
    tpu.vector_store %arg23[%c0_562, %c144_563], %722 {strides = array<i32>} : memref<4x256xf32, #tpu.memory_space<vmem>>, vector<4x16xf32>,
    %724 = vector.extract_strided_slice %703 {offsets = [0, 200], sizes = [4, 16], strides = [1, 1]} : vector<4x316xf32> to vector<4x16xf32>
    %c0_564 = arith.constant 0 : index
    %c160 = arith.constant 160 : index
    %725 = vector.load %arg23[%c0_564, %c160] : memref<4x256xf32, #tpu.memory_space<vmem>>, vector<4x16xf32>
    tpu.vector_store %arg23[%c0_564, %c160], %724 {strides = array<i32>} : memref<4x256xf32, #tpu.memory_space<vmem>>, vector<4x16xf32>,
    %726 = vector.extract_strided_slice %703 {offsets = [0, 220], sizes = [4, 16], strides = [1, 1]} : vector<4x316xf32> to vector<4x16xf32>
    %c0_565 = arith.constant 0 : index
    %c176 = arith.constant 176 : index
    %727 = vector.load %arg23[%c0_565, %c176] : memref<4x256xf32, #tpu.memory_space<vmem>>, vector<4x16xf32>
    tpu.vector_store %arg23[%c0_565, %c176], %726 {strides = array<i32>} : memref<4x256xf32, #tpu.memory_space<vmem>>, vector<4x16xf32>,
    %728 = vector.extract_strided_slice %703 {offsets = [0, 240], sizes = [4, 16], strides = [1, 1]} : vector<4x316xf32> to vector<4x16xf32>
    %c0_566 = arith.constant 0 : index
    %c192 = arith.constant 192 : index
    %729 = vector.load %arg23[%c0_566, %c192] : memref<4x256xf32, #tpu.memory_space<vmem>>, vector<4x16xf32>
    tpu.vector_store %arg23[%c0_566, %c192], %728 {strides = array<i32>} : memref<4x256xf32, #tpu.memory_space<vmem>>, vector<4x16xf32>,
    %730 = vector.extract_strided_slice %703 {offsets = [0, 260], sizes = [4, 16], strides = [1, 1]} : vector<4x316xf32> to vector<4x16xf32>
    %c0_567 = arith.constant 0 : index
    %c208 = arith.constant 208 : index
    %731 = vector.load %arg23[%c0_567, %c208] : memref<4x256xf32, #tpu.memory_space<vmem>>, vector<4x16xf32>
    tpu.vector_store %arg23[%c0_567, %c208], %730 {strides = array<i32>} : memref<4x256xf32, #tpu.memory_space<vmem>>, vector<4x16xf32>,
    %732 = vector.extract_strided_slice %703 {offsets = [0, 280], sizes = [4, 16], strides = [1, 1]} : vector<4x316xf32> to vector<4x16xf32>
    %c0_568 = arith.constant 0 : index
    %c224_569 = arith.constant 224 : index
    %733 = vector.load %arg23[%c0_568, %c224_569] : memref<4x256xf32, #tpu.memory_space<vmem>>, vector<4x16xf32>
    tpu.vector_store %arg23[%c0_568, %c224_569], %732 {strides = array<i32>} : memref<4x256xf32, #tpu.memory_space<vmem>>, vector<4x16xf32>,
    %734 = vector.extract_strided_slice %703 {offsets = [0, 300], sizes = [4, 16], strides = [1, 1]} : vector<4x316xf32> to vector<4x16xf32>
    %c0_570 = arith.constant 0 : index
    %c240 = arith.constant 240 : index
    %735 = vector.load %arg23[%c0_570, %c240] : memref<4x256xf32, #tpu.memory_space<vmem>>, vector<4x16xf32>
    tpu.vector_store %arg23[%c0_570, %c240], %734 {strides = array<i32>} : memref<4x256xf32, #tpu.memory_space<vmem>>, vector<4x16xf32>,
    %c0_571 = arith.constant 0 : index
    %c0_572 = arith.constant 0 : index
    %736 = vector.load %arg23[%c0_571, %c0_572] : memref<4x256xf32, #tpu.memory_space<vmem>>, vector<4x256xf32>
    %c0_573 = arith.constant 0 : index
    %c0_574 = arith.constant 0 : index
    %c0_575 = arith.constant 0 : index
    %737 = vector.load %arg18[%c0_573, %c0_574, %c0_575] : memref<1x4x256xf32, #tpu.memory_space<vmem>>, vector<1x4x256xf32>
    %738 = vector.shape_cast %737 : vector<1x4x256xf32> to vector<4x256xf32>
    %739 = vector.shape_cast %736 : vector<4x256xf32> to vector<1x4x256xf32>
    tpu.vector_store %arg18[%c0_573, %c0_574, %c0_575], %739 {strides = array<i32>} : memref<1x4x256xf32, #tpu.memory_space<vmem>>, vector<1x4x256xf32>,
    return
  }
  func.func @transform_0(%arg0: i32) -> (i32, i32, i32) {
    %c0_i32 = arith.constant 0 : i32
    %c0_i32_0 = arith.constant 0 : i32
    %c0_i32_1 = arith.constant 0 : i32
    return %arg0, %c0_i32, %c0_i32_0 : i32, i32, i32
  }
  func.func @transform_1(%arg0: i32) -> (i32, i32, i32) {
    %c0_i32 = arith.constant 0 : i32
    %c0_i32_0 = arith.constant 0 : i32
    %c0_i32_1 = arith.constant 0 : i32
    %c0_i32_2 = arith.constant 0 : i32
    return %c0_i32, %c0_i32_0, %c0_i32_1 : i32, i32, i32
  }
  func.func @transform_2(%arg0: i32) -> (i32, i32) {
    %c0_i32 = arith.constant 0 : i32
    %c0_i32_0 = arith.constant 0 : i32
    %c0_i32_1 = arith.constant 0 : i32
    return %c0_i32, %c0_i32_0 : i32, i32
  }
  func.func @transform_3(%arg0: i32) -> (i32, i32, i32) {
    %c0_i32 = arith.constant 0 : i32
    %c0_i32_0 = arith.constant 0 : i32
    %c0_i32_1 = arith.constant 0 : i32
    %c0_i32_2 = arith.constant 0 : i32
    return %c0_i32, %c0_i32_0, %c0_i32_1 : i32, i32, i32
  }
  func.func @transform_4(%arg0: i32) -> (i32, i32) {
    %c0_i32 = arith.constant 0 : i32
    %c0_i32_0 = arith.constant 0 : i32
    %c0_i32_1 = arith.constant 0 : i32
    return %c0_i32, %c0_i32_0 : i32, i32
  }
  func.func @transform_5(%arg0: i32) -> (i32, i32, i32) {
    %c0_i32 = arith.constant 0 : i32
    %c0_i32_0 = arith.constant 0 : i32
    %c0_i32_1 = arith.constant 0 : i32
    %c0_i32_2 = arith.constant 0 : i32
    return %c0_i32, %c0_i32_0, %c0_i32_1 : i32, i32, i32
  }
  func.func @transform_6(%arg0: i32) -> (i32, i32) {
    %c0_i32 = arith.constant 0 : i32
    %c0_i32_0 = arith.constant 0 : i32
    %c0_i32_1 = arith.constant 0 : i32
    return %c0_i32, %c0_i32_0 : i32, i32
  }
  func.func @transform_7(%arg0: i32) -> (i32, i32) {
    %c0_i32 = arith.constant 0 : i32
    %c0_i32_0 = arith.constant 0 : i32
    %c0_i32_1 = arith.constant 0 : i32
    return %c0_i32, %c0_i32_0 : i32, i32
  }
  func.func @transform_8(%arg0: i32) -> (i32, i32) {
    %c0_i32 = arith.constant 0 : i32
    %c0_i32_0 = arith.constant 0 : i32
    %c0_i32_1 = arith.constant 0 : i32
    return %c0_i32, %c0_i32_0 : i32, i32
  }
  func.func @transform_9(%arg0: i32) -> (i32, i32) {
    %c0_i32 = arith.constant 0 : i32
    %c0_i32_0 = arith.constant 0 : i32
    %c0_i32_1 = arith.constant 0 : i32
    return %c0_i32, %c0_i32_0 : i32, i32
  }
  func.func @transform_10(%arg0: i32) -> (i32, i32) {
    %c0_i32 = arith.constant 0 : i32
    %c0_i32_0 = arith.constant 0 : i32
    %c0_i32_1 = arith.constant 0 : i32
    return %c0_i32, %c0_i32_0 : i32, i32
  }
  func.func @transform_11(%arg0: i32) -> (i32, i32) {
    %c0_i32 = arith.constant 0 : i32
    %c0_i32_0 = arith.constant 0 : i32
    %c0_i32_1 = arith.constant 0 : i32
    return %c0_i32, %c0_i32_0 : i32, i32
  }
  func.func @transform_12(%arg0: i32) -> (i32, i32) {
    %c0_i32 = arith.constant 0 : i32
    %c0_i32_0 = arith.constant 0 : i32
    %c0_i32_1 = arith.constant 0 : i32
    return %c0_i32, %c0_i32_0 : i32, i32
  }
  func.func @transform_13(%arg0: i32) -> (i32, i32, i32) {
    %c0_i32 = arith.constant 0 : i32
    %c0_i32_0 = arith.constant 0 : i32
    %c0_i32_1 = arith.constant 0 : i32
    %c0_i32_2 = arith.constant 0 : i32
    return %c0_i32, %c0_i32_0, %c0_i32_1 : i32, i32, i32
  }
  func.func @transform_14(%arg0: i32) -> (i32, i32) {
    %c0_i32 = arith.constant 0 : i32
    %c0_i32_0 = arith.constant 0 : i32
    %c0_i32_1 = arith.constant 0 : i32
    return %c0_i32, %c0_i32_0 : i32, i32
  }
  func.func @transform_15(%arg0: i32) -> (i32, i32, i32) {
    %c0_i32 = arith.constant 0 : i32
    %c0_i32_0 = arith.constant 0 : i32
    %c0_i32_1 = arith.constant 0 : i32
    %c0_i32_2 = arith.constant 0 : i32
    return %c0_i32, %c0_i32_0, %c0_i32_1 : i32, i32, i32
  }
  func.func @transform_16(%arg0: i32) -> (i32, i32) {
    %c0_i32 = arith.constant 0 : i32
    %c0_i32_0 = arith.constant 0 : i32
    %c0_i32_1 = arith.constant 0 : i32
    return %c0_i32, %c0_i32_0 : i32, i32
  }
  func.func @transform_17(%arg0: i32) -> (i32, i32, i32) {
    %c0_i32 = arith.constant 0 : i32
    %c0_i32_0 = arith.constant 0 : i32
    %c0_i32_1 = arith.constant 0 : i32
    return %arg0, %c0_i32, %c0_i32_0 : i32, i32, i32
  }
  func.func @transform_18(%arg0: i32) -> (i32, i32, i32) {
    %c0_i32 = arith.constant 0 : i32
    %c0_i32_0 = arith.constant 0 : i32
    %c0_i32_1 = arith.constant 0 : i32
    return %arg0, %c0_i32, %c0_i32_0 : i32, i32, i32
  }
}

</mosaic_0001>

<bundles_post_ra>
// kernel: ae_baseline_forward.1
= control target key start
LH: loop header
LB: loop body
LE: loop exit
PB: predicated region body
PF: predicated region fallthrough
CT: control target
= control target key end

     0   :  { %s14516_s0 = inlined_call_operand.vmem [shape: f32[2,4,256], index: 0, kind: input, shape index: {}]   ;;  %s14517_s1 = inlined_call_operand.vmem [shape: bf16[25,6,4], index: 1, kind: input, shape index: {}]   ;;  %s14518_s2 = inlined_call_operand.vmem [shape: f32[6,1], index: 2, kind: input, shape index: {}]   ;;  %s14519_s3 = inlined_call_operand.vmem [shape: bf16[25,16,6], index: 3, kind: input, shape index: {}]   ;;  %s14520_s4 = inlined_call_operand.vmem [shape: f32[16,1], index: 4, kind: input, shape index: {}]   ;;  %s14521_s5 = inlined_call_operand.vmem [shape: bf16[16,120,32], index: 5, kind: input, shape index: {}]   ;;  %s14522_s6 = inlined_call_operand.vmem [shape: f32[1,32], index: 6, kind: input, shape index: {}]   ;;  %s14523_s7 = inlined_call_operand.vmem [shape: bf16[32,10], index: 7, kind: input, shape index: {}]   ;;  %s14524_s8 = inlined_call_operand.vmem [shape: f32[1,10], index: 8, kind: input, shape index: {}]   ;;  %s14525_s9 = inlined_call_operand.vmem [shape: bf16[10,32], index: 9, kind: input, shape index: {}]   ;;  %s14526_s10 = inlined_call_operand.vmem [shape: f32[1,32], index: 10, kind: input, shape index: {}]   ;;  %s14527_s11 = inlined_call_operand.vmem [shape: bf16[32,1024], index: 11, kind: input, shape index: {}]   ;;  %s14528_s12 = inlined_call_operand.vmem [shape: f32[1,1024], index: 12, kind: input, shape index: {}]   ;;  %s14529_s13 = inlined_call_operand.vmem [shape: bf16[25,6,16], index: 13, kind: input, shape index: {}]   ;;  %s14530_s14 = inlined_call_operand.vmem [shape: f32[6,1], index: 14, kind: input, shape index: {}]   ;;  %s14531_s15 = inlined_call_operand.vmem [shape: bf16[25,4,6], index: 15, kind: input, shape index: {}]   ;;  %s14532_s16 = inlined_call_operand.vmem [shape: f32[4,1], index: 16, kind: input, shape index: {}]   ;;  %s14533_s17 = inlined_call_operand.vmem [shape: f32[2,4,256], index: 17, kind: output, shape index: {0}]   ;;  %s14534_s18 = inlined_call_operand.hbm [shape: f32[2,1,10], index: 18, kind: output, shape index: {1}]  }
   0x1   :  { %14631 = sst [smem:[#allocation18_spill]] %s14516_s0 }
   0x2   :  { %14632 = sst [smem:[#allocation19_spill]] %s14517_s1 }
   0x3   :  { %14633 = sst [smem:[#allocation20_spill]] %s14518_s2 }
   0x4   :  { %14634 = sst [smem:[#allocation21_spill]] %s14519_s3 }
   0x5   :  { %14635 = sst [smem:[#allocation22_spill]] %s14520_s4 }
   0x6   :  { %14636 = sst [smem:[#allocation23_spill]] %s14521_s5 }
   0x7   :  { %14637 = sst [smem:[#allocation24_spill]] %s14530_s14 }
   0x8   :  { %14638 = sst [smem:[#allocation25_spill]] %s14531_s15 }
   0x9   :  { %14639 = sst [smem:[#allocation26_spill]] %s14532_s16 }
   0xa   :  { %14640 = sst [smem:[#allocation27_spill]] %s14533_s17 }
   0xb   :  { %14641 = sst [smem:[#allocation28_spill]] %s14534_s18 }
   0xc   :  { %24 = vsyncpa [#allocation7], 0 }
   0xd   :  { %26 = vsyncpa [#allocation7 + $0x1], 0  ;;  %s12396_s27 = smov 0   ;;  %s12398_s28 = smov 0  }
   0xe   :  { %s12400_s29 = smov 0   ;;  %s12402_s30 = smov 0  }
   0xf LB: > { %14642 = sst [smem:[#allocation9_spill]] %s12237_s27  ;;  %s12417_s0 = sadd.s32 4294967295, %s12249_s30   ;;  %s12249_s30 = sphi %s12402_s30, %s14860_s30   ;;  %s12245_s29 = sphi %s12400_s29, %s14862_s29   ;;  %s12241_s28 = sphi %s12398_s28, %s14864_s28   ;;  %s12237_s27 = sphi %s12396_s27, %s14863_s27  }
  0x10   : > { %14643 = sst [smem:[#allocation10_spill]] %s12245_s29  ;;  %s10307_s19 = sadd.s32 4294967294, %s12249_s30  }
  0x11   : > { %14644 = sst [smem:[#allocation11_spill]] %s12249_s30  ;;  %s12421_s1 = sadd.s32 1, %s12249_s30  }
  0x12   : > { %14645 = sst [smem:[#allocation12_spill]] %s12417_s0  ;;  %s427_s20 = sadd.s32 1, %s12245_s29 }
  0x13   : > { %14646 = sst [smem:[#allocation13_spill]] %s12421_s1  ;;  %s424_s21 = ssub.s32 %s12249_s30, %s12421_s1 }
  0x14   : > { %p437_p0 = scmp.ne.s32.totalorder %s12245_s29, %s12241_s28  ;;  %p425_p1 = scmp.eq.s32.totalorder %s424_s21, 0 }
  0x15   : > { %p438_p2 = scmp.eq.s32.totalorder %s12417_s0, 1  ;;  %p443_p3 = scmp.ne.s32.totalorder %s12241_s28, %s12237_s27 }
  0x16   : > { %p444_p4 = scmp.eq.s32.totalorder %s10307_s19, 1  ;;  %p10310_p7 = scmp.ge.s32.totalorder %s12249_s30, 1 }
  0x17   : > { %s12432_s22 = scalar_select %p425_p1, %s12245_s29, %s427_s20  }
  0x18   : > { %p12434_p5 = por %p438_p2, %p437_p0  ;;  %p12438_p6 = por %p444_p4, %p443_p3 }
  0x19   : > { %14647 = sst [smem:[#allocation14_spill]] %s12432_s22  ;;  %p518_p8 = scmp.lt.s32.totalorder %s12249_s30, 3 }
  0x1a   : > { %s14648_s2 = scalar_select %p12434_p5, 1, 0 }
  0x1b   : > { %s14650_s23 = scalar_select %p12438_p6, 1, 0 }
  0x1c   : > { %14649 = sst [smem:[#allocation15_spill]] %s14648_s2  ;;  %p519_p9 = pnand %p10310_p7, %p518_p8 }
  0x1d   : > { %14651 = sst [smem:[#allocation16_spill]] %s14650_s23 }
  0x1e   : > { %522 = sbr.rel (%p519_p9) target bundleno = 3619 (0xe23), region = 88 }
  0x25   : > { %p576_p10 = scmp.lt.s32.totalorder %s12417_s0, 1  ;;  %v12251_v0 = vmov 0   ;;  %s14653_s20 = sld [smem:[#allocation18_spill]]  ;;  %vm608_vm0 = vcmask 1041408   ;;  %vm604_vm1 = vcmask 31744   ;;  %vm14585_vm2 = vcmask 1039360  }
  0x26   : > { %647 = vmatprep.mubr.bf16.mxu0 %v12251_v0  ;;  %697 = vmatprep.mubr.bf16.mxu1 %v12251_v0  ;;  %s14576_s22 = smov 127   ;;  %s14538_s29 = smov 126   ;;  %vm14584_vm3 = vcmask 1031168   ;;  %vm14583_vm4 = vcmask 1022976   ;;  %vm14582_vm5 = vcmask 1014784   ;;  %vm892_vm6 = vcmask 916480  }
  0x27   : > { %s12446_s24 = scalar_select %p576_p10, %s12417_s0, 1  ;;  %12005 = vset.pattern.permute.xlu0 %v12251_v0  ;;  %12006 = vset.pattern.permute.xlu1 %v12251_v0  ;;  %vm952_vm7 = vcmask 908288   ;;  %vm1012_vm8 = vcmask 900096   ;;  %vm1072_vm9 = vcmask 891904   ;;  %vm1132_vm10 = vcmask 883712  }
  0x28   : > { %s14542_s26 = smov 112   ;;  %s14544_s19 = smov 111   ;;  %vm1192_vm11 = vcmask 785408   ;;  %vm1252_vm12 = vcmask 777216   ;;  %vm1312_vm13 = vcmask 769024   ;;  %vm1372_vm14 = vcmask 760832  }
  0x29   : > { %14652 = sst [smem:[#allocation17_spill]] %s12446_s24  ;;  %s14537_s25 = sshll.u32 %s12446_s24, 3  ;;  %vm14628_vm15 = vcmask 752640  }
  0x2a   : > { %s14658_s3 = sld [smem:[#allocation21_spill]]  ;;  %s14662_s1 = smov 124  }
  0x2b   : > { %s580_s21 = scalar_lea.vmem %s14653_s20, %s14537_s25  ;;  %s14654_s20 = sld [smem:[#allocation19_spill]] }
  0x2c   : > { %v587_v1 = vld [vmem:[%s580_s21] sm:$0xff]  ;;  %s14578_s21 = smov 125   ;;  %s14540_s25 = smov 124  }
  0x2d   : > { %v12458_v2 = vpack.c.bf16 %v587_v1, %v587_v1  ;;  %v589_v3 = vcombine.high %v587_v1, %v587_v1  ;;  %s14665_s23 = smov 108   ;;  %s14666_s27 = smov 96  }
  0x2e   : > { %s14667_s30 = smov 95   ;;  %s14668_s17 = smov 94  }
  0x2f   : > { %598 = vrot.lane.b32.xlu0 %v12458_v2, %s14576_s22  ;;  %708 = vrot.lane.b32.xlu1 %v12458_v2, %s14538_s29  ;;  %v12464_v4 = vpack.c.bf16 %v589_v3, %v589_v3  ;;  %v660_v5 = vsel %vm608_vm0, %v12458_v2, 0  ;;  %s14669_s24 = smov 93   ;;  %s14670_s18 = smov 92  }
  0x30   : > { %s14671_s2 = smov 80   ;;  %s14672_s0 = smov 79  }
  0x31   : > { %10318 = vmatprep.subr.msk.bf16.mxu1 %vm608_vm0, %v12464_v4  ;;  %v593_v6 = vld [vmem:[%s14654_s20] sm:$0x7]  ;;  %v10315_v15 = vld [vmem:[%s14654_s20 + $0x4] sm:$0x7]  ;;  %v10323_v23 = vld [vmem:[%s14654_s20 + $0xc] sm:$0x7] }
  0x32   : > { %666 = vmatpush1.bf16.msra.mxu1 %v660_v5  ;;  %v10320_v25 = vld [vmem:[%s14654_s20 + $0x8] sm:$0x7]  ;;  %v10329_v33 = vld [vmem:[%s14654_s20 + $0x14] sm:$0x7]  ;;  %v10326_v35 = vld [vmem:[%s14654_s20 + $0x10] sm:$0x7] }
  0x33   : > { %600 = vrot.lane.b32.xlu0 %v12464_v4, %s14576_s22  ;;  %710 = vrot.lane.b32.xlu1 %v12464_v4, %s14538_s29  ;;  %s14546_s29 = smov 110   ;;  %v10335_v43 = vld [vmem:[%s14654_s20 + $0x1c] sm:$0x7]  ;;  %v10332_v45 = vld [vmem:[%s14654_s20 + $0x18] sm:$0x7]  ;;  %s14664_s22 = smov 109  }
  0x34   : > { %v10341_v53 = vld [vmem:[%s14654_s20 + $0x24] sm:$0x7]  ;;  %v10338_v55 = vld [vmem:[%s14654_s20 + $0x20] sm:$0x7]  ;;  %v10347_v63 = vld [vmem:[%s14654_s20 + $0x2c] sm:$0x7] }
  0x35   : > { %10319 = vmatmul.mubr.msk.bf16.vlgmr.msra.gmra.mrb[0].mxu1 %vm604_vm1, %v593_v6  ;;  %s14673_s16 = smov 78   ;;  %s14674_s15 = smov 77  }
  0x36   : > { %815 = vmatprep.mubr.bf16.mxu1 %v12251_v0  ;;  %s14675_s14 = smov 76   ;;  %s14681_s4 = sld [smem:[#allocation22_spill]] }
  0x37   : > { %770 = vrot.lane.b32.xlu1 %v12464_v4, %s14578_s21  ;;  %768 = vrot.lane.b32.xlu0 %v12458_v2, %s14578_s21  ;;  %s14655_s21 = sld [smem:[#allocation20_spill]]  ;;  %s14689_s5 = sld [smem:[#allocation23_spill]] }
  0x3b   : > { %830 = vrot.lane.b32.xlu1 %v12464_v4, %s14540_s25  ;;  %828 = vrot.lane.b32.xlu0 %v12458_v2, %s14540_s25  ;;  %s14548_s25 = smov 109  }
  0x3d   : > { %v2086_v7 = vld [vmem:[%s14655_s21] sm:$0x3f]  ;;  %s14657_s21 = smov 127  }
  0x3f   : > { %890 = vrot.lane.b32.xlu1 %v12464_v4, %s14542_s26  ;;  %888 = vrot.lane.b32.xlu0 %v12458_v2, %s14542_s26  ;;  %s14550_s26 = smov 108  }
  0x43   : > { %950 = vrot.lane.b32.xlu1 %v12464_v4, %s14544_s19  ;;  %948 = vrot.lane.b32.xlu0 %v12458_v2, %s14544_s19  ;;  %s14552_s19 = smov 96  }
  0x47   : > { %1010 = vrot.lane.b32.xlu1 %v12464_v4, %s14546_s29  ;;  %1008 = vrot.lane.b32.xlu0 %v12458_v2, %s14546_s29  ;;  %s14554_s29 = smov 95  }
  0x4b   : > { %1070 = vrot.lane.b32.xlu1 %v12464_v4, %s14548_s25  ;;  %1068 = vrot.lane.b32.xlu0 %v12458_v2, %s14548_s25  ;;  %s14556_s25 = smov 94  }
  0x4f   : > { %1130 = vrot.lane.b32.xlu1 %v12464_v4, %s14550_s26  ;;  %1128 = vrot.lane.b32.xlu0 %v12458_v2, %s14550_s26  ;;  %s14558_s26 = smov 93  }
  0x53   : > { %1190 = vrot.lane.b32.xlu1 %v12464_v4, %s14552_s19  ;;  %1188 = vrot.lane.b32.xlu0 %v12458_v2, %s14552_s19  ;;  %s14560_s19 = smov 92  }
  0x57   : > { %1250 = vrot.lane.b32.xlu1 %v12464_v4, %s14554_s29  ;;  %1248 = vrot.lane.b32.xlu0 %v12458_v2, %s14554_s29  ;;  %s14562_s29 = smov 80  }
  0x5b   : > { %1310 = vrot.lane.b32.xlu1 %v12464_v4, %s14556_s25  ;;  %1308 = vrot.lane.b32.xlu0 %v12458_v2, %s14556_s25  ;;  %s14564_s25 = smov 79  }
  0x5f   : > { %1370 = vrot.lane.b32.xlu1 %v12464_v4, %s14558_s26  ;;  %1368 = vrot.lane.b32.xlu0 %v12458_v2, %s14558_s26  ;;  %s14566_s26 = smov 78  }
  0x63   : > { %1430 = vrot.lane.b32.xlu1 %v12464_v4, %s14560_s19  ;;  %1428 = vrot.lane.b32.xlu0 %v12458_v2, %s14560_s19  ;;  %s14568_s19 = smov 77  }
  0x67   : > { %1490 = vrot.lane.b32.xlu1 %v12464_v4, %s14562_s29  ;;  %1488 = vrot.lane.b32.xlu0 %v12458_v2, %s14562_s29  ;;  %s14570_s29 = smov 76  }
  0x6b   : > { %1550 = vrot.lane.b32.xlu1 %v12464_v4, %s14564_s25  ;;  %1548 = vrot.lane.b32.xlu0 %v12458_v2, %s14564_s25  ;;  %s14572_s25 = smov 64  }
  0x6f   : > { %1610 = vrot.lane.b32.xlu1 %v12464_v4, %s14566_s26  ;;  %1608 = vrot.lane.b32.xlu0 %v12458_v2, %s14566_s26  ;;  %s14574_s26 = smov 63  }
  0x73   : > { %1670 = vrot.lane.b32.xlu1 %v12464_v4, %s14568_s19  ;;  %1668 = vrot.lane.b32.xlu0 %v12458_v2, %s14568_s19  ;;  %s14595_s19 = smov 62  }
  0x77   : > { %1730 = vrot.lane.b32.xlu1 %v12464_v4, %s14570_s29  ;;  %1728 = vrot.lane.b32.xlu0 %v12458_v2, %s14570_s29  ;;  %s14592_s29 = smov 61  }
  0x7b   : > { %1790 = vrot.lane.b32.xlu1 %v12464_v4, %s14572_s25  ;;  %1788 = vrot.lane.b32.xlu0 %v12458_v2, %s14572_s25  ;;  %s14580_s25 = smov 60  }
  0x7f   : > { %1850 = vrot.lane.b32.xlu1 %v12464_v4, %s14574_s26  ;;  %1848 = vrot.lane.b32.xlu0 %v12458_v2, %s14574_s26  ;;  %s14663_s26 = smov 110  }
  0x83   : > { %1910 = vrot.lane.b32.xlu1 %v12464_v4, %s14595_s19  ;;  %1908 = vrot.lane.b32.xlu0 %v12458_v2, %s14595_s19  ;;  %s14660_s19 = smov 126  }
  0x87   : > { %1970 = vrot.lane.b32.xlu1 %v12464_v4, %s14592_s29  ;;  %1968 = vrot.lane.b32.xlu0 %v12458_v2, %s14592_s29  ;;  %s14656_s29 = smov 125  }
  0x8b   : > { %2030 = vrot.lane.b32.xlu1 %v12464_v4, %s14580_s25  ;;  %2028 = vrot.lane.b32.xlu0 %v12458_v2, %s14580_s25  ;;  %v10344_v2 = vld [vmem:[%s14654_s20 + $0x28] sm:$0x7]  ;;  %s14659_s25 = smov 112  }
  0x8f   : > { %2089 = vperm.xlu0 %12005, %v2086_v7  }
  0xa1   : > { %v599_v8 = vpop.permute.xlu0 %598  ;;  %v709_v9 = vpop.permute.xlu1 %708 }
  0xa5   : > { %v601_v10 = vpop.permute.xlu0 %600  ;;  %v711_v11 = vpop.permute.xlu1 %710 }
  0xa6   : > { %10316 = vmatprep.subr.msk.bf16.mxu0 %vm608_vm0, %v601_v10  ;;  %v603_v12 = vsel %vm14585_vm2, %v599_v8, %v601_v10  ;;  %v713_v13 = vsel %vm14584_vm3, %v709_v9, %v711_v11  ;;  %v10353_v10 = vld [vmem:[%s14654_s20 + $0x34] sm:$0x7]  ;;  %vm14586_vm3 = vcmask 637952   ;;  %vm14587_vm2 = vcmask 629760  }
  0xa7   : > { %v610_v14 = vsel %vm608_vm0, %v603_v12, 0  ;;  %v718_v16 = vsel %vm608_vm0, %v713_v13, 0  ;;  %v10350_v12 = vld [vmem:[%s14654_s20 + $0x30] sm:$0x7] }
  0xa8   : > { %616 = vmatpush1.bf16.msra.mxu0 %v610_v14 }
  0xa9   : > { %10321 = vmatprep.subr.msk.bf16.mxu0 %vm608_vm0, %v711_v11  ;;  %v771_v17 = vpop.permute.xlu1 %770  ;;  %v769_v18 = vpop.permute.xlu0 %768 }
  0xaa   : > { %v773_v19 = vsel %vm14583_vm4, %v769_v18, %v771_v17  ;;  %10324 = vmatprep.subr.msk.bf16.mxu1 %vm608_vm0, %v771_v17  ;;  %vm14621_vm4 = vcmask 646144  }
  0xab   : > { %10317 = vmatmul.mubr.msk.bf16.vlgmr.msra.gmra.mrb[0].mxu0 %vm604_vm1, %v10315_v15  ;;  %v778_v20 = vsel %vm608_vm0, %v773_v19, 0 }
  0xac   : > { %724 = vmatpush1.bf16.msra.mxu0 %v718_v16  ;;  %755 = vmatprep.mubr.bf16.mxu0 %v12251_v0 }
  0xad   : > { %784 = vmatpush1.bf16.msra.mxu1 %v778_v20  ;;  %v831_v21 = vpop.permute.xlu1 %830  ;;  %v829_v22 = vpop.permute.xlu0 %828  ;;  %v10359_v20 = vld [vmem:[%s14654_s20 + $0x3c] sm:$0x7] }
  0xae   : > { %v833_v24 = vsel %vm14582_vm5, %v829_v22, %v831_v21  ;;  %10327 = vmatprep.subr.msk.bf16.mxu0 %vm608_vm0, %v831_v21  ;;  %vm14620_vm5 = vcmask 654336   ;;  %v10356_v22 = vld [vmem:[%s14654_s20 + $0x38] sm:$0x7] }
  0xaf   : > { %v838_v26 = vsel %vm608_vm0, %v833_v24, 0 }
  0xb0   : > { %10325 = vmatmul.mubr.msk.bf16.vlgmr.msra.gmra.mrb[4].mxu1 %vm604_vm1, %v10323_v23 }
  0xb1   : > { %v891_v27 = vpop.permute.xlu1 %890  ;;  %v889_v28 = vpop.permute.xlu0 %888  ;;  %935 = vmatprep.mubr.bf16.mxu1 %v12251_v0 }
  0xb2   : > { %v893_v29 = vsel %vm892_vm6, %v889_v28, %v891_v27  ;;  %10330 = vmatprep.subr.msk.bf16.mxu1 %vm608_vm0, %v891_v27 }
  0xb3   : > { %10322 = vmatmul.mubr.msk.bf16.vlgmr.msra.gmra.mrb[4].mxu0 %vm604_vm1, %v10320_v25  ;;  %v898_v30 = vsel %vm608_vm0, %v893_v29, 0 }
  0xb4   : > { %844 = vmatpush1.bf16.msra.mxu0 %v838_v26  ;;  %875 = vmatprep.mubr.bf16.mxu0 %v12251_v0 }
  0xb5   : > { %904 = vmatpush1.bf16.msra.mxu1 %v898_v30  ;;  %v951_v31 = vpop.permute.xlu1 %950  ;;  %v949_v32 = vpop.permute.xlu0 %948  ;;  %v10365_v30 = vld [vmem:[%s14654_s20 + $0x44] sm:$0x7] }
  0xb6   : > { %v953_v34 = vsel %vm952_vm7, %v949_v32, %v951_v31  ;;  %10333 = vmatprep.subr.msk.bf16.mxu0 %vm608_vm0, %v951_v31  ;;  %v10362_v32 = vld [vmem:[%s14654_s20 + $0x40] sm:$0x7] }
  0xb7   : > { %v958_v36 = vsel %vm608_vm0, %v953_v34, 0 }
  0xb8   : > { %10331 = vmatmul.mubr.msk.bf16.vlgmr.msra.gmra.mrb[8].mxu1 %vm604_vm1, %v10329_v33 }
  0xb9   : > { %v1011_v37 = vpop.permute.xlu1 %1010  ;;  %v1009_v38 = vpop.permute.xlu0 %1008  ;;  %1055 = vmatprep.mubr.bf16.mxu1 %v12251_v0 }
  0xba   : > { %v1013_v39 = vsel %vm1012_vm8, %v1009_v38, %v1011_v37  ;;  %10336 = vmatprep.subr.msk.bf16.mxu1 %vm608_vm0, %v1011_v37 }
  0xbb   : > { %10328 = vmatmul.mubr.msk.bf16.vlgmr.msra.gmra.mrb[8].mxu0 %vm604_vm1, %v10326_v35  ;;  %v1018_v40 = vsel %vm608_vm0, %v1013_v39, 0 }
  0xbc   : > { %964 = vmatpush1.bf16.msra.mxu0 %v958_v36  ;;  %995 = vmatprep.mubr.bf16.mxu0 %v12251_v0 }
  0xbd   : > { %1024 = vmatpush1.bf16.msra.mxu1 %v1018_v40  ;;  %v1071_v41 = vpop.permute.xlu1 %1070  ;;  %v1069_v42 = vpop.permute.xlu0 %1068  ;;  %v10371_v40 = vld [vmem:[%s14654_s20 + $0x4c] sm:$0x7] }
  0xbe   : > { %v1073_v44 = vsel %vm1072_vm9, %v1069_v42, %v1071_v41  ;;  %10339 = vmatprep.subr.msk.bf16.mxu0 %vm608_vm0, %v1071_v41  ;;  %v10368_v42 = vld [vmem:[%s14654_s20 + $0x48] sm:$0x7] }
  0xbf   : > { %v1078_v46 = vsel %vm608_vm0, %v1073_v44, 0 }
  0xc0   : > { %10337 = vmatmul.mubr.msk.bf16.vlgmr.msra.gmra.mrb[12].mxu1 %vm604_vm1, %v10335_v43 }
  0xc1   : > { %v1131_v47 = vpop.permute.xlu1 %1130  ;;  %v1129_v48 = vpop.permute.xlu0 %1128  ;;  %1175 = vmatprep.mubr.bf16.mxu1 %v12251_v0 }
  0xc2   : > { %v1133_v49 = vsel %vm1132_vm10, %v1129_v48, %v1131_v47  ;;  %10342 = vmatprep.subr.msk.bf16.mxu1 %vm608_vm0, %v1131_v47 }
  0xc3   : > { %10334 = vmatmul.mubr.msk.bf16.vlgmr.msra.gmra.mrb[12].mxu0 %vm604_vm1, %v10332_v45  ;;  %v1138_v50 = vsel %vm608_vm0, %v1133_v49, 0 }
  0xc4   : > { %1084 = vmatpush1.bf16.msra.mxu0 %v1078_v46  ;;  %1115 = vmatprep.mubr.bf16.mxu0 %v12251_v0 }
  0xc5   : > { %1144 = vmatpush1.bf16.msra.mxu1 %v1138_v50  ;;  %v1191_v51 = vpop.permute.xlu1 %1190  ;;  %v1189_v52 = vpop.permute.xlu0 %1188  ;;  %v10377_v50 = vld [vmem:[%s14654_s20 + $0x54] sm:$0x7] }
  0xc6   : > { %v1193_v54 = vsel %vm1192_vm11, %v1189_v52, %v1191_v51  ;;  %10345 = vmatprep.subr.msk.bf16.mxu0 %vm608_vm0, %v1191_v51  ;;  %v10374_v52 = vld [vmem:[%s14654_s20 + $0x50] sm:$0x7] }
  0xc7   : > { %v1198_v56 = vsel %vm608_vm0, %v1193_v54, 0 }
  0xc8   : > { %10343 = vmatmul.mubr.msk.bf16.vlgmr.msra.gmra.mrb[16].mxu1 %vm604_vm1, %v10341_v53 }
  0xc9   : > { %v1251_v57 = vpop.permute.xlu1 %1250  ;;  %v1249_v58 = vpop.permute.xlu0 %1248  ;;  %1295 = vmatprep.mubr.bf16.mxu1 %v12251_v0 }
  0xca   : > { %v1253_v59 = vsel %vm1252_vm12, %v1249_v58, %v1251_v57  ;;  %10348 = vmatprep.subr.msk.bf16.mxu1 %vm608_vm0, %v1251_v57 }
  0xcb   : > { %10340 = vmatmul.mubr.msk.bf16.vlgmr.msra.gmra.mrb[16].mxu0 %vm604_vm1, %v10338_v55  ;;  %v1258_v60 = vsel %vm608_vm0, %v1253_v59, 0 }
  0xcc   : > { %1204 = vmatpush1.bf16.msra.mxu0 %v1198_v56  ;;  %1235 = vmatprep.mubr.bf16.mxu0 %v12251_v0 }
  0xcd   : > { %1264 = vmatpush1.bf16.msra.mxu1 %v1258_v60  ;;  %v1311_v61 = vpop.permute.xlu1 %1310  ;;  %v1309_v62 = vpop.permute.xlu0 %1308  ;;  %v10383_v60 = vld [vmem:[%s14654_s20 + $0x5c] sm:$0x7] }
  0xce   : > { %v1313_v1 = vsel %vm1312_vm13, %v1309_v62, %v1311_v61  ;;  %10351 = vmatprep.subr.msk.bf16.mxu0 %vm608_vm0, %v1311_v61  ;;  %v10380_v62 = vld [vmem:[%s14654_s20 + $0x58] sm:$0x7] }
  0xcf   : > { %v1318_v3 = vsel %vm608_vm0, %v1313_v1, 0  ;;  %v10386_v1 = vld [vmem:[%s14654_s20 + $0x60] sm:$0x7]  ;;  %s14661_s20 = smov 111  }
  0xd0   : > { %10349 = vmatmul.mubr.msk.bf16.vlgmr.msra.gmra.mrb[20].mxu1 %vm604_vm1, %v10347_v63 }
  0xd1   : > { %v1371_v4 = vpop.permute.xlu1 %1370  ;;  %v1369_v5 = vpop.permute.xlu0 %1368  ;;  %1415 = vmatprep.mubr.bf16.mxu1 %v12251_v0 }
  0xd2   : > { %v1373_v6 = vsel %vm1372_vm14, %v1369_v5, %v1371_v4  ;;  %10354 = vmatprep.subr.msk.bf16.mxu1 %vm608_vm0, %v1371_v4 }
  0xd3   : > { %10346 = vmatmul.mubr.msk.bf16.vlgmr.msra.gmra.mrb[20].mxu0 %vm604_vm1, %v10344_v2  ;;  %v1378_v7 = vsel %vm608_vm0, %v1373_v6, 0  ;;  %v12276_v6 = vmov 0.0  }
  0xd4   : > { %1324 = vmatpush1.bf16.msra.mxu0 %v1318_v3  ;;  %1355 = vmatprep.mubr.bf16.mxu0 %v12251_v0  ;;  %5880 = vst [vmem:[#allocation3] sm:$0xff] %v12276_v6  ;;  %5881 = vst [vmem:[#allocation3 + $0x8] sm:$0xff] %v12276_v6 }
  0xd5   : > { %1384 = vmatpush1.bf16.msra.mxu1 %v1378_v7  ;;  %v1431_v8 = vpop.permute.xlu1 %1430  ;;  %v1429_v9 = vpop.permute.xlu0 %1428  ;;  %5882 = vst [vmem:[#allocation3 + $0x10] sm:$0xff] %v12276_v6  ;;  %5883 = vst [vmem:[#allocation3 + $0x18] sm:$0xff] %v12276_v6 }
  0xd6   : > { %v1433_v11 = vsel %vm14628_vm15, %v1429_v9, %v1431_v8  ;;  %10357 = vmatprep.subr.msk.bf16.mxu0 %vm608_vm0, %v1431_v8  ;;  %7370 = vst [vmem:[#allocation4] sm:$0x3f] %v12276_v6  ;;  %7371 = vst [vmem:[#allocation4 + $0x8] sm:$0x3f] %v12276_v6 }
  0xd7   : > { %v1438_v13 = vsel %vm608_vm0, %v1433_v11, 0  ;;  %7372 = vst [vmem:[#allocation4 + $0x10] sm:$0x3f] %v12276_v6 }
  0xd8   : > { %10355 = vmatmul.mubr.msk.bf16.vlgmr.msra.gmra.mrb[24].mxu1 %vm604_vm1, %v10353_v10 }
  0xd9   : > { %v1491_v14 = vpop.permute.xlu1 %1490  ;;  %v1489_v15 = vpop.permute.xlu0 %1488  ;;  %1535 = vmatprep.mubr.bf16.mxu1 %v12251_v0 }
  0xda   : > { %v1493_v16 = vsel %vm14620_vm5, %v1489_v15, %v1491_v14  ;;  %10360 = vmatprep.subr.msk.bf16.mxu1 %vm608_vm0, %v1491_v14 }
  0xdb   : > { %10352 = vmatmul.mubr.msk.bf16.vlgmr.msra.gmra.mrb[24].mxu0 %vm604_vm1, %v10350_v12  ;;  %v1498_v17 = vsel %vm608_vm0, %v1493_v16, 0 }
  0xdc   : > { %1444 = vmatpush1.bf16.msra.mxu0 %v1438_v13  ;;  %1475 = vmatprep.mubr.bf16.mxu0 %v12251_v0 }
  0xdd   : > { %1504 = vmatpush1.bf16.msra.mxu1 %v1498_v17  ;;  %v1551_v18 = vpop.permute.xlu1 %1550  ;;  %v1549_v19 = vpop.permute.xlu0 %1548 }
  0xde   : > { %v1553_v21 = vsel %vm14621_vm4, %v1549_v19, %v1551_v18  ;;  %10363 = vmatprep.subr.msk.bf16.mxu0 %vm608_vm0, %v1551_v18 }
  0xdf   : > { %v1558_v23 = vsel %vm608_vm0, %v1553_v21, 0 }
  0xe0   : > { %10361 = vmatmul.mubr.msk.bf16.vlgmr.msra.gmra.mrb[28].mxu1 %vm604_vm1, %v10359_v20 }
  0xe1   : > { %v1611_v24 = vpop.permute.xlu1 %1610  ;;  %v1609_v25 = vpop.permute.xlu0 %1608  ;;  %1655 = vmatprep.mubr.bf16.mxu1 %v12251_v0 }
  0xe2   : > { %v1613_v26 = vsel %vm14586_vm3, %v1609_v25, %v1611_v24  ;;  %10366 = vmatprep.subr.msk.bf16.mxu1 %vm608_vm0, %v1611_v24  ;;  %vm14588_vm3 = vcmask 621568  }
  0xe3   : > { %10358 = vmatmul.mubr.msk.bf16.vlgmr.msra.gmra.mrb[28].mxu0 %vm604_vm1, %v10356_v22  ;;  %v1618_v27 = vsel %vm608_vm0, %v1613_v26, 0 }
  0xe4   : > { %1564 = vmatpush1.bf16.msra.mxu0 %v1558_v23  ;;  %1595 = vmatprep.mubr.bf16.mxu0 %v12251_v0 }
  0xe5   : > { %1624 = vmatpush1.bf16.msra.mxu1 %v1618_v27  ;;  %v1671_v28 = vpop.permute.xlu1 %1670  ;;  %v1669_v29 = vpop.permute.xlu0 %1668 }
  0xe6   : > { %v1673_v31 = vsel %vm14587_vm2, %v1669_v29, %v1671_v28  ;;  %10369 = vmatprep.subr.msk.bf16.mxu0 %vm608_vm0, %v1671_v28  ;;  %vm14589_vm2 = vcmask 523264  }
  0xe7   : > { %v1678_v33 = vsel %vm608_vm0, %v1673_v31, 0 }
  0xe8   : > { %10367 = vmatmul.mubr.msk.bf16.vlgmr.msra.gmra.mrb[32].mxu1 %vm604_vm1, %v10365_v30 }
  0xe9   : > { %v1731_v34 = vpop.permute.xlu1 %1730  ;;  %v1729_v35 = vpop.permute.xlu0 %1728  ;;  %1775 = vmatprep.mubr.bf16.mxu1 %v12251_v0 }
  0xea   : > { %v1733_v36 = vsel %vm14588_vm3, %v1729_v35, %v1731_v34  ;;  %10372 = vmatprep.subr.msk.bf16.mxu1 %vm608_vm0, %v1731_v34  ;;  %vm14590_vm3 = vcmask 515072  }
  0xeb   : > { %10364 = vmatmul.mubr.msk.bf16.vlgmr.msra.gmra.mrb[32].mxu0 %vm604_vm1, %v10362_v32  ;;  %v1738_v37 = vsel %vm608_vm0, %v1733_v36, 0 }
  0xec   : > { %1684 = vmatpush1.bf16.msra.mxu0 %v1678_v33  ;;  %1715 = vmatprep.mubr.bf16.mxu0 %v12251_v0 }
  0xed   : > { %1744 = vmatpush1.bf16.msra.mxu1 %v1738_v37  ;;  %v1791_v38 = vpop.permute.xlu1 %1790  ;;  %v1789_v39 = vpop.permute.xlu0 %1788 }
  0xee   : > { %v1793_v41 = vsel %vm14589_vm2, %v1789_v39, %v1791_v38  ;;  %10375 = vmatprep.subr.msk.bf16.mxu0 %vm608_vm0, %v1791_v38  ;;  %vm14591_vm2 = vcmask 506880  }
  0xef   : > { %v1798_v43 = vsel %vm608_vm0, %v1793_v41, 0 }
  0xf0   : > { %10373 = vmatmul.mubr.msk.bf16.vlgmr.msra.gmra.mrb[36].mxu1 %vm604_vm1, %v10371_v40 }
  0xf1   : > { %v1851_v44 = vpop.permute.xlu1 %1850  ;;  %v1849_v45 = vpop.permute.xlu0 %1848  ;;  %1895 = vmatprep.mubr.bf16.mxu1 %v12251_v0 }
  0xf2   : > { %v1853_v46 = vsel %vm14590_vm3, %v1849_v45, %v1851_v44  ;;  %10378 = vmatprep.subr.msk.bf16.mxu1 %vm608_vm0, %v1851_v44  ;;  %vm14627_vm3 = vcmask 498688  }
  0xf3   : > { %10370 = vmatmul.mubr.msk.bf16.vlgmr.msra.gmra.mrb[36].mxu0 %vm604_vm1, %v10368_v42  ;;  %v1858_v47 = vsel %vm608_vm0, %v1853_v46, 0 }
  0xf4   : > { %1804 = vmatpush1.bf16.msra.mxu0 %v1798_v43  ;;  %1835 = vmatprep.mubr.bf16.mxu0 %v12251_v0 }
  0xf5   : > { %1864 = vmatpush1.bf16.msra.mxu1 %v1858_v47  ;;  %v1911_v48 = vpop.permute.xlu1 %1910  ;;  %v1909_v49 = vpop.permute.xlu0 %1908 }
  0xf6   : > { %v1913_v51 = vsel %vm14591_vm2, %v1909_v49, %v1911_v48  ;;  %10381 = vmatprep.subr.msk.bf16.mxu0 %vm608_vm0, %v1911_v48  ;;  %vm14594_vm2 = vcmask 490496  }
  0xf7   : > { %v1918_v53 = vsel %vm608_vm0, %v1913_v51, 0 }
  0xf8   : > { %10379 = vmatmul.mubr.msk.bf16.vlgmr.msra.gmra.mrb[40].mxu1 %vm604_vm1, %v10377_v50 }
  0xf9   : > { %v1971_v54 = vpop.permute.xlu1 %1970  ;;  %v1969_v55 = vpop.permute.xlu0 %1968  ;;  %2015 = vmatprep.mubr.bf16.mxu1 %v12251_v0 }
  0xfa   : > { %v1973_v56 = vsel %vm14627_vm3, %v1969_v55, %v1971_v54  ;;  %10384 = vmatprep.subr.msk.bf16.mxu1 %vm608_vm0, %v1971_v54 }
  0xfb   : > { %10376 = vmatmul.mubr.msk.bf16.vlgmr.msra.gmra.mrb[40].mxu0 %vm604_vm1, %v10374_v52  ;;  %v1978_v57 = vsel %vm608_vm0, %v1973_v56, 0 }
  0xfc   : > { %1924 = vmatpush1.bf16.msra.mxu0 %v1918_v53  ;;  %1955 = vmatprep.mubr.bf16.mxu0 %v12251_v0 }
  0xfd   : > { %1984 = vmatpush1.bf16.msra.mxu1 %v1978_v57  ;;  %v2031_v58 = vpop.permute.xlu1 %2030  ;;  %v2029_v59 = vpop.permute.xlu0 %2028 }
  0xfe   : > { %v2033_v61 = vsel %vm14594_vm2, %v2029_v59, %v2031_v58  ;;  %10387 = vmatprep.subr.msk.bf16.mxu0 %vm608_vm0, %v2031_v58  ;;  %11283 = vmatprep.subr.bf16.mxu1 %v12276_v6  ;;  %vm14622_vm2 = vcmask 48128  }
  0xff   : > { %v2038_v63 = vsel %vm608_vm0, %v2033_v61, 0  ;;  %vm14625_vm0 = vmmov 0  }
 0x100   : > { %10385 = vmatmul.mubr.msk.bf16.vlgmr.msra.gmra.mrb[44].mxu1 %vm604_vm1, %v10383_v60 }
 0x101   : > { %11285 = vmatprep.mubr.msk.bf16.mxu1 %vm14625_vm0, %v12276_v6 }
 0x103   : > { %10382 = vmatmul.mubr.msk.bf16.vlgmr.msra.gmra.mrb[44].mxu0 %vm604_vm1, %v10380_v62 }
 0x104   : > { %2044 = vmatpush1.bf16.msra.mxu0 %v2038_v63  ;;  %2075 = vmatprep.mubr.bf16.mxu0 %v12251_v0 }
 0x105   : > { %11289 = vmatprep.subr.bf16.mxu0 %v12276_v6 }
 0x108   : > { %v699_v2 = vpop.f32.mrb[0].mxu1 }
 0x109   : > { %v701_v3 = vpop.f32.mrb[1].mxu1 }
 0x10a   : > { %v703_v4 = vpop.f32.mrb[2].mxu1 }
 0x10b   : > { %10388 = vmatmul.mubr.msk.bf16.vlgmr.msra.gmra.mrb[48].mxu0 %vm604_vm1, %v10386_v1  ;;  %v704_v5 = vpop.f32.mrb[3].mxu1  ;;  %vm14623_vm1 = vcmask 1042432  }
 0x10c   : > { %11291 = vmatprep.mubr.msk.bf16.mxu0 %vm14625_vm0, %v12276_v6 }
 0x17e   : > { %v649_v7 = vpop.f32.mrb[0].mxu0 }
 0x17f   : > { %v700_v8 = vadd.f32 %v699_v2, %v649_v7  ;;  %v651_v9 = vpop.f32.mrb[1].mxu0 }
 0x180   : > { %v702_v10 = vadd.f32 %v701_v3, %v651_v9  ;;  %v653_v11 = vpop.f32.mrb[2].mxu0 }
 0x181   : > { %v654_v12 = vpop.f32.mrb[3].mxu0 }
 0x183   : > { %v817_v13 = vpop.f32.mrb[4].mxu1 }
 0x184   : > { %v819_v14 = vpop.f32.mrb[5].mxu1 }
 0x185   : > { %v821_v15 = vpop.f32.mrb[6].mxu1 }
 0x186   : > { %v757_v16 = vpop.f32.mrb[4].mxu0  ;;  %v822_v17 = vpop.f32.mrb[7].mxu1 }
 0x187   : > { %v764_v18 = vadd.f32 %v757_v16, %v700_v8  ;;  %v759_v19 = vpop.f32.mrb[5].mxu0 }
 0x188   : > { %v765_v20 = vadd.f32 %v759_v19, %v702_v10  ;;  %v761_v21 = vpop.f32.mrb[6].mxu0 }
 0x189   : > { %v824_v22 = vadd.f32 %v817_v13, %v764_v18  ;;  %v762_v23 = vpop.f32.mrb[7].mxu0 }
 0x18a   : > { %v825_v24 = vadd.f32 %v819_v14, %v765_v20 }
 0x18b   : > { %v937_v25 = vpop.f32.mrb[8].mxu1 }
 0x18c   : > { %v939_v26 = vpop.f32.mrb[9].mxu1 }
 0x18d   : > { %v941_v27 = vpop.f32.mrb[10].mxu1 }
 0x18e   : > { %v877_v28 = vpop.f32.mrb[8].mxu0  ;;  %v942_v29 = vpop.f32.mrb[11].mxu1 }
 0x18f   : > { %v884_v30 = vadd.f32 %v877_v28, %v824_v22  ;;  %v879_v31 = vpop.f32.mrb[9].mxu0 }
 0x190   : > { %v885_v32 = vadd.f32 %v879_v31, %v825_v24  ;;  %v881_v33 = vpop.f32.mrb[10].mxu0 }
 0x191   : > { %v944_v34 = vadd.f32 %v937_v25, %v884_v30  ;;  %v882_v35 = vpop.f32.mrb[11].mxu0 }
 0x192   : > { %v945_v36 = vadd.f32 %v939_v26, %v885_v32 }
 0x193   : > { %v1057_v37 = vpop.f32.mrb[12].mxu1 }
 0x194   : > { %v1059_v38 = vpop.f32.mrb[13].mxu1 }
 0x195   : > { %v1061_v39 = vpop.f32.mrb[14].mxu1 }
 0x196   : > { %v997_v40 = vpop.f32.mrb[12].mxu0  ;;  %v1062_v41 = vpop.f32.mrb[15].mxu1 }
 0x197   : > { %v1004_v42 = vadd.f32 %v997_v40, %v944_v34  ;;  %v999_v43 = vpop.f32.mrb[13].mxu0 }
 0x198   : > { %v1005_v44 = vadd.f32 %v999_v43, %v945_v36  ;;  %v1001_v45 = vpop.f32.mrb[14].mxu0 }
 0x199   : > { %v1064_v46 = vadd.f32 %v1057_v37, %v1004_v42  ;;  %v1002_v47 = vpop.f32.mrb[15].mxu0 }
 0x19a   : > { %v1065_v48 = vadd.f32 %v1059_v38, %v1005_v44 }
 0x19b   : > { %v1177_v49 = vpop.f32.mrb[16].mxu1 }
 0x19c   : > { %v1179_v50 = vpop.f32.mrb[17].mxu1 }
 0x19d   : > { %v1181_v51 = vpop.f32.mrb[18].mxu1 }
 0x19e   : > { %v1117_v52 = vpop.f32.mrb[16].mxu0  ;;  %v1182_v53 = vpop.f32.mrb[19].mxu1 }
 0x19f   : > { %v1124_v54 = vadd.f32 %v1117_v52, %v1064_v46  ;;  %v1119_v55 = vpop.f32.mrb[17].mxu0 }
 0x1a0   : > { %v1125_v56 = vadd.f32 %v1119_v55, %v1065_v48  ;;  %v1121_v57 = vpop.f32.mrb[18].mxu0 }
 0x1a1   : > { %v1184_v58 = vadd.f32 %v1177_v49, %v1124_v54  ;;  %v1122_v59 = vpop.f32.mrb[19].mxu0 }
 0x1a2   : > { %v1185_v60 = vadd.f32 %v1179_v50, %v1125_v56 }
 0x1a3   : > { %v1297_v61 = vpop.f32.mrb[20].mxu1 }
 0x1a4   : > { %v1299_v62 = vpop.f32.mrb[21].mxu1 }
 0x1a5   : > { %v1301_v63 = vpop.f32.mrb[22].mxu1 }
 0x1a6   : > { %v1237_v1 = vpop.f32.mrb[20].mxu0  ;;  %v1302_v2 = vpop.f32.mrb[23].mxu1 }
 0x1a7   : > { %v1244_v3 = vadd.f32 %v1237_v1, %v1184_v58  ;;  %v1239_v4 = vpop.f32.mrb[21].mxu0 }
 0x1a8   : > { %v1245_v5 = vadd.f32 %v1239_v4, %v1185_v60  ;;  %v1241_v7 = vpop.f32.mrb[22].mxu0 }
 0x1a9   : > { %v1304_v8 = vadd.f32 %v1297_v61, %v1244_v3  ;;  %v1242_v9 = vpop.f32.mrb[23].mxu0 }
 0x1aa   : > { %v1305_v10 = vadd.f32 %v1299_v62, %v1245_v5 }
 0x1ab   : > { %v1417_v11 = vpop.f32.mrb[24].mxu1 }
 0x1ac   : > { %v1419_v12 = vpop.f32.mrb[25].mxu1 }
 0x1ad   : > { %v1421_v13 = vpop.f32.mrb[26].mxu1 }
 0x1ae   : > { %v1357_v14 = vpop.f32.mrb[24].mxu0  ;;  %v1422_v15 = vpop.f32.mrb[27].mxu1 }
 0x1af   : > { %v1364_v16 = vadd.f32 %v1357_v14, %v1304_v8  ;;  %v1359_v17 = vpop.f32.mrb[25].mxu0 }
 0x1b0   : > { %v1365_v18 = vadd.f32 %v1359_v17, %v1305_v10  ;;  %v1361_v19 = vpop.f32.mrb[26].mxu0 }
 0x1b1   : > { %v1424_v20 = vadd.f32 %v1417_v11, %v1364_v16  ;;  %v1362_v21 = vpop.f32.mrb[27].mxu0 }
 0x1b2   : > { %v1425_v22 = vadd.f32 %v1419_v12, %v1365_v18 }
 0x1b3   : > { %v1537_v23 = vpop.f32.mrb[28].mxu1 }
 0x1b4   : > { %v1539_v24 = vpop.f32.mrb[29].mxu1 }
 0x1b5   : > { %v1541_v25 = vpop.f32.mrb[30].mxu1 }
 0x1b6   : > { %v1477_v26 = vpop.f32.mrb[28].mxu0  ;;  %v1542_v27 = vpop.f32.mrb[31].mxu1 }
 0x1b7   : > { %v1484_v28 = vadd.f32 %v1477_v26, %v1424_v20  ;;  %v1479_v29 = vpop.f32.mrb[29].mxu0 }
 0x1b8   : > { %v1485_v30 = vadd.f32 %v1479_v29, %v1425_v22  ;;  %v1481_v31 = vpop.f32.mrb[30].mxu0  ;;  %v2090_v22 = vpop.permute.xlu0 %2089 }
 0x1b9   : > { %v1544_v32 = vadd.f32 %v1537_v23, %v1484_v28  ;;  %v1482_v33 = vpop.f32.mrb[31].mxu0 }
 0x1ba   : > { %v1545_v34 = vadd.f32 %v1539_v24, %v1485_v30 }
 0x1bb   : > { %v1657_v35 = vpop.f32.mrb[32].mxu1 }
 0x1bc   : > { %v1659_v36 = vpop.f32.mrb[33].mxu1 }
 0x1bd   : > { %v1661_v37 = vpop.f32.mrb[34].mxu1 }
 0x1be   : > { %v1597_v38 = vpop.f32.mrb[32].mxu0  ;;  %v1662_v39 = vpop.f32.mrb[35].mxu1  ;;  %v3631_v37 = vld [vmem:[%s14681_s4 + $0x8] sm:$0xff] }
 0x1bf   : > { %v1604_v40 = vadd.f32 %v1597_v38, %v1544_v32  ;;  %v1599_v41 = vpop.f32.mrb[33].mxu0  ;;  %v12008_v32 = vld [vmem:[%s14658_s3] sm:$0xff]  }
 0x1c0   : > { %v1605_v42 = vadd.f32 %v1599_v41, %v1545_v34  ;;  %v1601_v43 = vpop.f32.mrb[34].mxu0 }
 0x1c1   : > { %v1664_v44 = vadd.f32 %v1657_v35, %v1604_v40  ;;  %v1602_v45 = vpop.f32.mrb[35].mxu0  ;;  %v12011_v43 = vld [vmem:[%s14658_s3 + $0x18] sm:$0xff]  }
 0x1c2   : > { %v1665_v46 = vadd.f32 %v1659_v36, %v1605_v42  ;;  %v3630_v36 = vld [vmem:[%s14681_s4] sm:$0xff]  ;;  %v12009_v42 = vld [vmem:[%s14658_s3 + $0x8] sm:$0xff]   ;;  %s14691_s4 = smov 96  }
 0x1c3   : > { %v1777_v47 = vpop.f32.mrb[36].mxu1 }
 0x1c4   : > { %v1779_v48 = vpop.f32.mrb[37].mxu1 }
 0x1c5   : > { %v1781_v49 = vpop.f32.mrb[38].mxu1 }
 0x1c6   : > { %v1717_v50 = vpop.f32.mrb[36].mxu0  ;;  %v1782_v51 = vpop.f32.mrb[39].mxu1  ;;  %v12010_v49 = vld [vmem:[%s14658_s3 + $0x10] sm:$0xff]  }
 0x1c7   : > { %v1719_v52 = vpop.f32.mrb[37].mxu0  ;;  %v1724_v53 = vadd.f32 %v1717_v50, %v1664_v44 }
 0x1c8   : > { %v1721_v54 = vpop.f32.mrb[38].mxu0  ;;  %v1725_v55 = vadd.f32 %v1719_v52, %v1665_v46 }
 0x1c9   : > { %v1784_v56 = vadd.f32 %v1777_v47, %v1724_v53  ;;  %v1722_v57 = vpop.f32.mrb[39].mxu0 }
 0x1ca   : > { %v1785_v58 = vadd.f32 %v1779_v48, %v1725_v55  ;;  %v12013_v55 = vld [vmem:[%s14658_s3 + $0x28] sm:$0xff]  }
 0x1cb   : > { %v1897_v59 = vpop.f32.mrb[40].mxu1 }
 0x1cc   : > { %v1899_v60 = vpop.f32.mrb[41].mxu1 }
 0x1cd   : > { %v1901_v61 = vpop.f32.mrb[42].mxu1 }
 0x1ce   : > { %v1837_v62 = vpop.f32.mrb[40].mxu0  ;;  %v1902_v63 = vpop.f32.mrb[43].mxu1 }
 0x1cf   : > { %v1844_v1 = vadd.f32 %v1837_v62, %v1784_v56  ;;  %v1839_v2 = vpop.f32.mrb[41].mxu0 }
 0x1d0   : > { %v1845_v3 = vadd.f32 %v1839_v2, %v1785_v58  ;;  %v1841_v4 = vpop.f32.mrb[42].mxu0  ;;  %v12012_v58 = vld [vmem:[%s14658_s3 + $0x20] sm:$0xff]   ;;  %v12015_v2 = vld [vmem:[%s14658_s3 + $0x38] sm:$0xff]  }
 0x1d1   : > { %v1904_v5 = vadd.f32 %v1897_v59, %v1844_v1  ;;  %v1842_v7 = vpop.f32.mrb[43].mxu0 }
 0x1d2   : > { %v1905_v8 = vadd.f32 %v1899_v60, %v1845_v3 }
 0x1d3   : > { %v2017_v9 = vpop.f32.mrb[44].mxu1 }
 0x1d4   : > { %v2019_v10 = vpop.f32.mrb[45].mxu1 }
 0x1d5   : > { %v2021_v11 = vpop.f32.mrb[46].mxu1 }
 0x1d6   : > { %v1957_v12 = vpop.f32.mrb[44].mxu0  ;;  %v2022_v13 = vpop.f32.mrb[47].mxu1 }
 0x1d7   : > { %v1964_v14 = vadd.f32 %v1957_v12, %v1904_v5  ;;  %v1959_v15 = vpop.f32.mrb[45].mxu0  ;;  %v12014_v5 = vld [vmem:[%s14658_s3 + $0x30] sm:$0xff]   ;;  %v12017_v13 = vld [vmem:[%s14658_s3 + $0x48] sm:$0xff]  }
 0x1d8   : > { %v1965_v16 = vadd.f32 %v1959_v15, %v1905_v8  ;;  %v1961_v17 = vpop.f32.mrb[46].mxu0 }
 0x1d9   : > { %v2024_v18 = vadd.f32 %v2017_v9, %v1964_v14  ;;  %v1962_v19 = vpop.f32.mrb[47].mxu0 }
 0x1da   : > { %v2025_v20 = vadd.f32 %v2019_v10, %v1965_v16  ;;  %v12016_v16 = vld [vmem:[%s14658_s3 + $0x40] sm:$0xff]  }
 0x1de   : > { %v2077_v21 = vpop.f32.mrb[48].mxu0 }
 0x1df   : > { %v2084_v23 = vadd.f32 %v2077_v21, %v2024_v18  ;;  %v2079_v24 = vpop.f32.mrb[49].mxu0 }
 0x1e0   : > { %v2085_v25 = vadd.f32 %v2079_v24, %v2025_v20  ;;  %v2081_v26 = vpop.f32.mrb[50].mxu0 }
 0x1e1   : > { %v2092_v27 = vadd.f32 %v2090_v22, %v2084_v23  ;;  %v2082_v28 = vpop.f32.mrb[51].mxu0  ;;  %v12019_v23 = vld [vmem:[%s14658_s3 + $0x58] sm:$0xff]   ;;  %v12018_v26 = vld [vmem:[%s14658_s3 + $0x50] sm:$0xff]  }
 0x1e2   : > { %v2093_v33 = vadd.f32 %v2090_v22, %v2085_v25 }
 0x1e3   : > { %v2094_v29 = vmax.f32 %v2092_v27, 0.0 }
 0x1e4   : > { %v2095_v34 = vmax.f32 %v2093_v33, 0.0  ;;  %v12021_v33 = vld [vmem:[%s14658_s3 + $0x68] sm:$0xff]  }
 0x1e5   : > { %v2096_v30 = vpack.c.bf16 %v2094_v29, %v2094_v29 }
 0x1e6   : > { %v2097_v35 = vpack.c.bf16 %v2095_v34, %v2095_v34 }
 0x1e7   : > { %2279 = vrot.lane.b32.xlu0 %v2096_v30, %s14656_s29  ;;  %2109 = vrot.lane.b32.xlu1 %v2096_v30, %s14657_s21  ;;  %v2169_v31 = vsel %vm14623_vm1, %v2096_v30, 0 }
 0x1e8   : > { %11290 = vmatpush3.bf16.msra.mxu0 %v2169_v31 }
 0x1e9   : > { %11301 = vmatprep.subr.bf16.mxu0 %v12276_v6 }
 0x1eb   : > { %2398 = vrot.lane.b32.xlu0 %v2096_v30, %s14659_s25  ;;  %2220 = vrot.lane.b32.xlu1 %v2096_v30, %s14660_s19 }
 0x1ec   : > { %11292 = vmatmul.mubr.msk.bf16.vlgmr.msra.gmra.mrb[52].mxu0 %vm14622_vm2, %v12008_v32 }
 0x1ed   : > { %11303 = vmatprep.mubr.msk.bf16.mxu0 %vm14625_vm0, %v12276_v6 }
 0x1ef   : > { %2460 = vrot.lane.b32.xlu0 %v2096_v30, %s14661_s20  ;;  %2338 = vrot.lane.b32.xlu1 %v2096_v30, %s14662_s1 }
 0x1f3   : > { %2522 = vrot.lane.b32.xlu0 %v2096_v30, %s14663_s26  ;;  %2400 = vrot.lane.b32.xlu1 %v2097_v35, %s14659_s25 }
 0x1f7   : > { %2584 = vrot.lane.b32.xlu0 %v2096_v30, %s14664_s22  ;;  %2462 = vrot.lane.b32.xlu1 %v2097_v35, %s14661_s20 }
 0x1fb   : > { %2646 = vrot.lane.b32.xlu0 %v2096_v30, %s14665_s23  ;;  %2524 = vrot.lane.b32.xlu1 %v2097_v35, %s14663_s26 }
 0x1ff   : > { %2708 = vrot.lane.b32.xlu0 %v2096_v30, %s14666_s27  ;;  %2586 = vrot.lane.b32.xlu1 %v2097_v35, %s14664_s22  ;;  %s12279_s22 = smov 100  }
 0x203   : > { %2770 = vrot.lane.b32.xlu0 %v2096_v30, %s14667_s30  ;;  %2648 = vrot.lane.b32.xlu1 %v2097_v35, %s14665_s23 }
 0x207   : > { %2832 = vrot.lane.b32.xlu0 %v2096_v30, %s14668_s17  ;;  %2710 = vrot.lane.b32.xlu1 %v2097_v35, %s14666_s27 }
 0x20b   : > { %2894 = vrot.lane.b32.xlu0 %v2096_v30, %s14669_s24  ;;  %2772 = vrot.lane.b32.xlu1 %v2097_v35, %s14667_s30  ;;  %s14678_s30 = smov 62  }
 0x20f   : > { %2956 = vrot.lane.b32.xlu0 %v2096_v30, %s14670_s18  ;;  %2834 = vrot.lane.b32.xlu1 %v2097_v35, %s14668_s17  ;;  %s14676_s17 = smov 64  }
 0x213   : > { %3018 = vrot.lane.b32.xlu0 %v2096_v30, %s14671_s2  ;;  %2896 = vrot.lane.b32.xlu1 %v2097_v35, %s14669_s24  ;;  %s14677_s24 = smov 63  }
 0x217   : > { %3080 = vrot.lane.b32.xlu0 %v2096_v30, %s14672_s0  ;;  %2958 = vrot.lane.b32.xlu1 %v2097_v35, %s14670_s18 }
 0x21b   : > { %3142 = vrot.lane.b32.xlu0 %v2096_v30, %s14673_s16  ;;  %3020 = vrot.lane.b32.xlu1 %v2097_v35, %s14671_s2  ;;  %s14679_s2 = smov 61  }
 0x21f   : > { %3204 = vrot.lane.b32.xlu0 %v2096_v30, %s14674_s15  ;;  %3082 = vrot.lane.b32.xlu1 %v2097_v35, %s14672_s0  ;;  %s14680_s0 = smov 60  }
 0x223   : > { %3266 = vrot.lane.b32.xlu0 %v2096_v30, %s14675_s14  ;;  %3144 = vrot.lane.b32.xlu1 %v2097_v35, %s14673_s16  ;;  %s14624_s16 = sand.u32 1, %s12241_s28  }
 0x224   : > { %s13663_s27 = scalar_lea.vmem [#allocation6], %s14624_s16  ;;  %s12281_s16 = smov 116  }
 0x227   : > { %3328 = vrot.lane.b32.xlu0 %v2096_v30, %s14676_s17  ;;  %3206 = vrot.lane.b32.xlu1 %v2097_v35, %s14674_s15  ;;  %s14692_s15 = smov 95  }
 0x22b   : > { %3390 = vrot.lane.b32.xlu0 %v2096_v30, %s14677_s24  ;;  %3268 = vrot.lane.b32.xlu1 %v2097_v35, %s14675_s14 }
 0x22f   : > { %3452 = vrot.lane.b32.xlu0 %v2096_v30, %s14678_s30  ;;  %3330 = vrot.lane.b32.xlu1 %v2097_v35, %s14676_s17 }
 0x233   : > { %3514 = vrot.lane.b32.xlu0 %v2096_v30, %s14679_s2  ;;  %3392 = vrot.lane.b32.xlu1 %v2097_v35, %s14677_s24  ;;  %s14629_s24 = smov 68  }
 0x237   : > { %3576 = vrot.lane.b32.xlu0 %v2096_v30, %s14680_s0  ;;  %3454 = vrot.lane.b32.xlu1 %v2097_v35, %s14678_s30  ;;  %s14693_s30 = smov 94  }
 0x23b   : > { %3634 = vperm.xlu0 %12005, %v3630_v36   ;;  %3516 = vrot.lane.b32.xlu1 %v2097_v35, %s14679_s2  ;;  %v12020_v36 = vld [vmem:[%s14658_s3 + $0x60] sm:$0xff]  }
 0x23f   : > { %3578 = vrot.lane.b32.xlu1 %v2097_v35, %s14680_s0 }
 0x243   : > { %3639 = vperm.xlu1 %12006, %v3631_v37  }
 0x259   : > { %v2280_v38 = vpop.permute.xlu0 %2279  ;;  %v2110_v39 = vpop.permute.xlu1 %2109 }
 0x25a   : > { %v2285_v40 = vsel %vm14623_vm1, %v2280_v38, 0  ;;  %v2117_v41 = vsel %vm14623_vm1, %v2110_v39, 0 }
 0x25b   : > { %11284 = vmatpush3.bf16.msra.mxu1 %v2117_v41  ;;  %11302 = vmatpush3.bf16.msra.mxu0 %v2285_v40 }
 0x25c   : > { %11295 = vmatprep.subr.bf16.mxu1 %v12276_v6  ;;  %11313 = vmatprep.subr.bf16.mxu0 %v12276_v6 }
 0x25d   : > { %v2399_v44 = vpop.permute.xlu0 %2398  ;;  %v2221_v45 = vpop.permute.xlu1 %2220 }
 0x25e   : > { %v2226_v46 = vsel %vm14623_vm1, %v2221_v45, 0  ;;  %11286 = vmatmul.mubr.msk.bf16.vlgmr.msra.gmra.mrb[48].mxu1 %vm14622_vm2, %v12009_v42  ;;  %11304 = vmatmul.mubr.msk.bf16.vlgmr.msra.gmra.mrb[56].mxu0 %vm14622_vm2, %v12011_v43  ;;  %v12023_v43 = vld [vmem:[%s14658_s3 + $0x78] sm:$0xff]  }
 0x25f   : > { %11296 = vmatpush3.bf16.msra.mxu1 %v2226_v46  ;;  %11297 = vmatprep.mubr.msk.bf16.mxu1 %vm14625_vm0, %v12276_v6  ;;  %v12022_v46 = vld [vmem:[%s14658_s3 + $0x70] sm:$0xff]  }
 0x260   : > { %11307 = vmatprep.subr.bf16.mxu1 %v12276_v6  ;;  %11315 = vmatprep.mubr.msk.bf16.mxu0 %vm14625_vm0, %v12276_v6 }
 0x261   : > { %v2461_v47 = vpop.permute.xlu0 %2460  ;;  %v2339_v48 = vpop.permute.xlu1 %2338 }
 0x262   : > { %v2344_v52 = vsel %vm14623_vm1, %v2339_v48, 0 }
 0x265   : > { %v2523_v50 = vpop.permute.xlu0 %2522  ;;  %v2401_v51 = vpop.permute.xlu1 %2400 }
 0x266   : > { %v2402_v53 = vsel %vm892_vm6, %v2399_v44, %v2401_v51  ;;  %11298 = vmatmul.mubr.msk.bf16.vlgmr.msra.gmra.mrb[52].mxu1 %vm14622_vm2, %v12010_v49 }
 0x267   : > { %v2407_v54 = vsel %vm14623_vm1, %v2402_v53, 0  ;;  %11308 = vmatpush3.bf16.msra.mxu1 %v2344_v52  ;;  %11309 = vmatprep.mubr.msk.bf16.mxu1 %vm14625_vm0, %v12276_v6  ;;  %v12025_v53 = vld [vmem:[%s14658_s3 + $0x88] sm:$0xff]  }
 0x268   : > { %11314 = vmatpush3.bf16.msra.mxu0 %v2407_v54  ;;  %11319 = vmatprep.subr.bf16.mxu1 %v12276_v6 }
 0x269   : > { %v2585_v56 = vpop.permute.xlu0 %2584  ;;  %v2463_v57 = vpop.permute.xlu1 %2462  ;;  %11325 = vmatprep.subr.bf16.mxu0 %v12276_v6 }
 0x26a   : > { %v2464_v59 = vsel %vm952_vm7, %v2461_v47, %v2463_v57 }
 0x26b   : > { %11316 = vmatmul.mubr.msk.bf16.vlgmr.msra.gmra.mrb[60].mxu0 %vm14622_vm2, %v12013_v55  ;;  %v2469_v62 = vsel %vm14623_vm1, %v2464_v59, 0 }
 0x26c   : > { %11327 = vmatprep.mubr.msk.bf16.mxu0 %vm14625_vm0, %v12276_v6 }
 0x26d   : > { %v2647_v60 = vpop.permute.xlu0 %2646  ;;  %v2525_v61 = vpop.permute.xlu1 %2524 }
 0x26e   : > { %v2526_v63 = vsel %vm1012_vm8, %v2523_v50, %v2525_v61  ;;  %11310 = vmatmul.mubr.msk.bf16.vlgmr.msra.gmra.mrb[56].mxu1 %vm14622_vm2, %v12012_v58 }
 0x26f   : > { %v2531_v1 = vsel %vm14623_vm1, %v2526_v63, 0  ;;  %11320 = vmatpush3.bf16.msra.mxu1 %v2469_v62  ;;  %11321 = vmatprep.mubr.msk.bf16.mxu1 %vm14625_vm0, %v12276_v6  ;;  %v12027_v62 = vld [vmem:[%s14658_s3 + $0x98] sm:$0xff]  }
 0x270   : > { %11326 = vmatpush3.bf16.msra.mxu0 %v2531_v1  ;;  %11331 = vmatprep.subr.bf16.mxu1 %v12276_v6 }
 0x271   : > { %v2709_v3 = vpop.permute.xlu0 %2708  ;;  %v2587_v4 = vpop.permute.xlu1 %2586  ;;  %11337 = vmatprep.subr.bf16.mxu0 %v12276_v6 }
 0x272   : > { %v2588_v7 = vsel %vm1072_vm9, %v2585_v56, %v2587_v4  ;;  %v12024_v56 = vld [vmem:[%s14658_s3 + $0x80] sm:$0xff]  }
 0x273   : > { %11328 = vmatmul.mubr.msk.bf16.vlgmr.msra.gmra.mrb[64].mxu0 %vm14622_vm2, %v12015_v2  ;;  %v2593_v10 = vsel %vm14623_vm1, %v2588_v7, 0  ;;  %v12026_v2 = vld [vmem:[%s14658_s3 + $0x90] sm:$0xff]  }
 0x274   : > { %11339 = vmatprep.mubr.msk.bf16.mxu0 %vm14625_vm0, %v12276_v6 }
 0x275   : > { %v2771_v8 = vpop.permute.xlu0 %2770  ;;  %v2649_v9 = vpop.permute.xlu1 %2648 }
 0x276   : > { %v2650_v11 = vsel %vm1132_vm10, %v2647_v60, %v2649_v9  ;;  %11322 = vmatmul.mubr.msk.bf16.vlgmr.msra.gmra.mrb[60].mxu1 %vm14622_vm2, %v12014_v5 }
 0x277   : > { %v2655_v12 = vsel %vm14623_vm1, %v2650_v11, 0  ;;  %11332 = vmatpush3.bf16.msra.mxu1 %v2593_v10  ;;  %11333 = vmatprep.mubr.msk.bf16.mxu1 %vm14625_vm0, %v12276_v6  ;;  %v12029_v10 = vld [vmem:[%s14658_s3 + $0xa8] sm:$0xff]  }
 0x278   : > { %11338 = vmatpush3.bf16.msra.mxu0 %v2655_v12  ;;  %11343 = vmatprep.subr.bf16.mxu1 %v12276_v6  ;;  %v12028_v12 = vld [vmem:[%s14658_s3 + $0xa0] sm:$0xff]  }
 0x279   : > { %v2833_v14 = vpop.permute.xlu0 %2832  ;;  %v2711_v15 = vpop.permute.xlu1 %2710  ;;  %11349 = vmatprep.subr.bf16.mxu0 %v12276_v6 }
 0x27a   : > { %v2712_v17 = vsel %vm1192_vm11, %v2709_v3, %v2711_v15 }
 0x27b   : > { %11340 = vmatmul.mubr.msk.bf16.vlgmr.msra.gmra.mrb[68].mxu0 %vm14622_vm2, %v12017_v13  ;;  %v2717_v20 = vsel %vm14623_vm1, %v2712_v17, 0 }
 0x27c   : > { %11351 = vmatprep.mubr.msk.bf16.mxu0 %vm14625_vm0, %v12276_v6 }
 0x27d   : > { %v2895_v18 = vpop.permute.xlu0 %2894  ;;  %v2773_v19 = vpop.permute.xlu1 %2772 }
 0x27e   : > { %v2774_v21 = vsel %vm1252_vm12, %v2771_v8, %v2773_v19  ;;  %11334 = vmatmul.mubr.msk.bf16.vlgmr.msra.gmra.mrb[64].mxu1 %vm14622_vm2, %v12016_v16  ;;  %v12031_v19 = vld [vmem:[%s14658_s3 + $0xb8] sm:$0xff]  }
 0x27f   : > { %v2779_v22 = vsel %vm14623_vm1, %v2774_v21, 0  ;;  %11344 = vmatpush3.bf16.msra.mxu1 %v2717_v20  ;;  %11345 = vmatprep.mubr.msk.bf16.mxu1 %vm14625_vm0, %v12276_v6 }
 0x280   : > { %11350 = vmatpush3.bf16.msra.mxu0 %v2779_v22  ;;  %11355 = vmatprep.subr.bf16.mxu1 %v12276_v6  ;;  %v12030_v22 = vld [vmem:[%s14658_s3 + $0xb0] sm:$0xff]  }
 0x281   : > { %v2957_v24 = vpop.permute.xlu0 %2956  ;;  %v2835_v25 = vpop.permute.xlu1 %2834  ;;  %11361 = vmatprep.subr.bf16.mxu0 %v12276_v6 }
 0x282   : > { %v2836_v27 = vsel %vm1312_vm13, %v2833_v14, %v2835_v25  ;;  %v12032_v25 = vld [vmem:[%s14658_s3 + $0xc0] sm:$0xff]   ;;  %s14690_s3 = smov 109  }
 0x283   : > { %11352 = vmatmul.mubr.msk.bf16.vlgmr.msra.gmra.mrb[72].mxu0 %vm14622_vm2, %v12019_v23  ;;  %v2841_v30 = vsel %vm14623_vm1, %v2836_v27, 0 }
 0x284   : > { %11363 = vmatprep.mubr.msk.bf16.mxu0 %vm14625_vm0, %v12276_v6 }
 0x285   : > { %v3019_v28 = vpop.permute.xlu0 %3018  ;;  %v2897_v29 = vpop.permute.xlu1 %2896 }
 0x286   : > { %v2898_v31 = vsel %vm1372_vm14, %v2895_v18, %v2897_v29  ;;  %11346 = vmatmul.mubr.msk.bf16.vlgmr.msra.gmra.mrb[68].mxu1 %vm14622_vm2, %v12018_v26 }
 0x287   : > { %v2903_v32 = vsel %vm14623_vm1, %v2898_v31, 0  ;;  %11356 = vmatpush3.bf16.msra.mxu1 %v2841_v30  ;;  %11357 = vmatprep.mubr.msk.bf16.mxu1 %vm14625_vm0, %v12276_v6  ;;  %v12033_v30 = vld [vmem:[%s14689_s5] sm:$0xff]  }
 0x288   : > { %11362 = vmatpush3.bf16.msra.mxu0 %v2903_v32  ;;  %11367 = vmatprep.subr.bf16.mxu1 %v12276_v6  ;;  %v12034_v31 = vld [vmem:[%s14689_s5 + $0x3c] sm:$0xff]   ;;  %v12035_v32 = vld [vmem:[%s14689_s5 + $0x8] sm:$0xff]  }
 0x289   : > { %v3081_v34 = vpop.permute.xlu0 %3080  ;;  %v2959_v35 = vpop.permute.xlu1 %2958  ;;  %11373 = vmatprep.subr.bf16.mxu0 %v12276_v6 }
 0x28a   : > { %v2960_v37 = vsel %vm14628_vm15, %v2957_v24, %v2959_v35  ;;  %v12038_v35 = vld [vmem:[%s14689_s5 + $0x4c] sm:$0xff]   ;;  %vm5933_vm15 = vcmask 1015712  }
 0x28b   : > { %11364 = vmatmul.mubr.msk.bf16.vlgmr.msra.gmra.mrb[76].mxu0 %vm14622_vm2, %v12021_v33  ;;  %v2965_v40 = vsel %vm14623_vm1, %v2960_v37, 0  ;;  %v12036_v33 = vld [vmem:[%s14689_s5 + $0x44] sm:$0xff]   ;;  %v12040_v37 = vld [vmem:[%s14689_s5 + $0x54] sm:$0xff]  }
 0x28c   : > { %11375 = vmatprep.mubr.msk.bf16.mxu0 %vm14625_vm0, %v12276_v6 }
 0x28d   : > { %v3143_v38 = vpop.permute.xlu0 %3142  ;;  %v3021_v39 = vpop.permute.xlu1 %3020 }
 0x28e   : > { %v3022_v41 = vsel %vm14620_vm5, %v3019_v28, %v3021_v39  ;;  %11358 = vmatmul.mubr.msk.bf16.vlgmr.msra.gmra.mrb[72].mxu1 %vm14622_vm2, %v12020_v36  ;;  %vm14682_vm5 = vcmask 637952   ;;  %v12039_v36 = vld [vmem:[%s14689_s5 + $0x18] sm:$0xff]  }
 0x28f   : > { %v3027_v42 = vsel %vm14623_vm1, %v3022_v41, 0  ;;  %11368 = vmatpush3.bf16.msra.mxu1 %v2965_v40  ;;  %11369 = vmatprep.mubr.msk.bf16.mxu1 %vm14625_vm0, %v12276_v6  ;;  %v12042_v39 = vld [vmem:[%s14689_s5 + $0x5c] sm:$0xff]   ;;  %v12043_v40 = vld [vmem:[%s14689_s5 + $0x28] sm:$0xff]  }
 0x290   : > { %11374 = vmatpush3.bf16.msra.mxu0 %v3027_v42  ;;  %11379 = vmatprep.subr.bf16.mxu1 %v12276_v6  ;;  %v12044_v41 = vld [vmem:[%s14689_s5 + $0x64] sm:$0xff]   ;;  %v12045_v42 = vld [vmem:[%s14689_s5 + $0x30] sm:$0xff]  }
 0x291   : > { %v3205_v44 = vpop.permute.xlu0 %3204  ;;  %v3083_v45 = vpop.permute.xlu1 %3082  ;;  %11385 = vmatprep.subr.bf16.mxu0 %v12276_v6 }
 0x292   : > { %v3084_v47 = vsel %vm14621_vm4, %v3081_v34, %v3083_v45  ;;  %vm14684_vm4 = vcmask 621568   ;;  %v12037_v34 = vld [vmem:[%s14689_s5 + $0x10] sm:$0xff]  }
 0x293   : > { %11376 = vmatmul.mubr.msk.bf16.vlgmr.msra.gmra.mrb[80].mxu0 %vm14622_vm2, %v12023_v43  ;;  %v3089_v50 = vsel %vm14623_vm1, %v3084_v47, 0  ;;  %v12046_v43 = vld [vmem:[%s14689_s5 + $0x6c] sm:$0xff]  }
 0x294   : > { %11387 = vmatprep.mubr.msk.bf16.mxu0 %vm14625_vm0, %v12276_v6 }
 0x295   : > { %v3267_v48 = vpop.permute.xlu0 %3266  ;;  %v3145_v49 = vpop.permute.xlu1 %3144 }
 0x296   : > { %v3146_v51 = vsel %vm14682_vm5, %v3143_v38, %v3145_v49  ;;  %11370 = vmatmul.mubr.msk.bf16.vlgmr.msra.gmra.mrb[76].mxu1 %vm14622_vm2, %v12022_v46  ;;  %vm14683_vm5 = vcmask 629760   ;;  %v12041_v38 = vld [vmem:[%s14689_s5 + $0x20] sm:$0xff]   ;;  %v12048_v46 = vld [vmem:[%s14689_s5 + $0x74] ss:$0 sps:$4 sm:$0xff]  }
 0x297   : > { %v3151_v52 = vsel %vm14623_vm1, %v3146_v51, 0  ;;  %11380 = vmatpush3.bf16.msra.mxu1 %v3089_v50  ;;  %11381 = vmatprep.mubr.msk.bf16.mxu1 %vm14625_vm0, %v12276_v6 }
 0x298   : > { %11386 = vmatpush3.bf16.msra.mxu0 %v3151_v52  ;;  %11391 = vmatprep.subr.bf16.mxu1 %v12276_v6 }
 0x299   : > { %v3207_v54 = vpop.permute.xlu1 %3206  ;;  %11397 = vmatprep.subr.bf16.mxu0 %v12276_v6  ;;  %v3329_v55 = vpop.permute.xlu0 %3328 }
 0x29a   : > { %v3208_v57 = vsel %vm14683_vm5, %v3205_v44, %v3207_v54  ;;  %vm14686_vm5 = vcmask 515072   ;;  %v12047_v44 = vld [vmem:[%s14689_s5 + $0x38] ss:$0 sps:$4 sm:$0xff]  }
 0x29b   : > { %11388 = vmatmul.mubr.msk.bf16.vlgmr.msra.gmra.mrb[84].mxu0 %vm14622_vm2, %v12025_v53  ;;  %v3213_v59 = vsel %vm14623_vm1, %v3208_v57, 0 }
 0x29c   : > { %11399 = vmatprep.mubr.msk.bf16.mxu0 %vm14625_vm0, %v12276_v6 }
 0x29d   : > { %v3269_v58 = vpop.permute.xlu1 %3268  ;;  %v3391_v63 = vpop.permute.xlu0 %3390 }
 0x29e   : > { %v3270_v60 = vsel %vm14684_vm4, %v3267_v48, %v3269_v58  ;;  %11382 = vmatmul.mubr.msk.bf16.vlgmr.msra.gmra.mrb[80].mxu1 %vm14622_vm2, %v12024_v56  ;;  %vm14685_vm4 = vcmask 523264  }
 0x29f   : > { %v3275_v61 = vsel %vm14623_vm1, %v3270_v60, 0  ;;  %11392 = vmatpush3.bf16.msra.mxu1 %v3213_v59  ;;  %11393 = vmatprep.mubr.msk.bf16.mxu1 %vm14625_vm0, %v12276_v6 }
 0x2a0   : > { %11398 = vmatpush3.bf16.msra.mxu0 %v3275_v61  ;;  %11403 = vmatprep.subr.bf16.mxu1 %v12276_v6 }
 0x2a1   : > { %v3331_v1 = vpop.permute.xlu1 %3330  ;;  %11409 = vmatprep.subr.bf16.mxu0 %v12276_v6  ;;  %v3453_v5 = vpop.permute.xlu0 %3452 }
 0x2a2   : > { %v3332_v3 = vsel %vm14685_vm4, %v3329_v55, %v3331_v1  ;;  %vm14687_vm4 = vcmask 506880  }
 0x2a3   : > { %11400 = vmatmul.mubr.msk.bf16.vlgmr.msra.gmra.mrb[88].mxu0 %vm14622_vm2, %v12027_v62  ;;  %v3337_v7 = vsel %vm14623_vm1, %v3332_v3, 0 }
 0x2a4   : > { %11411 = vmatprep.mubr.msk.bf16.mxu0 %vm14625_vm0, %v12276_v6 }
 0x2a5   : > { %v3393_v4 = vpop.permute.xlu1 %3392  ;;  %v3515_v14 = vpop.permute.xlu0 %3514 }
 0x2a6   : > { %v3394_v8 = vsel %vm14686_vm5, %v3391_v63, %v3393_v4  ;;  %11394 = vmatmul.mubr.msk.bf16.vlgmr.msra.gmra.mrb[84].mxu1 %vm14622_vm2, %v12026_v2  ;;  %vm14688_vm5 = vcmask 490496  }
 0x2a7   : > { %v3399_v9 = vsel %vm14623_vm1, %v3394_v8, 0  ;;  %11404 = vmatpush3.bf16.msra.mxu1 %v3337_v7  ;;  %11405 = vmatprep.mubr.msk.bf16.mxu1 %vm14625_vm0, %v12276_v6 }
 0x2a8   : > { %11410 = vmatpush3.bf16.msra.mxu0 %v3399_v9  ;;  %11415 = vmatprep.subr.bf16.mxu1 %v12276_v6 }
 0x2a9   : > { %v3455_v11 = vpop.permute.xlu1 %3454  ;;  %11421 = vmatprep.subr.bf16.mxu0 %v12276_v6  ;;  %v3577_v21 = vpop.permute.xlu0 %3576 }
 0x2aa   : > { %v3456_v13 = vsel %vm14687_vm4, %v3453_v5, %v3455_v11  ;;  %vm3730_vm4 = vcmask 1043456  }
 0x2ab   : > { %11412 = vmatmul.mubr.msk.bf16.vlgmr.msra.gmra.mrb[92].mxu0 %vm14622_vm2, %v12029_v10  ;;  %v3461_v16 = vsel %vm14623_vm1, %v3456_v13, 0  ;;  %v3822_v45 = vsel %vm3730_vm4, %v12047_v44, 0  ;;  %v3732_v47 = vsel %vm3730_vm4, %v12048_v46, 0 }
 0x2ac   : > { %11423 = vmatprep.mubr.msk.bf16.mxu0 %vm14625_vm0, %v12276_v6 }
 0x2ad   : > { %v3517_v15 = vpop.permute.xlu1 %3516 }
 0x2ae   : > { %v3518_v17 = vsel %vm14627_vm3, %v3515_v14, %v3517_v15  ;;  %11406 = vmatmul.mubr.msk.bf16.vlgmr.msra.gmra.mrb[88].mxu1 %vm14622_vm2, %v12028_v12  ;;  %vm5972_vm3 = vcmask 359712  }
 0x2af   : > { %v3523_v18 = vsel %vm14623_vm1, %v3518_v17, 0  ;;  %11416 = vmatpush3.bf16.msra.mxu1 %v3461_v16  ;;  %11417 = vmatprep.mubr.msk.bf16.mxu1 %vm14625_vm0, %v12276_v6 }
 0x2b0   : > { %11422 = vmatpush3.bf16.msra.mxu0 %v3523_v18  ;;  %11427 = vmatprep.subr.bf16.mxu1 %v12276_v6 }
 0x2b1   : > { %v3579_v20 = vpop.permute.xlu1 %3578  ;;  %11433 = vmatprep.subr.bf16.mxu0 %v12276_v6 }
 0x2b2   : > { %v3580_v23 = vsel %vm14688_vm5, %v3577_v21, %v3579_v20  ;;  %vm3726_vm5 = vcmask 982016  }
 0x2b3   : > { %11424 = vmatmul.mubr.msk.bf16.vlgmr.msra.gmra.mrb[96].mxu0 %vm14622_vm2, %v12031_v19  ;;  %v3585_v24 = vsel %vm14623_vm1, %v3580_v23, 0  ;;  %vm5468_vm1 = vcmask 80896  }
 0x2b4   : > { %11449 = vmatprep.mubr.msk.bf16.mxu0 %vm14625_vm0, %v12276_v6  ;;  %11434 = vmatpush3.bf16.msra.mxu0 %v12034_v31 }
 0x2b5   : > { %11435 = vmatprep.subr.bf16.mxu0 %v12276_v6 }
 0x2b6   : > { %11418 = vmatmul.mubr.msk.bf16.vlgmr.msra.gmra.mrb[92].mxu1 %vm14622_vm2, %v12030_v22 }
 0x2b7   : > { %11428 = vmatpush3.bf16.msra.mxu1 %v3585_v24  ;;  %11429 = vmatprep.mubr.msk.bf16.mxu1 %vm14625_vm0, %v12276_v6 }
 0x2b8   : > { %11453 = vmatprep.subr.bf16.mxu1 %v12276_v6  ;;  %11436 = vmatpush3.bf16.msra.mxu0 %v12036_v33 }
 0x2b9   : > { %11437 = vmatprep.subr.bf16.mxu0 %v12276_v6 }
 0x2bc   : > { %11438 = vmatpush3.bf16.msra.mxu0 %v12038_v35 }
 0x2bd   : > { %11439 = vmatprep.subr.bf16.mxu0 %v12276_v6 }
 0x2be   : > { %11430 = vmatmul.mubr.msk.bf16.vlgmr.msra.gmra.mrb[96].mxu1 %vm14622_vm2, %v12032_v25  ;;  %vm5457_vm2 = vcmask 73728  }
 0x2bf   : > { %v2205_v26 = vpop.f32.mrb[52].mxu0  ;;  %11469 = vmatprep.mubr.msk.bf16.mxu1 %vm14625_vm0, %v12276_v6  ;;  %11454 = vmatpush3.bf16.msra.mxu1 %v12033_v30 }
 0x2c0   : > { %v11293_v27 = vpop.f32.mrb[53].mxu0  ;;  %11455 = vmatprep.subr.bf16.mxu1 %v12276_v6  ;;  %11440 = vmatpush3.bf16.msra.mxu0 %v12040_v37 }
 0x2c1   : > { %v2208_v28 = vpop.f32.mrb[54].mxu0  ;;  %11441 = vmatprep.subr.bf16.mxu0 %v12276_v6 }
 0x2c2   : > { %v11294_v29 = vpop.f32.mrb[55].mxu0 }
 0x2c3   : > { %11456 = vmatpush3.bf16.msra.mxu1 %v12035_v32 }
 0x2c4   : > { %11457 = vmatprep.subr.bf16.mxu1 %v12276_v6  ;;  %11442 = vmatpush3.bf16.msra.mxu0 %v12042_v39 }
 0x2c5   : > { %11443 = vmatprep.subr.bf16.mxu0 %v12276_v6 }
 0x2c7   : > { %11458 = vmatpush3.bf16.msra.mxu1 %v12037_v34 }
 0x2c8   : > { %11459 = vmatprep.subr.bf16.mxu1 %v12276_v6  ;;  %11444 = vmatpush3.bf16.msra.mxu0 %v12044_v41 }
 0x2c9   : > { %11445 = vmatprep.subr.bf16.mxu0 %v12276_v6 }
 0x2cb   : > { %11460 = vmatpush3.bf16.msra.mxu1 %v12039_v36 }
 0x2cc   : > { %11461 = vmatprep.subr.bf16.mxu1 %v12276_v6  ;;  %11446 = vmatpush3.bf16.msra.mxu0 %v12046_v43 }
 0x2cd   : > { %11447 = vmatprep.subr.bf16.mxu0 %v12276_v6 }
 0x2cf   : > { %11462 = vmatpush3.bf16.msra.mxu1 %v12041_v38 }
 0x2d0   : > { %11463 = vmatprep.subr.bf16.mxu1 %v12276_v6  ;;  %11448 = vmatpush3.bf16.msra.mxu0 %v3732_v47 }
 0x2d1   : > { %11473 = vmatprep.subr.bf16.mxu0 %v12276_v6 }
 0x2d3   : > { %11464 = vmatpush3.bf16.msra.mxu1 %v12043_v40 }
 0x2d4   : > { %11465 = vmatprep.subr.bf16.mxu1 %v12276_v6 }
 0x2d7   : > { %11466 = vmatpush3.bf16.msra.mxu1 %v12045_v42 }
 0x2d8   : > { %11467 = vmatprep.subr.bf16.mxu1 %v12276_v6 }
 0x2db   : > { %11468 = vmatpush3.bf16.msra.mxu1 %v3822_v45 }
 0x2dc   : > { %11493 = vmatprep.subr.bf16.mxu1 %v12276_v6 }
 0x331   : > { %v2153_v48 = vpop.f32.mrb[48].mxu1  ;;  %v2321_v49 = vpop.f32.mrb[56].mxu0 }
 0x332   : > { %v2206_v50 = vadd.f32 %v2205_v26, %v2153_v48  ;;  %v11287_v51 = vpop.f32.mrb[49].mxu1  ;;  %v11305_v52 = vpop.f32.mrb[57].mxu0 }
 0x333   : > { %v2156_v53 = vpop.f32.mrb[50].mxu1  ;;  %v2324_v54 = vpop.f32.mrb[58].mxu0 }
 0x334   : > { %v2209_v55 = vadd.f32 %v2208_v28, %v2156_v53  ;;  %v11288_v56 = vpop.f32.mrb[51].mxu1  ;;  %v11306_v57 = vpop.f32.mrb[59].mxu0 }
 0x339   : > { %v2262_v58 = vpop.f32.mrb[52].mxu1 }
 0x33a   : > { %v2269_v59 = vadd.f32 %v2262_v58, %v2206_v50  ;;  %v11299_v60 = vpop.f32.mrb[53].mxu1 }
 0x33b   : > { %v2265_v61 = vpop.f32.mrb[54].mxu1 }
 0x33c   : > { %v2270_v62 = vadd.f32 %v2265_v61, %v2209_v55  ;;  %v2328_v63 = vadd.f32 %v2321_v49, %v2269_v59  ;;  %v11300_v1 = vpop.f32.mrb[55].mxu1 }
 0x33e   : > { %v2329_v2 = vadd.f32 %v2324_v54, %v2270_v62  ;;  %v2443_v3 = vpop.f32.mrb[60].mxu0 }
 0x33f   : > { %v11317_v6 = vpop.f32.mrb[61].mxu0 }
 0x340   : > { %v2446_v4 = vpop.f32.mrb[62].mxu0 }
 0x341   : > { %v2380_v5 = vpop.f32.mrb[56].mxu1  ;;  %v11318_v7 = vpop.f32.mrb[63].mxu0 }
 0x342   : > { %v2387_v8 = vadd.f32 %v2380_v5, %v2328_v63  ;;  %v11311_v9 = vpop.f32.mrb[57].mxu1 }
 0x343   : > { %v2383_v10 = vpop.f32.mrb[58].mxu1 }
 0x344   : > { %v2388_v11 = vadd.f32 %v2383_v10, %v2329_v2  ;;  %v2450_v12 = vadd.f32 %v2443_v3, %v2387_v8  ;;  %v11312_v13 = vpop.f32.mrb[59].mxu1 }
 0x346   : > { %v2451_v14 = vadd.f32 %v2446_v4, %v2388_v11  ;;  %v2567_v15 = vpop.f32.mrb[64].mxu0 }
 0x347   : > { %v11329_v16 = vpop.f32.mrb[65].mxu0 }
 0x348   : > { %v2570_v17 = vpop.f32.mrb[66].mxu0 }
 0x349   : > { %v2505_v18 = vpop.f32.mrb[60].mxu1  ;;  %v11330_v19 = vpop.f32.mrb[67].mxu0 }
 0x34a   : > { %v2512_v20 = vadd.f32 %v2505_v18, %v2450_v12  ;;  %v11323_v21 = vpop.f32.mrb[61].mxu1 }
 0x34b   : > { %v2508_v22 = vpop.f32.mrb[62].mxu1 }
 0x34c   : > { %v2513_v23 = vadd.f32 %v2508_v22, %v2451_v14  ;;  %v2574_v24 = vadd.f32 %v2567_v15, %v2512_v20  ;;  %v11324_v25 = vpop.f32.mrb[63].mxu1 }
 0x34e   : > { %v2575_v26 = vadd.f32 %v2570_v17, %v2513_v23  ;;  %v2691_v27 = vpop.f32.mrb[68].mxu0 }
 0x34f   : > { %v11341_v28 = vpop.f32.mrb[69].mxu0 }
 0x350   : > { %v2694_v29 = vpop.f32.mrb[70].mxu0 }
 0x351   : > { %v2629_v30 = vpop.f32.mrb[64].mxu1  ;;  %v11342_v31 = vpop.f32.mrb[71].mxu0 }
 0x352   : > { %v2636_v32 = vadd.f32 %v2629_v30, %v2574_v24  ;;  %v11335_v33 = vpop.f32.mrb[65].mxu1 }
 0x353   : > { %v2632_v34 = vpop.f32.mrb[66].mxu1 }
 0x354   : > { %v2637_v35 = vadd.f32 %v2632_v34, %v2575_v26  ;;  %v2698_v36 = vadd.f32 %v2691_v27, %v2636_v32  ;;  %v11336_v37 = vpop.f32.mrb[67].mxu1 }
 0x356   : > { %v2699_v38 = vadd.f32 %v2694_v29, %v2637_v35  ;;  %v2815_v39 = vpop.f32.mrb[72].mxu0 }
 0x357   : > { %v11353_v40 = vpop.f32.mrb[73].mxu0 }
 0x358   : > { %v2818_v41 = vpop.f32.mrb[74].mxu0 }
 0x359   : > { %v2753_v42 = vpop.f32.mrb[68].mxu1  ;;  %v11354_v43 = vpop.f32.mrb[75].mxu0 }
 0x35a   : > { %v2760_v44 = vadd.f32 %v2753_v42, %v2698_v36  ;;  %v11347_v45 = vpop.f32.mrb[69].mxu1 }
 0x35b   : > { %v2756_v46 = vpop.f32.mrb[70].mxu1 }
 0x35c   : > { %v2761_v47 = vadd.f32 %v2756_v46, %v2699_v38  ;;  %v2822_v48 = vadd.f32 %v2815_v39, %v2760_v44  ;;  %v11348_v49 = vpop.f32.mrb[71].mxu1 }
 0x35e   : > { %v2823_v50 = vadd.f32 %v2818_v41, %v2761_v47  ;;  %v2939_v51 = vpop.f32.mrb[76].mxu0 }
 0x35f   : > { %v11365_v52 = vpop.f32.mrb[77].mxu0 }
 0x360   : > { %v2942_v53 = vpop.f32.mrb[78].mxu0 }
 0x361   : > { %v2877_v54 = vpop.f32.mrb[72].mxu1  ;;  %v11366_v55 = vpop.f32.mrb[79].mxu0 }
 0x362   : > { %v2884_v56 = vadd.f32 %v2877_v54, %v2822_v48  ;;  %v11359_v57 = vpop.f32.mrb[73].mxu1 }
 0x363   : > { %v2880_v58 = vpop.f32.mrb[74].mxu1 }
 0x364   : > { %v2885_v59 = vadd.f32 %v2880_v58, %v2823_v50  ;;  %v2946_v60 = vadd.f32 %v2939_v51, %v2884_v56  ;;  %v11360_v61 = vpop.f32.mrb[75].mxu1 }
 0x365   : > { %v3635_v61 = vpop.permute.xlu0 %3634 }
 0x366   : > { %v2947_v62 = vadd.f32 %v2942_v53, %v2885_v59  ;;  %v3063_v63 = vpop.f32.mrb[80].mxu0 }
 0x367   : > { %v11377_v1 = vpop.f32.mrb[81].mxu0 }
 0x368   : > { %v3066_v2 = vpop.f32.mrb[82].mxu0 }
 0x369   : > { %v3001_v3 = vpop.f32.mrb[76].mxu1  ;;  %v11378_v6 = vpop.f32.mrb[83].mxu0 }
 0x36a   : > { %v3008_v4 = vadd.f32 %v3001_v3, %v2946_v60  ;;  %v11371_v5 = vpop.f32.mrb[77].mxu1 }
 0x36b   : > { %v3004_v7 = vpop.f32.mrb[78].mxu1 }
 0x36c   : > { %v3009_v8 = vadd.f32 %v3004_v7, %v2947_v62  ;;  %v3070_v9 = vadd.f32 %v3063_v63, %v3008_v4  ;;  %v11372_v10 = vpop.f32.mrb[79].mxu1 }
 0x36e   : > { %v3071_v11 = vadd.f32 %v3066_v2, %v3009_v8  ;;  %v3187_v12 = vpop.f32.mrb[84].mxu0  ;;  %v3640_v2 = vpop.permute.xlu1 %3639 }
 0x36f   : > { %v11389_v13 = vpop.f32.mrb[85].mxu0 }
 0x370   : > { %v3190_v14 = vpop.f32.mrb[86].mxu0  ;;  %v12051_v13 = vld [vmem:[%s14689_s5 + $0xbc] sm:$0xff]  }
 0x371   : > { %v3125_v15 = vpop.f32.mrb[80].mxu1  ;;  %v11390_v16 = vpop.f32.mrb[87].mxu0 }
 0x372   : > { %v3132_v17 = vadd.f32 %v3125_v15, %v3070_v9  ;;  %v11383_v18 = vpop.f32.mrb[81].mxu1  ;;  %v12049_v9 = vld [vmem:[%s14689_s5 + $0xb4] sm:$0xff]   ;;  %v12052_v15 = vld [vmem:[%s14689_s5 + $0x80] sm:$0xff]  }
 0x373   : > { %v3128_v19 = vpop.f32.mrb[82].mxu1  ;;  %v12053_v16 = vld [vmem:[%s14689_s5 + $0xc4] sm:$0xff]   ;;  %v12055_v18 = vld [vmem:[%s14689_s5 + $0xcc] sm:$0xff]  }
 0x374   : > { %v3133_v20 = vadd.f32 %v3128_v19, %v3071_v11  ;;  %v3194_v21 = vadd.f32 %v3187_v12, %v3132_v17  ;;  %v11384_v22 = vpop.f32.mrb[83].mxu1  ;;  %v12050_v11 = vld [vmem:[%s14689_s5 + $0x78] sm:$0xff]   ;;  %v12054_v17 = vld [vmem:[%s14689_s5 + $0x88] sm:$0xff]   ;;  %v12056_v19 = vld [vmem:[%s14689_s5 + $0x90] sm:$0xff]  }
 0x375   : > { %v12059_v22 = vld [vmem:[%s14689_s5 + $0xdc] sm:$0xff]  }
 0x376   : > { %v3195_v23 = vadd.f32 %v3190_v14, %v3133_v20  ;;  %v3311_v24 = vpop.f32.mrb[88].mxu0  ;;  %v13125_v14 = vld [vmem:[#allocation3] sm:$0xff] }
 0x377   : > { %v11401_v25 = vpop.f32.mrb[89].mxu0  ;;  %v12057_v20 = vld [vmem:[%s14689_s5 + $0xd4] sm:$0xff]  }
 0x378   : > { %v3314_v26 = vpop.f32.mrb[90].mxu0  ;;  %v12063_v25 = vld [vmem:[%s14689_s5 + $0xec] ss:$0 sps:$4 sm:$0xff]  }
 0x379   : > { %v3249_v27 = vpop.f32.mrb[84].mxu1  ;;  %v11402_v28 = vpop.f32.mrb[91].mxu0 }
 0x37a   : > { %v3256_v29 = vadd.f32 %v3249_v27, %v3194_v21  ;;  %v11395_v30 = vpop.f32.mrb[85].mxu1  ;;  %v12058_v21 = vld [vmem:[%s14689_s5 + $0x98] sm:$0xff]   ;;  %v12064_v27 = vld [vmem:[%s14689_s5 + $0xb0] ss:$0 sps:$4 sm:$0xff]   ;;  %v4040_v28 = vsel %vm3730_vm4, %v12063_v25, 0 }
 0x37b   : > { %v3252_v31 = vpop.f32.mrb[86].mxu1  ;;  %v12065_v30 = vld [vmem:[%s14689_s5 + $0x12c] sm:$0xff]   ;;  %v12111_v25 = vld [vmem:[%s14689_s5 + $0x254] ss:$0 sps:$4 sm:$0xff]  }
 0x37c   : > { %v3257_v32 = vadd.f32 %v3252_v31, %v3195_v23  ;;  %v3318_v33 = vadd.f32 %v3311_v24, %v3256_v29  ;;  %v11396_v34 = vpop.f32.mrb[87].mxu1  ;;  %v12060_v23 = vld [vmem:[%s14689_s5 + $0xa0] sm:$0xff]   ;;  %v3931_v29 = vsel %vm3730_vm4, %v12064_v27, 0  ;;  %v12112_v27 = vld [vmem:[%s14689_s5 + $0x218] ss:$0 sps:$4 sm:$0xff]  }
 0x37d   : > { %v12061_v24 = vld [vmem:[%s14689_s5 + $0xe4] sm:$0xff]   ;;  %v12067_v34 = vld [vmem:[%s14689_s5 + $0x134] sm:$0xff]  }
 0x37e   : > { %v3319_v35 = vadd.f32 %v3314_v26, %v3257_v32  ;;  %v3435_v36 = vpop.f32.mrb[92].mxu0  ;;  %v12062_v26 = vld [vmem:[%s14689_s5 + $0xa8] sm:$0xff]   ;;  %v12066_v32 = vld [vmem:[%s14689_s5 + $0xf0] sm:$0xff]  }
 0x37f   : > { %v11413_v37 = vpop.f32.mrb[93].mxu0 }
 0x380   : > { %v3438_v38 = vpop.f32.mrb[94].mxu0  ;;  %v12070_v37 = vld [vmem:[%s14689_s5 + $0x100] sm:$0xff]  }
 0x381   : > { %v3373_v39 = vpop.f32.mrb[88].mxu1  ;;  %v11414_v40 = vpop.f32.mrb[95].mxu0 }
 0x382   : > { %v3380_v41 = vadd.f32 %v3373_v39, %v3318_v33  ;;  %v11407_v42 = vpop.f32.mrb[89].mxu1  ;;  %v12072_v39 = vld [vmem:[%s14689_s5 + $0x108] sm:$0xff]  }
 0x383   : > { %v3376_v43 = vpop.f32.mrb[90].mxu1  ;;  %v12073_v40 = vld [vmem:[%s14689_s5 + $0x14c] sm:$0xff]   ;;  %v12075_v42 = vld [vmem:[%s14689_s5 + $0x154] sm:$0xff]  }
 0x384   : > { %v3381_v44 = vadd.f32 %v3376_v43, %v3319_v35  ;;  %v3442_v45 = vadd.f32 %v3435_v36, %v3380_v41  ;;  %v11408_v46 = vpop.f32.mrb[91].mxu1  ;;  %v12068_v35 = vld [vmem:[%s14689_s5 + $0xf8] sm:$0xff]   ;;  %v12074_v41 = vld [vmem:[%s14689_s5 + $0x110] sm:$0xff]  }
 0x385   : > { %v12069_v36 = vld [vmem:[%s14689_s5 + $0x13c] sm:$0xff]  }
 0x386   : > { %v3443_v47 = vadd.f32 %v3438_v38, %v3381_v44  ;;  %v3559_v48 = vpop.f32.mrb[96].mxu0  ;;  %v12071_v38 = vld [vmem:[%s14689_s5 + $0x144] sm:$0xff]   ;;  %v12076_v43 = vld [vmem:[%s14689_s5 + $0x118] sm:$0xff]  }
 0x387   : > { %v11425_v49 = vpop.f32.mrb[97].mxu0  ;;  %v12077_v44 = vld [vmem:[%s14689_s5 + $0x15c] sm:$0xff]  }
 0x388   : > { %v3562_v50 = vpop.f32.mrb[98].mxu0  ;;  %v12078_v46 = vld [vmem:[%s14689_s5 + $0x120] sm:$0xff]  }
 0x389   : > { %v3497_v51 = vpop.f32.mrb[92].mxu1  ;;  %v11426_v52 = vpop.f32.mrb[99].mxu0 }
 0x38a   : > { %v3504_v53 = vadd.f32 %v3497_v51, %v3442_v45  ;;  %v11419_v54 = vpop.f32.mrb[93].mxu1  ;;  %v12079_v45 = vld [vmem:[%s14689_s5 + $0x164] ss:$0 sps:$4 sm:$0xff]   ;;  %v12082_v52 = vld [vmem:[%s14689_s5 + $0x168] sm:$0xff]  }
 0x38b   : > { %v3500_v55 = vpop.f32.mrb[94].mxu1  ;;  %v12083_v54 = vld [vmem:[%s14689_s5 + $0x1ac] sm:$0xff]  }
 0x38c   : > { %v3505_v56 = vadd.f32 %v3500_v55, %v3443_v47  ;;  %v3566_v57 = vadd.f32 %v3559_v48, %v3504_v53  ;;  %v11420_v58 = vpop.f32.mrb[95].mxu1  ;;  %v12080_v47 = vld [vmem:[%s14689_s5 + $0x128] ss:$0 sps:$4 sm:$0xff]   ;;  %v4258_v48 = vsel %vm3730_vm4, %v12079_v45, 0  ;;  %v12084_v55 = vld [vmem:[%s14689_s5 + $0x170] sm:$0xff]  }
 0x38d   : > { %v4149_v49 = vsel %vm3730_vm4, %v12080_v47, 0  ;;  %v12087_v58 = vld [vmem:[%s14689_s5 + $0x1bc] sm:$0xff]   ;;  %v12127_v45 = vld [vmem:[%s14689_s5 + $0x2cc] ss:$0 sps:$4 sm:$0xff]   ;;  %v12128_v47 = vld [vmem:[%s14689_s5 + $0x290] ss:$0 sps:$4 sm:$0xff]  }
 0x38e   : > { %v3567_v59 = vadd.f32 %v3562_v50, %v3505_v56  ;;  %v12081_v50 = vld [vmem:[%s14689_s5 + $0x1a4] sm:$0xff]   ;;  %v12085_v56 = vld [vmem:[%s14689_s5 + $0x1b4] sm:$0xff]  }
 0x391   : > { %v3621_v60 = vpop.f32.mrb[96].mxu1 }
 0x392   : > { %v3628_v62 = vadd.f32 %v3621_v60, %v3566_v57  ;;  %v11431_v63 = vpop.f32.mrb[97].mxu1  ;;  %v12086_v57 = vld [vmem:[%s14689_s5 + $0x178] sm:$0xff]   ;;  %v12089_v60 = vld [vmem:[%s14689_s5 + $0x1c4] sm:$0xff]  }
 0x393   : > { %v3624_v1 = vpop.f32.mrb[98].mxu1  ;;  %v12092_v63 = vld [vmem:[%s14689_s5 + $0x190] sm:$0xff]  }
 0x394   : > { %v3642_v3 = vadd.f32 %v3635_v61, %v3628_v62  ;;  %v3629_v6 = vadd.f32 %v3624_v1, %v3567_v59  ;;  %v11432_v4 = vpop.f32.mrb[99].mxu1  ;;  %v12088_v59 = vld [vmem:[%s14689_s5 + $0x180] sm:$0xff]   ;;  %v12090_v61 = vld [vmem:[%s14689_s5 + $0x188] sm:$0xff]   ;;  %v12093_v1 = vld [vmem:[%s14689_s5 + $0x1d4] sm:$0xff]  }
 0x395   : > { %v12091_v62 = vld [vmem:[%s14689_s5 + $0x1cc] sm:$0xff]  }
 0x396   : > { %v3643_v5 = vadd.f32 %v3640_v2, %v3629_v6  ;;  %v3644_v7 = vmax.f32 %v3642_v3, 0.0  ;;  %v12095_v2 = vld [vmem:[%s14689_s5 + $0x1dc] ss:$0 sps:$4 sm:$0xff]   ;;  %v12096_v6 = vld [vmem:[%s14689_s5 + $0x1a0] ss:$0 sps:$4 sm:$0xff]  }
 0x397   : > { %v12094_v3 = vld [vmem:[%s14689_s5 + $0x198] sm:$0xff]   ;;  %v4476_v4 = vsel %vm3730_vm4, %v12095_v2, 0  ;;  %v12143_v2 = vld [vmem:[%s14689_s5 + $0x344] ss:$0 sps:$4 sm:$0xff]  }
 0x398   : > { %v3645_v8 = vmax.f32 %v3643_v5, 0.0  ;;  %v4367_v5 = vsel %vm3730_vm4, %v12096_v6, 0  ;;  %v12144_v6 = vld [vmem:[%s14689_s5 + $0x308] ss:$0 sps:$4 sm:$0xff]  }
 0x39a   : > { %v13112_v10 = vpack.c.bf16 %v3645_v8, %v3644_v7  ;;  %v12097_v7 = vld [vmem:[%s14689_s5 + $0x21c] sm:$0xff]  }
 0x39c   : > { %11470 = vmatmul.mubr.msk.bf16.vlgmr.msra.gmra.mrb[100].mxu1 %vm3726_vm5, %v13112_v10  ;;  %v13120_v12 = vshrl.u32 %v13112_v10, 16  ;;  %v3881_v33 = vrot.slane %v13112_v10, 1  ;;  %v4099_v53 = vrot.slane %v13112_v10, 2 }
 0x39d   : > { %11494 = vmatpush3.bf16.msra.mxu1 %v12049_v9  ;;  %11509 = vmatprep.mubr.msk.bf16.mxu1 %vm14625_vm0, %v13125_v14  ;;  %v12098_v9 = vld [vmem:[%s14689_s5 + $0x1e0] sm:$0xff]  }
 0x39e   : > { %11450 = vmatmul.mubr.msk.bf16.vlgmr.msra.gmra.mrb[100].mxu0 %vm3726_vm5, %v13120_v12  ;;  %11495 = vmatprep.subr.bf16.mxu1 %v13125_v14  ;;  %v3990_v31 = vrot.slane %v13120_v12, 1  ;;  %v4208_v51 = vrot.slane %v13120_v12, 2  ;;  %v4426_v8 = vrot.slane %v13120_v12, 3 }
 0x39f   : > { %11474 = vmatpush3.bf16.msra.mxu0 %v12050_v11  ;;  %11489 = vmatprep.mubr.msk.bf16.mxu0 %vm14625_vm0, %v13125_v14  ;;  %v4317_v11 = vrot.slane %v13112_v10, 3 }
 0x3a0   : > { %11475 = vmatprep.subr.bf16.mxu0 %v13125_v14 }
 0x3a1   : > { %11496 = vmatpush3.bf16.msra.mxu1 %v12051_v13  ;;  %v12099_v13 = vld [vmem:[%s14689_s5 + $0x224] sm:$0xff]  }
 0x3a2   : > { %11497 = vmatprep.subr.bf16.mxu1 %v13125_v14 }
 0x3a3   : > { %11476 = vmatpush3.bf16.msra.mxu0 %v12052_v15  ;;  %v12100_v15 = vld [vmem:[%s14689_s5 + $0x1e8] sm:$0xff]  }
 0x3a4   : > { %11477 = vmatprep.subr.bf16.mxu0 %v13125_v14 }
 0x3a5   : > { %11498 = vmatpush3.bf16.msra.mxu1 %v12053_v16  ;;  %v12101_v16 = vld [vmem:[%s14689_s5 + $0x22c] sm:$0xff]  }
 0x3a6   : > { %11499 = vmatprep.subr.bf16.mxu1 %v13125_v14 }
 0x3a7   : > { %11478 = vmatpush3.bf16.msra.mxu0 %v12054_v17  ;;  %v12102_v17 = vld [vmem:[%s14689_s5 + $0x1f0] sm:$0xff]  }
 0x3a8   : > { %11479 = vmatprep.subr.bf16.mxu0 %v13125_v14 }
 0x3a9   : > { %11500 = vmatpush3.bf16.msra.mxu1 %v12055_v18  ;;  %v12103_v18 = vld [vmem:[%s14689_s5 + $0x234] sm:$0xff]  }
 0x3aa   : > { %11501 = vmatprep.subr.bf16.mxu1 %v13125_v14 }
 0x3ab   : > { %11480 = vmatpush3.bf16.msra.mxu0 %v12056_v19  ;;  %v12104_v19 = vld [vmem:[%s14689_s5 + $0x1f8] sm:$0xff]  }
 0x3ac   : > { %11481 = vmatprep.subr.bf16.mxu0 %v13125_v14 }
 0x3ad   : > { %11502 = vmatpush3.bf16.msra.mxu1 %v12057_v20  ;;  %v12105_v20 = vld [vmem:[%s14689_s5 + $0x23c] sm:$0xff]  }
 0x3ae   : > { %11503 = vmatprep.subr.bf16.mxu1 %v13125_v14 }
 0x3af   : > { %11482 = vmatpush3.bf16.msra.mxu0 %v12058_v21  ;;  %v12106_v21 = vld [vmem:[%s14689_s5 + $0x200] sm:$0xff]  }
 0x3b0   : > { %11483 = vmatprep.subr.bf16.mxu0 %v13125_v14 }
 0x3b1   : > { %11504 = vmatpush3.bf16.msra.mxu1 %v12059_v22  ;;  %v12107_v22 = vld [vmem:[%s14689_s5 + $0x244] sm:$0xff]  }
 0x3b2   : > { %11505 = vmatprep.subr.bf16.mxu1 %v13125_v14 }
 0x3b3   : > { %11484 = vmatpush3.bf16.msra.mxu0 %v12060_v23  ;;  %v12108_v23 = vld [vmem:[%s14689_s5 + $0x208] sm:$0xff]  }
 0x3b4   : > { %11485 = vmatprep.subr.bf16.mxu0 %v13125_v14 }
 0x3b5   : > { %11506 = vmatpush3.bf16.msra.mxu1 %v12061_v24  ;;  %v12109_v24 = vld [vmem:[%s14689_s5 + $0x24c] sm:$0xff]  }
 0x3b6   : > { %11507 = vmatprep.subr.bf16.mxu1 %v13125_v14 }
 0x3b7   : > { %11486 = vmatpush3.bf16.msra.mxu0 %v12062_v26  ;;  %v12110_v26 = vld [vmem:[%s14689_s5 + $0x210] sm:$0xff]  }
 0x3b8   : > { %11487 = vmatprep.subr.bf16.mxu0 %v13125_v14 }
 0x3b9   : > { %11508 = vmatpush3.bf16.msra.mxu1 %v4040_v28  ;;  %v4694_v28 = vsel %vm3730_vm4, %v12111_v25, 0 }
 0x3ba   : > { %11533 = vmatprep.subr.bf16.mxu1 %v13125_v14 }
 0x3bb   : > { %11488 = vmatpush3.bf16.msra.mxu0 %v3931_v29  ;;  %v4585_v29 = vsel %vm3730_vm4, %v12112_v27, 0 }
 0x3bc   : > { %11510 = vmatmul.mubr.msk.bf16.vlgmr.msra.gmra.mrb[104].mxu1 %vm3726_vm5, %v3990_v31  ;;  %11513 = vmatprep.subr.bf16.mxu0 %v13125_v14  ;;  %v4644_v31 = vrot.slane %v13120_v12, 4 }
 0x3bd   : > { %11534 = vmatpush3.bf16.msra.mxu1 %v12065_v30  ;;  %11549 = vmatprep.mubr.msk.bf16.mxu1 %vm14625_vm0, %v13125_v14  ;;  %v12113_v30 = vld [vmem:[%s14689_s5 + $0x294] sm:$0xff]  }
 0x3be   : > { %11490 = vmatmul.mubr.msk.bf16.vlgmr.msra.gmra.mrb[104].mxu0 %vm3726_vm5, %v3881_v33  ;;  %11535 = vmatprep.subr.bf16.mxu1 %v13125_v14  ;;  %v4535_v33 = vrot.slane %v13112_v10, 4 }
 0x3bf   : > { %11514 = vmatpush3.bf16.msra.mxu0 %v12066_v32  ;;  %11529 = vmatprep.mubr.msk.bf16.mxu0 %vm14625_vm0, %v13125_v14  ;;  %v12114_v32 = vld [vmem:[%s14689_s5 + $0x258] sm:$0xff]  }
 0x3c0   : > { %11515 = vmatprep.subr.bf16.mxu0 %v13125_v14 }
 0x3c1   : > { %11536 = vmatpush3.bf16.msra.mxu1 %v12067_v34  ;;  %v12115_v34 = vld [vmem:[%s14689_s5 + $0x29c] sm:$0xff]  }
 0x3c2   : > { %11537 = vmatprep.subr.bf16.mxu1 %v13125_v14 }
 0x3c3   : > { %11516 = vmatpush3.bf16.msra.mxu0 %v12068_v35  ;;  %v12116_v35 = vld [vmem:[%s14689_s5 + $0x260] sm:$0xff]  }
 0x3c4   : > { %11517 = vmatprep.subr.bf16.mxu0 %v13125_v14 }
 0x3c5   : > { %11538 = vmatpush3.bf16.msra.mxu1 %v12069_v36  ;;  %v12117_v36 = vld [vmem:[%s14689_s5 + $0x2a4] sm:$0xff]  }
 0x3c6   : > { %11539 = vmatprep.subr.bf16.mxu1 %v13125_v14 }
 0x3c7   : > { %11518 = vmatpush3.bf16.msra.mxu0 %v12070_v37  ;;  %v12118_v37 = vld [vmem:[%s14689_s5 + $0x268] sm:$0xff]  }
 0x3c8   : > { %11519 = vmatprep.subr.bf16.mxu0 %v13125_v14 }
 0x3c9   : > { %11540 = vmatpush3.bf16.msra.mxu1 %v12071_v38  ;;  %v12119_v38 = vld [vmem:[%s14689_s5 + $0x2ac] sm:$0xff]  }
 0x3ca   : > { %11541 = vmatprep.subr.bf16.mxu1 %v13125_v14 }
 0x3cb   : > { %11520 = vmatpush3.bf16.msra.mxu0 %v12072_v39  ;;  %v12120_v39 = vld [vmem:[%s14689_s5 + $0x270] sm:$0xff]  }
 0x3cc   : > { %11521 = vmatprep.subr.bf16.mxu0 %v13125_v14 }
 0x3cd   : > { %11542 = vmatpush3.bf16.msra.mxu1 %v12073_v40  ;;  %v12121_v40 = vld [vmem:[%s14689_s5 + $0x2b4] sm:$0xff]  }
 0x3ce   : > { %11543 = vmatprep.subr.bf16.mxu1 %v13125_v14 }
 0x3cf   : > { %11522 = vmatpush3.bf16.msra.mxu0 %v12074_v41  ;;  %v12122_v41 = vld [vmem:[%s14689_s5 + $0x278] sm:$0xff]  }
 0x3d0   : > { %11523 = vmatprep.subr.bf16.mxu0 %v13125_v14 }
 0x3d1   : > { %11544 = vmatpush3.bf16.msra.mxu1 %v12075_v42  ;;  %v12123_v42 = vld [vmem:[%s14689_s5 + $0x2bc] sm:$0xff]  }
 0x3d2   : > { %11545 = vmatprep.subr.bf16.mxu1 %v13125_v14 }
 0x3d3   : > { %11524 = vmatpush3.bf16.msra.mxu0 %v12076_v43  ;;  %v12124_v43 = vld [vmem:[%s14689_s5 + $0x280] sm:$0xff]  }
 0x3d4   : > { %11525 = vmatprep.subr.bf16.mxu0 %v13125_v14 }
 0x3d5   : > { %11546 = vmatpush3.bf16.msra.mxu1 %v12077_v44  ;;  %v12125_v44 = vld [vmem:[%s14689_s5 + $0x2c4] sm:$0xff]  }
 0x3d6   : > { %11547 = vmatprep.subr.bf16.mxu1 %v13125_v14 }
 0x3d7   : > { %11526 = vmatpush3.bf16.msra.mxu0 %v12078_v46  ;;  %v12126_v46 = vld [vmem:[%s14689_s5 + $0x288] sm:$0xff]  }
 0x3d8   : > { %11527 = vmatprep.subr.bf16.mxu0 %v13125_v14 }
 0x3d9   : > { %11548 = vmatpush3.bf16.msra.mxu1 %v4258_v48  ;;  %v4912_v48 = vsel %vm3730_vm4, %v12127_v45, 0 }
 0x3da   : > { %11573 = vmatprep.subr.bf16.mxu1 %v13125_v14 }
 0x3db   : > { %11528 = vmatpush3.bf16.msra.mxu0 %v4149_v49  ;;  %v4803_v49 = vsel %vm3730_vm4, %v12128_v47, 0 }
 0x3dc   : > { %11550 = vmatmul.mubr.msk.bf16.vlgmr.msra.gmra.mrb[108].mxu1 %vm3726_vm5, %v4208_v51  ;;  %11553 = vmatprep.subr.bf16.mxu0 %v13125_v14  ;;  %v4862_v51 = vrot.slane %v13120_v12, 5 }
 0x3dd   : > { %11574 = vmatpush3.bf16.msra.mxu1 %v12081_v50  ;;  %11589 = vmatprep.mubr.msk.bf16.mxu1 %vm14625_vm0, %v13125_v14  ;;  %v12129_v50 = vld [vmem:[%s14689_s5 + $0x30c] sm:$0xff]  }
 0x3de   : > { %11530 = vmatmul.mubr.msk.bf16.vlgmr.msra.gmra.mrb[108].mxu0 %vm3726_vm5, %v4099_v53  ;;  %11575 = vmatprep.subr.bf16.mxu1 %v13125_v14  ;;  %v4753_v53 = vrot.slane %v13112_v10, 5 }
 0x3df   : > { %11554 = vmatpush3.bf16.msra.mxu0 %v12082_v52  ;;  %11569 = vmatprep.mubr.msk.bf16.mxu0 %vm14625_vm0, %v13125_v14  ;;  %v12130_v52 = vld [vmem:[%s14689_s5 + $0x2d0] sm:$0xff]  }
 0x3e0   : > { %11555 = vmatprep.subr.bf16.mxu0 %v13125_v14 }
 0x3e1   : > { %11576 = vmatpush3.bf16.msra.mxu1 %v12083_v54  ;;  %v12131_v54 = vld [vmem:[%s14689_s5 + $0x314] sm:$0xff]  }
 0x3e2   : > { %11577 = vmatprep.subr.bf16.mxu1 %v13125_v14 }
 0x3e3   : > { %11556 = vmatpush3.bf16.msra.mxu0 %v12084_v55  ;;  %v12132_v55 = vld [vmem:[%s14689_s5 + $0x2d8] sm:$0xff]  }
 0x3e4   : > { %11557 = vmatprep.subr.bf16.mxu0 %v13125_v14 }
 0x3e5   : > { %11578 = vmatpush3.bf16.msra.mxu1 %v12085_v56  ;;  %v12133_v56 = vld [vmem:[%s14689_s5 + $0x31c] sm:$0xff]  }
 0x3e6   : > { %11579 = vmatprep.subr.bf16.mxu1 %v13125_v14 }
 0x3e7   : > { %11558 = vmatpush3.bf16.msra.mxu0 %v12086_v57  ;;  %v12134_v57 = vld [vmem:[%s14689_s5 + $0x2e0] sm:$0xff]  }
 0x3e8   : > { %11559 = vmatprep.subr.bf16.mxu0 %v13125_v14 }
 0x3e9   : > { %11580 = vmatpush3.bf16.msra.mxu1 %v12087_v58  ;;  %v12135_v58 = vld [vmem:[%s14689_s5 + $0x324] sm:$0xff]  }
 0x3ea   : > { %11581 = vmatprep.subr.bf16.mxu1 %v13125_v14 }
 0x3eb   : > { %11560 = vmatpush3.bf16.msra.mxu0 %v12088_v59  ;;  %v12136_v59 = vld [vmem:[%s14689_s5 + $0x2e8] sm:$0xff]  }
 0x3ec   : > { %11561 = vmatprep.subr.bf16.mxu0 %v13125_v14 }
 0x3ed   : > { %11582 = vmatpush3.bf16.msra.mxu1 %v12089_v60  ;;  %v12137_v60 = vld [vmem:[%s14689_s5 + $0x32c] sm:$0xff]  }
 0x3ee   : > { %11583 = vmatprep.subr.bf16.mxu1 %v13125_v14 }
 0x3ef   : > { %11562 = vmatpush3.bf16.msra.mxu0 %v12090_v61  ;;  %v12138_v61 = vld [vmem:[%s14689_s5 + $0x2f0] sm:$0xff]  }
 0x3f0   : > { %11563 = vmatprep.subr.bf16.mxu0 %v13125_v14 }
 0x3f1   : > { %11584 = vmatpush3.bf16.msra.mxu1 %v12091_v62  ;;  %v12139_v62 = vld [vmem:[%s14689_s5 + $0x334] sm:$0xff]  }
 0x3f2   : > { %11585 = vmatprep.subr.bf16.mxu1 %v13125_v14 }
 0x3f3   : > { %11564 = vmatpush3.bf16.msra.mxu0 %v12092_v63  ;;  %v12140_v63 = vld [vmem:[%s14689_s5 + $0x2f8] sm:$0xff]  }
 0x3f4   : > { %11565 = vmatprep.subr.bf16.mxu0 %v13125_v14 }
 0x3f5   : > { %11586 = vmatpush3.bf16.msra.mxu1 %v12093_v1  ;;  %v12141_v1 = vld [vmem:[%s14689_s5 + $0x33c] sm:$0xff]  }
 0x3f6   : > { %11587 = vmatprep.subr.bf16.mxu1 %v13125_v14 }
 0x3f7   : > { %11566 = vmatpush3.bf16.msra.mxu0 %v12094_v3  ;;  %v12142_v3 = vld [vmem:[%s14689_s5 + $0x300] sm:$0xff]  }
 0x3f8   : > { %11567 = vmatprep.subr.bf16.mxu0 %v13125_v14 }
 0x3f9   : > { %11588 = vmatpush3.bf16.msra.mxu1 %v4476_v4  ;;  %v5130_v4 = vsel %vm3730_vm4, %v12143_v2, 0 }
 0x3fa   : > { %11613 = vmatprep.subr.bf16.mxu1 %v13125_v14 }
 0x3fb   : > { %11568 = vmatpush3.bf16.msra.mxu0 %v4367_v5  ;;  %v5021_v5 = vsel %vm3730_vm4, %v12144_v6, 0 }
 0x3fc   : > { %11590 = vmatmul.mubr.msk.bf16.vlgmr.msra.gmra.mrb[112].mxu1 %vm3726_vm5, %v4426_v8  ;;  %11593 = vmatprep.subr.bf16.mxu0 %v13125_v14  ;;  %v5080_v8 = vrot.slane %v13120_v12, 6 }
 0x3fd   : > { %11614 = vmatpush3.bf16.msra.mxu1 %v12097_v7  ;;  %11629 = vmatprep.mubr.msk.bf16.mxu1 %vm14625_vm0, %v13125_v14  ;;  %v12145_v7 = vld [vmem:[%s14689_s5 + $0x384] sm:$0xff]  }
 0x3fe   : > { %11570 = vmatmul.mubr.msk.bf16.vlgmr.msra.gmra.mrb[112].mxu0 %vm3726_vm5, %v4317_v11  ;;  %11615 = vmatprep.subr.bf16.mxu1 %v13125_v14  ;;  %v4971_v11 = vrot.slane %v13112_v10, 6 }
 0x3ff   : > { %11594 = vmatpush3.bf16.msra.mxu0 %v12098_v9  ;;  %11609 = vmatprep.mubr.msk.bf16.mxu0 %vm14625_vm0, %v13125_v14  ;;  %v12146_v9 = vld [vmem:[%s14689_s5 + $0x348] sm:$0xff]  }
 0x400   : > { %11595 = vmatprep.subr.bf16.mxu0 %v13125_v14 }
 0x401   : > { %11616 = vmatpush3.bf16.msra.mxu1 %v12099_v13  ;;  %v12147_v13 = vld [vmem:[%s14689_s5 + $0x38c] sm:$0xff]  }
 0x402   : > { %11617 = vmatprep.subr.bf16.mxu1 %v13125_v14 }
 0x403   : > { %11596 = vmatpush3.bf16.msra.mxu0 %v12100_v15  ;;  %v12148_v15 = vld [vmem:[%s14689_s5 + $0x350] sm:$0xff]  }
 0x404   : > { %11597 = vmatprep.subr.bf16.mxu0 %v13125_v14 }
 0x405   : > { %11618 = vmatpush3.bf16.msra.mxu1 %v12101_v16  ;;  %v12149_v16 = vld [vmem:[%s14689_s5 + $0x394] sm:$0xff]  }
 0x406   : > { %11619 = vmatprep.subr.bf16.mxu1 %v13125_v14 }
 0x407   : > { %11598 = vmatpush3.bf16.msra.mxu0 %v12102_v17  ;;  %v12150_v17 = vld [vmem:[%s14689_s5 + $0x358] sm:$0xff]  }
 0x408   : > { %11599 = vmatprep.subr.bf16.mxu0 %v13125_v14 }
 0x409   : > { %11620 = vmatpush3.bf16.msra.mxu1 %v12103_v18  ;;  %v12151_v18 = vld [vmem:[%s14689_s5 + $0x39c] sm:$0xff]  }
 0x40a   : > { %11621 = vmatprep.subr.bf16.mxu1 %v13125_v14 }
 0x40b   : > { %11600 = vmatpush3.bf16.msra.mxu0 %v12104_v19  ;;  %v12152_v19 = vld [vmem:[%s14689_s5 + $0x360] sm:$0xff]  }
 0x40c   : > { %11601 = vmatprep.subr.bf16.mxu0 %v13125_v14 }
 0x40d   : > { %11622 = vmatpush3.bf16.msra.mxu1 %v12105_v20  ;;  %v12153_v20 = vld [vmem:[%s14689_s5 + $0x3a4] sm:$0xff]  }
 0x40e   : > { %11623 = vmatprep.subr.bf16.mxu1 %v13125_v14 }
 0x40f   : > { %11602 = vmatpush3.bf16.msra.mxu0 %v12106_v21  ;;  %v12154_v21 = vld [vmem:[%s14689_s5 + $0x368] sm:$0xff]  }
 0x410   : > { %11603 = vmatprep.subr.bf16.mxu0 %v13125_v14 }
 0x411   : > { %11624 = vmatpush3.bf16.msra.mxu1 %v12107_v22  ;;  %v12155_v22 = vld [vmem:[%s14689_s5 + $0x3ac] sm:$0xff]  }
 0x412   : > { %11625 = vmatprep.subr.bf16.mxu1 %v13125_v14 }
 0x413   : > { %11604 = vmatpush3.bf16.msra.mxu0 %v12108_v23 }
 0x414   : > { %11605 = vmatprep.subr.bf16.mxu0 %v13125_v14 }
 0x415   : > { %11626 = vmatpush3.bf16.msra.mxu1 %v12109_v24  ;;  %v12156_v24 = vld [vmem:[%s14689_s5 + $0x370] sm:$0xff]  }
 0x416   : > { %11627 = vmatprep.subr.bf16.mxu1 %v13125_v14 }
 0x417   : > { %11606 = vmatpush3.bf16.msra.mxu0 %v12110_v26 }
 0x418   : > { %11607 = vmatprep.subr.bf16.mxu0 %v13125_v14 }
 0x419   : > { %11628 = vmatpush3.bf16.msra.mxu1 %v4694_v28  ;;  %v12157_v28 = vld [vmem:[%s14689_s5 + $0x3b4] sm:$0xff]  }
 0x41a   : > { %11653 = vmatprep.subr.bf16.mxu1 %v13125_v14 }
 0x41b   : > { %11608 = vmatpush3.bf16.msra.mxu0 %v4585_v29 }
 0x41c   : > { %11630 = vmatmul.mubr.msk.bf16.vlgmr.msra.gmra.mrb[116].mxu1 %vm3726_vm5, %v4644_v31  ;;  %11633 = vmatprep.subr.bf16.mxu0 %v13125_v14 }
 0x41d   : > { %11654 = vmatpush3.bf16.msra.mxu1 %v12113_v30  ;;  %11669 = vmatprep.mubr.msk.bf16.mxu1 %vm14625_vm0, %v13125_v14 }
 0x41e   : > { %11610 = vmatmul.mubr.msk.bf16.vlgmr.msra.gmra.mrb[116].mxu0 %vm3726_vm5, %v4535_v33  ;;  %11655 = vmatprep.subr.bf16.mxu1 %v13125_v14 }
 0x41f   : > { %11634 = vmatpush3.bf16.msra.mxu0 %v12114_v32  ;;  %11649 = vmatprep.mubr.msk.bf16.mxu0 %vm14625_vm0, %v13125_v14  ;;  %v12159_v32 = vld [vmem:[%s14689_s5 + $0x3bc] ss:$0 sps:$4 sm:$0xff]  }
 0x420   : > { %11635 = vmatprep.subr.bf16.mxu0 %v13125_v14 }
 0x421   : > { %11656 = vmatpush3.bf16.msra.mxu1 %v12115_v34  ;;  %v12158_v34 = vld [vmem:[%s14689_s5 + $0x378] sm:$0xff]  }
 0x422   : > { %11657 = vmatprep.subr.bf16.mxu1 %v13125_v14 }
 0x423   : > { %11636 = vmatpush3.bf16.msra.mxu0 %v12116_v35 }
 0x424   : > { %11637 = vmatprep.subr.bf16.mxu0 %v13125_v14 }
 0x425   : > { %11658 = vmatpush3.bf16.msra.mxu1 %v12117_v36  ;;  %v12160_v36 = vld [vmem:[%s14689_s5 + $0x380] ss:$0 sps:$4 sm:$0xff]   ;;  %s12280_s5 = smov 84  }
 0x426   : > { %11659 = vmatprep.subr.bf16.mxu1 %v13125_v14 }
 0x427   : > { %11638 = vmatpush3.bf16.msra.mxu0 %v12118_v37  ;;  %v5348_v37 = vsel %vm3730_vm4, %v12159_v32, 0 }
 0x428   : > { %11639 = vmatprep.subr.bf16.mxu0 %v13125_v14 }
 0x429   : > { %11660 = vmatpush3.bf16.msra.mxu1 %v12119_v38  ;;  %v5239_v38 = vsel %vm3730_vm4, %v12160_v36, 0  ;;  %vm5412_vm4 = vcmask 261120  }
 0x42a   : > { %11661 = vmatprep.subr.bf16.mxu1 %v13125_v14 }
 0x42b   : > { %11640 = vmatpush3.bf16.msra.mxu0 %v12120_v39  ;;  %v5298_v39 = vrot.slane %v13120_v12, 7 }
 0x42c   : > { %11641 = vmatprep.subr.bf16.mxu0 %v13125_v14 }
 0x42d   : > { %11662 = vmatpush3.bf16.msra.mxu1 %v12121_v40  ;;  %v5189_v40 = vrot.slane %v13112_v10, 7 }
 0x42e   : > { %11663 = vmatprep.subr.bf16.mxu1 %v13125_v14 }
 0x42f   : > { %11642 = vmatpush3.bf16.msra.mxu0 %v12122_v41 }
 0x430   : > { %11643 = vmatprep.subr.bf16.mxu0 %v13125_v14 }
 0x431   : > { %11664 = vmatpush3.bf16.msra.mxu1 %v12123_v42 }
 0x432   : > { %11665 = vmatprep.subr.bf16.mxu1 %v13125_v14 }
 0x433   : > { %11644 = vmatpush3.bf16.msra.mxu0 %v12124_v43 }
 0x434   : > { %11645 = vmatprep.subr.bf16.mxu0 %v13125_v14 }
 0x435   : > { %11666 = vmatpush3.bf16.msra.mxu1 %v12125_v44 }
 0x436   : > { %11667 = vmatprep.subr.bf16.mxu1 %v13125_v14 }
 0x437   : > { %11646 = vmatpush3.bf16.msra.mxu0 %v12126_v46 }
 0x438   : > { %11647 = vmatprep.subr.bf16.mxu0 %v13125_v14 }
 0x439   : > { %11668 = vmatpush3.bf16.msra.mxu1 %v4912_v48 }
 0x43a   : > { %11693 = vmatprep.subr.bf16.mxu1 %v13125_v14 }
 0x43b   : > { %11648 = vmatpush3.bf16.msra.mxu0 %v4803_v49 }
 0x43c   : > { %11670 = vmatmul.mubr.msk.bf16.vlgmr.msra.gmra.mrb[120].mxu1 %vm3726_vm5, %v4862_v51  ;;  %11673 = vmatprep.subr.bf16.mxu0 %v13125_v14 }
 0x43d   : > { %11694 = vmatpush3.bf16.msra.mxu1 %v12129_v50  ;;  %11709 = vmatprep.mubr.msk.bf16.mxu1 %vm14625_vm0, %v13125_v14 }
 0x43e   : > { %11650 = vmatmul.mubr.msk.bf16.vlgmr.msra.gmra.mrb[120].mxu0 %vm3726_vm5, %v4753_v53  ;;  %11695 = vmatprep.subr.bf16.mxu1 %v13125_v14 }
 0x43f   : > { %11674 = vmatpush3.bf16.msra.mxu0 %v12130_v52  ;;  %11689 = vmatprep.mubr.msk.bf16.mxu0 %vm14625_vm0, %v13125_v14 }
 0x440   : > { %11675 = vmatprep.subr.bf16.mxu0 %v13125_v14 }
 0x441   : > { %11696 = vmatpush3.bf16.msra.mxu1 %v12131_v54 }
 0x442   : > { %11697 = vmatprep.subr.bf16.mxu1 %v13125_v14 }
 0x443   : > { %11676 = vmatpush3.bf16.msra.mxu0 %v12132_v55 }
 0x444   : > { %11677 = vmatprep.subr.bf16.mxu0 %v13125_v14 }
 0x445   : > { %11698 = vmatpush3.bf16.msra.mxu1 %v12133_v56 }
 0x446   : > { %11699 = vmatprep.subr.bf16.mxu1 %v13125_v14 }
 0x447   : > { %11678 = vmatpush3.bf16.msra.mxu0 %v12134_v57 }
 0x448   : > { %11679 = vmatprep.subr.bf16.mxu0 %v13125_v14 }
 0x449   : > { %11700 = vmatpush3.bf16.msra.mxu1 %v12135_v58 }
 0x44a   : > { %11701 = vmatprep.subr.bf16.mxu1 %v13125_v14 }
 0x44b   : > { %11680 = vmatpush3.bf16.msra.mxu0 %v12136_v59 }
 0x44c   : > { %11681 = vmatprep.subr.bf16.mxu0 %v13125_v14 }
 0x44d   : > { %11702 = vmatpush3.bf16.msra.mxu1 %v12137_v60 }
 0x44e   : > { %11703 = vmatprep.subr.bf16.mxu1 %v13125_v14 }
 0x44f   : > { %11682 = vmatpush3.bf16.msra.mxu0 %v12138_v61 }
 0x450   : > { %11683 = vmatprep.subr.bf16.mxu0 %v13125_v14 }
 0x451   : > { %11704 = vmatpush3.bf16.msra.mxu1 %v12139_v62 }
 0x452   : > { %11705 = vmatprep.subr.bf16.mxu1 %v13125_v14 }
 0x453   : > { %11684 = vmatpush3.bf16.msra.mxu0 %v12140_v63 }
 0x454   : > { %11685 = vmatprep.subr.bf16.mxu0 %v13125_v14 }
 0x455   : > { %11706 = vmatpush3.bf16.msra.mxu1 %v12141_v1 }
 0x456   : > { %11707 = vmatprep.subr.bf16.mxu1 %v13125_v14 }
 0x457   : > { %11686 = vmatpush3.bf16.msra.mxu0 %v12142_v3 }
 0x458   : > { %11687 = vmatprep.subr.bf16.mxu0 %v13125_v14 }
 0x459   : > { %11708 = vmatpush3.bf16.msra.mxu1 %v5130_v4 }
 0x45a   : > { %11733 = vmatprep.subr.bf16.mxu1 %v13125_v14 }
 0x45b   : > { %11688 = vmatpush3.bf16.msra.mxu0 %v5021_v5  ;;  %v12161_v5 = vld [vmem:[%s14523_s7] sm:$0xff]  }
 0x45c   : > { %11710 = vmatmul.mubr.msk.bf16.vlgmr.msra.gmra.mrb[124].mxu1 %vm3726_vm5, %v5080_v8  ;;  %11713 = vmatprep.subr.bf16.mxu0 %v13125_v14 }
 0x45d   : > { %11734 = vmatpush3.bf16.msra.mxu1 %v12145_v7  ;;  %11749 = vmatprep.mubr.msk.bf16.mxu1 %vm14625_vm0, %v13125_v14  ;;  %v12162_v7 = vld [vmem:[%s14523_s7 + $0x8] sm:$0xff]  }
 0x45e   : > { %11690 = vmatmul.mubr.msk.bf16.vlgmr.msra.gmra.mrb[124].mxu0 %vm3726_vm5, %v4971_v11  ;;  %11735 = vmatprep.subr.bf16.mxu1 %v13125_v14 }
 0x45f   : > { %11714 = vmatpush3.bf16.msra.mxu0 %v12146_v9  ;;  %11729 = vmatprep.mubr.msk.bf16.mxu0 %vm14625_vm0, %v13125_v14 }
 0x460   : > { %11715 = vmatprep.subr.bf16.mxu0 %v13125_v14 }
 0x461   : > { %11736 = vmatpush3.bf16.msra.mxu1 %v12147_v13 }
 0x462   : > { %11737 = vmatprep.subr.bf16.mxu1 %v13125_v14 }
 0x463   : > { %11716 = vmatpush3.bf16.msra.mxu0 %v12148_v15 }
 0x464   : > { %11717 = vmatprep.subr.bf16.mxu0 %v13125_v14 }
 0x465   : > { %11738 = vmatpush3.bf16.msra.mxu1 %v12149_v16 }
 0x466   : > { %11739 = vmatprep.subr.bf16.mxu1 %v13125_v14 }
 0x467   : > { %11718 = vmatpush3.bf16.msra.mxu0 %v12150_v17 }
 0x468   : > { %11719 = vmatprep.subr.bf16.mxu0 %v13125_v14 }
 0x469   : > { %11740 = vmatpush3.bf16.msra.mxu1 %v12151_v18 }
 0x46a   : > { %11741 = vmatprep.subr.bf16.mxu1 %v13125_v14 }
 0x46b   : > { %11720 = vmatpush3.bf16.msra.mxu0 %v12152_v19 }
 0x46c   : > { %11721 = vmatprep.subr.bf16.mxu0 %v13125_v14 }
 0x46d   : > { %11742 = vmatpush3.bf16.msra.mxu1 %v12153_v20 }
 0x46e   : > { %11743 = vmatprep.subr.bf16.mxu1 %v13125_v14 }
 0x46f   : > { %11722 = vmatpush3.bf16.msra.mxu0 %v12154_v21  ;;  %v3858_v23 = vpop.f32.mrb[100].mxu1 }
 0x470   : > { %v11471_v25 = vpop.f32.mrb[101].mxu1  ;;  %11723 = vmatprep.subr.bf16.mxu0 %v13125_v14 }
 0x471   : > { %11744 = vmatpush3.bf16.msra.mxu1 %v12155_v22  ;;  %v3768_v26 = vpop.f32.mrb[100].mxu0  ;;  %v3861_v27 = vpop.f32.mrb[102].mxu1 }
 0x472   : > { %v3859_v29 = vadd.f32 %v3858_v23, %v3768_v26  ;;  %v11451_v30 = vpop.f32.mrb[101].mxu0  ;;  %v11472_v31 = vpop.f32.mrb[103].mxu1  ;;  %11745 = vmatprep.subr.bf16.mxu1 %v13125_v14 }
 0x473   : > { %11724 = vmatpush3.bf16.msra.mxu0 %v12156_v24  ;;  %v3771_v33 = vpop.f32.mrb[102].mxu0 }
 0x474   : > { %v11452_v35 = vpop.f32.mrb[103].mxu0  ;;  %11725 = vmatprep.subr.bf16.mxu0 %v13125_v14 }
 0x475   : > { %11746 = vmatpush3.bf16.msra.mxu1 %v12157_v28 }
 0x476   : > { %11747 = vmatprep.subr.bf16.mxu1 %v13125_v14 }
 0x477   : > { %11726 = vmatpush3.bf16.msra.mxu0 %v12158_v34 }
 0x478   : > { %11727 = vmatprep.subr.bf16.mxu0 %v13125_v14 }
 0x479   : > { %11748 = vmatpush3.bf16.msra.mxu1 %v5348_v37 }
 0x47a   : > { %11761 = vmatprep.subr.bf16.mxu1 %v13125_v14 }
 0x47b   : > { %11728 = vmatpush3.bf16.msra.mxu0 %v5239_v38 }
 0x47c   : > { %11750 = vmatmul.mubr.msk.bf16.vlgmr.msra.gmra.mrb[128].mxu1 %vm3726_vm5, %v5298_v39  ;;  %11753 = vmatprep.subr.bf16.mxu0 %v13125_v14 }
 0x47d   : > { %11763 = vmatprep.mubr.msk.bf16.mxu1 %vm14625_vm0, %v13125_v14 }
 0x47e   : > { %11730 = vmatmul.mubr.msk.bf16.vlgmr.msra.gmra.mrb[128].mxu0 %vm3726_vm5, %v5189_v40  ;;  %vm5472_vm5 = vcmask 1044480  }
 0x47f   : > { %11757 = vmatprep.mubr.msk.bf16.mxu0 %vm14625_vm0, %v13125_v14  ;;  %11754 = vmatpush3.bf16.msra.mxu0 %v12161_v5  ;;  %vm5920_vm0 = vcmask 884512  }
 0x480   : > { %11755 = vmatprep.subr.bf16.mxu0 %v13125_v14 }
 0x483   : > { %11756 = vmatpush3.bf16.msra.mxu0 %v12162_v7 }
 0x48f   : > { %v4076_v41 = vpop.f32.mrb[104].mxu1 }
 0x490   : > { %v11511_v42 = vpop.f32.mrb[105].mxu1 }
 0x491   : > { %v3967_v12 = vpop.f32.mrb[104].mxu0  ;;  %v4079_v43 = vpop.f32.mrb[106].mxu1 }
 0x492   : > { %v3973_v44 = vadd.f32 %v3967_v12, %v3859_v29  ;;  %v11491_v45 = vpop.f32.mrb[105].mxu0  ;;  %v11512_v46 = vpop.f32.mrb[107].mxu1 }
 0x493   : > { %v3970_v47 = vpop.f32.mrb[106].mxu0 }
 0x494   : > { %v11492_v48 = vpop.f32.mrb[107].mxu0  ;;  %v4082_v10 = vadd.f32 %v4076_v41, %v3973_v44  ;;  %v5391_v47 = vld [vmem:[%s14522_s6] sm:$0x1] }
 0x4af   : > { %v4294_v49 = vpop.f32.mrb[108].mxu1 }
 0x4b0   : > { %v11551_v50 = vpop.f32.mrb[109].mxu1 }
 0x4b1   : > { %v4185_v51 = vpop.f32.mrb[108].mxu0  ;;  %v4297_v52 = vpop.f32.mrb[110].mxu1 }
 0x4b2   : > { %v4191_v53 = vadd.f32 %v4185_v51, %v4082_v10  ;;  %v11531_v54 = vpop.f32.mrb[109].mxu0  ;;  %v11552_v55 = vpop.f32.mrb[111].mxu1 }
 0x4b3   : > { %v4188_v56 = vpop.f32.mrb[110].mxu0  ;;  %v5399_v55 = vld [vmem:[%s14524_s8] sm:$0x1] }
 0x4b4   : > { %v11532_v57 = vpop.f32.mrb[111].mxu0  ;;  %v4300_v58 = vadd.f32 %v4294_v49, %v4191_v53  ;;  %v12163_v53 = vld [vmem:[%s14525_s9] sm:$0x1f]  }
 0x4b5   : > { %v5474_v54 = vsel %vm5472_vm5, %v12163_v53, 0  ;;  %vm5907_vm5 = vcmask 753312  }
 0x4b6   : > { %11762 = vmatpush3.bf16.msra.mxu1 %v5474_v54 }
 0x4cf   : > { %v4512_v59 = vpop.f32.mrb[112].mxu1 }
 0x4d0   : > { %v11591_v60 = vpop.f32.mrb[113].mxu1 }
 0x4d1   : > { %v4403_v61 = vpop.f32.mrb[112].mxu0  ;;  %v4515_v62 = vpop.f32.mrb[114].mxu1 }
 0x4d2   : > { %v4409_v63 = vadd.f32 %v4403_v61, %v4300_v58  ;;  %v11571_v1 = vpop.f32.mrb[113].mxu0  ;;  %v11592_v2 = vpop.f32.mrb[115].mxu1 }
 0x4d3   : > { %v4406_v3 = vpop.f32.mrb[114].mxu0  ;;  %v5522_v1 = vld [vmem:[%s14527_s11 + $0x20] sm:$0xff]  ;;  %v5519_v2 = vld [vmem:[%s14527_s11 + $0x8] sm:$0xff] }
 0x4d4   : > { %v11572_v6 = vpop.f32.mrb[115].mxu0  ;;  %v4518_v4 = vadd.f32 %v4512_v59, %v4409_v63  ;;  %v5518_v63 = vld [vmem:[%s14527_s11] sm:$0xff] }
 0x4d5   : > { %v10862_v3 = vcombine.high %v5518_v63, %v5522_v1  ;;  %v5523_v6 = vld [vmem:[%s14527_s11 + $0x28] sm:$0xff] }
 0x4d6   : > { %v10863_v5 = vcombine.low %v5519_v2, %v5523_v6  ;;  %v10864_v7 = vcombine.high %v5519_v2, %v5523_v6 }
 0x4d7   : > { %5659 = vmatprep.subr.bf16.mxu0 %v10862_v3 }
 0x4d8   : > { %5700 = vmatprep.subr.bf16.mxu1 %v10864_v7 }
 0x4ef   : > { %v4730_v8 = vpop.f32.mrb[116].mxu1 }
 0x4f0   : > { %v11631_v9 = vpop.f32.mrb[117].mxu1 }
 0x4f1   : > { %v4621_v11 = vpop.f32.mrb[116].mxu0  ;;  %v4733_v13 = vpop.f32.mrb[118].mxu1  ;;  %v5530_v9 = vld [vmem:[%s14527_s11 + $0x60] sm:$0xff] }
 0x4f2   : > { %v4627_v15 = vadd.f32 %v4621_v11, %v4518_v4  ;;  %v11611_v16 = vpop.f32.mrb[117].mxu0  ;;  %v11632_v17 = vpop.f32.mrb[119].mxu1  ;;  %v10861_v4 = vcombine.low %v5518_v63, %v5522_v1  ;;  %v5527_v11 = vld [vmem:[%s14527_s11 + $0x48] sm:$0xff] }
 0x4f3   : > { %v4624_v18 = vpop.f32.mrb[118].mxu0 }
 0x4f4   : > { %v11612_v19 = vpop.f32.mrb[119].mxu0  ;;  %v4736_v20 = vadd.f32 %v4730_v8, %v4627_v15  ;;  %v5526_v8 = vld [vmem:[%s14527_s11 + $0x40] sm:$0xff]  ;;  %v5531_v15 = vld [vmem:[%s14527_s11 + $0x68] sm:$0xff] }
 0x4f5   : > { %v10870_v13 = vcombine.high %v5526_v8, %v5530_v9  ;;  %v10869_v16 = vcombine.low %v5526_v8, %v5530_v9  ;;  %v10871_v17 = vcombine.low %v5527_v11, %v5531_v15  ;;  %v10872_v18 = vcombine.high %v5527_v11, %v5531_v15  ;;  %v5520_v19 = vld [vmem:[%s14527_s11 + $0x10] sm:$0xff] }
 0x50f   : > { %v4948_v21 = vpop.f32.mrb[120].mxu1 }
 0x510   : > { %v11671_v22 = vpop.f32.mrb[121].mxu1 }
 0x511   : > { %v4839_v23 = vpop.f32.mrb[120].mxu0  ;;  %v4951_v24 = vpop.f32.mrb[122].mxu1 }
 0x512   : > { %v4845_v25 = vadd.f32 %v4839_v23, %v4736_v20  ;;  %v11651_v26 = vpop.f32.mrb[121].mxu0  ;;  %v11672_v27 = vpop.f32.mrb[123].mxu1  ;;  %v5524_v20 = vld [vmem:[%s14527_s11 + $0x30] sm:$0xff]  ;;  %v5525_v23 = vld [vmem:[%s14527_s11 + $0x38] sm:$0xff] }
 0x513   : > { %v4842_v28 = vpop.f32.mrb[122].mxu0  ;;  %v10866_v22 = vcombine.high %v5520_v19, %v5524_v20  ;;  %v10865_v24 = vcombine.low %v5520_v19, %v5524_v20  ;;  %v5462_v27 = vld [vmem:[%s14526_s10] sm:$0x1] }
 0x514   : > { %v11652_v29 = vpop.f32.mrb[123].mxu0  ;;  %v4954_v30 = vadd.f32 %v4948_v21, %v4845_v25  ;;  %v5521_v21 = vld [vmem:[%s14527_s11 + $0x18] sm:$0xff] }
 0x515   : > { %v10867_v25 = vcombine.low %v5521_v21, %v5525_v23  ;;  %v10868_v26 = vcombine.high %v5521_v21, %v5525_v23 }
 0x52f   : > { %v5166_v31 = vpop.f32.mrb[124].mxu1 }
 0x530   : > { %v11711_v32 = vpop.f32.mrb[125].mxu1 }
 0x531   : > { %v5057_v33 = vpop.f32.mrb[124].mxu0  ;;  %v5169_v34 = vpop.f32.mrb[126].mxu1 }
 0x532   : > { %v5063_v35 = vadd.f32 %v5057_v33, %v4954_v30  ;;  %v11691_v36 = vpop.f32.mrb[125].mxu0  ;;  %v11712_v37 = vpop.f32.mrb[127].mxu1  ;;  %v5528_v33 = vld [vmem:[%s14527_s11 + $0x50] sm:$0xff] }
 0x533   : > { %v5060_v38 = vpop.f32.mrb[126].mxu0  ;;  %v5532_v34 = vld [vmem:[%s14527_s11 + $0x70] sm:$0xff]  ;;  %v5533_v36 = vld [vmem:[%s14527_s11 + $0x78] sm:$0xff] }
 0x534   : > { %v11692_v39 = vpop.f32.mrb[127].mxu0  ;;  %v5172_v40 = vadd.f32 %v5166_v31, %v5063_v35  ;;  %v5529_v35 = vld [vmem:[%s14527_s11 + $0x58] sm:$0xff] }
 0x535   : > { %v10874_v39 = vcombine.high %v5528_v33, %v5532_v34 }
 0x54f   : > { %v5384_v41 = vpop.f32.mrb[128].mxu1 }
 0x550   : > { %v11751_v42 = vpop.f32.mrb[129].mxu1 }
 0x551   : > { %v5275_v12 = vpop.f32.mrb[128].mxu0  ;;  %v5387_v43 = vpop.f32.mrb[130].mxu1  ;;  %v10875_v42 = vcombine.low %v5529_v35, %v5533_v36 }
 0x552   : > { %v5281_v44 = vadd.f32 %v5275_v12, %v5172_v40  ;;  %v11731_v45 = vpop.f32.mrb[129].mxu0  ;;  %v11752_v46 = vpop.f32.mrb[131].mxu1  ;;  %v10876_v40 = vcombine.high %v5529_v35, %v5533_v36  ;;  %v5616_v12 = vlaneseq }
 0x553   : > { %v5278_v48 = vpop.f32.mrb[130].mxu0  ;;  %v5534_v46 = vld [vmem:[%s14528_s12] sm:$0xff] }
 0x554   : > { %v5390_v10 = vadd.f32 %v5384_v41, %v5281_v44  ;;  %v11732_v49 = vpop.f32.mrb[131].mxu0  ;;  %v10873_v41 = vcombine.low %v5528_v33, %v5532_v34  ;;  %v5617_v43 = vshrl.u32 %v5616_v12, 7 }
 0x556   : > { %v5392_v50 = vadd.f32 %v5391_v47, %v5390_v10  ;;  %v5618_v44 = vsub.s32 0, %v5617_v43  ;;  %v5626_v45 = vsub.s32 2, %v5617_v43  ;;  %v5622_v47 = vsub.s32 1, %v5617_v43 }
 0x557   : > { %v5630_v48 = vsub.s32 3, %v5617_v43  ;;  %v5638_v1 = vsub.s32 5, %v5617_v43  ;;  %v5646_v2 = vsub.s32 7, %v5617_v43 }
 0x558   : > { %12164 = vtanh.f32 %v5392_v50  ;;  %v5619_v10 = vrot.slane %v5534_v46, %v5618_v44  ;;  %v5627_v49 = vrot.slane %v5534_v46, %v5626_v45  ;;  %v5623_v50 = vrot.slane %v5534_v46, %v5622_v47 }
 0x559   : > { %v5639_v7 = vrot.slane %v5534_v46, %v5638_v1  ;;  %v5647_v8 = vrot.slane %v5534_v46, %v5646_v2 }
 0x562   : > { %v12165_v51 = vpop.eup %12164 }
 0x563   : > { %v5394_v52 = vpack.c.bf16 %v12165_v51, %v12165_v51  ;;  %v5631_v51 = vrot.slane %v5534_v46, %v5630_v48 }
 0x565   : > { %11758 = vmatmul.mubr.msk.bf16.vlgmr.msra.gmra.mrb[132].mxu0 %vm5412_vm4, %v5394_v52 }
 0x566   : > { %5691 = vmatprep.mubr.bf16.mxu0 %v12251_v0  ;;  %5660 = vmatpush1.bf16.msra.mxu0 %v10861_v4 }
 0x567   : > { %5661 = vmatprep.subr.bf16.mxu0 %v10870_v13 }
 0x56a   : > { %5662 = vmatpush1.bf16.msra.mxu0 %v10869_v16 }
 0x56b   : > { %5741 = vmatprep.subr.bf16.mxu0 %v10866_v22 }
 0x638   : > { %v5450_v56 = vpop.f32.mrb[132].mxu0 }
 0x639   : > { %v5451_v57 = vadd.f32 %v5450_v56, %v5399_v55  ;;  %v11759_v58 = vpop.f32.mrb[133].mxu0 }
 0x63a   : > { %v5453_v59 = vpop.f32.mrb[134].mxu0  ;;  %v5634_v58 = vsub.s32 4, %v5617_v43 }
 0x63b   : > { %12166 = vtanh.f32 %v5451_v57  ;;  %v11760_v60 = vpop.f32.mrb[135].mxu0  ;;  %v5642_v59 = vsub.s32 6, %v5617_v43 }
 0x63c   : > { %v5635_v4 = vrot.slane %v5534_v46, %v5634_v58 }
 0x645   : > { %v12167_v61 = vpop.eup %12166 }
 0x646   : > { %v5459_v62 = vpack.c.bf16 %v12167_v61, %v12167_v61  ;;  %5458 = vst.msk [vmem:[%s13663_s27] sm:$0x1] %vm5457_vm2, %v12167_v61  ;;  %vm5831_vm2 = vcmask 516096  }
 0x648   : > { %11764 = vmatmul.mubr.msk.bf16.vlgmr.msra.gmra.mrb[132].mxu1 %vm5468_vm1, %v5459_v62  ;;  %vm5894_vm1 = vcmask 622112  }
 0x649   : > { %5732 = vmatprep.mubr.bf16.mxu1 %v12251_v0  ;;  %5701 = vmatpush1.bf16.msra.mxu1 %v10863_v5  ;;  %v5643_v5 = vrot.slane %v5534_v46, %v5642_v59 }
 0x64a   : > { %5702 = vmatprep.subr.bf16.mxu1 %v10872_v18 }
 0x64d   : > { %5703 = vmatpush1.bf16.msra.mxu1 %v10871_v17 }
 0x64e   : > { %5782 = vmatprep.subr.bf16.mxu1 %v10868_v26 }
 0x71b   : > { %v5510_v28 = vpop.f32.mrb[132].mxu1 }
 0x71c   : > { %v5511_v29 = vadd.f32 %v5510_v28, %v5462_v27  ;;  %v11765_v30 = vpop.f32.mrb[133].mxu1 }
 0x71d   : > { %v5513_v31 = vpop.f32.mrb[134].mxu1 }
 0x71e   : > { %12168 = vtanh.f32 %v5511_v29  ;;  %v11766_v32 = vpop.f32.mrb[135].mxu1 }
 0x728   : > { %v12169_v37 = vpop.eup %12168 }
 0x729   : > { %v5517_v38 = vpack.c.bf16 %v12169_v37, %v12169_v37 }
 0x72b   : > { %10877 = vmatmul.mubr.msk.bf16.vlgmr.msra.gmra.mrb[136].mxu0 %vm5412_vm4, %v5517_v38  ;;  %10878 = vmatmul.mubr.msk.bf16.vlgmr.msra.gmra.mrb[136].mxu1 %vm5412_vm4, %v5517_v38 }
 0x72c   : > { %5742 = vmatpush1.bf16.msra.mxu0 %v10865_v24  ;;  %5783 = vmatpush1.bf16.msra.mxu1 %v10867_v25 }
 0x72d   : > { %5743 = vmatprep.subr.bf16.mxu0 %v10874_v39  ;;  %5784 = vmatprep.subr.bf16.mxu1 %v10876_v40 }
 0x72e   : > { %5773 = vmatprep.mubr.bf16.mxu0 %v12251_v0  ;;  %5814 = vmatprep.mubr.bf16.mxu1 %v12251_v0 }
 0x730   : > { %5744 = vmatpush1.bf16.msra.mxu0 %v10873_v41  ;;  %5785 = vmatpush1.bf16.msra.mxu1 %v10875_v42 }
 0x733   : > { %10879 = vmatmul.mubr.msk.bf16.vlgmr.msra.gmra.mrb[140].mxu0 %vm5412_vm4, %v5517_v38  ;;  %10880 = vmatmul.mubr.msk.bf16.vlgmr.msra.gmra.mrb[140].mxu1 %vm5412_vm4, %v5517_v38  ;;  %vm5946_vm4 = vcmask 97312  }
 0x734   : > { %6042 = vmatprep.mubr.bf16.mxu0 %v12251_v0  ;;  %6086 = vmatprep.mubr.bf16.mxu1 %v12251_v0 }
 0x7fe   : > { %v5693_v52 = vpop.f32.mrb[136].mxu0  ;;  %v5734_v53 = vpop.f32.mrb[136].mxu1 }
 0x7ff   : > { %v5694_v54 = vadd.f32 %v5693_v52, %v5619_v10  ;;  %v5735_v55 = vadd.f32 %v5734_v53, %v5627_v49  ;;  %v5695_v56 = vpop.f32.mrb[137].mxu0  ;;  %v5736_v57 = vpop.f32.mrb[137].mxu1 }
 0x800   : > { %v5696_v60 = vadd.f32 %v5695_v56, %v5623_v50  ;;  %v5737_v61 = vadd.f32 %v5736_v57, %v5631_v51  ;;  %v5697_v62 = vpop.f32.mrb[138].mxu0  ;;  %v5738_v63 = vpop.f32.mrb[138].mxu1 }
 0x801   : > { %12170 = vtanh.f32 %v5694_v54  ;;  %v5698_v3 = vpop.f32.mrb[139].mxu0  ;;  %v5739_v6 = vpop.f32.mrb[139].mxu1  ;;  %v5994_v62 = vld [vmem:[%s14529_s13] sm:$0x7] }
 0x802   : > { %12172 = vtanh.f32 %v5735_v55 }
 0x803   : > { %12174 = vtanh.f32 %v5696_v60 }
 0x804   : > { %12176 = vtanh.f32 %v5737_v61 }
 0x806   : > { %v5775_v9 = vpop.f32.mrb[140].mxu0  ;;  %v5816_v11 = vpop.f32.mrb[140].mxu1 }
 0x807   : > { %v5776_v13 = vadd.f32 %v5775_v9, %v5635_v4  ;;  %v5817_v15 = vadd.f32 %v5816_v11, %v5643_v5  ;;  %v5777_v16 = vpop.f32.mrb[141].mxu0  ;;  %v5818_v17 = vpop.f32.mrb[141].mxu1  ;;  %v10881_v4 = vld [vmem:[%s14529_s13 + $0x4] sm:$0x7] }
 0x808   : > { %v5778_v18 = vadd.f32 %v5777_v16, %v5639_v7  ;;  %v5819_v19 = vadd.f32 %v5818_v17, %v5647_v8  ;;  %v5779_v20 = vpop.f32.mrb[142].mxu0  ;;  %v5820_v21 = vpop.f32.mrb[142].mxu1  ;;  %v10886_v16 = vld [vmem:[%s14529_s13 + $0xc] sm:$0x7] }
 0x809   : > { %12178 = vtanh.f32 %v5776_v13  ;;  %v5780_v22 = vpop.f32.mrb[143].mxu0  ;;  %v5821_v23 = vpop.f32.mrb[143].mxu1 }
 0x80a   : > { %12180 = vtanh.f32 %v5817_v15  ;;  %v10884_v15 = vld [vmem:[%s14529_s13 + $0x8] sm:$0x7]  ;;  %v10888_v23 = vld [vmem:[%s14529_s13 + $0x10] sm:$0x7] }
 0x80b   : > { %v12171_v24 = vpop.eup %12170  ;;  %12182 = vtanh.f32 %v5778_v18 }
 0x80c   : > { %v12173_v25 = vpop.eup %12172  ;;  %5832 = vst.msk [vmem:[#allocation2] sm:$0x1] %vm5831_vm2, %v12171_v24  ;;  %12184 = vtanh.f32 %v5819_v19  ;;  %5834 = vrot.lane.b32.xlu0 %v12171_v24, %s14676_s17  ;;  %v10890_v24 = vld [vmem:[%s14529_s13 + $0x14] sm:$0x7] }
 0x80d   : > { %v12175_v26 = vpop.eup %12174  ;;  %5844 = vst.msk [vmem:[#allocation2 + $0x4] sm:$0x1] %vm5831_vm2, %v12173_v25 }
 0x80e   : > { %v12177_v27 = vpop.eup %12176  ;;  %5838 = vst.msk [vmem:[#allocation2 + $0x2] sm:$0x1] %vm5831_vm2, %v12175_v26  ;;  %5840 = vrot.lane.b32.xlu1 %v12175_v26, %s14676_s17 }
 0x80f   : > { %5850 = vst.msk [vmem:[#allocation2 + $0x6] sm:$0x1] %vm5831_vm2, %v12177_v27 }
 0x810   : > { %5846 = vrot.lane.b32.xlu0 %v12173_v25, %s14676_s17 }
 0x812   : > { %5852 = vrot.lane.b32.xlu1 %v12177_v27, %s14676_s17 }
 0x813   : > { %v12179_v28 = vpop.eup %12178 }
 0x814   : > { %v12181_v29 = vpop.eup %12180  ;;  %5856 = vst.msk [vmem:[#allocation2 + $0x8] sm:$0x1] %vm5831_vm2, %v12179_v28  ;;  %5858 = vrot.lane.b32.xlu0 %v12179_v28, %s14676_s17 }
 0x815   : > { %v12183_v30 = vpop.eup %12182  ;;  %5868 = vst.msk [vmem:[#allocation2 + $0xc] sm:$0x1] %vm5831_vm2, %v12181_v29 }
 0x816   : > { %v12185_v31 = vpop.eup %12184  ;;  %5862 = vst.msk [vmem:[#allocation2 + $0xa] sm:$0x1] %vm5831_vm2, %v12183_v30  ;;  %5864 = vrot.lane.b32.xlu1 %v12183_v30, %s14676_s17 }
 0x817   : > { %5874 = vst.msk [vmem:[#allocation2 + $0xe] sm:$0x1] %vm5831_vm2, %v12185_v31 }
 0x818   : > { %5870 = vrot.lane.b32.xlu0 %v12181_v29, %s14676_s17 }
 0x81a   : > { %5876 = vrot.lane.b32.xlu1 %v12185_v31, %s14676_s17  ;;  %v10892_v31 = vld [vmem:[%s14529_s13 + $0x18] sm:$0x7] }
 0x87e   : > { %v5835_v32 = vpop.permute.xlu0 %5834 }
 0x87f   : > { %5837 = vst.msk [vmem:[#allocation2 + $0x1] sm:$0x1] %vm5831_vm2, %v5835_v32  ;;  %v10894_v32 = vld [vmem:[%s14529_s13 + $0x1c] sm:$0x7] }
 0x880   : > { %v5841_v33 = vpop.permute.xlu1 %5840 }
 0x881   : > { %5843 = vst.msk [vmem:[#allocation2 + $0x3] sm:$0x1] %vm5831_vm2, %v5841_v33 }
 0x882   : > { %v5847_v34 = vpop.permute.xlu0 %5846 }
 0x883   : > { %5849 = vst.msk [vmem:[#allocation2 + $0x5] sm:$0x1] %vm5831_vm2, %v5847_v34 }
 0x884   : > { %v5853_v35 = vpop.permute.xlu1 %5852 }
 0x885   : > { %5855 = vst.msk [vmem:[#allocation2 + $0x7] sm:$0x1] %vm5831_vm2, %v5853_v35 }
 0x886   : > { %v5859_v36 = vpop.permute.xlu0 %5858 }
 0x887   : > { %5861 = vst.msk [vmem:[#allocation2 + $0x9] sm:$0x1] %vm5831_vm2, %v5859_v36 }
 0x888   : > { %v5865_v37 = vpop.permute.xlu1 %5864 }
 0x889   : > { %5867 = vst.msk [vmem:[#allocation2 + $0xb] sm:$0x1] %vm5831_vm2, %v5865_v37 }
 0x88a   : > { %v5871_v38 = vpop.permute.xlu0 %5870 }
 0x88b   : > { %5873 = vst.msk [vmem:[#allocation2 + $0xd] sm:$0x1] %vm5831_vm2, %v5871_v38 }
 0x88c   : > { %v5877_v39 = vpop.permute.xlu1 %5876  ;;  %v5884_v40 = vld [vmem:[#allocation2] sm:$0xff] }
 0x88d   : > { %5879 = vst.msk [vmem:[#allocation2 + $0xf] sm:$0x1] %vm5831_vm2, %v5877_v39  ;;  %5888 = vrot.lane.b32.xlu0 %v5884_v40, %s14629_s24  ;;  %vm5959_vm2 = vcmask 228512   ;;  %v10896_v39 = vld [vmem:[%s14529_s13 + $0x20] sm:$0x7] }
 0x891   : > { %5940 = vrot.lane.b32.xlu0 %v5884_v40, %s12279_s22 }
 0x894   : > { %v5885_v41 = vld [vmem:[#allocation2 + $0x8] sm:$0xff] }
 0x895   : > { %5890 = vrot.lane.b32.xlu1 %v5885_v41, %s14629_s24  ;;  %5901 = vrot.lane.b32.xlu0 %v5884_v40, %s14675_s14  ;;  %s14697_s24 = smov 78  }
 0x899   : > { %5942 = vrot.lane.b32.xlu1 %v5885_v41, %s12279_s22  ;;  %5953 = vrot.lane.b32.xlu0 %v5884_v40, %s14665_s23 }
 0x89d   : > { %5903 = vrot.lane.b32.xlu1 %v5885_v41, %s14675_s14  ;;  %5914 = vrot.lane.b32.xlu0 %v5884_v40, %s12280_s5 }
 0x8a1   : > { %5955 = vrot.lane.b32.xlu1 %v5885_v41, %s14665_s23  ;;  %5966 = vrot.lane.b32.xlu0 %v5884_v40, %s12281_s16 }
 0x8a5   : > { %5916 = vrot.lane.b32.xlu1 %v5885_v41, %s12280_s5  ;;  %5927 = vrot.lane.b32.xlu0 %v5884_v40, %s14670_s18 }
 0x8a9   : > { %5968 = vrot.lane.b32.xlu1 %v5885_v41, %s12281_s16  ;;  %5979 = vrot.lane.b32.xlu0 %v5884_v40, %s14662_s1  ;;  %v10898_v40 = vld [vmem:[%s14529_s13 + $0x24] sm:$0x7] }
 0x8ad   : > { %5929 = vrot.lane.b32.xlu1 %v5885_v41, %s14670_s18 }
 0x8b1   : > { %5981 = vrot.lane.b32.xlu1 %v5885_v41, %s14662_s1 }
 0x8ff   : > { %v5889_v42 = vpop.permute.xlu0 %5888 }
 0x900   : > { %5895 = vst.msk [vmem:[#allocation3] sm:$0xff] %vm5894_vm1, %v5889_v42 }
 0x903   : > { %v5941_v12 = vpop.permute.xlu0 %5940 }
 0x904   : > { %5947 = vst.msk [vmem:[#allocation3 + $0x8] sm:$0xff] %vm5946_vm4, %v5941_v12 }
 0x907   : > { %v5891_v43 = vpop.permute.xlu1 %5890  ;;  %v5902_v44 = vpop.permute.xlu0 %5901 }
 0x908   : > { %5896 = vst.msk [vmem:[#allocation3 + $0x10] sm:$0xff] %vm5894_vm1, %v5891_v43  ;;  %vm5985_vm1 = vcmask 490912  }
 0x909   : > { %5908 = vst.msk [vmem:[#allocation3] sm:$0xff] %vm5907_vm5, %v5902_v44 }
 0x90b   : > { %v5943_v45 = vpop.permute.xlu1 %5942  ;;  %v5954_v46 = vpop.permute.xlu0 %5953 }
 0x90c   : > { %5948 = vst.msk [vmem:[#allocation3 + $0x18] sm:$0xff] %vm5946_vm4, %v5943_v45  ;;  %vm14704_vm4 = vcmask 1022976  }
 0x90d   : > { %5960 = vst.msk [vmem:[#allocation3 + $0x8] sm:$0xff] %vm5959_vm2, %v5954_v46  ;;  %v10900_v46 = vld [vmem:[%s14529_s13 + $0x28] sm:$0x7] }
 0x90f   : > { %v5904_v47 = vpop.permute.xlu1 %5903  ;;  %v5915_v48 = vpop.permute.xlu0 %5914 }
 0x910   : > { %5909 = vst.msk [vmem:[#allocation3 + $0x10] sm:$0xff] %vm5907_vm5, %v5904_v47  ;;  %vm14705_vm5 = vcmask 1014784   ;;  %v10902_v47 = vld [vmem:[%s14529_s13 + $0x2c] sm:$0x7] }
 0x911   : > { %5921 = vst.msk [vmem:[#allocation3] sm:$0xff] %vm5920_vm0, %v5915_v48 }
 0x913   : > { %v5956_v10 = vpop.permute.xlu1 %5955  ;;  %v5967_v49 = vpop.permute.xlu0 %5966 }
 0x914   : > { %5961 = vst.msk [vmem:[#allocation3 + $0x18] sm:$0xff] %vm5959_vm2, %v5956_v10  ;;  %vm14714_vm2 = vcmask 506880  }
 0x915   : > { %5973 = vst.msk [vmem:[#allocation3 + $0x8] sm:$0xff] %vm5972_vm3, %v5967_v49 }
 0x917   : > { %v5917_v50 = vpop.permute.xlu1 %5916  ;;  %v5928_v51 = vpop.permute.xlu0 %5927 }
 0x918   : > { %5922 = vst.msk [vmem:[#allocation3 + $0x10] sm:$0xff] %vm5920_vm0, %v5917_v50  ;;  %vm14703_vm0 = vcmask 1031168  }
 0x919   : > { %5934 = vst.msk [vmem:[#allocation3] sm:$0xff] %vm5933_vm15, %v5928_v51 }
 0x91b   : > { %v5969_v52 = vpop.permute.xlu1 %5968  ;;  %v5980_v53 = vpop.permute.xlu0 %5979 }
 0x91c   : > { %5974 = vst.msk [vmem:[#allocation3 + $0x18] sm:$0xff] %vm5972_vm3, %v5969_v52  ;;  %vm6006_vm3 = vcmask 130048  }
 0x91d   : > { %5986 = vst.msk [vmem:[#allocation3 + $0x8] sm:$0xff] %vm5985_vm1, %v5980_v53  ;;  %v10904_v53 = vld [vmem:[%s14529_s13 + $0x30] sm:$0x7] }
 0x91f   : > { %v5930_v54 = vpop.permute.xlu1 %5929 }
 0x920   : > { %5935 = vst.msk [vmem:[#allocation3 + $0x10] sm:$0xff] %vm5933_vm15, %v5930_v54  ;;  %v5988_v56 = vld [vmem:[#allocation3] sm:$0xff]  ;;  %vm14702_vm15 = vcmask 1039360  }
 0x921   : > { %v10906_v54 = vld [vmem:[%s14529_s13 + $0x34] sm:$0x7] }
 0x923   : > { %v5982_v55 = vpop.permute.xlu1 %5981 }
 0x924   : > { %5987 = vst.msk [vmem:[#allocation3 + $0x18] sm:$0xff] %vm5985_vm1, %v5982_v55  ;;  %v5989_v59 = vld [vmem:[#allocation3 + $0x8] sm:$0xff]  ;;  %vm14715_vm1 = vcmask 498688  }
 0x927   : > { %v5990_v57 = vld [vmem:[#allocation3 + $0x10] sm:$0xff] }
 0x928   : > { %v5992_v58 = vpack.c.bf16 %v5990_v57, %v5988_v56 }
 0x92a   : > { %5999 = vrot.lane.b32.xlu0 %v5992_v58, %s14657_s21 }
 0x92b   : > { %v5991_v60 = vld [vmem:[#allocation3 + $0x18] sm:$0xff] }
 0x92c   : > { %v5993_v61 = vpack.c.bf16 %v5991_v60, %v5989_v59 }
 0x92e   : > { %6097 = vrot.lane.b32.xlu0 %v5992_v58, %s14660_s19  ;;  %6001 = vrot.lane.b32.xlu1 %v5993_v61, %s14657_s21 }
 0x92f   : > { %6054 = vmatprep.subr.bf16.mxu1 %v5993_v61 }
 0x930   : > { %6055 = vmatpush1.bf16.msra.mxu1 %v5992_v58 }
 0x932   : > { %6152 = vrot.lane.b32.xlu0 %v5992_v58, %s14656_s29  ;;  %6099 = vrot.lane.b32.xlu1 %v5993_v61, %s14660_s19 }
 0x933   : > { %10883 = vmatmul.mubr.msk.bf16.vlgmr.msra.gmra.mrb[144].mxu1 %vm6006_vm3, %v5994_v62  ;;  %v10910_v62 = vld [vmem:[%s14529_s13 + $0x3c] sm:$0x7] }
 0x934   : > { %6194 = vmatprep.mubr.bf16.mxu1 %v12251_v0 }
 0x936   : > { %6207 = vrot.lane.b32.xlu0 %v5992_v58, %s14662_s1  ;;  %6154 = vrot.lane.b32.xlu1 %v5993_v61, %s14656_s29 }
 0x93a   : > { %6262 = vrot.lane.b32.xlu0 %v5992_v58, %s14659_s25  ;;  %6209 = vrot.lane.b32.xlu1 %v5993_v61, %s14662_s1 }
 0x93e   : > { %6317 = vrot.lane.b32.xlu0 %v5992_v58, %s14661_s20  ;;  %6264 = vrot.lane.b32.xlu1 %v5993_v61, %s14659_s25 }
 0x942   : > { %6372 = vrot.lane.b32.xlu0 %v5992_v58, %s14663_s26  ;;  %6319 = vrot.lane.b32.xlu1 %v5993_v61, %s14661_s20  ;;  %s14694_s20 = smov 93  }
 0x946   : > { %6427 = vrot.lane.b32.xlu0 %v5992_v58, %s14690_s3  ;;  %6374 = vrot.lane.b32.xlu1 %v5993_v61, %s14663_s26  ;;  %s14695_s26 = smov 80  }
 0x94a   : > { %6482 = vrot.lane.b32.xlu0 %v5992_v58, %s14665_s23  ;;  %6429 = vrot.lane.b32.xlu1 %v5993_v61, %s14690_s3  ;;  %s14696_s3 = smov 79  }
 0x94e   : > { %6537 = vrot.lane.b32.xlu0 %v5992_v58, %s14691_s4  ;;  %6484 = vrot.lane.b32.xlu1 %v5993_v61, %s14665_s23 }
 0x952   : > { %6592 = vrot.lane.b32.xlu0 %v5992_v58, %s14692_s15  ;;  %6539 = vrot.lane.b32.xlu1 %v5993_v61, %s14691_s4 }
 0x956   : > { %6647 = vrot.lane.b32.xlu0 %v5992_v58, %s14693_s30  ;;  %6594 = vrot.lane.b32.xlu1 %v5993_v61, %s14692_s15  ;;  %s14698_s15 = smov 77  }
 0x95a   : > { %6702 = vrot.lane.b32.xlu0 %v5992_v58, %s14694_s20  ;;  %6649 = vrot.lane.b32.xlu1 %v5993_v61, %s14693_s30  ;;  %s14699_s30 = smov 63  }
 0x95e   : > { %6757 = vrot.lane.b32.xlu0 %v5992_v58, %s14670_s18  ;;  %6704 = vrot.lane.b32.xlu1 %v5993_v61, %s14694_s20  ;;  %s14700_s20 = smov 62  }
 0x962   : > { %6812 = vrot.lane.b32.xlu0 %v5992_v58, %s14695_s26  ;;  %6759 = vrot.lane.b32.xlu1 %v5993_v61, %s14670_s18 }
 0x966   : > { %6867 = vrot.lane.b32.xlu0 %v5992_v58, %s14696_s3  ;;  %6814 = vrot.lane.b32.xlu1 %v5993_v61, %s14695_s26 }
 0x96a   : > { %6922 = vrot.lane.b32.xlu0 %v5992_v58, %s14697_s24  ;;  %6869 = vrot.lane.b32.xlu1 %v5993_v61, %s14696_s3  ;;  %s14718_s3 = smov 68  }
 0x96e   : > { %6977 = vrot.lane.b32.xlu0 %v5992_v58, %s14698_s15  ;;  %6924 = vrot.lane.b32.xlu1 %v5993_v61, %s14697_s24  ;;  %s12290_s24 = smov 85  }
 0x972   : > { %7032 = vrot.lane.b32.xlu0 %v5992_v58, %s14675_s14  ;;  %6979 = vrot.lane.b32.xlu1 %v5993_v61, %s14698_s15  ;;  %s14701_s15 = sld [smem:[#allocation24_spill]] }
 0x976   : > { %7087 = vrot.lane.b32.xlu0 %v5992_v58, %s14676_s17  ;;  %7034 = vrot.lane.b32.xlu1 %v5993_v61, %s14675_s14 }
 0x978   : > { %v7360_v63 = vld [vmem:[%s14701_s15] sm:$0x3f]  ;;  %s12282_s15 = smov 104  }
 0x97a   : > { %7142 = vrot.lane.b32.xlu0 %v5992_v58, %s14699_s30  ;;  %7089 = vrot.lane.b32.xlu1 %v5993_v61, %s14676_s17 }
 0x97e   : > { %7197 = vrot.lane.b32.xlu0 %v5992_v58, %s14700_s20  ;;  %7144 = vrot.lane.b32.xlu1 %v5993_v61, %s14699_s30  ;;  %s12283_s30 = smov 88  }
 0x982   : > { %7252 = vrot.lane.b32.xlu0 %v5992_v58, %s14679_s2  ;;  %7199 = vrot.lane.b32.xlu1 %v5993_v61, %s14700_s20  ;;  %s12284_s20 = smov 120  }
 0x986   : > { %7307 = vrot.lane.b32.xlu0 %v5992_v58, %s14680_s0  ;;  %7254 = vrot.lane.b32.xlu1 %v5993_v61, %s14679_s2  ;;  %s12289_s2 = smov 86  }
 0x98a   : > { %7363 = vperm.xlu0 %12005, %v7360_v63   ;;  %7309 = vrot.lane.b32.xlu1 %v5993_v61, %s14680_s0  ;;  %v10908_v61 = vld [vmem:[%s14529_s13 + $0x38] sm:$0x7]  ;;  %s12288_s0 = smov 87  }
 0x99c   : > { %v6000_v1 = vpop.permute.xlu0 %5999 }
 0x9a0   : > { %v6002_v2 = vpop.permute.xlu1 %6001  ;;  %v6098_v3 = vpop.permute.xlu0 %6097 }
 0x9a1   : > { %6010 = vmatprep.subr.bf16.mxu0 %v6002_v2  ;;  %v6003_v6 = vsel %vm14702_vm15, %v6000_v1, %v6002_v2  ;;  %vm14716_vm15 = vcmask 490496  }
 0x9a2   : > { %6011 = vmatpush1.bf16.msra.mxu0 %v6003_v6 }
 0x9a4   : > { %v6100_v5 = vpop.permute.xlu1 %6099  ;;  %v6153_v7 = vpop.permute.xlu0 %6152 }
 0x9a5   : > { %10882 = vmatmul.mubr.msk.bf16.vlgmr.msra.gmra.mrb[144].mxu0 %vm6006_vm3, %v10881_v4  ;;  %6107 = vmatprep.subr.bf16.mxu0 %v6100_v5  ;;  %v6101_v8 = vsel %vm14703_vm0, %v6098_v3, %v6100_v5  ;;  %v10912_v5 = vld [vmem:[%s14529_s13 + $0x40] sm:$0x7]  ;;  %vm14717_vm0 = vmmov 0  }
 0x9a6   : > { %6108 = vmatpush1.bf16.msra.mxu0 %v6101_v8  ;;  %6139 = vmatprep.mubr.bf16.mxu0 %v12251_v0 }
 0x9a8   : > { %v6155_v9 = vpop.permute.xlu1 %6154  ;;  %v6208_v11 = vpop.permute.xlu0 %6207 }
 0x9a9   : > { %6162 = vmatprep.subr.bf16.mxu1 %v6155_v9  ;;  %v6156_v13 = vsel %vm14704_vm4, %v6153_v7, %v6155_v9  ;;  %v10914_v7 = vld [vmem:[%s14529_s13 + $0x44] sm:$0x7]  ;;  %vm7396_vm4 = vcmask 226432  }
 0x9aa   : > { %6163 = vmatpush1.bf16.msra.mxu1 %v6156_v13 }
 0x9ac   : > { %v6210_v17 = vpop.permute.xlu1 %6209  ;;  %v6263_v18 = vpop.permute.xlu0 %6262 }
 0x9ad   : > { %10885 = vmatmul.mubr.msk.bf16.vlgmr.msra.gmra.mrb[148].mxu0 %vm6006_vm3, %v10884_v15  ;;  %6217 = vmatprep.subr.bf16.mxu0 %v6210_v17  ;;  %v6211_v19 = vsel %vm14705_vm5, %v6208_v11, %v6210_v17  ;;  %v10916_v17 = vld [vmem:[%s14529_s13 + $0x48] sm:$0x7]  ;;  %vm7401_vm5 = vcmask 390432  }
 0x9ae   : > { %6218 = vmatpush1.bf16.msra.mxu0 %v6211_v19  ;;  %10887 = vmatmul.mubr.msk.bf16.vlgmr.msra.gmra.mrb[148].mxu1 %vm6006_vm3, %v10886_v16 }
 0x9af   : > { %6249 = vmatprep.mubr.bf16.mxu0 %v12251_v0  ;;  %6304 = vmatprep.mubr.bf16.mxu1 %v12251_v0 }
 0x9b0   : > { %v6265_v20 = vpop.permute.xlu1 %6264  ;;  %v6318_v21 = vpop.permute.xlu0 %6317 }
 0x9b1   : > { %6272 = vmatprep.subr.bf16.mxu1 %v6265_v20  ;;  %v6266_v22 = vsel %vm892_vm6, %v6263_v18, %v6265_v20  ;;  %vm14706_vm6 = vcmask 752640   ;;  %v10918_v18 = vld [vmem:[%s14529_s13 + $0x4c] sm:$0x7] }
 0x9b2   : > { %6273 = vmatpush1.bf16.msra.mxu1 %v6266_v22 }
 0x9b4   : > { %v6320_v25 = vpop.permute.xlu1 %6319  ;;  %v6373_v26 = vpop.permute.xlu0 %6372 }
 0x9b5   : > { %10889 = vmatmul.mubr.msk.bf16.vlgmr.msra.gmra.mrb[152].mxu0 %vm6006_vm3, %v10888_v23  ;;  %6327 = vmatprep.subr.bf16.mxu0 %v6320_v25  ;;  %v6321_v27 = vsel %vm952_vm7, %v6318_v21, %v6320_v25  ;;  %vm14707_vm7 = vcmask 654336   ;;  %v10920_v25 = vld [vmem:[%s14529_s13 + $0x50] sm:$0x7] }
 0x9b6   : > { %6328 = vmatpush1.bf16.msra.mxu0 %v6321_v27  ;;  %10891 = vmatmul.mubr.msk.bf16.vlgmr.msra.gmra.mrb[152].mxu1 %vm6006_vm3, %v10890_v24 }
 0x9b7   : > { %6359 = vmatprep.mubr.bf16.mxu0 %v12251_v0  ;;  %6414 = vmatprep.mubr.bf16.mxu1 %v12251_v0 }
 0x9b8   : > { %v6375_v28 = vpop.permute.xlu1 %6374  ;;  %v6428_v29 = vpop.permute.xlu0 %6427 }
 0x9b9   : > { %6382 = vmatprep.subr.bf16.mxu1 %v6375_v28  ;;  %v6376_v30 = vsel %vm1012_vm8, %v6373_v26, %v6375_v28  ;;  %vm14708_vm8 = vcmask 646144   ;;  %v10922_v26 = vld [vmem:[%s14529_s13 + $0x54] sm:$0x7] }
 0x9ba   : > { %6383 = vmatpush1.bf16.msra.mxu1 %v6376_v30 }
 0x9bc   : > { %v6430_v33 = vpop.permute.xlu1 %6429  ;;  %v6483_v34 = vpop.permute.xlu0 %6482 }
 0x9bd   : > { %10893 = vmatmul.mubr.msk.bf16.vlgmr.msra.gmra.mrb[156].mxu0 %vm6006_vm3, %v10892_v31  ;;  %6437 = vmatprep.subr.bf16.mxu0 %v6430_v33  ;;  %v6431_v35 = vsel %vm1072_vm9, %v6428_v29, %v6430_v33  ;;  %vm14709_vm9 = vcmask 637952   ;;  %v10926_v33 = vld [vmem:[%s14529_s13 + $0x5c] sm:$0x7] }
 0x9be   : > { %6438 = vmatpush1.bf16.msra.mxu0 %v6431_v35  ;;  %10895 = vmatmul.mubr.msk.bf16.vlgmr.msra.gmra.mrb[156].mxu1 %vm6006_vm3, %v10894_v32  ;;  %v10924_v32 = vld [vmem:[%s14529_s13 + $0x58] sm:$0x7] }
 0x9bf   : > { %6469 = vmatprep.mubr.bf16.mxu0 %v12251_v0  ;;  %6524 = vmatprep.mubr.bf16.mxu1 %v12251_v0 }
 0x9c0   : > { %v6485_v36 = vpop.permute.xlu1 %6484  ;;  %v6538_v37 = vpop.permute.xlu0 %6537 }
 0x9c1   : > { %6492 = vmatprep.subr.bf16.mxu1 %v6485_v36  ;;  %v6486_v38 = vsel %vm1132_vm10, %v6483_v34, %v6485_v36 }
 0x9c2   : > { %6493 = vmatpush1.bf16.msra.mxu1 %v6486_v38 }
 0x9c4   : > { %v6540_v41 = vpop.permute.xlu1 %6539  ;;  %v6593_v42 = vpop.permute.xlu0 %6592 }
 0x9c5   : > { %10897 = vmatmul.mubr.msk.bf16.vlgmr.msra.gmra.mrb[160].mxu0 %vm6006_vm3, %v10896_v39  ;;  %6547 = vmatprep.subr.bf16.mxu0 %v6540_v41  ;;  %v6541_v12 = vsel %vm1192_vm11, %v6538_v37, %v6540_v41  ;;  %vm14710_vm11 = vcmask 629760   ;;  %v10928_v37 = vld [vmem:[%s14529_s13 + $0x60] sm:$0x7] }
 0x9c6   : > { %6548 = vmatpush1.bf16.msra.mxu0 %v6541_v12  ;;  %10899 = vmatmul.mubr.msk.bf16.vlgmr.msra.gmra.mrb[160].mxu1 %vm6006_vm3, %v10898_v40 }
 0x9c7   : > { %6579 = vmatprep.mubr.bf16.mxu0 %v12251_v0  ;;  %6634 = vmatprep.mubr.bf16.mxu1 %v12251_v0 }
 0x9c8   : > { %v6595_v43 = vpop.permute.xlu1 %6594  ;;  %v6648_v44 = vpop.permute.xlu0 %6647 }
 0x9c9   : > { %6602 = vmatprep.subr.bf16.mxu1 %v6595_v43  ;;  %v6596_v45 = vsel %vm1252_vm12, %v6593_v42, %v6595_v43  ;;  %vm14711_vm12 = vcmask 621568  }
 0x9ca   : > { %6603 = vmatpush1.bf16.msra.mxu1 %v6596_v45 }
 0x9cc   : > { %v6650_v48 = vpop.permute.xlu1 %6649  ;;  %v6703_v10 = vpop.permute.xlu0 %6702 }
 0x9cd   : > { %10901 = vmatmul.mubr.msk.bf16.vlgmr.msra.gmra.mrb[164].mxu0 %vm6006_vm3, %v10900_v46  ;;  %6657 = vmatprep.subr.bf16.mxu0 %v6650_v48  ;;  %v6651_v49 = vsel %vm1312_vm13, %v6648_v44, %v6650_v48  ;;  %vm14712_vm13 = vcmask 523264  }
 0x9ce   : > { %6658 = vmatpush1.bf16.msra.mxu0 %v6651_v49  ;;  %10903 = vmatmul.mubr.msk.bf16.vlgmr.msra.gmra.mrb[164].mxu1 %vm6006_vm3, %v10902_v47 }
 0x9cf   : > { %6689 = vmatprep.mubr.bf16.mxu0 %v12251_v0  ;;  %6744 = vmatprep.mubr.bf16.mxu1 %v12251_v0 }
 0x9d0   : > { %v6705_v50 = vpop.permute.xlu1 %6704  ;;  %v6758_v51 = vpop.permute.xlu0 %6757 }
 0x9d1   : > { %6712 = vmatprep.subr.bf16.mxu1 %v6705_v50  ;;  %v6706_v52 = vsel %vm1372_vm14, %v6703_v10, %v6705_v50  ;;  %vm14713_vm14 = vcmask 515072  }
 0x9d2   : > { %6713 = vmatpush1.bf16.msra.mxu1 %v6706_v52 }
 0x9d4   : > { %v6760_v55 = vpop.permute.xlu1 %6759  ;;  %v6813_v56 = vpop.permute.xlu0 %6812 }
 0x9d5   : > { %10905 = vmatmul.mubr.msk.bf16.vlgmr.msra.gmra.mrb[168].mxu0 %vm6006_vm3, %v10904_v53  ;;  %6767 = vmatprep.subr.bf16.mxu0 %v6760_v55  ;;  %v6761_v57 = vsel %vm14706_vm6, %v6758_v51, %v6760_v55  ;;  %vm7406_vm6 = vcmask 554432  }
 0x9d6   : > { %6768 = vmatpush1.bf16.msra.mxu0 %v6761_v57  ;;  %10907 = vmatmul.mubr.msk.bf16.vlgmr.msra.gmra.mrb[168].mxu1 %vm6006_vm3, %v10906_v54 }
 0x9d7   : > { %6799 = vmatprep.mubr.bf16.mxu0 %v12251_v0  ;;  %6854 = vmatprep.mubr.bf16.mxu1 %v12251_v0 }
 0x9d8   : > { %v6815_v58 = vpop.permute.xlu1 %6814  ;;  %v6868_v59 = vpop.permute.xlu0 %6867 }
 0x9d9   : > { %6822 = vmatprep.subr.bf16.mxu1 %v6815_v58  ;;  %v6816_v60 = vsel %vm14707_vm7, %v6813_v56, %v6815_v58  ;;  %vm7411_vm7 = vcmask 718432  }
 0x9da   : > { %6823 = vmatpush1.bf16.msra.mxu1 %v6816_v60 }
 0x9dc   : > { %v6870_v63 = vpop.permute.xlu1 %6869  ;;  %v6923_v1 = vpop.permute.xlu0 %6922 }
 0x9dd   : > { %10909 = vmatmul.mubr.msk.bf16.vlgmr.msra.gmra.mrb[172].mxu0 %vm6006_vm3, %v10908_v61  ;;  %6877 = vmatprep.subr.bf16.mxu0 %v6870_v63  ;;  %v6871_v2 = vsel %vm14708_vm8, %v6868_v59, %v6870_v63  ;;  %vm7379_vm8 = vcmask 784032  }
 0x9de   : > { %6878 = vmatpush1.bf16.msra.mxu0 %v6871_v2  ;;  %10911 = vmatmul.mubr.msk.bf16.vlgmr.msra.gmra.mrb[172].mxu1 %vm6006_vm3, %v10910_v62 }
 0x9df   : > { %6909 = vmatprep.mubr.bf16.mxu0 %v12251_v0  ;;  %6964 = vmatprep.mubr.bf16.mxu1 %v12251_v0 }
 0x9e0   : > { %v6925_v3 = vpop.permute.xlu1 %6924  ;;  %v6978_v6 = vpop.permute.xlu0 %6977 }
 0x9e1   : > { %6932 = vmatprep.subr.bf16.mxu1 %v6925_v3  ;;  %v6926_v4 = vsel %vm14709_vm9, %v6923_v1, %v6925_v3  ;;  %vm7373_vm9 = vcmask 128000  }
 0x9e2   : > { %6933 = vmatpush1.bf16.msra.mxu1 %v6926_v4  ;;  %7374 = vst.msk [vmem:[#allocation4 + $0x18] sm:$0x3f] %vm7373_vm9, %v13125_v14 }
 0x9e4   : > { %v6980_v8 = vpop.permute.xlu1 %6979  ;;  %v7033_v9 = vpop.permute.xlu0 %7032 }
 0x9e5   : > { %10913 = vmatmul.mubr.msk.bf16.vlgmr.msra.gmra.mrb[176].mxu0 %vm6006_vm3, %v10912_v5  ;;  %6987 = vmatprep.subr.bf16.mxu0 %v6980_v8  ;;  %v6981_v11 = vsel %vm14710_vm11, %v6978_v6, %v6980_v8  ;;  %vm7384_vm11 = vcmask 948032  }
 0x9e6   : > { %6988 = vmatpush1.bf16.msra.mxu0 %v6981_v11  ;;  %10915 = vmatmul.mubr.msk.bf16.vlgmr.msra.gmra.mrb[176].mxu1 %vm6006_vm3, %v10914_v7 }
 0x9e7   : > { %7019 = vmatprep.mubr.bf16.mxu0 %v12251_v0  ;;  %7074 = vmatprep.mubr.bf16.mxu1 %v12251_v0 }
 0x9e8   : > { %v7035_v13 = vpop.permute.xlu1 %7034  ;;  %v7088_v15 = vpop.permute.xlu0 %7087 }
 0x9e9   : > { %7042 = vmatprep.subr.bf16.mxu1 %v7035_v13  ;;  %v7036_v16 = vsel %vm14711_vm12, %v7033_v9, %v7035_v13  ;;  %vm7416_vm12 = vcmask 882432  }
 0x9ea   : > { %7043 = vmatpush1.bf16.msra.mxu1 %v7036_v16 }
 0x9ec   : > { %v7090_v19 = vpop.permute.xlu1 %7089  ;;  %v7143_v20 = vpop.permute.xlu0 %7142 }
 0x9ed   : > { %10917 = vmatmul.mubr.msk.bf16.vlgmr.msra.gmra.mrb[180].mxu0 %vm6006_vm3, %v10916_v17  ;;  %7097 = vmatprep.subr.bf16.mxu0 %v7090_v19  ;;  %v7091_v21 = vsel %vm14712_vm13, %v7088_v15, %v7090_v19  ;;  %vm7389_vm13 = vcmask 1046496  }
 0x9ee   : > { %7098 = vmatpush1.bf16.msra.mxu0 %v7091_v21  ;;  %10919 = vmatmul.mubr.msk.bf16.vlgmr.msra.gmra.mrb[180].mxu1 %vm6006_vm3, %v10918_v18 }
 0x9ef   : > { %7129 = vmatprep.mubr.bf16.mxu0 %v12251_v0  ;;  %7184 = vmatprep.mubr.bf16.mxu1 %v12251_v0 }
 0x9f0   : > { %v7145_v22 = vpop.permute.xlu1 %7144  ;;  %v7198_v23 = vpop.permute.xlu0 %7197 }
 0x9f1   : > { %7152 = vmatprep.subr.bf16.mxu1 %v7145_v22  ;;  %v7146_v24 = vsel %vm14713_vm14, %v7143_v20, %v7145_v22  ;;  %vm7427_vm14 = vcmask 160832  }
 0x9f2   : > { %7153 = vmatpush1.bf16.msra.mxu1 %v7146_v24 }
 0x9f4   : > { %v7200_v27 = vpop.permute.xlu1 %7199  ;;  %v7253_v29 = vpop.permute.xlu0 %7252 }
 0x9f5   : > { %10921 = vmatmul.mubr.msk.bf16.vlgmr.msra.gmra.mrb[184].mxu0 %vm6006_vm3, %v10920_v25  ;;  %7207 = vmatprep.subr.bf16.mxu0 %v7200_v27  ;;  %v7201_v28 = vsel %vm14714_vm2, %v7198_v23, %v7200_v27  ;;  %vm7432_vm2 = vcmask 324832  }
 0x9f6   : > { %7208 = vmatpush1.bf16.msra.mxu0 %v7201_v28  ;;  %10923 = vmatmul.mubr.msk.bf16.vlgmr.msra.gmra.mrb[184].mxu1 %vm6006_vm3, %v10922_v26 }
 0x9f7   : > { %7239 = vmatprep.mubr.bf16.mxu0 %v12251_v0  ;;  %7294 = vmatprep.mubr.bf16.mxu1 %v12251_v0 }
 0x9f8   : > { %v7255_v30 = vpop.permute.xlu1 %7254  ;;  %v7308_v34 = vpop.permute.xlu0 %7307 }
 0x9f9   : > { %7262 = vmatprep.subr.bf16.mxu1 %v7255_v30  ;;  %v7256_v31 = vsel %vm14715_vm1, %v7253_v29, %v7255_v30  ;;  %vm7434_vm1 = vcmask 488832  }
 0x9fa   : > { %7263 = vmatpush1.bf16.msra.mxu1 %v7256_v31 }
 0x9fc   : > { %v7310_v35 = vpop.permute.xlu1 %7309 }
 0x9fd   : > { %10925 = vmatmul.mubr.msk.bf16.vlgmr.msra.gmra.mrb[188].mxu0 %vm6006_vm3, %v10924_v32  ;;  %7317 = vmatprep.subr.bf16.mxu0 %v7310_v35  ;;  %v7311_v36 = vsel %vm14716_vm15, %v7308_v34, %v7310_v35  ;;  %vm7422_vm15 = vcmask 1046432  }
 0x9fe   : > { %7318 = vmatpush1.bf16.msra.mxu0 %v7311_v36  ;;  %10927 = vmatmul.mubr.msk.bf16.vlgmr.msra.gmra.mrb[188].mxu1 %vm6006_vm3, %v10926_v33 }
 0x9ff   : > { %7349 = vmatprep.mubr.bf16.mxu0 %v12251_v0  ;;  %11767 = vmatprep.subr.bf16.mxu0 %v13125_v14 }
 0xa00   : > { %7502 = vmatprep.mubr.bf16.mxu1 %v12251_v0 }
 0xa05   : > { %10929 = vmatmul.mubr.msk.bf16.vlgmr.msra.gmra.mrb[192].mxu0 %vm6006_vm3, %v10928_v37  ;;  %vm7391_vm3 = vcmask 62464  }
 0xa06   : > { %v6088_v38 = vpop.f32.mrb[144].mxu1  ;;  %11769 = vmatprep.mubr.msk.bf16.mxu0 %vm14717_vm0, %v13125_v14 }
 0xa07   : > { %v6090_v39 = vpop.f32.mrb[145].mxu1 }
 0xa08   : > { %v6092_v40 = vpop.f32.mrb[146].mxu1 }
 0xa09   : > { %v6093_v41 = vpop.f32.mrb[147].mxu1 }
 0xa78   : > { %v6044_v42 = vpop.f32.mrb[144].mxu0 }
 0xa79   : > { %v6089_v12 = vadd.f32 %v6088_v38, %v6044_v42  ;;  %v6046_v43 = vpop.f32.mrb[145].mxu0 }
 0xa7a   : > { %v6091_v44 = vadd.f32 %v6090_v39, %v6046_v43  ;;  %v6048_v45 = vpop.f32.mrb[146].mxu0 }
 0xa7b   : > { %v6049_v46 = vpop.f32.mrb[147].mxu0 }
 0xa80   : > { %v6141_v47 = vpop.f32.mrb[148].mxu0 }
 0xa81   : > { %v6148_v48 = vadd.f32 %v6141_v47, %v6089_v12  ;;  %v6143_v10 = vpop.f32.mrb[149].mxu0  ;;  %v6196_v49 = vpop.f32.mrb[148].mxu1 }
 0xa82   : > { %v6149_v50 = vadd.f32 %v6143_v10, %v6091_v44  ;;  %v6145_v51 = vpop.f32.mrb[150].mxu0  ;;  %v6198_v52 = vpop.f32.mrb[149].mxu1 }
 0xa83   : > { %v6203_v53 = vadd.f32 %v6196_v49, %v6148_v48  ;;  %v6146_v54 = vpop.f32.mrb[151].mxu0  ;;  %v6200_v55 = vpop.f32.mrb[150].mxu1 }
 0xa84   : > { %v6204_v56 = vadd.f32 %v6198_v52, %v6149_v50  ;;  %v6201_v57 = vpop.f32.mrb[151].mxu1 }
 0xa88   : > { %v6251_v58 = vpop.f32.mrb[152].mxu0 }
 0xa89   : > { %v6258_v59 = vadd.f32 %v6251_v58, %v6203_v53  ;;  %v6253_v60 = vpop.f32.mrb[153].mxu0  ;;  %v6306_v61 = vpop.f32.mrb[152].mxu1 }
 0xa8a   : > { %v6259_v62 = vadd.f32 %v6253_v60, %v6204_v56  ;;  %v6255_v63 = vpop.f32.mrb[154].mxu0  ;;  %v6308_v1 = vpop.f32.mrb[153].mxu1 }
 0xa8b   : > { %v6313_v2 = vadd.f32 %v6306_v61, %v6258_v59  ;;  %v6256_v3 = vpop.f32.mrb[155].mxu0  ;;  %v6310_v6 = vpop.f32.mrb[154].mxu1 }
 0xa8c   : > { %v6314_v4 = vadd.f32 %v6308_v1, %v6259_v62  ;;  %v6311_v5 = vpop.f32.mrb[155].mxu1 }
 0xa90   : > { %v6361_v7 = vpop.f32.mrb[156].mxu0 }
 0xa91   : > { %v6368_v8 = vadd.f32 %v6361_v7, %v6313_v2  ;;  %v6363_v9 = vpop.f32.mrb[157].mxu0  ;;  %v6416_v11 = vpop.f32.mrb[156].mxu1 }
 0xa92   : > { %v6369_v13 = vadd.f32 %v6363_v9, %v6314_v4  ;;  %v6365_v15 = vpop.f32.mrb[158].mxu0  ;;  %v6418_v16 = vpop.f32.mrb[157].mxu1 }
 0xa93   : > { %v6423_v17 = vadd.f32 %v6416_v11, %v6368_v8  ;;  %v6366_v18 = vpop.f32.mrb[159].mxu0  ;;  %v6420_v19 = vpop.f32.mrb[158].mxu1 }
 0xa94   : > { %v6424_v20 = vadd.f32 %v6418_v16, %v6369_v13  ;;  %v6421_v21 = vpop.f32.mrb[159].mxu1 }
 0xa98   : > { %v6471_v22 = vpop.f32.mrb[160].mxu0 }
 0xa99   : > { %v6478_v23 = vadd.f32 %v6471_v22, %v6423_v17  ;;  %v6473_v24 = vpop.f32.mrb[161].mxu0  ;;  %v6526_v25 = vpop.f32.mrb[160].mxu1 }
 0xa9a   : > { %v6479_v26 = vadd.f32 %v6473_v24, %v6424_v20  ;;  %v6475_v27 = vpop.f32.mrb[162].mxu0  ;;  %v6528_v28 = vpop.f32.mrb[161].mxu1 }
 0xa9b   : > { %v6533_v29 = vadd.f32 %v6526_v25, %v6478_v23  ;;  %v6476_v30 = vpop.f32.mrb[163].mxu0  ;;  %v6530_v31 = vpop.f32.mrb[162].mxu1 }
 0xa9c   : > { %v6534_v32 = vadd.f32 %v6528_v28, %v6479_v26  ;;  %v6531_v33 = vpop.f32.mrb[163].mxu1 }
 0xaa0   : > { %v6581_v34 = vpop.f32.mrb[164].mxu0 }
 0xaa1   : > { %v6588_v35 = vadd.f32 %v6581_v34, %v6533_v29  ;;  %v6583_v36 = vpop.f32.mrb[165].mxu0  ;;  %v6636_v37 = vpop.f32.mrb[164].mxu1 }
 0xaa2   : > { %v6589_v38 = vadd.f32 %v6583_v36, %v6534_v32  ;;  %v6585_v39 = vpop.f32.mrb[166].mxu0  ;;  %v6638_v40 = vpop.f32.mrb[165].mxu1 }
 0xaa3   : > { %v6643_v41 = vadd.f32 %v6636_v37, %v6588_v35  ;;  %v6586_v42 = vpop.f32.mrb[167].mxu0  ;;  %v6640_v12 = vpop.f32.mrb[166].mxu1 }
 0xaa4   : > { %v6644_v43 = vadd.f32 %v6638_v40, %v6589_v38  ;;  %v6641_v44 = vpop.f32.mrb[167].mxu1 }
 0xaa8   : > { %v6691_v45 = vpop.f32.mrb[168].mxu0 }
 0xaa9   : > { %v6698_v46 = vadd.f32 %v6691_v45, %v6643_v41  ;;  %v6693_v47 = vpop.f32.mrb[169].mxu0  ;;  %v6746_v48 = vpop.f32.mrb[168].mxu1 }
 0xaaa   : > { %v6699_v10 = vadd.f32 %v6693_v47, %v6644_v43  ;;  %v6695_v49 = vpop.f32.mrb[170].mxu0  ;;  %v6748_v50 = vpop.f32.mrb[169].mxu1 }
 0xaab   : > { %v6753_v51 = vadd.f32 %v6746_v48, %v6698_v46  ;;  %v6696_v52 = vpop.f32.mrb[171].mxu0  ;;  %v6750_v53 = vpop.f32.mrb[170].mxu1 }
 0xaac   : > { %v6754_v54 = vadd.f32 %v6748_v50, %v6699_v10  ;;  %v6751_v55 = vpop.f32.mrb[171].mxu1 }
 0xab0   : > { %v6801_v56 = vpop.f32.mrb[172].mxu0 }
 0xab1   : > { %v6808_v57 = vadd.f32 %v6801_v56, %v6753_v51  ;;  %v6803_v58 = vpop.f32.mrb[173].mxu0  ;;  %v6856_v59 = vpop.f32.mrb[172].mxu1 }
 0xab2   : > { %v6809_v60 = vadd.f32 %v6803_v58, %v6754_v54  ;;  %v6805_v61 = vpop.f32.mrb[174].mxu0  ;;  %v6858_v62 = vpop.f32.mrb[173].mxu1 }
 0xab3   : > { %v6863_v63 = vadd.f32 %v6856_v59, %v6808_v57  ;;  %v6806_v1 = vpop.f32.mrb[175].mxu0  ;;  %v6860_v2 = vpop.f32.mrb[174].mxu1 }
 0xab4   : > { %v6864_v3 = vadd.f32 %v6858_v62, %v6809_v60  ;;  %v6861_v6 = vpop.f32.mrb[175].mxu1  ;;  %v7364_v57 = vpop.permute.xlu0 %7363 }
 0xab8   : > { %v6911_v4 = vpop.f32.mrb[176].mxu0 }
 0xab9   : > { %v6918_v5 = vadd.f32 %v6911_v4, %v6863_v63  ;;  %v6913_v7 = vpop.f32.mrb[177].mxu0  ;;  %v6966_v8 = vpop.f32.mrb[176].mxu1 }
 0xaba   : > { %v6919_v9 = vadd.f32 %v6913_v7, %v6864_v3  ;;  %v6915_v11 = vpop.f32.mrb[178].mxu0  ;;  %v6968_v13 = vpop.f32.mrb[177].mxu1 }
 0xabb   : > { %v6973_v15 = vadd.f32 %v6966_v8, %v6918_v5  ;;  %v6916_v16 = vpop.f32.mrb[179].mxu0  ;;  %v6970_v17 = vpop.f32.mrb[178].mxu1 }
 0xabc   : > { %v6974_v18 = vadd.f32 %v6968_v13, %v6919_v9  ;;  %v6971_v19 = vpop.f32.mrb[179].mxu1 }
 0xac0   : > { %v7021_v20 = vpop.f32.mrb[180].mxu0 }
 0xac1   : > { %v7028_v21 = vadd.f32 %v7021_v20, %v6973_v15  ;;  %v7023_v22 = vpop.f32.mrb[181].mxu0  ;;  %v7076_v23 = vpop.f32.mrb[180].mxu1 }
 0xac2   : > { %v7029_v24 = vadd.f32 %v7023_v22, %v6974_v18  ;;  %v7025_v25 = vpop.f32.mrb[182].mxu0  ;;  %v7078_v26 = vpop.f32.mrb[181].mxu1 }
 0xac3   : > { %v7083_v27 = vadd.f32 %v7076_v23, %v7028_v21  ;;  %v7026_v28 = vpop.f32.mrb[183].mxu0  ;;  %v7080_v29 = vpop.f32.mrb[182].mxu1  ;;  %v7439_v23 = vld [vmem:[#allocation4 + $0x18] sm:$0x3f] }
 0xac4   : > { %v7084_v30 = vadd.f32 %v7078_v26, %v7029_v24  ;;  %v7081_v31 = vpop.f32.mrb[183].mxu1  ;;  %v14077_v24 = vpack.c.bf16 %v7439_v23, %v7439_v23 }
 0xac8   : > { %v7131_v32 = vpop.f32.mrb[184].mxu0 }
 0xac9   : > { %v7138_v33 = vadd.f32 %v7131_v32, %v7083_v27  ;;  %v7133_v34 = vpop.f32.mrb[185].mxu0  ;;  %v7186_v35 = vpop.f32.mrb[184].mxu1 }
 0xaca   : > { %v7139_v36 = vadd.f32 %v7133_v34, %v7084_v30  ;;  %v7135_v37 = vpop.f32.mrb[186].mxu0  ;;  %v7188_v38 = vpop.f32.mrb[185].mxu1 }
 0xacb   : > { %v7193_v39 = vadd.f32 %v7186_v35, %v7138_v33  ;;  %v7136_v40 = vpop.f32.mrb[187].mxu0  ;;  %v7190_v41 = vpop.f32.mrb[186].mxu1 }
 0xacc   : > { %v7194_v42 = vadd.f32 %v7188_v38, %v7139_v36  ;;  %v7191_v12 = vpop.f32.mrb[187].mxu1 }
 0xad0   : > { %v7241_v43 = vpop.f32.mrb[188].mxu0 }
 0xad1   : > { %v7248_v44 = vadd.f32 %v7241_v43, %v7193_v39  ;;  %v7243_v45 = vpop.f32.mrb[189].mxu0  ;;  %v7296_v46 = vpop.f32.mrb[188].mxu1 }
 0xad2   : > { %v7249_v47 = vadd.f32 %v7243_v45, %v7194_v42  ;;  %v7245_v48 = vpop.f32.mrb[190].mxu0  ;;  %v7298_v10 = vpop.f32.mrb[189].mxu1 }
 0xad3   : > { %v7303_v49 = vadd.f32 %v7296_v46, %v7248_v44  ;;  %v7246_v50 = vpop.f32.mrb[191].mxu0  ;;  %v7300_v51 = vpop.f32.mrb[190].mxu1 }
 0xad4   : > { %v7304_v52 = vadd.f32 %v7298_v10, %v7249_v47  ;;  %v7301_v53 = vpop.f32.mrb[191].mxu1 }
 0xad8   : > { %v7351_v54 = vpop.f32.mrb[192].mxu0 }
 0xad9   : > { %v7358_v55 = vadd.f32 %v7351_v54, %v7303_v49  ;;  %v7353_v56 = vpop.f32.mrb[193].mxu0 }
 0xada   : > { %v7359_v58 = vadd.f32 %v7353_v56, %v7304_v52  ;;  %v7355_v59 = vpop.f32.mrb[194].mxu0 }
 0xadb   : > { %v7366_v60 = vadd.f32 %v7364_v57, %v7358_v55  ;;  %v7356_v61 = vpop.f32.mrb[195].mxu0 }
 0xadc   : > { %v7367_v63 = vadd.f32 %v7364_v57, %v7359_v58 }
 0xadd   : > { %v7368_v62 = vmax.f32 %v7366_v60, 0.0 }
 0xade   : > { %v7369_v1 = vmax.f32 %v7367_v63, 0.0 }
 0xadf   : > { %7393 = vrot.lane.b32.xlu0 %v7368_v62, %s14691_s4  ;;  %7386 = vrot.lane.b32.xlu1 %v7368_v62, %s14670_s18 }
 0xae3   : > { %7403 = vrot.lane.b32.xlu0 %v7368_v62, %s12282_s15  ;;  %7398 = vrot.lane.b32.xlu1 %v7368_v62, %s12279_s22 }
 0xae7   : > { %7408 = vrot.lane.b32.xlu0 %v7368_v62, %s14665_s23  ;;  %7376 = vrot.lane.b32.xlu1 %v7368_v62, %s12280_s5 }
 0xaeb   : > { %7381 = vrot.lane.b32.xlu0 %v7368_v62, %s12283_s30  ;;  %7413 = vrot.lane.b32.xlu1 %v7368_v62, %s14659_s25 }
 0xaef   : > { %7429 = vrot.lane.b32.xlu0 %v7369_v1, %s14662_s1  ;;  %7424 = vrot.lane.b32.xlu1 %v7369_v1, %s12284_s20 }
 0xaf3   : > { %7419 = vrot.lane.b32.xlu1 %v7369_v1, %s12281_s16 }
 0xb51   : > { %v7394_v2 = vpop.permute.xlu0 %7393  ;;  %v7387_v3 = vpop.permute.xlu1 %7386 }
 0xb52   : > { %7392 = vst.msk [vmem:[#allocation4 + $0x8] sm:$0x3f] %vm7391_vm3, %v7387_v3  ;;  %vm14719_vm3 = vcmask 1042432  }
 0xb53   : > { %7397 = vst.msk [vmem:[#allocation4 + $0x8] sm:$0x3f] %vm7396_vm4, %v7394_v2  ;;  %vm14721_vm4 = vcmask 1039360   ;;  %vm14726_vm9 = vmmov %vm14719_vm3 }
 0xb55   : > { %v7404_v6 = vpop.permute.xlu0 %7403  ;;  %v7399_v4 = vpop.permute.xlu1 %7398 }
 0xb56   : > { %7402 = vst.msk [vmem:[#allocation4 + $0x8] sm:$0x3f] %vm7401_vm5, %v7399_v4  ;;  %vm14722_vm5 = vmmov %vm14721_vm4 }
 0xb57   : > { %7407 = vst.msk [vmem:[#allocation4 + $0x8] sm:$0x3f] %vm7406_vm6, %v7404_v6  ;;  %vm14723_vm6 = vmmov %vm14719_vm3 }
 0xb59   : > { %v7409_v5 = vpop.permute.xlu0 %7408  ;;  %v7377_v7 = vpop.permute.xlu1 %7376 }
 0xb5a   : > { %7412 = vst.msk [vmem:[#allocation4 + $0x8] sm:$0x3f] %vm7411_vm7, %v7409_v5  ;;  %vm14724_vm7 = vmmov %vm14719_vm3 }
 0xb5b   : > { %7380 = vst.msk [vmem:[#allocation4] sm:$0x3f] %vm7379_vm8, %v7377_v7  ;;  %vm14725_vm8 = vcmask 48128  }
 0xb5d   : > { %v7382_v8 = vpop.permute.xlu0 %7381  ;;  %v7414_v9 = vpop.permute.xlu1 %7413 }
 0xb5e   : > { %7385 = vst.msk [vmem:[#allocation4] sm:$0x3f] %vm7384_vm11, %v7382_v8  ;;  %vm14727_vm11 = vmmov %vm14719_vm3 }
 0xb5f   : > { %7417 = vst.msk [vmem:[#allocation4 + $0x8] sm:$0x3f] %vm7416_vm12, %v7414_v9  ;;  %vm14728_vm12 = vmmov %vm14725_vm8 }
 0xb60   : > { %7390 = vst.msk [vmem:[#allocation4] sm:$0x3f] %vm7389_vm13, %v7387_v3  ;;  %vm14729_vm13 = vmmov %vm14719_vm3 }
 0xb61   : > { %v7430_v11 = vpop.permute.xlu0 %7429  ;;  %v7425_v13 = vpop.permute.xlu1 %7424 }
 0xb62   : > { %7428 = vst.msk [vmem:[#allocation4 + $0x10] sm:$0x3f] %vm7427_vm14, %v7425_v13  ;;  %vm14730_vm14 = vcmask 1031168  }
 0xb63   : > { %7433 = vst.msk [vmem:[#allocation4 + $0x10] sm:$0x3f] %vm7432_vm2, %v7430_v11  ;;  %vm14731_vm2 = vmmov %vm14719_vm3 }
 0xb64   : > { %7435 = vst.msk [vmem:[#allocation4 + $0x10] sm:$0x3f] %vm7434_vm1, %v7369_v1  ;;  %vm14732_vm1 = vmmov %vm14731_vm2 }
 0xb65   : > { %v7420_v15 = vpop.permute.xlu1 %7419 }
 0xb66   : > { %7423 = vst.msk [vmem:[#allocation4 + $0x8] sm:$0x3f] %vm7422_vm15, %v7420_v15  ;;  %vm14733_vm15 = vmmov %vm14730_vm14 }
 0xb67   : > { %v7436_v16 = vld [vmem:[#allocation4] sm:$0x3f] }
 0xb68   : > { %v13983_v17 = vpack.c.bf16 %v7436_v16, %v7436_v16 }
 0xb6a   : > { %7450 = vrot.lane.b32.xlu0 %v13983_v17, %s14657_s21  ;;  %v7555_v36 = vsel %vm14729_vm13, %v13983_v17, 0  ;;  %vm14743_vm13 = vmmov %vm14732_vm1 }
 0xb6b   : > { %v7438_v18 = vld [vmem:[#allocation4 + $0x10] sm:$0x3f] }
 0xb6c   : > { %v13987_v19 = vpack.c.bf16 %v7438_v18, %v7438_v18 }
 0xb6d   : > { %v7437_v20 = vld [vmem:[#allocation4 + $0x8] sm:$0x3f] }
 0xb6e   : > { %v13989_v21 = vpack.c.bf16 %v7437_v20, %v7437_v20  ;;  %7454 = vrot.lane.b32.xlu0 %v13987_v19, %s14657_s21  ;;  %v7561_v33 = vsel %vm14726_vm9, %v13987_v19, 0 }
 0xb70   : > { %7452 = vrot.lane.b32.xlu1 %v13989_v21, %s14657_s21  ;;  %s12287_s21 = smov 105  }
 0xb72   : > { %7648 = vrot.lane.b32.xlu0 %v13989_v21, %s14660_s19 }
 0xb74   : > { %7646 = vrot.lane.b32.xlu1 %v13983_v17, %s14660_s19 }
 0xb76   : > { %7752 = vrot.lane.b32.xlu0 %v13983_v17, %s14656_s29 }
 0xb78   : > { %7650 = vrot.lane.b32.xlu1 %v13987_v19, %s14660_s19  ;;  %s12285_s19 = smov 107  }
 0xb7a   : > { %7756 = vrot.lane.b32.xlu0 %v13987_v19, %s14656_s29 }
 0xb7c   : > { %7754 = vrot.lane.b32.xlu1 %v13989_v21, %s14656_s29  ;;  %s12286_s29 = smov 106  }
 0xb7e   : > { %7860 = vrot.lane.b32.xlu0 %v13989_v21, %s14662_s1 }
 0xb80   : > { %7858 = vrot.lane.b32.xlu1 %v13983_v17, %s14662_s1 }
 0xb82   : > { %7964 = vrot.lane.b32.xlu0 %v13983_v17, %s14665_s23 }
 0xb84   : > { %7862 = vrot.lane.b32.xlu1 %v13987_v19, %s14662_s1 }
 0xb86   : > { %7968 = vrot.lane.b32.xlu0 %v13987_v19, %s14665_s23 }
 0xb88   : > { %7966 = vrot.lane.b32.xlu1 %v13989_v21, %s14665_s23 }
 0xb8a   : > { %8072 = vrot.lane.b32.xlu0 %v13989_v21, %s12285_s19 }
 0xb8c   : > { %8070 = vrot.lane.b32.xlu1 %v13983_v17, %s12285_s19 }
 0xb8e   : > { %8177 = vrot.lane.b32.xlu0 %v13983_v17, %s12286_s29 }
 0xb90   : > { %8074 = vrot.lane.b32.xlu1 %v13987_v19, %s12285_s19  ;;  %s12291_s19 = smov 67  }
 0xb92   : > { %8181 = vrot.lane.b32.xlu0 %v13987_v19, %s12286_s29 }
 0xb94   : > { %8179 = vrot.lane.b32.xlu1 %v13989_v21, %s12286_s29  ;;  %s12292_s29 = smov 66  }
 0xb96   : > { %8286 = vrot.lane.b32.xlu0 %v13989_v21, %s12287_s21 }
 0xb98   : > { %8284 = vrot.lane.b32.xlu1 %v13983_v17, %s12287_s21 }
 0xb9a   : > { %8391 = vrot.lane.b32.xlu0 %v13983_v17, %s12282_s15 }
 0xb9c   : > { %8288 = vrot.lane.b32.xlu1 %v13987_v19, %s12287_s21  ;;  %s12293_s21 = smov 65  }
 0xb9e   : > { %8395 = vrot.lane.b32.xlu0 %v13987_v19, %s12282_s15 }
 0xba0   : > { %8393 = vrot.lane.b32.xlu1 %v13989_v21, %s12282_s15 }
 0xba2   : > { %8500 = vrot.lane.b32.xlu0 %v13989_v21, %s12283_s30 }
 0xba4   : > { %8498 = vrot.lane.b32.xlu1 %v13983_v17, %s12283_s30 }
 0xba6   : > { %8605 = vrot.lane.b32.xlu0 %v13983_v17, %s12288_s0 }
 0xba8   : > { %8502 = vrot.lane.b32.xlu1 %v13987_v19, %s12283_s30 }
 0xbaa   : > { %8609 = vrot.lane.b32.xlu0 %v13987_v19, %s12288_s0 }
 0xbac   : > { %8607 = vrot.lane.b32.xlu1 %v13989_v21, %s12288_s0  ;;  %s12294_s0 = smov 48  }
 0xbae   : > { %8714 = vrot.lane.b32.xlu0 %v13989_v21, %s12289_s2 }
 0xbb0   : > { %8712 = vrot.lane.b32.xlu1 %v13983_v17, %s12289_s2 }
 0xbb2   : > { %8819 = vrot.lane.b32.xlu0 %v13983_v17, %s12290_s24 }
 0xbb4   : > { %8716 = vrot.lane.b32.xlu1 %v13987_v19, %s12289_s2 }
 0xbb6   : > { %8823 = vrot.lane.b32.xlu0 %v13987_v19, %s12290_s24 }
 0xbb8   : > { %8821 = vrot.lane.b32.xlu1 %v13989_v21, %s12290_s24 }
 0xbba   : > { %8928 = vrot.lane.b32.xlu0 %v13989_v21, %s12280_s5 }
 0xbbc   : > { %8926 = vrot.lane.b32.xlu1 %v13983_v17, %s12280_s5 }
 0xbbe   : > { %9033 = vrot.lane.b32.xlu0 %v13983_v17, %s14718_s3 }
 0xbc0   : > { %8930 = vrot.lane.b32.xlu1 %v13987_v19, %s12280_s5 }
 0xbc2   : > { %9037 = vrot.lane.b32.xlu0 %v13987_v19, %s14718_s3 }
 0xbc4   : > { %9035 = vrot.lane.b32.xlu1 %v13989_v21, %s14718_s3 }
 0xbc6   : > { %9142 = vrot.lane.b32.xlu0 %v13989_v21, %s12291_s19 }
 0xbc8   : > { %9140 = vrot.lane.b32.xlu1 %v13983_v17, %s12291_s19 }
 0xbca   : > { %9247 = vrot.lane.b32.xlu0 %v13983_v17, %s12292_s29 }
 0xbcc   : > { %9144 = vrot.lane.b32.xlu1 %v13987_v19, %s12291_s19  ;;  %s14720_s19 = sld [smem:[#allocation25_spill]] }
 0xbce   : > { %9251 = vrot.lane.b32.xlu0 %v13987_v19, %s12292_s29 }
 0xbd0   : > { %9249 = vrot.lane.b32.xlu1 %v13989_v21, %s12292_s29  ;;  %s12299_s29 = smov 72  }
 0xbd2   : > { %9356 = vrot.lane.b32.xlu0 %v13989_v21, %s12293_s21  ;;  %v10930_v28 = vld [vmem:[%s14720_s19 + $0x2] sm:$0x3]  ;;  %v7444_v38 = vld [vmem:[%s14720_s19] sm:$0x3]  ;;  %v10937_v47 = vld [vmem:[%s14720_s19 + $0x4] sm:$0x3] }
 0xbd3   : > { %v10941_v55 = vld [vmem:[%s14720_s19 + $0x6] sm:$0x3]  ;;  %v10945_v1 = vld [vmem:[%s14720_s19 + $0x8] sm:$0x3]  ;;  %v10949_v13 = vld [vmem:[%s14720_s19 + $0xa] sm:$0x3] }
 0xbd4   : > { %9354 = vrot.lane.b32.xlu1 %v13983_v17, %s12293_s21  ;;  %v10953_v23 = vld [vmem:[%s14720_s19 + $0xc] sm:$0x3] }
 0xbd6   : > { %9461 = vrot.lane.b32.xlu0 %v13983_v17, %s14676_s17 }
 0xbd8   : > { %9358 = vrot.lane.b32.xlu1 %v13987_v19, %s12293_s21  ;;  %s14753_s21 = sld [smem:[#allocation26_spill]] }
 0xbda   : > { %9465 = vrot.lane.b32.xlu0 %v13987_v19, %s14676_s17 }
 0xbdc   : > { %v7451_v22 = vpop.permute.xlu0 %7450  ;;  %9463 = vrot.lane.b32.xlu1 %v13989_v21, %s14676_s17  ;;  %s12295_s17 = smov 47  }
 0xbde   : > { %9570 = vrot.lane.b32.xlu0 %v13989_v21, %s12294_s0  ;;  %v10116_v4 = vld [vmem:[%s14753_s21] sm:$0xf]  ;;  %s14850_s21 = sld [smem:[#allocation12_spill]] }
 0xbe0   : > { %v7455_v25 = vpop.permute.xlu0 %7454  ;;  %9568 = vrot.lane.b32.xlu1 %v13983_v17, %s12294_s0 }
 0xbe1   : > { %v7468_v26 = vsel %vm14719_vm3, %v7455_v25, 0  ;;  %vm14734_vm3 = vmmov %vm14725_vm8 }
 0xbe2   : > { %11768 = vmatpush3.bf16.msra.mxu0 %v7468_v26  ;;  %9574 = vrot.lane.b32.xlu0 %v14077_v24, %s12294_s0  ;;  %v7453_v27 = vpop.permute.xlu1 %7452 }
 0xbe3   : > { %v7456_v29 = vsel %vm14721_vm4, %v7451_v22, %v7453_v27  ;;  %v7457_v30 = vsel %vm14722_vm5, %v7453_v27, %v7455_v25  ;;  %11773 = vmatprep.subr.bf16.mxu0 %v13125_v14  ;;  %vm14735_vm4 = vcmask 1022976   ;;  %vm14736_vm5 = vmmov %vm14732_vm1 }
 0xbe4   : > { %v7462_v31 = vsel %vm14723_vm6, %v7456_v29, 0  ;;  %v7649_v32 = vpop.permute.xlu0 %7648  ;;  %9572 = vrot.lane.b32.xlu1 %v13987_v19, %s12294_s0  ;;  %10931 = vmatprep.subr.msk.bf16.mxu1 %vm14724_vm7, %v7457_v30  ;;  %s12296_s0 = smov 46   ;;  %vm14737_vm6 = vmmov %vm14734_vm3 }
 0xbe5   : > { %7471 = vmatpush1.bf16.msra.mxu1 %v7462_v31  ;;  %11770 = vmatmul.mubr.msk.bf16.vlgmr.msra.gmra.mrb[196].mxu0 %vm14725_vm8, %v10930_v28  ;;  %vm14738_vm7 = vmmov %vm14732_vm1 }
 0xbe6   : > { %11774 = vmatpush3.bf16.msra.mxu0 %v7561_v33  ;;  %9680 = vrot.lane.b32.xlu0 %v13989_v21, %s12295_s17  ;;  %v7647_v34 = vpop.permute.xlu1 %7646  ;;  %vm14739_vm8 = vmmov %vm14732_vm1 }
 0xbe7   : > { %10934 = vmatprep.subr.msk.bf16.mxu1 %vm14727_vm11, %v13989_v21  ;;  %11775 = vmatprep.mubr.msk.bf16.mxu0 %vm14717_vm0, %v13125_v14  ;;  %v7652_v42 = vsel %vm14733_vm15, %v7647_v34, %v7649_v32  ;;  %vm14740_vm9 = vmmov %vm14735_vm4 }
 0xbe8   : > { %v7753_v35 = vpop.permute.xlu0 %7752  ;;  %9678 = vrot.lane.b32.xlu1 %v13983_v17, %s12295_s17  ;;  %10932 = vmatmul.mubr.msk.bf16.vlgmr.msra.gmra.mrb[192].mxu1 %vm14728_vm12, %v10930_v28  ;;  %v7658_v44 = vsel %vm14736_vm5, %v7652_v42, 0  ;;  %vm14741_vm11 = vmmov %vm14734_vm3  ;;  %vm14742_vm12 = vcmask 1014784  }
 0xbe9   : > { %7564 = vmatpush1.bf16.msra.mxu1 %v7555_v36  ;;  %11779 = vmatprep.subr.bf16.mxu0 %v13125_v14  ;;  %vm14749_vm5 = vmmov %vm14734_vm3 }
 0xbea   : > { %9684 = vrot.lane.b32.xlu0 %v14077_v24, %s12295_s17  ;;  %v7651_v37 = vpop.permute.xlu1 %7650  ;;  %7595 = vmatprep.mubr.bf16.mxu1 %v12251_v0 }
 0xbeb   : > { %v7653_v39 = vsel %vm14730_vm14, %v7649_v32, %v7651_v37  ;;  %v7664_v40 = vsel %vm14731_vm2, %v7651_v37, 0  ;;  %vm14744_vm14 = vmmov %vm14734_vm3  ;;  %v10957_v32 = vld [vmem:[%s14720_s19 + $0xe] sm:$0x3] }
 0xbec   : > { %v7757_v41 = vpop.permute.xlu0 %7756  ;;  %9682 = vrot.lane.b32.xlu1 %v13987_v19, %s12295_s17  ;;  %10938 = vmatprep.subr.msk.bf16.mxu1 %vm14732_vm1, %v7653_v39  ;;  %s12297_s17 = smov 45   ;;  %vm14745_vm2 = vmmov %vm14732_vm1 }
 0xbed   : > { %11776 = vmatmul.mubr.msk.bf16.vlgmr.msra.gmra.mrb[200].mxu0 %vm14734_vm3, %v7444_v38  ;;  %v7770_v10 = vsel %vm14739_vm8, %v7757_v41, 0  ;;  %vm14746_vm1 = vmmov %vm14742_vm12 }
 0xbee   : > { %11780 = vmatpush3.bf16.msra.mxu0 %v7664_v40  ;;  %9790 = vrot.lane.b32.xlu0 %v13989_v21, %s12296_s0  ;;  %v7755_v12 = vpop.permute.xlu1 %7754  ;;  %vm14747_vm15 = vmmov %vm14745_vm2 }
 0xbef   : > { %v7759_v43 = vsel %vm14735_vm4, %v7755_v12, %v7757_v41  ;;  %11781 = vmatprep.mubr.msk.bf16.mxu0 %vm14717_vm0, %v13125_v14  ;;  %11785 = vmatprep.subr.bf16.mxu0 %v13125_v14  ;;  %v7758_v49 = vsel %vm14740_vm9, %v7753_v35, %v7755_v12  ;;  %vm14748_vm4 = vmmov %vm14745_vm2  ;;  %v10961_v41 = vld [vmem:[%s14720_s19 + $0x10] sm:$0x3] }
 0xbf0   : > { %v7861_v45 = vpop.permute.xlu0 %7860  ;;  %9788 = vrot.lane.b32.xlu1 %v13983_v17, %s12296_s0  ;;  %10935 = vmatmul.mubr.msk.bf16.vlgmr.msra.gmra.mrb[196].mxu1 %vm14737_vm6, %v7444_v38  ;;  %v7764_v52 = vsel %vm14743_vm13, %v7758_v49, 0  ;;  %vm14750_vm6 = vmmov %vm14745_vm2 }
 0xbf1   : > { %7667 = vmatpush1.bf16.msra.mxu1 %v7658_v44  ;;  %7698 = vmatprep.mubr.bf16.mxu1 %v12251_v0  ;;  %vm14752_vm8 = vmmov %vm14734_vm3 }
 0xbf2   : > { %10942 = vmatprep.subr.msk.bf16.mxu1 %vm14738_vm7, %v7759_v43  ;;  %9794 = vrot.lane.b32.xlu0 %v14077_v24, %s12296_s0  ;;  %v7859_v46 = vpop.permute.xlu1 %7858  ;;  %vm14751_vm7 = vmmov %vm14745_vm2 }
 0xbf3   : > { %v7864_v57 = vsel %vm14746_vm1, %v7859_v46, %v7861_v45  ;;  %vm14754_vm9 = vmmov %vm14745_vm2 }
 0xbf4   : > { %v7965_v48 = vpop.permute.xlu0 %7964  ;;  %9792 = vrot.lane.b32.xlu1 %v13987_v19, %s12296_s0  ;;  %s12298_s0 = smov 44   ;;  %v7870_v60 = vsel %vm14748_vm4, %v7864_v57, 0  ;;  %vm14757_vm13 = vmmov %vm14745_vm2 }
 0xbf5   : > { %11782 = vmatmul.mubr.msk.bf16.vlgmr.msra.gmra.mrb[204].mxu0 %vm14741_vm11, %v10937_v47  ;;  %vm8076_vm11 = vcmask 875520   ;;  %vm14759_vm1 = vmmov %vm14748_vm4 }
 0xbf6   : > { %11786 = vmatpush3.bf16.msra.mxu0 %v7770_v10  ;;  %9900 = vrot.lane.b32.xlu0 %v13989_v21, %s12297_s17  ;;  %v7863_v50 = vpop.permute.xlu1 %7862  ;;  %vm14762_vm4 = vmmov %vm14759_vm1  ;;  %v10965_v10 = vld [vmem:[%s14720_s19 + $0x12] sm:$0x3] }
 0xbf7   : > { %v7865_v51 = vsel %vm14742_vm12, %v7861_v45, %v7863_v50  ;;  %11787 = vmatprep.mubr.msk.bf16.mxu0 %vm14717_vm0, %v13125_v14  ;;  %11791 = vmatprep.subr.bf16.mxu0 %v13125_v14  ;;  %v7876_v58 = vsel %vm14747_vm15, %v7863_v50, 0  ;;  %vm14755_vm12 = vmmov %vm14734_vm3 }
 0xbf8   : > { %v7969_v53 = vpop.permute.xlu0 %7968  ;;  %9898 = vrot.lane.b32.xlu1 %v13983_v17, %s12297_s17  ;;  %10939 = vmatmul.mubr.msk.bf16.vlgmr.msra.gmra.mrb[200].mxu1 %vm14744_vm14, %v10937_v47  ;;  %vm14758_vm14 = vmmov %vm14734_vm3 }
 0xbf9   : > { %7773 = vmatpush1.bf16.msra.mxu1 %v7764_v52  ;;  %7804 = vmatprep.mubr.bf16.mxu1 %v12251_v0  ;;  %v7982_v3 = vsel %vm14751_vm7, %v7969_v53, 0  ;;  %vm14760_vm15 = vmmov %vm14734_vm3  ;;  %vm8290_vm7 = vcmask 859136  }
 0xbfa   : > { %10946 = vmatprep.subr.msk.bf16.mxu1 %vm14745_vm2, %v7865_v51  ;;  %9904 = vrot.lane.b32.xlu0 %v14077_v24, %s12297_s17  ;;  %v7967_v54 = vpop.permute.xlu1 %7966 }
 0xbfb   : > { %v7971_v62 = vsel %vm1132_vm10, %v7967_v54, %v7969_v53  ;;  %v7970_v6 = vsel %vm1132_vm10, %v7965_v48, %v7967_v54  ;;  %vm14756_vm10 = vmmov %vm14745_vm2  ;;  %vm8183_vm2 = vcmask 867328  }
 0xbfc   : > { %v8073_v56 = vpop.permute.xlu0 %8072  ;;  %9902 = vrot.lane.b32.xlu1 %v13987_v19, %s12297_s17  ;;  %v7976_v7 = vsel %vm14754_vm9, %v7970_v6, 0  ;;  %vm14765_vm9 = vmmov %vm14759_vm1 }
 0xbfd   : > { %11788 = vmatmul.mubr.msk.bf16.vlgmr.msra.gmra.mrb[208].mxu0 %vm14734_vm3, %v10941_v55  ;;  %vm14761_vm3 = vmmov %vm14759_vm1 }
 0xbfe   : > { %11792 = vmatpush3.bf16.msra.mxu0 %v7876_v58  ;;  %10010 = vrot.lane.b32.xlu0 %v13989_v21, %s12298_s0  ;;  %v8071_v59 = vpop.permute.xlu1 %8070 }
 0xbff   : > { %11793 = vmatprep.mubr.msk.bf16.mxu0 %vm14717_vm0, %v13125_v14  ;;  %11797 = vmatprep.subr.bf16.mxu0 %v13125_v14  ;;  %v8077_v16 = vsel %vm8076_vm11, %v8071_v59, %v8073_v56 }
 0xc00   : > { %v8178_v61 = vpop.permute.xlu0 %8177  ;;  %10008 = vrot.lane.b32.xlu1 %v13983_v17, %s12298_s0  ;;  %10943 = vmatmul.mubr.msk.bf16.vlgmr.msra.gmra.mrb[204].mxu1 %vm14749_vm5, %v10941_v55 }
 0xc01   : > { %7879 = vmatpush1.bf16.msra.mxu1 %v7870_v60  ;;  %7910 = vmatprep.mubr.bf16.mxu1 %v12251_v0 }
 0xc02   : > { %10950 = vmatprep.subr.msk.bf16.mxu1 %vm14750_vm6, %v7971_v62  ;;  %v8075_v63 = vpop.permute.xlu1 %8074  ;;  %10014 = vrot.lane.b32.xlu0 %v14077_v24, %s12298_s0  ;;  %vm14763_vm6 = vmmov %vm14759_vm1 }
 0xc03   : > { %v8078_v9 = vsel %vm8076_vm11, %v8073_v56, %v8075_v63  ;;  %v8089_v17 = vsel %vm14757_vm13, %v8075_v63, 0  ;;  %vm14766_vm11 = vmmov %vm14759_vm1  ;;  %v10969_v56 = vld [vmem:[%s14720_s19 + $0x14] sm:$0x3] }
 0xc04   : > { %v8182_v2 = vpop.permute.xlu0 %8181  ;;  %10012 = vrot.lane.b32.xlu1 %v13987_v19, %s12298_s0  ;;  %v8083_v19 = vsel %vm14759_vm1, %v8077_v16, 0  ;;  %vm14768_vm13 = vmmov %vm14759_vm1 }
 0xc05   : > { %11794 = vmatmul.mubr.msk.bf16.vlgmr.msra.gmra.mrb[212].mxu0 %vm14752_vm8, %v10945_v1  ;;  %v8196_v25 = vsel %vm14762_vm4, %v8182_v2, 0  ;;  %vm14764_vm8 = vmmov %vm14749_vm5  ;;  %vm8504_vm4 = vcmask 719872  }
 0xc06   : > { %11798 = vmatpush3.bf16.msra.mxu0 %v7982_v3  ;;  %v8180_v5 = vpop.permute.xlu1 %8179  ;;  %11799 = vmatprep.mubr.msk.bf16.mxu0 %vm14717_vm0, %v13125_v14 }
 0xc07   : > { %11803 = vmatprep.subr.bf16.mxu0 %v13125_v14  ;;  %v8185_v21 = vsel %vm8183_vm2, %v8180_v5, %v8182_v2  ;;  %v8184_v26 = vsel %vm8183_vm2, %v8178_v61, %v8180_v5  ;;  %vm14770_vm2 = vmmov %vm14759_vm1 }
 0xc08   : > { %v8287_v8 = vpop.permute.xlu0 %8286  ;;  %10119 = vperm.xlu1 %12006, %v10116_v4   ;;  %10947 = vmatmul.mubr.msk.bf16.vlgmr.msra.gmra.mrb[208].mxu1 %vm14755_vm12, %v10945_v1  ;;  %v8190_v28 = vsel %vm14763_vm6, %v8184_v26, 0  ;;  %vm14767_vm12 = vmmov %vm14749_vm5  ;;  %v10973_v1 = vld [vmem:[%s14720_s19 + $0x16] sm:$0x3] }
 0xc09   : > { %7985 = vmatpush1.bf16.msra.mxu1 %v7976_v7  ;;  %8016 = vmatprep.mubr.bf16.mxu1 %v12251_v0  ;;  %vm14773_vm6 = vmmov %vm14759_vm1 }
 0xc0a   : > { %10954 = vmatprep.subr.msk.bf16.mxu1 %vm14756_vm10, %v8078_v9  ;;  %v8285_v11 = vpop.permute.xlu1 %8284  ;;  %vm8397_vm10 = vcmask 850944   ;;  %v10977_v9 = vld [vmem:[%s14720_s19 + $0x18] sm:$0x3] }
 0xc0b   : > { %v8291_v34 = vsel %vm8290_vm7, %v8285_v11, %v8287_v8 }
 0xc0c   : > { %v8392_v15 = vpop.permute.xlu0 %8391  ;;  %v8297_v37 = vsel %vm14768_vm13, %v8291_v34, 0  ;;  %vm14778_vm13 = vmmov %vm14759_vm1 }
 0xc0d   : > { %11800 = vmatmul.mubr.msk.bf16.vlgmr.msra.gmra.mrb[216].mxu0 %vm14758_vm14, %v10949_v13  ;;  %vm14769_vm14 = vmmov %vm14749_vm5 }
 0xc0e   : > { %11804 = vmatpush3.bf16.msra.mxu0 %v8089_v17  ;;  %v8289_v18 = vpop.permute.xlu1 %8288  ;;  %11805 = vmatprep.mubr.msk.bf16.mxu0 %vm14717_vm0, %v13125_v14 }
 0xc0f   : > { %11809 = vmatprep.subr.bf16.mxu0 %v13125_v14  ;;  %v8292_v30 = vsel %vm8290_vm7, %v8287_v8, %v8289_v18  ;;  %v8303_v35 = vsel %vm14766_vm11, %v8289_v18, 0  ;;  %vm14774_vm7 = vmmov %vm14759_vm1 }
 0xc10   : > { %v8396_v20 = vpop.permute.xlu0 %8395  ;;  %10951 = vmatmul.mubr.msk.bf16.vlgmr.msra.gmra.mrb[212].mxu1 %vm14760_vm15, %v10949_v13  ;;  %vm14771_vm15 = vmmov %vm14749_vm5 }
 0xc11   : > { %8092 = vmatpush1.bf16.msra.mxu1 %v8083_v19  ;;  %8123 = vmatprep.mubr.bf16.mxu1 %v12251_v0  ;;  %v8410_v12 = vsel %vm14759_vm1, %v8396_v20, 0  ;;  %vm14776_vm11 = vmmov %vm14759_vm1  ;;  %v10981_v19 = vld [vmem:[%s14720_s19 + $0x1a] sm:$0x3] }
 0xc12   : > { %10958 = vmatprep.subr.msk.bf16.mxu1 %vm14761_vm3, %v8185_v21  ;;  %v8394_v22 = vpop.permute.xlu1 %8393  ;;  %vm14772_vm3 = vmmov %vm14759_vm1 }
 0xc13   : > { %v8399_v39 = vsel %vm8397_vm10, %v8394_v22, %v8396_v20  ;;  %v8398_v43 = vsel %vm8397_vm10, %v8392_v15, %v8394_v22 }
 0xc14   : > { %v8501_v24 = vpop.permute.xlu0 %8500  ;;  %v8404_v45 = vsel %vm14772_vm3, %v8398_v43, 0 }
 0xc15   : > { %11806 = vmatmul.mubr.msk.bf16.vlgmr.msra.gmra.mrb[220].mxu0 %vm14749_vm5, %v10953_v23 }
 0xc16   : > { %11810 = vmatpush3.bf16.msra.mxu0 %v8196_v25  ;;  %v8499_v27 = vpop.permute.xlu1 %8498  ;;  %11811 = vmatprep.mubr.msk.bf16.mxu0 %vm14717_vm0, %v13125_v14 }
 0xc17   : > { %11815 = vmatprep.subr.bf16.mxu0 %v13125_v14  ;;  %v8505_v49 = vsel %vm8504_vm4, %v8499_v27, %v8501_v24  ;;  %v10985_v27 = vld [vmem:[%s14720_s19 + $0x1c] sm:$0x3] }
 0xc18   : > { %v14202_v29 = vpop.permute.xlu0 %8605  ;;  %10955 = vmatmul.mubr.msk.bf16.vlgmr.msra.gmra.mrb[216].mxu1 %vm14764_vm8, %v10953_v23  ;;  %vm14775_vm8 = vmmov %vm14749_vm5  ;;  %v8511_v53 = vsel %vm14776_vm11, %v8505_v49, 0 }
 0xc19   : > { %8199 = vmatpush1.bf16.msra.mxu1 %v8190_v28  ;;  %8230 = vmatprep.mubr.bf16.mxu1 %v12251_v0  ;;  %vm14787_vm11 = vmmov %vm14759_vm1 }
 0xc1a   : > { %10962 = vmatprep.subr.msk.bf16.mxu1 %vm14765_vm9, %v8292_v30  ;;  %v8503_v31 = vpop.permute.xlu1 %8502  ;;  %vm8611_vm9 = vcmask 711680  }
 0xc1b   : > { %v8506_v47 = vsel %vm8504_vm4, %v8501_v24, %v8503_v31  ;;  %v8517_v50 = vsel %vm14774_vm7, %v8503_v31, 0  ;;  %vm14782_vm4 = vmmov %vm14759_vm1  ;;  %vm8825_vm7 = vcmask 695296  }
 0xc1c   : > { %v8610_v33 = vpop.permute.xlu0 %8609 }
 0xc1d   : > { %11812 = vmatmul.mubr.msk.bf16.vlgmr.msra.gmra.mrb[224].mxu0 %vm14767_vm12, %v10957_v32  ;;  %vm14777_vm12 = vmmov %vm14749_vm5 }
 0xc1e   : > { %11816 = vmatpush3.bf16.msra.mxu0 %v8303_v35  ;;  %v8608_v36 = vpop.permute.xlu1 %8607  ;;  %11817 = vmatprep.mubr.msk.bf16.mxu0 %vm14717_vm0, %v13125_v14  ;;  %v10989_v35 = vld [vmem:[%s14720_s19 + $0x1e] sm:$0x3] }
 0xc1f   : > { %11821 = vmatprep.subr.bf16.mxu0 %v13125_v14  ;;  %v8613_v54 = vsel %vm8611_vm9, %v8608_v36, %v8610_v33  ;;  %v8612_v59 = vsel %vm8611_vm9, %v14202_v29, %v8608_v36 }
 0xc20   : > { %v8715_v38 = vpop.permute.xlu0 %8714  ;;  %10959 = vmatmul.mubr.msk.bf16.vlgmr.msra.gmra.mrb[220].mxu1 %vm14769_vm14, %v10957_v32  ;;  %vm14779_vm14 = vmmov %vm14759_vm1  ;;  %v8618_v61 = vsel %vm14759_vm1, %v8612_v59, 0 }
 0xc21   : > { %8306 = vmatpush1.bf16.msra.mxu1 %v8297_v37  ;;  %8337 = vmatprep.mubr.bf16.mxu1 %v12251_v0  ;;  %v8624_v58 = vsel %vm14779_vm14, %v8610_v33, 0  ;;  %vm14790_vm14 = vmmov %vm14759_vm1 }
 0xc22   : > { %10966 = vmatprep.subr.msk.bf16.mxu1 %vm14770_vm2, %v8399_v39  ;;  %v8713_v40 = vpop.permute.xlu1 %8712  ;;  %vm14780_vm2 = vmmov %vm14749_vm5 }
 0xc23   : > { %vm14781_vm3 = vmmov %vm14780_vm2 }
 0xc24   : > { %v14223_v42 = vpop.permute.xlu0 %8819  ;;  %vm14786_vm9 = vmmov %vm14780_vm2 }
 0xc25   : > { %11818 = vmatmul.mubr.msk.bf16.vlgmr.msra.gmra.mrb[228].mxu0 %vm14771_vm15, %v10961_v41  ;;  %vm8718_vm15 = vcmask 703488  }
 0xc26   : > { %11822 = vmatpush3.bf16.msra.mxu0 %v8410_v12  ;;  %v8717_v44 = vpop.permute.xlu1 %8716  ;;  %11823 = vmatprep.mubr.msk.bf16.mxu0 %vm14717_vm0, %v13125_v14  ;;  %v8719_v3 = vsel %vm8718_vm15, %v8713_v40, %v8715_v38 }
 0xc27   : > { %11827 = vmatprep.subr.bf16.mxu0 %v13125_v14  ;;  %v8720_v62 = vsel %vm8718_vm15, %v8715_v38, %v8717_v44  ;;  %vm14792_vm15 = vmmov %vm14782_vm4 }
 0xc28   : > { %v8824_v46 = vpop.permute.xlu0 %8823  ;;  %10963 = vmatmul.mubr.msk.bf16.vlgmr.msra.gmra.mrb[224].mxu1 %vm14749_vm5, %v10961_v41  ;;  %vm14783_vm5 = vmmov %vm14759_vm1 }
 0xc29   : > { %8413 = vmatpush1.bf16.msra.mxu1 %v8404_v45  ;;  %8444 = vmatprep.mubr.bf16.mxu1 %v12251_v0  ;;  %v8731_v6 = vsel %vm14783_vm5, %v8717_v44, 0  ;;  %vm9039_vm5 = vcmask 556032  }
 0xc2a   : > { %10970 = vmatprep.subr.msk.bf16.mxu1 %vm14773_vm6, %v8506_v47  ;;  %v8822_v48 = vpop.permute.xlu1 %8821  ;;  %vm14784_vm6 = vmmov %vm14780_vm2 }
 0xc2b   : > { %v8827_v7 = vsel %vm8825_vm7, %v8822_v48, %v8824_v46  ;;  %v8826_v13 = vsel %vm8825_vm7, %v14223_v42, %v8822_v48  ;;  %v10993_v42 = vld [vmem:[%s14720_s19 + $0x20] sm:$0x3] }
 0xc2c   : > { %v14239_v51 = vpop.permute.xlu0 %8928  ;;  %v8832_v16 = vsel %vm14790_vm14, %v8826_v13, 0 }
 0xc2d   : > { %11824 = vmatmul.mubr.msk.bf16.vlgmr.msra.gmra.mrb[232].mxu0 %vm14775_vm8, %v10965_v10  ;;  %vm14785_vm8 = vmmov %vm14759_vm1 }
 0xc2e   : > { %11828 = vmatpush3.bf16.msra.mxu0 %v8517_v50  ;;  %v14242_v52 = vpop.permute.xlu1 %8926  ;;  %11829 = vmatprep.mubr.msk.bf16.mxu0 %vm14717_vm0, %v13125_v14  ;;  %v8725_v5 = vsel %vm14785_vm8, %v8719_v3, 0 }
 0xc2f   : > { %11833 = vmatprep.subr.bf16.mxu0 %v13125_v14 }
 0xc30   : > { %10967 = vmatmul.mubr.msk.bf16.vlgmr.msra.gmra.mrb[228].mxu1 %vm14777_vm12, %v10965_v10  ;;  %v14254_v57 = vpop.permute.xlu0 %9033  ;;  %vm14788_vm12 = vmmov %vm14759_vm1  ;;  %v10997_v10 = vld [vmem:[%s14720_s19 + $0x22] sm:$0x3] }
 0xc31   : > { %8520 = vmatpush1.bf16.msra.mxu1 %v8511_v53  ;;  %8551 = vmatprep.mubr.bf16.mxu1 %v12251_v0  ;;  %v8838_v11 = vsel %vm14788_vm12, %v8824_v46, 0  ;;  %vm14791_vm1 = vmmov %vm14781_vm3 }
 0xc32   : > { %10974 = vmatprep.subr.msk.bf16.mxu1 %vm14778_vm13, %v8613_v54  ;;  %v8931_v55 = vpop.permute.xlu1 %8930  ;;  %vm14789_vm13 = vmmov %vm14780_vm2 }
 0xc33   : > { %vm14796_vm7 = vmmov %vm14791_vm1 }
 0xc34   : > { %v9038_v63 = vpop.permute.xlu0 %9037  ;;  %vm14801_vm14 = vmmov %vm14791_vm1 }
 0xc35   : > { %11830 = vmatmul.mubr.msk.bf16.vlgmr.msra.gmra.mrb[236].mxu0 %vm14780_vm2, %v10969_v56  ;;  %vm8932_vm2 = vcmask 687104  }
 0xc36   : > { %11834 = vmatpush3.bf16.msra.mxu0 %v8624_v58  ;;  %v14259_v60 = vpop.permute.xlu1 %9035  ;;  %11835 = vmatprep.mubr.msk.bf16.mxu0 %vm14717_vm0, %v13125_v14  ;;  %v8934_v18 = vsel %vm8932_vm2, %v14239_v51, %v8931_v55  ;;  %v8933_v21 = vsel %vm8932_vm2, %v14242_v52, %v14239_v51 }
 0xc37   : > { %11839 = vmatprep.subr.bf16.mxu0 %v13125_v14  ;;  %v9041_v25 = vsel %vm9039_vm5, %v14259_v60, %v9038_v63  ;;  %v9040_v30 = vsel %vm9039_vm5, %v14254_v57, %v14259_v60  ;;  %vm14806_vm5 = vmmov %vm14796_vm7 }
 0xc38   : > { %10971 = vmatmul.mubr.msk.bf16.vlgmr.msra.gmra.mrb[232].mxu1 %vm14781_vm3, %v10969_v56  ;;  %v9143_v4 = vpop.permute.xlu0 %9142  ;;  %vm14793_vm3 = vmmov %vm14782_vm4  ;;  %v11001_v56 = vld [vmem:[%s14720_s19 + $0x24] sm:$0x3] }
 0xc39   : > { %8627 = vmatpush1.bf16.msra.mxu1 %v8618_v61  ;;  %8658 = vmatprep.mubr.bf16.mxu1 %v12251_v0  ;;  %v8945_v22 = vsel %vm14793_vm3, %v8931_v55, 0  ;;  %vm14797_vm8 = vmmov %vm14793_vm3 }
 0xc3a   : > { %10978 = vmatprep.subr.msk.bf16.mxu1 %vm14782_vm4, %v8720_v62  ;;  %v14271_v2 = vpop.permute.xlu1 %9140  ;;  %vm14794_vm4 = vmmov %vm14791_vm1 }
 0xc3b   : > { %vm14800_vm12 = vmmov %vm14793_vm3 }
 0xc3c   : > { %v14287_v15 = vpop.permute.xlu0 %9247  ;;  %v9046_v32 = vsel %vm14800_vm12, %v9040_v30, 0  ;;  %vm14802_vm2 = vmmov %vm14793_vm3  ;;  %v11017_v30 = vld [vmem:[%s14720_s19 + $0x2c] sm:$0x3] }
 0xc3d   : > { %11836 = vmatmul.mubr.msk.bf16.vlgmr.msra.gmra.mrb[240].mxu0 %vm14784_vm6, %v10973_v1  ;;  %vm14795_vm6 = vmmov %vm14793_vm3 }
 0xc3e   : > { %11840 = vmatpush3.bf16.msra.mxu0 %v8731_v6  ;;  %11841 = vmatprep.mubr.msk.bf16.mxu0 %vm14717_vm0, %v13125_v14  ;;  %v9145_v8 = vpop.permute.xlu1 %9144  ;;  %v8939_v24 = vsel %vm14795_vm6, %v8933_v21, 0  ;;  %vm14811_vm12 = vmmov %vm14806_vm5 }
 0xc3f   : > { %11845 = vmatprep.subr.bf16.mxu0 %v13125_v14 }
 0xc40   : > { %10975 = vmatmul.mubr.msk.bf16.vlgmr.msra.gmra.mrb[236].mxu1 %vm14786_vm9, %v10973_v1  ;;  %v9252_v20 = vpop.permute.xlu0 %9251  ;;  %vm14798_vm9 = vmmov %vm14793_vm3  ;;  %vm9253_vm3 = vcmask 539648   ;;  %v11005_v1 = vld [vmem:[%s14720_s19 + $0x26] sm:$0x3] }
 0xc41   : > { %8734 = vmatpush1.bf16.msra.mxu1 %v8725_v5  ;;  %8765 = vmatprep.mubr.bf16.mxu1 %v12251_v0  ;;  %v9052_v29 = vsel %vm14798_vm9, %v9038_v63, 0 }
 0xc42   : > { %10982 = vmatprep.subr.msk.bf16.mxu1 %vm14787_vm11, %v8827_v7  ;;  %v9250_v17 = vpop.permute.xlu1 %9249  ;;  %vm14799_vm11 = vmmov %vm14791_vm1 }
 0xc43   : > { %v9255_v41 = vsel %vm9253_vm3, %v9250_v17, %v9252_v20  ;;  %v9254_v44 = vsel %vm9253_vm3, %v14287_v15, %v9250_v17  ;;  %vm14816_vm3 = vcmask 523264  }
 0xc44   : > { %v9357_v26 = vpop.permute.xlu0 %9356 }
 0xc45   : > { %11842 = vmatmul.mubr.msk.bf16.vlgmr.msra.gmra.mrb[244].mxu0 %vm14789_vm13, %v10977_v9  ;;  %vm9146_vm13 = vcmask 547840  }
 0xc46   : > { %11846 = vmatpush3.bf16.msra.mxu0 %v8838_v11  ;;  %11847 = vmatprep.mubr.msk.bf16.mxu0 %vm14717_vm0, %v13125_v14  ;;  %v14305_v23 = vpop.permute.xlu1 %9354  ;;  %v9148_v33 = vsel %vm9146_vm13, %v9143_v4, %v9145_v8  ;;  %v9147_v36 = vsel %vm9146_vm13, %v14271_v2, %v9143_v4  ;;  %v11009_v11 = vld [vmem:[%s14720_s19 + $0x28] sm:$0x3] }
 0xc47   : > { %11851 = vmatprep.subr.bf16.mxu0 %v13125_v14 }
 0xc48   : > { %10979 = vmatmul.mubr.msk.bf16.vlgmr.msra.gmra.mrb[240].mxu1 %vm14791_vm1, %v10977_v9  ;;  %v9462_v31 = vpop.permute.xlu0 %9461  ;;  %vm14803_vm1 = vmmov %vm14802_vm2 }
 0xc49   : > { %8841 = vmatpush1.bf16.msra.mxu1 %v8832_v16  ;;  %8872 = vmatprep.mubr.bf16.mxu1 %v12251_v0  ;;  %v9159_v37 = vsel %vm14803_vm1, %v9145_v8, 0  ;;  %vm14807_vm6 = vmmov %vm14803_vm1 }
 0xc4a   : > { %10986 = vmatprep.subr.msk.bf16.mxu1 %vm14792_vm15, %v8934_v18  ;;  %v9359_v28 = vpop.permute.xlu1 %9358  ;;  %vm14804_vm15 = vmmov %vm14794_vm4 }
 0xc4b   : > { %vm14810_vm9 = vmmov %vm14803_vm1 }
 0xc4c   : > { %v9466_v38 = vpop.permute.xlu0 %9465  ;;  %v9260_v46 = vsel %vm14810_vm9, %v9254_v44, 0  ;;  %vm14812_vm13 = vmmov %vm14803_vm1  ;;  %vm9576_vm9 = vcmask 392192  }
 0xc4d   : > { %11848 = vmatmul.mubr.msk.bf16.vlgmr.msra.gmra.mrb[248].mxu0 %vm14794_vm4, %v10981_v19  ;;  %vm14805_vm4 = vmmov %vm14803_vm1 }
 0xc4e   : > { %11852 = vmatpush3.bf16.msra.mxu0 %v8945_v22  ;;  %11853 = vmatprep.mubr.msk.bf16.mxu0 %vm14717_vm0, %v13125_v14  ;;  %v9464_v34 = vpop.permute.xlu1 %9463  ;;  %v9153_v39 = vsel %vm14805_vm4, %v9147_v36, 0  ;;  %vm14817_vm4 = vmmov %vm14803_vm1  ;;  %v11013_v22 = vld [vmem:[%s14720_s19 + $0x2a] sm:$0x3] }
 0xc4f   : > { %11857 = vmatprep.subr.bf16.mxu0 %v13125_v14  ;;  %v9468_v54 = vsel %vm14816_vm3, %v9464_v34, %v9466_v38 }
 0xc50   : > { %10983 = vmatmul.mubr.msk.bf16.vlgmr.msra.gmra.mrb[244].mxu1 %vm14796_vm7, %v10981_v19  ;;  %v9571_v12 = vpop.permute.xlu0 %9570  ;;  %vm14808_vm7 = vmmov %vm14803_vm1 }
 0xc51   : > { %8948 = vmatpush1.bf16.msra.mxu1 %v8939_v24  ;;  %8979 = vmatprep.mubr.bf16.mxu1 %v12251_v0  ;;  %v9266_v43 = vsel %vm14808_vm7, %v9252_v20, 0 }
 0xc52   : > { %10990 = vmatprep.subr.msk.bf16.mxu1 %vm14797_vm8, %v9041_v25  ;;  %v9569_v40 = vpop.permute.xlu1 %9568  ;;  %vm14809_vm8 = vmmov %vm14806_vm5 }
 0xc53   : > { %v9577_v3 = vsel %vm9576_vm9, %v9569_v40, %v9571_v12 }
 0xc54   : > { %v9575_v48 = vpop.permute.xlu0 %9574 }
 0xc55   : > { %11854 = vmatmul.mubr.msk.bf16.vlgmr.msra.gmra.mrb[252].mxu0 %vm14799_vm11, %v10985_v27  ;;  %vm9360_vm11 = vcmask 531456  }
 0xc56   : > { %11858 = vmatpush3.bf16.msra.mxu0 %v9052_v29  ;;  %11859 = vmatprep.mubr.msk.bf16.mxu0 %vm14717_vm0, %v13125_v14  ;;  %v9573_v45 = vpop.permute.xlu1 %9572  ;;  %v9362_v47 = vsel %vm9360_vm11, %v9357_v26, %v9359_v28  ;;  %v9361_v50 = vsel %vm9360_vm11, %v14305_v23, %v9357_v26 }
 0xc57   : > { %11863 = vmatprep.subr.bf16.mxu0 %v13125_v14  ;;  %v9367_v53 = vsel %vm14803_vm1, %v9361_v50, 0  ;;  %v9578_v62 = vsel %vm9576_vm9, %v9571_v12, %v9573_v45  ;;  %v9579_v63 = vsel %vm9576_vm9, %v9573_v45, %v9575_v48  ;;  %v11025_v12 = vld [vmem:[%s14720_s19 + $0x30] sm:$0x3] }
 0xc58   : > { %10987 = vmatmul.mubr.msk.bf16.vlgmr.msra.gmra.mrb[248].mxu1 %vm14801_vm14, %v10985_v27  ;;  %vm14813_vm14 = vmmov %vm14803_vm1  ;;  %v9681_v52 = vpop.permute.xlu0 %9680 }
 0xc59   : > { %9055 = vmatpush1.bf16.msra.mxu1 %v9046_v32  ;;  %9086 = vmatprep.mubr.bf16.mxu1 %v12251_v0  ;;  %v9373_v51 = vsel %vm14813_vm14, %v9359_v28, 0 }
 0xc5a   : > { %10994 = vmatprep.subr.msk.bf16.mxu1 %vm14802_vm2, %v9148_v33  ;;  %v9679_v49 = vpop.permute.xlu1 %9678  ;;  %vm14814_vm2 = vmmov %vm14806_vm5 }
 0xc5b   : > { %vm14820_vm7 = vmmov %vm14814_vm2 }
 0xc5c   : > { %v9685_v59 = vpop.permute.xlu0 %9684  ;;  %vm14822_vm11 = vmmov %vm14814_vm2 }
 0xc5d   : > { %11860 = vmatmul.mubr.msk.bf16.vlgmr.msra.gmra.mrb[0].mxu0 %vm14804_vm15, %v10989_v35  ;;  %vm14815_vm15 = vmmov %vm14814_vm2 }
 0xc5e   : > { %11864 = vmatpush3.bf16.msra.mxu0 %v9159_v37  ;;  %11865 = vmatprep.mubr.msk.bf16.mxu0 %vm14717_vm0, %v13125_v14  ;;  %v9683_v55 = vpop.permute.xlu1 %9682  ;;  %vm14825_vm14 = vmmov %vm14814_vm2 }
 0xc5f   : > { %11869 = vmatprep.subr.bf16.mxu0 %v13125_v14 }
 0xc60   : > { %10991 = vmatmul.mubr.msk.bf16.vlgmr.msra.gmra.mrb[252].mxu1 %vm14806_vm5, %v10989_v35  ;;  %vm14818_vm5 = vmmov %vm14803_vm1  ;;  %v9791_v2 = vpop.permute.xlu0 %9790 }
 0xc61   : > { %9162 = vmatpush1.bf16.msra.mxu1 %v9153_v39  ;;  %9193 = vmatprep.mubr.bf16.mxu1 %v12251_v0  ;;  %v9479_v57 = vsel %vm14818_vm5, %v9466_v38, 0  ;;  %vm14830_vm5 = vmmov %vm14820_vm7  ;;  %v11021_v39 = vld [vmem:[%s14720_s19 + $0x2e] sm:$0x3] }
 0xc62   : > { %10998 = vmatprep.subr.msk.bf16.mxu1 %vm14807_vm6, %v9255_v41  ;;  %vm14819_vm6 = vmmov %vm14816_vm3  ;;  %v9789_v61 = vpop.permute.xlu1 %9788 }
 0xc63   : > { %v9467_v58 = vsel %vm14819_vm6, %v9462_v31, %v9464_v34 }
 0xc64   : > { %v9795_v8 = vpop.permute.xlu0 %9794 }
 0xc65   : > { %11866 = vmatmul.mubr.msk.bf16.vlgmr.msra.gmra.mrb[4].mxu0 %vm14809_vm8, %v10993_v42  ;;  %vm14821_vm8 = vmmov %vm14803_vm1 }
 0xc66   : > { %11870 = vmatpush3.bf16.msra.mxu0 %v9266_v43  ;;  %11871 = vmatprep.mubr.msk.bf16.mxu0 %vm14717_vm0, %v13125_v14  ;;  %v9473_v60 = vsel %vm14821_vm8, %v9467_v58, 0  ;;  %v9793_v4 = vpop.permute.xlu1 %9792  ;;  %vm14832_vm8 = vmmov %vm14830_vm5 }
 0xc67   : > { %11875 = vmatprep.subr.bf16.mxu0 %v13125_v14 }
 0xc68   : > { %10995 = vmatmul.mubr.msk.bf16.vlgmr.msra.gmra.mrb[0].mxu1 %vm14811_vm12, %v10993_v42  ;;  %vm14823_vm12 = vmmov %vm14803_vm1  ;;  %v9901_v17 = vpop.permute.xlu0 %9900 }
 0xc69   : > { %9269 = vmatpush1.bf16.msra.mxu1 %v9260_v46  ;;  %9300 = vmatprep.mubr.bf16.mxu1 %v12251_v0 }
 0xc6a   : > { %11002 = vmatprep.subr.msk.bf16.mxu1 %vm14812_vm13, %v9362_v47  ;;  %vm14824_vm13 = vmmov %vm14803_vm1  ;;  %v9899_v13 = vpop.permute.xlu1 %9898 }
 0xc6b   : > { %v9590_v6 = vsel %vm14824_vm13, %v9579_v63, 0 }
 0xc6c   : > { %v9905_v25 = vpop.permute.xlu0 %9904 }
 0xc6d   : > { %11872 = vmatmul.mubr.msk.bf16.vlgmr.msra.gmra.mrb[8].mxu0 %vm14814_vm2, %v10997_v10  ;;  %vm14826_vm2 = vmmov %vm14803_vm1  ;;  %vm9686_vm1 = vcmask 384000  }
 0xc6e   : > { %11876 = vmatpush3.bf16.msra.mxu0 %v9373_v51  ;;  %11877 = vmatprep.mubr.msk.bf16.mxu0 %vm14717_vm0, %v13125_v14  ;;  %v9584_v5 = vsel %vm14826_vm2, %v9577_v3, 0  ;;  %v9688_v7 = vsel %vm9686_vm1, %v9681_v52, %v9683_v55  ;;  %v9689_v9 = vsel %vm9686_vm1, %v9683_v55, %v9685_v59  ;;  %vm14828_vm3 = vmmov %vm14826_vm2  ;;  %v9687_v15 = vsel %vm9686_vm1, %v9679_v49, %v9681_v52  ;;  %v9903_v21 = vpop.permute.xlu1 %9902 }
 0xc6f   : > { %11881 = vmatprep.subr.bf16.mxu0 %v13125_v14  ;;  %vm14831_vm6 = vmmov %vm14826_vm2 }
 0xc70   : > { %10999 = vmatmul.mubr.msk.bf16.vlgmr.msra.gmra.mrb[4].mxu1 %vm14815_vm15, %v10997_v10  ;;  %vm14827_vm15 = vmmov %vm14820_vm7  ;;  %v9694_v18 = vsel %vm14831_vm6, %v9687_v15, 0  ;;  %v10011_v31 = vpop.permute.xlu0 %10010 }
 0xc71   : > { %9376 = vmatpush1.bf16.msra.mxu1 %v9367_v53  ;;  %9407 = vmatprep.mubr.bf16.mxu1 %v12251_v0  ;;  %vm14833_vm9 = vmmov %vm14826_vm2 }
 0xc72   : > { %11006 = vmatprep.subr.msk.bf16.mxu1 %vm14817_vm4, %v9468_v54  ;;  %vm14829_vm4 = vmmov %vm14826_vm2  ;;  %v10009_v27 = vpop.permute.xlu1 %10008 }
 0xc73   : > { %v9700_v16 = vsel %vm14829_vm4, %v9689_v9, 0  ;;  %vm14836_vm13 = vmmov %vm14826_vm2 }
 0xc74   : > { %vm14838_vm1 = vmmov %vm14828_vm3  ;;  %v10015_v35 = vpop.permute.xlu0 %10014 }
 0xc75   : > { %11878 = vmatmul.mubr.msk.bf16.vlgmr.msra.gmra.mrb[12].mxu0 %vm14820_vm7, %v11001_v56  ;;  %vm9796_vm7 = vcmask 375808   ;;  %vm14841_vm4 = vmmov %vm14838_vm1 }
 0xc76   : > { %11882 = vmatpush3.bf16.msra.mxu0 %v9479_v57  ;;  %11883 = vmatprep.mubr.msk.bf16.mxu0 %vm14717_vm0, %v13125_v14  ;;  %v9798_v19 = vsel %vm9796_vm7, %v9791_v2, %v9793_v4  ;;  %v9799_v20 = vsel %vm9796_vm7, %v9793_v4, %v9795_v8  ;;  %v9797_v23 = vsel %vm9796_vm7, %v9789_v61, %v9791_v2  ;;  %v10013_v34 = vpop.permute.xlu1 %10012  ;;  %vm14843_vm7 = vmmov %vm14838_vm1 }
 0xc77   : > { %11887 = vmatprep.subr.bf16.mxu0 %v13125_v14  ;;  %v9804_v26 = vsel %vm14836_vm13, %v9797_v23, 0 }
 0xc78   : > { %11003 = vmatmul.mubr.msk.bf16.vlgmr.msra.gmra.mrb[8].mxu1 %vm14822_vm11, %v11001_v56  ;;  %vm14834_vm11 = vmmov %vm14826_vm2 }
 0xc79   : > { %9482 = vmatpush1.bf16.msra.mxu1 %v9473_v60  ;;  %9513 = vmatprep.mubr.bf16.mxu1 %v12251_v0  ;;  %v9810_v24 = vsel %vm14834_vm11, %v9799_v20, 0  ;;  %vm14837_vm2 = vmmov %vm14830_vm5 }
 0xc7a   : > { %11010 = vmatprep.subr.msk.bf16.mxu1 %vm14823_vm12, %v9578_v62  ;;  %vm14835_vm12 = vmmov %vm14830_vm5 }
 0xc7b   : > { %vm14842_vm6 = vmmov %vm14837_vm2 }
 0xc7c   : > { %vm14846_vm11 = vmmov %vm14838_vm1 }
 0xc7d   : > { %11884 = vmatmul.mubr.msk.bf16.vlgmr.msra.gmra.mrb[16].mxu0 %vm14825_vm14, %v11005_v1  ;;  %vm9906_vm14 = vcmask 367616   ;;  %vm14848_vm13 = vmmov %vm14837_vm2 }
 0xc7e   : > { %11888 = vmatpush3.bf16.msra.mxu0 %v9590_v6  ;;  %11889 = vmatprep.mubr.msk.bf16.mxu0 %vm14717_vm0, %v13125_v14  ;;  %v9908_v28 = vsel %vm9906_vm14, %v9901_v17, %v9903_v21  ;;  %v9909_v29 = vsel %vm9906_vm14, %v9903_v21, %v9905_v25  ;;  %v9907_v32 = vsel %vm9906_vm14, %v9899_v13, %v9901_v17  ;;  %vm14849_vm14 = vmmov %vm14837_vm2 }
 0xc7f   : > { %11893 = vmatprep.subr.bf16.mxu0 %v13125_v14  ;;  %v9914_v36 = vsel %vm14841_vm4, %v9907_v32, 0 }
 0xc80   : > { %11007 = vmatmul.mubr.msk.bf16.vlgmr.msra.gmra.mrb[12].mxu1 %vm14827_vm15, %v11005_v1  ;;  %vm14839_vm15 = vmmov %vm14838_vm1 }
 0xc81   : > { %9593 = vmatpush1.bf16.msra.mxu1 %v9584_v5  ;;  %9624 = vmatprep.mubr.bf16.mxu1 %v12251_v0  ;;  %v9920_v33 = vsel %vm14839_vm15, %v9909_v29, 0 }
 0xc82   : > { %11014 = vmatprep.subr.msk.bf16.mxu1 %vm14828_vm3, %v9688_v7  ;;  %vm14840_vm3 = vmmov %vm14837_vm2 }
 0xc85   : > { %11890 = vmatmul.mubr.msk.bf16.vlgmr.msra.gmra.mrb[20].mxu0 %vm14830_vm5, %v11009_v11  ;;  %vm10016_vm5 = vcmask 359424  }
 0xc86   : > { %11894 = vmatpush3.bf16.msra.mxu0 %v9700_v16  ;;  %11895 = vmatprep.mubr.msk.bf16.mxu0 %vm14717_vm0, %v13125_v14  ;;  %v10018_v37 = vsel %vm10016_vm5, %v10011_v31, %v10013_v34  ;;  %v10019_v38 = vsel %vm10016_vm5, %v10013_v34, %v10015_v35  ;;  %v10017_v40 = vsel %vm10016_vm5, %v10009_v27, %v10011_v31 }
 0xc87   : > { %11899 = vmatprep.subr.bf16.mxu0 %v13125_v14  ;;  %v10024_v42 = vsel %vm14846_vm11, %v10017_v40, 0 }
 0xc88   : > { %11011 = vmatmul.mubr.msk.bf16.vlgmr.msra.gmra.mrb[16].mxu1 %vm14832_vm8, %v11009_v11  ;;  %vm14844_vm8 = vmmov %vm14838_vm1 }
 0xc89   : > { %9703 = vmatpush1.bf16.msra.mxu1 %v9694_v18  ;;  %9734 = vmatprep.mubr.bf16.mxu1 %v12251_v0  ;;  %v10030_v41 = vsel %vm14844_vm8, %v10019_v38, 0 }
 0xc8a   : > { %11018 = vmatprep.subr.msk.bf16.mxu1 %vm14833_vm9, %v9798_v19  ;;  %vm14845_vm9 = vmmov %vm14837_vm2 }
 0xc8d   : > { %11896 = vmatmul.mubr.msk.bf16.vlgmr.msra.gmra.mrb[24].mxu0 %vm14835_vm12, %v11013_v22  ;;  %vm14847_vm12 = vmmov %vm14837_vm2 }
 0xc8e   : > { %11900 = vmatpush3.bf16.msra.mxu0 %v9810_v24  ;;  %11901 = vmatprep.mubr.msk.bf16.mxu0 %vm14717_vm0, %v13125_v14 }
 0xc8f   : > { %11905 = vmatprep.subr.bf16.mxu0 %v13125_v14 }
 0xc90   : > { %11015 = vmatmul.mubr.msk.bf16.vlgmr.msra.gmra.mrb[20].mxu1 %vm14837_vm2, %v11013_v22 }
 0xc91   : > { %9813 = vmatpush1.bf16.msra.mxu1 %v9804_v26  ;;  %9844 = vmatprep.mubr.bf16.mxu1 %v12251_v0 }
 0xc92   : > { %11022 = vmatprep.subr.msk.bf16.mxu1 %vm14838_vm1, %v9908_v28 }
 0xc95   : > { %11902 = vmatmul.mubr.msk.bf16.vlgmr.msra.gmra.mrb[28].mxu0 %vm14840_vm3, %v11017_v30 }
 0xc96   : > { %11906 = vmatpush3.bf16.msra.mxu0 %v9920_v33  ;;  %11907 = vmatprep.mubr.msk.bf16.mxu0 %vm14717_vm0, %v13125_v14 }
 0xc97   : > { %11911 = vmatprep.subr.bf16.mxu0 %v13125_v14 }
 0xc98   : > { %11019 = vmatmul.mubr.msk.bf16.vlgmr.msra.gmra.mrb[24].mxu1 %vm14842_vm6, %v11017_v30 }
 0xc99   : > { %9923 = vmatpush1.bf16.msra.mxu1 %v9914_v36  ;;  %9954 = vmatprep.mubr.bf16.mxu1 %v12251_v0 }
 0xc9a   : > { %11026 = vmatprep.subr.msk.bf16.mxu1 %vm14843_vm7, %v10018_v37 }
 0xc9d   : > { %11908 = vmatmul.mubr.msk.bf16.vlgmr.msra.gmra.mrb[32].mxu0 %vm14845_vm9, %v11021_v39 }
 0xc9e   : > { %11912 = vmatpush3.bf16.msra.mxu0 %v10030_v41  ;;  %11913 = vmatprep.mubr.msk.bf16.mxu0 %vm14717_vm0, %v13125_v14  ;;  %vm10128_vm0 = vcmask 125952  }
 0xca0   : > { %11023 = vmatmul.mubr.msk.bf16.vlgmr.msra.gmra.mrb[28].mxu1 %vm14847_vm12, %v11021_v39 }
 0xca1   : > { %10033 = vmatpush1.bf16.msra.mxu1 %v10024_v42  ;;  %10064 = vmatprep.mubr.bf16.mxu1 %v12251_v0 }
 0xca5   : > { %11914 = vmatmul.mubr.msk.bf16.vlgmr.msra.gmra.mrb[36].mxu0 %vm14848_vm13, %v11025_v12 }
 0xca8   : > { %11027 = vmatmul.mubr.msk.bf16.vlgmr.msra.gmra.mrb[32].mxu1 %vm14849_vm14, %v11025_v12 }
 0xcb8   : > { %v7545_v43 = vpop.f32.mrb[196].mxu0 }
 0xcb9   : > { %v11771_v44 = vpop.f32.mrb[197].mxu0 }
 0xcba   : > { %v7548_v45 = vpop.f32.mrb[198].mxu0 }
 0xcbb   : > { %v11772_v46 = vpop.f32.mrb[199].mxu0  ;;  %v7504_v14 = vpop.f32.mrb[192].mxu1 }
 0xcbc   : > { %v7506_v47 = vpop.f32.mrb[193].mxu1 }
 0xcbd   : > { %v7508_v48 = vpop.f32.mrb[194].mxu1 }
 0xcbe   : > { %v7509_v10 = vpop.f32.mrb[195].mxu1 }
 0xcc0   : > { %v7638_v49 = vpop.f32.mrb[200].mxu0 }
 0xcc1   : > { %v7639_v50 = vadd.f32 %v7638_v49, %v7545_v43  ;;  %v11777_v51 = vpop.f32.mrb[201].mxu0 }
 0xcc2   : > { %v7641_v0 = vpop.f32.mrb[202].mxu0 }
 0xcc3   : > { %v7597_v52 = vpop.f32.mrb[196].mxu1  ;;  %v11778_v53 = vpop.f32.mrb[203].mxu0 }
 0xcc4   : > { %v7598_v54 = vadd.f32 %v7597_v52, %v7504_v14  ;;  %v7599_v55 = vpop.f32.mrb[197].mxu1 }
 0xcc5   : > { %v7600_v56 = vadd.f32 %v7599_v55, %v7506_v47  ;;  %v7601_v57 = vpop.f32.mrb[198].mxu1 }
 0xcc6   : > { %v7602_v58 = vpop.f32.mrb[199].mxu1 }
 0xcc8   : > { %v7741_v59 = vpop.f32.mrb[204].mxu0 }
 0xcc9   : > { %v7749_v60 = vadd.f32 %v7741_v59, %v7639_v50  ;;  %v11783_v61 = vpop.f32.mrb[205].mxu0 }
 0xcca   : > { %v7744_v62 = vpop.f32.mrb[206].mxu0 }
 0xccb   : > { %v7700_v63 = vpop.f32.mrb[200].mxu1  ;;  %v11784_v1 = vpop.f32.mrb[207].mxu0 }
 0xccc   : > { %v7747_v2 = vadd.f32 %v7700_v63, %v7598_v54  ;;  %v7702_v3 = vpop.f32.mrb[201].mxu1 }
 0xccd   : > { %v7748_v6 = vadd.f32 %v7702_v3, %v7600_v56  ;;  %v7704_v4 = vpop.f32.mrb[202].mxu1 }
 0xcce   : > { %v7705_v5 = vpop.f32.mrb[203].mxu1 }
 0xcd0   : > { %v7847_v7 = vpop.f32.mrb[208].mxu0 }
 0xcd1   : > { %v7855_v8 = vadd.f32 %v7847_v7, %v7749_v60  ;;  %v11789_v9 = vpop.f32.mrb[209].mxu0 }
 0xcd2   : > { %v7850_v11 = vpop.f32.mrb[210].mxu0 }
 0xcd3   : > { %v7806_v13 = vpop.f32.mrb[204].mxu1  ;;  %v11790_v15 = vpop.f32.mrb[211].mxu0 }
 0xcd4   : > { %v7853_v16 = vadd.f32 %v7806_v13, %v7747_v2  ;;  %v7808_v17 = vpop.f32.mrb[205].mxu1 }
 0xcd5   : > { %v7854_v18 = vadd.f32 %v7808_v17, %v7748_v6  ;;  %v7810_v19 = vpop.f32.mrb[206].mxu1 }
 0xcd6   : > { %v7811_v20 = vpop.f32.mrb[207].mxu1 }
 0xcd8   : > { %v7953_v21 = vpop.f32.mrb[212].mxu0 }
 0xcd9   : > { %v7961_v22 = vadd.f32 %v7953_v21, %v7855_v8  ;;  %v11795_v23 = vpop.f32.mrb[213].mxu0 }
 0xcda   : > { %v7956_v24 = vpop.f32.mrb[214].mxu0 }
 0xcdb   : > { %v7912_v25 = vpop.f32.mrb[208].mxu1  ;;  %v11796_v26 = vpop.f32.mrb[215].mxu0 }
 0xcdc   : > { %v7959_v27 = vadd.f32 %v7912_v25, %v7853_v16  ;;  %v7914_v28 = vpop.f32.mrb[209].mxu1 }
 0xcdd   : > { %v7960_v29 = vadd.f32 %v7914_v28, %v7854_v18  ;;  %v7916_v30 = vpop.f32.mrb[210].mxu1 }
 0xcde   : > { %v7917_v31 = vpop.f32.mrb[211].mxu1 }
 0xce0   : > { %v8059_v32 = vpop.f32.mrb[216].mxu0 }
 0xce1   : > { %v8067_v33 = vadd.f32 %v8059_v32, %v7961_v22  ;;  %v11801_v34 = vpop.f32.mrb[217].mxu0 }
 0xce2   : > { %v8062_v35 = vpop.f32.mrb[218].mxu0 }
 0xce3   : > { %v8018_v36 = vpop.f32.mrb[212].mxu1  ;;  %v11802_v37 = vpop.f32.mrb[219].mxu0 }
 0xce4   : > { %v8065_v38 = vadd.f32 %v8018_v36, %v7959_v27  ;;  %v8020_v39 = vpop.f32.mrb[213].mxu1 }
 0xce5   : > { %v8066_v40 = vadd.f32 %v8020_v39, %v7960_v29  ;;  %v8022_v41 = vpop.f32.mrb[214].mxu1 }
 0xce6   : > { %v8023_v42 = vpop.f32.mrb[215].mxu1 }
 0xce8   : > { %v8166_v12 = vpop.f32.mrb[220].mxu0 }
 0xce9   : > { %v8174_v43 = vadd.f32 %v8166_v12, %v8067_v33  ;;  %v11807_v44 = vpop.f32.mrb[221].mxu0 }
 0xcea   : > { %v8169_v45 = vpop.f32.mrb[222].mxu0 }
 0xceb   : > { %v8125_v46 = vpop.f32.mrb[216].mxu1  ;;  %v11808_v14 = vpop.f32.mrb[223].mxu0 }
 0xcec   : > { %v8172_v47 = vadd.f32 %v8125_v46, %v8065_v38  ;;  %v8127_v48 = vpop.f32.mrb[217].mxu1 }
 0xced   : > { %v8173_v10 = vadd.f32 %v8127_v48, %v8066_v40  ;;  %v8129_v49 = vpop.f32.mrb[218].mxu1 }
 0xcee   : > { %v8130_v50 = vpop.f32.mrb[219].mxu1 }
 0xcf0   : > { %v8273_v51 = vpop.f32.mrb[224].mxu0 }
 0xcf1   : > { %v8281_v0 = vadd.f32 %v8273_v51, %v8174_v43  ;;  %v11813_v52 = vpop.f32.mrb[225].mxu0 }
 0xcf2   : > { %v8276_v53 = vpop.f32.mrb[226].mxu0 }
 0xcf3   : > { %v8232_v54 = vpop.f32.mrb[220].mxu1  ;;  %v11814_v55 = vpop.f32.mrb[227].mxu0 }
 0xcf4   : > { %v8279_v56 = vadd.f32 %v8232_v54, %v8172_v47  ;;  %v8234_v57 = vpop.f32.mrb[221].mxu1 }
 0xcf5   : > { %v8280_v58 = vadd.f32 %v8234_v57, %v8173_v10  ;;  %v8236_v59 = vpop.f32.mrb[222].mxu1 }
 0xcf6   : > { %v8237_v60 = vpop.f32.mrb[223].mxu1 }
 0xcf8   : > { %v8380_v61 = vpop.f32.mrb[228].mxu0 }
 0xcf9   : > { %v8388_v62 = vadd.f32 %v8380_v61, %v8281_v0  ;;  %v11819_v63 = vpop.f32.mrb[229].mxu0 }
 0xcfa   : > { %v8383_v1 = vpop.f32.mrb[230].mxu0 }
 0xcfb   : > { %v8339_v2 = vpop.f32.mrb[224].mxu1  ;;  %v11820_v3 = vpop.f32.mrb[231].mxu0 }
 0xcfc   : > { %v8386_v6 = vadd.f32 %v8339_v2, %v8279_v56  ;;  %v8341_v4 = vpop.f32.mrb[225].mxu1 }
 0xcfd   : > { %v8387_v5 = vadd.f32 %v8341_v4, %v8280_v58  ;;  %v8343_v7 = vpop.f32.mrb[226].mxu1 }
 0xcfe   : > { %v8344_v8 = vpop.f32.mrb[227].mxu1 }
 0xd00   : > { %v8487_v9 = vpop.f32.mrb[232].mxu0 }
 0xd01   : > { %v8495_v11 = vadd.f32 %v8487_v9, %v8388_v62  ;;  %v11825_v13 = vpop.f32.mrb[233].mxu0 }
 0xd02   : > { %v8490_v15 = vpop.f32.mrb[234].mxu0 }
 0xd03   : > { %v8446_v16 = vpop.f32.mrb[228].mxu1  ;;  %v11826_v17 = vpop.f32.mrb[235].mxu0 }
 0xd04   : > { %v8493_v18 = vadd.f32 %v8446_v16, %v8386_v6  ;;  %v8448_v19 = vpop.f32.mrb[229].mxu1 }
 0xd05   : > { %v8494_v20 = vadd.f32 %v8448_v19, %v8387_v5  ;;  %v8450_v21 = vpop.f32.mrb[230].mxu1 }
 0xd06   : > { %v8451_v22 = vpop.f32.mrb[231].mxu1 }
 0xd08   : > { %v8594_v23 = vpop.f32.mrb[236].mxu0 }
 0xd09   : > { %v8602_v24 = vadd.f32 %v8594_v23, %v8495_v11  ;;  %v11831_v25 = vpop.f32.mrb[237].mxu0 }
 0xd0a   : > { %v8597_v26 = vpop.f32.mrb[238].mxu0 }
 0xd0b   : > { %v8553_v27 = vpop.f32.mrb[232].mxu1  ;;  %v11832_v28 = vpop.f32.mrb[239].mxu0 }
 0xd0c   : > { %v8600_v29 = vadd.f32 %v8553_v27, %v8493_v18  ;;  %v8555_v30 = vpop.f32.mrb[233].mxu1 }
 0xd0d   : > { %v8601_v31 = vadd.f32 %v8555_v30, %v8494_v20  ;;  %v8557_v32 = vpop.f32.mrb[234].mxu1 }
 0xd0e   : > { %v8558_v33 = vpop.f32.mrb[235].mxu1 }
 0xd10   : > { %v8701_v34 = vpop.f32.mrb[240].mxu0 }
 0xd11   : > { %v8709_v35 = vadd.f32 %v8701_v34, %v8602_v24  ;;  %v11837_v36 = vpop.f32.mrb[241].mxu0 }
 0xd12   : > { %v8704_v37 = vpop.f32.mrb[242].mxu0 }
 0xd13   : > { %v8660_v38 = vpop.f32.mrb[236].mxu1  ;;  %v11838_v39 = vpop.f32.mrb[243].mxu0 }
 0xd14   : > { %v8707_v40 = vadd.f32 %v8660_v38, %v8600_v29  ;;  %v8662_v41 = vpop.f32.mrb[237].mxu1 }
 0xd15   : > { %v8708_v42 = vadd.f32 %v8662_v41, %v8601_v31  ;;  %v8664_v12 = vpop.f32.mrb[238].mxu1 }
 0xd16   : > { %v8665_v43 = vpop.f32.mrb[239].mxu1 }
 0xd18   : > { %v8808_v44 = vpop.f32.mrb[244].mxu0 }
 0xd19   : > { %v8816_v45 = vadd.f32 %v8808_v44, %v8709_v35  ;;  %v11843_v46 = vpop.f32.mrb[245].mxu0 }
 0xd1a   : > { %v8811_v14 = vpop.f32.mrb[246].mxu0 }
 0xd1b   : > { %v8767_v47 = vpop.f32.mrb[240].mxu1  ;;  %v11844_v48 = vpop.f32.mrb[247].mxu0 }
 0xd1c   : > { %v8814_v10 = vadd.f32 %v8767_v47, %v8707_v40  ;;  %v8769_v49 = vpop.f32.mrb[241].mxu1 }
 0xd1d   : > { %v8815_v50 = vadd.f32 %v8769_v49, %v8708_v42  ;;  %v8771_v51 = vpop.f32.mrb[242].mxu1 }
 0xd1e   : > { %v8772_v0 = vpop.f32.mrb[243].mxu1 }
 0xd20   : > { %v8915_v52 = vpop.f32.mrb[248].mxu0 }
 0xd21   : > { %v8923_v53 = vadd.f32 %v8915_v52, %v8816_v45  ;;  %v11849_v54 = vpop.f32.mrb[249].mxu0 }
 0xd22   : > { %v8918_v55 = vpop.f32.mrb[250].mxu0 }
 0xd23   : > { %v8874_v56 = vpop.f32.mrb[244].mxu1  ;;  %v11850_v57 = vpop.f32.mrb[251].mxu0 }
 0xd24   : > { %v8921_v58 = vadd.f32 %v8874_v56, %v8814_v10  ;;  %v8876_v59 = vpop.f32.mrb[245].mxu1 }
 0xd25   : > { %v8922_v60 = vadd.f32 %v8876_v59, %v8815_v50  ;;  %v8878_v61 = vpop.f32.mrb[246].mxu1 }
 0xd26   : > { %v8879_v62 = vpop.f32.mrb[247].mxu1 }
 0xd28   : > { %v9022_v63 = vpop.f32.mrb[252].mxu0 }
 0xd29   : > { %v9030_v1 = vadd.f32 %v9022_v63, %v8923_v53  ;;  %v11855_v2 = vpop.f32.mrb[253].mxu0 }
 0xd2a   : > { %v9025_v3 = vpop.f32.mrb[254].mxu0 }
 0xd2b   : > { %v8981_v6 = vpop.f32.mrb[248].mxu1  ;;  %v11856_v4 = vpop.f32.mrb[255].mxu0 }
 0xd2c   : > { %v9028_v5 = vadd.f32 %v8981_v6, %v8921_v58  ;;  %v8983_v7 = vpop.f32.mrb[249].mxu1 }
 0xd2d   : > { %v9029_v8 = vadd.f32 %v8983_v7, %v8922_v60  ;;  %v8985_v9 = vpop.f32.mrb[250].mxu1 }
 0xd2e   : > { %v8986_v11 = vpop.f32.mrb[251].mxu1 }
 0xd30   : > { %v9129_v13 = vpop.f32.mrb[0].mxu0 }
 0xd31   : > { %v9137_v15 = vadd.f32 %v9129_v13, %v9030_v1  ;;  %v11861_v16 = vpop.f32.mrb[1].mxu0 }
 0xd32   : > { %v9132_v17 = vpop.f32.mrb[2].mxu0 }
 0xd33   : > { %v9088_v18 = vpop.f32.mrb[252].mxu1  ;;  %v11862_v19 = vpop.f32.mrb[3].mxu0 }
 0xd34   : > { %v9135_v20 = vadd.f32 %v9088_v18, %v9028_v5  ;;  %v9090_v21 = vpop.f32.mrb[253].mxu1 }
 0xd35   : > { %v9136_v22 = vadd.f32 %v9090_v21, %v9029_v8  ;;  %v9092_v23 = vpop.f32.mrb[254].mxu1 }
 0xd36   : > { %v9093_v24 = vpop.f32.mrb[255].mxu1 }
 0xd38   : > { %v9236_v25 = vpop.f32.mrb[4].mxu0 }
 0xd39   : > { %v9244_v26 = vadd.f32 %v9236_v25, %v9137_v15  ;;  %v11867_v27 = vpop.f32.mrb[5].mxu0 }
 0xd3a   : > { %v9239_v28 = vpop.f32.mrb[6].mxu0 }
 0xd3b   : > { %v9195_v29 = vpop.f32.mrb[0].mxu1  ;;  %v11868_v30 = vpop.f32.mrb[7].mxu0 }
 0xd3c   : > { %v9242_v31 = vadd.f32 %v9195_v29, %v9135_v20  ;;  %v9197_v32 = vpop.f32.mrb[1].mxu1 }
 0xd3d   : > { %v9243_v33 = vadd.f32 %v9197_v32, %v9136_v22  ;;  %v9199_v34 = vpop.f32.mrb[2].mxu1 }
 0xd3e   : > { %v9200_v35 = vpop.f32.mrb[3].mxu1 }
 0xd40   : > { %v9343_v36 = vpop.f32.mrb[8].mxu0 }
 0xd41   : > { %v9351_v37 = vadd.f32 %v9343_v36, %v9244_v26  ;;  %v11873_v38 = vpop.f32.mrb[9].mxu0 }
 0xd42   : > { %v9346_v39 = vpop.f32.mrb[10].mxu0 }
 0xd43   : > { %v9302_v40 = vpop.f32.mrb[4].mxu1  ;;  %v11874_v41 = vpop.f32.mrb[11].mxu0 }
 0xd44   : > { %v9349_v42 = vadd.f32 %v9302_v40, %v9242_v31  ;;  %v9304_v12 = vpop.f32.mrb[5].mxu1 }
 0xd45   : > { %v9350_v43 = vadd.f32 %v9304_v12, %v9243_v33  ;;  %v9306_v44 = vpop.f32.mrb[6].mxu1 }
 0xd46   : > { %v9307_v45 = vpop.f32.mrb[7].mxu1 }
 0xd48   : > { %v9450_v46 = vpop.f32.mrb[12].mxu0 }
 0xd49   : > { %v9458_v14 = vadd.f32 %v9450_v46, %v9351_v37  ;;  %v11879_v47 = vpop.f32.mrb[13].mxu0 }
 0xd4a   : > { %v9453_v48 = vpop.f32.mrb[14].mxu0 }
 0xd4b   : > { %v9409_v10 = vpop.f32.mrb[8].mxu1  ;;  %v11880_v49 = vpop.f32.mrb[15].mxu0 }
 0xd4c   : > { %v9456_v50 = vadd.f32 %v9409_v10, %v9349_v42  ;;  %v9411_v51 = vpop.f32.mrb[9].mxu1  ;;  %v10120_v49 = vpop.permute.xlu1 %10119 }
 0xd4d   : > { %v9457_v0 = vadd.f32 %v9411_v51, %v9350_v43  ;;  %v9413_v52 = vpop.f32.mrb[10].mxu1 }
 0xd4e   : > { %v9414_v53 = vpop.f32.mrb[11].mxu1 }
 0xd50   : > { %v9556_v54 = vpop.f32.mrb[16].mxu0 }
 0xd51   : > { %v9564_v55 = vadd.f32 %v9556_v54, %v9458_v14  ;;  %v11885_v56 = vpop.f32.mrb[17].mxu0 }
 0xd52   : > { %v9559_v57 = vpop.f32.mrb[18].mxu0 }
 0xd53   : > { %v9515_v58 = vpop.f32.mrb[12].mxu1  ;;  %v11886_v59 = vpop.f32.mrb[19].mxu0 }
 0xd54   : > { %v9562_v60 = vadd.f32 %v9515_v58, %v9456_v50  ;;  %v9517_v61 = vpop.f32.mrb[13].mxu1 }
 0xd55   : > { %v9563_v62 = vadd.f32 %v9517_v61, %v9457_v0  ;;  %v9519_v63 = vpop.f32.mrb[14].mxu1 }
 0xd56   : > { %v9520_v1 = vpop.f32.mrb[15].mxu1 }
 0xd58   : > { %v9667_v2 = vpop.f32.mrb[20].mxu0 }
 0xd59   : > { %v9675_v3 = vadd.f32 %v9667_v2, %v9564_v55  ;;  %v11891_v6 = vpop.f32.mrb[21].mxu0 }
 0xd5a   : > { %v9670_v4 = vpop.f32.mrb[22].mxu0 }
 0xd5b   : > { %v9626_v5 = vpop.f32.mrb[16].mxu1  ;;  %v11892_v7 = vpop.f32.mrb[23].mxu0 }
 0xd5c   : > { %v9673_v8 = vadd.f32 %v9626_v5, %v9562_v60  ;;  %v9628_v9 = vpop.f32.mrb[17].mxu1 }
 0xd5d   : > { %v9674_v11 = vadd.f32 %v9628_v9, %v9563_v62  ;;  %v9630_v13 = vpop.f32.mrb[18].mxu1 }
 0xd5e   : > { %v9631_v15 = vpop.f32.mrb[19].mxu1 }
 0xd60   : > { %v9777_v16 = vpop.f32.mrb[24].mxu0 }
 0xd61   : > { %v9785_v17 = vadd.f32 %v9777_v16, %v9675_v3  ;;  %v11897_v18 = vpop.f32.mrb[25].mxu0 }
 0xd62   : > { %v9780_v19 = vpop.f32.mrb[26].mxu0 }
 0xd63   : > { %v9736_v20 = vpop.f32.mrb[20].mxu1  ;;  %v11898_v21 = vpop.f32.mrb[27].mxu0 }
 0xd64   : > { %v9783_v22 = vadd.f32 %v9736_v20, %v9673_v8  ;;  %v9738_v23 = vpop.f32.mrb[21].mxu1 }
 0xd65   : > { %v9784_v24 = vadd.f32 %v9738_v23, %v9674_v11  ;;  %v9740_v25 = vpop.f32.mrb[22].mxu1 }
 0xd66   : > { %v9741_v26 = vpop.f32.mrb[23].mxu1 }
 0xd68   : > { %v9887_v27 = vpop.f32.mrb[28].mxu0 }
 0xd69   : > { %v9895_v28 = vadd.f32 %v9887_v27, %v9785_v17  ;;  %v11903_v29 = vpop.f32.mrb[29].mxu0 }
 0xd6a   : > { %v9890_v30 = vpop.f32.mrb[30].mxu0 }
 0xd6b   : > { %v9846_v31 = vpop.f32.mrb[24].mxu1  ;;  %v11904_v32 = vpop.f32.mrb[31].mxu0 }
 0xd6c   : > { %v9893_v33 = vadd.f32 %v9846_v31, %v9783_v22  ;;  %v9848_v34 = vpop.f32.mrb[25].mxu1 }
 0xd6d   : > { %v9894_v35 = vadd.f32 %v9848_v34, %v9784_v24  ;;  %v9850_v36 = vpop.f32.mrb[26].mxu1 }
 0xd6e   : > { %v9851_v37 = vpop.f32.mrb[27].mxu1 }
 0xd70   : > { %v9997_v38 = vpop.f32.mrb[32].mxu0 }
 0xd71   : > { %v10005_v39 = vadd.f32 %v9997_v38, %v9895_v28  ;;  %v11909_v40 = vpop.f32.mrb[33].mxu0 }
 0xd72   : > { %v10000_v41 = vpop.f32.mrb[34].mxu0 }
 0xd73   : > { %v9956_v42 = vpop.f32.mrb[28].mxu1  ;;  %v11910_v12 = vpop.f32.mrb[35].mxu0 }
 0xd74   : > { %v10003_v43 = vadd.f32 %v9956_v42, %v9893_v33  ;;  %v9958_v44 = vpop.f32.mrb[29].mxu1 }
 0xd75   : > { %v10004_v45 = vadd.f32 %v9958_v44, %v9894_v35  ;;  %v9960_v46 = vpop.f32.mrb[30].mxu1 }
 0xd76   : > { %v9961_v14 = vpop.f32.mrb[31].mxu1 }
 0xd78   : > { %v10107_v47 = vpop.f32.mrb[36].mxu0 }
 0xd79   : > { %v10115_v48 = vadd.f32 %v10107_v47, %v10005_v39  ;;  %v11915_v10 = vpop.f32.mrb[37].mxu0 }
 0xd7a   : > { %v10110_v50 = vpop.f32.mrb[38].mxu0 }
 0xd7b   : > { %v10124_v51 = vadd.f32 %v10120_v49, %v10115_v48  ;;  %v10066_v0 = vpop.f32.mrb[32].mxu1  ;;  %v11916_v52 = vpop.f32.mrb[39].mxu0 }
 0xd7c   : > { %v10113_v53 = vadd.f32 %v10066_v0, %v10003_v43  ;;  %v10068_v54 = vpop.f32.mrb[33].mxu1 }
 0xd7d   : > { %v10127_v55 = vmax.f32 %v10124_v51, 0.0  ;;  %v10114_v56 = vadd.f32 %v10068_v54, %v10004_v45  ;;  %v10070_v57 = vpop.f32.mrb[34].mxu1 }
 0xd7e   : > { %v10122_v58 = vadd.f32 %v10120_v49, %v10113_v53  ;;  %v10071_v59 = vpop.f32.mrb[35].mxu1 }
 0xd7f   : > { %v10123_v60 = vadd.f32 %v10120_v49, %v10114_v56  ;;  %10196 = vrot.lane.b32.xlu0 %v10127_v55, %s12299_s29  ;;  %10192 = vrot.lane.b32.xlu1 %v10127_v55, %s14675_s14  ;;  %s11029_s14 = sshll.u32 %s14850_s21, 4 }
 0xd80   : > { %v10125_v61 = vmax.f32 %v10122_v58, 0.0 }
 0xd81   : > { %v10126_v62 = vmax.f32 %v10123_v60, 0.0 }
 0xd82   : > { %10129 = vst.msk [vmem:[#allocation5] sm:$0xf] %vm10128_vm0, %v10125_v61 }
 0xd83   : > { %10146 = vrot.lane.b32.xlu0 %v10125_v61, %s14659_s25  ;;  %10131 = vrot.lane.b32.xlu1 %v10125_v61, %s14662_s1  ;;  %v10157_v63 = vcombine.low %v10125_v61, %v10126_v62  ;;  %s10227_s1 = sshll.u32 %s13663_s27, 4  ;;  %s10228_s1 = int_to_ptr.vmem [resolvable:$true] %s10227_s1 }
 0xd87   : > { %10151 = vrot.lane.b32.xlu0 %v10125_v61, %s14665_s23  ;;  %10136 = vrot.lane.b32.xlu1 %v10125_v61, %s12284_s20  ;;  %s14852_s23 = sld [smem:[#allocation28_spill]] }
 0xd8b   : > { %10171 = vrot.lane.b32.xlu0 %v10126_v62, %s14691_s4  ;;  %10141 = vrot.lane.b32.xlu1 %v10125_v61, %s12281_s16  ;;  %s14853_s16 = sand.u32 1, %s12241_s28   ;;  %s12187_s4 = scalar_lea.vmem %s10228_s1, 16 }
 0xd8c   : > { %p12188_p11 = scmp.ne.s32.totalorder %s10228_s1, %s12187_s4 }
 0xd8d   : > { %s14462_s24 = scalar_lea.hbm %s14852_s23, %s11029_s14 }
 0xd8e   : > { %p12189_p12 = pnand %p12188_p11, %p12434_p5 }
 0xd8f   : > { %10175 = vrot.lane.b32.xlu0 %v10126_v62, %s14670_s18  ;;  %10183 = vrot.lane.b32.xlu1 %v10126_v62, %s12280_s5  ;;  %s10212_s18 = scalar_lea.sflag [#allocation7], %s14853_s16  ;;  %s12300_s5 = smov [#allocation6]  }
 0xd90   : > { %p12190_p13 = pneg %p12189_p12 }
 0xd93   : > { %10179 = vrot.lane.b32.xlu0 %v10126_v62, %s12283_s30  ;;  %10187 = vrot.lane.b32.xlu1 %v10126_v62, %s14695_s26  ;;  %s12191_s26 = sshll.u32 %s12300_s5, 4  ;;  %s12192_s26 = int_to_ptr.vmem [resolvable:$false] %s12191_s26 }
 0xd94   : > { %s12193_s27 = scalar_lea.vmem %s12192_s26, 32  ;;  %p12194_p0 = scmp.lt.s32.totalorder %s10228_s1, %s12192_s26 }
 0xd95   : > { %p12195_p1 = scmp.lt.s32.totalorder %s12193_s27, %s12187_s4 }
 0xd97   : > { %10166 = vrot.lane.b32.xlu1 %v10126_v62, %s12279_s22  ;;  %10158 = vrot.lane.b32.xlu0 %v10157_v63, %s12282_s15  ;;  %p12196_p2 = por %p12195_p1, %p12194_p0 }
 0xd99   : > { %p12197_p3 = pnand %p12196_p2, %p12190_p13 }
 0xd9b   : > { %12200 = shalt.err (!%p12197_p3)
}
 0xd9c   : > { %s12201_s22 = scalar_lea.hbm %s14462_s24, 16  ;;  %s12205_s20 = scalar_lea.hbm %s14852_s23, 32 }
 0xd9d   : > { %p12202_p4 = scmp.ne.s32.totalorder %s14462_s24, %s12201_s22  ;;  %p12206_p9 = scmp.lt.u32.totalorder %s14462_s24, %s14852_s23 }
 0xd9e   : > { %p12207_p10 = scmp.lt.u32.totalorder %s12205_s20, %s12201_s22  ;;  %p12209_p12 = scmp.lt.u32.totalorder %s12201_s22, %s14462_s24 }
 0xd9f   : > { %p12203_p7 = pnand %p12202_p4, %p12434_p5 }
 0xda0   : > { %p12208_p11 = por %p12207_p10, %p12206_p9 }
 0xda1   : > { %p12204_p8 = pneg %p12203_p7 }
 0xda2   : > { %p12210_p13 = por %p12209_p12, %p12208_p11 }
 0xda4   : > { %p12211_p0 = pnand %p12210_p13, %p12204_p8 }
 0xda6   : > { %12214 = shalt.err (!%p12211_p0)
}
 0xda7   : > { %11917 = dma.vmem_to_hbm [thread:$0]  (%p12434_p5), %s10228_s1, 16, %s14462_s24, %s10212_s18   ;;  %10200 = vrot.lane.b32.xlu0 %v10127_v55, %s14718_s3  ;;  %vm10134_vm2 = vcmask 257152   ;;  %vm10139_vm1 = vcmask 388352   ;;  %vm10144_vm15 = vcmask 519552   ;;  %vm10149_vm3 = vcmask 650752  }
 0xda8   : > { %vm10154_vm4 = vcmask 781952   ;;  %s14854_s3 = sld [smem:[#allocation17_spill]]  ;;  %vm10164_vm5 = vcmask 913152   ;;  %vm10169_vm6 = vcmask 1044352   ;;  %s14856_s1 = sld [smem:[#allocation27_spill]] }
 0xdae   : > { %s14855_s21 = sshll.u32 %s14854_s3, 3 }
 0xdaf   : > { %s585_s25 = scalar_lea.vmem %s14856_s1, %s14855_s21 }
 0xdf1   : > { %v10197_v1 = vpop.permute.xlu0 %10196  ;;  %v10193_v2 = vpop.permute.xlu1 %10192 }
 0xdf5   : > { %v10147_v3 = vpop.permute.xlu0 %10146  ;;  %v10132_v6 = vpop.permute.xlu1 %10131 }
 0xdf6   : > { %10135 = vst.msk [vmem:[#allocation5] sm:$0xf] %vm10134_vm2, %v10132_v6 }
 0xdf9   : > { %v10152_v4 = vpop.permute.xlu0 %10151  ;;  %v10137_v5 = vpop.permute.xlu1 %10136 }
 0xdfa   : > { %10140 = vst.msk [vmem:[#allocation5] sm:$0xf] %vm10139_vm1, %v10137_v5 }
 0xdfd   : > { %v10172_v7 = vpop.permute.xlu0 %10171  ;;  %v10142_v8 = vpop.permute.xlu1 %10141 }
 0xdfe   : > { %10174 = vst.msk [vmem:[#allocation5 + $0x4] sm:$0xf] %vm10128_vm0, %v10172_v7 }
 0xdff   : > { %10145 = vst.msk [vmem:[#allocation5] sm:$0xf] %vm10144_vm15, %v10142_v8 }
 0xe00   : > { %10150 = vst.msk [vmem:[#allocation5] sm:$0xf] %vm10149_vm3, %v10147_v3 }
 0xe01   : > { %10155 = vst.msk [vmem:[#allocation5] sm:$0xf] %vm10154_vm4, %v10152_v4  ;;  %v10176_v9 = vpop.permute.xlu0 %10175  ;;  %v10184_v11 = vpop.permute.xlu1 %10183 }
 0xe02   : > { %10178 = vst.msk [vmem:[#allocation5 + $0x4] sm:$0xf] %vm10134_vm2, %v10176_v9 }
 0xe05   : > { %v10180_v13 = vpop.permute.xlu0 %10179  ;;  %v10188_v15 = vpop.permute.xlu1 %10187 }
 0xe06   : > { %10182 = vst.msk [vmem:[#allocation5 + $0x4] sm:$0xf] %vm10139_vm1, %v10180_v13 }
 0xe07   : > { %10186 = vst.msk [vmem:[#allocation5 + $0x4] sm:$0xf] %vm10144_vm15, %v10184_v11 }
 0xe08   : > { %10190 = vst.msk [vmem:[#allocation5 + $0x4] sm:$0xf] %vm10149_vm3, %v10188_v15 }
 0xe09   : > { %10195 = vst.msk [vmem:[#allocation5 + $0x4] sm:$0xf] %vm10154_vm4, %v10193_v2  ;;  %v10159_v16 = vpop.permute.xlu0 %10158  ;;  %v10167_v19 = vpop.permute.xlu1 %10166 }
 0xe0a   : > { %v10160_v17 = vrot.slane %v10159_v16, 4  ;;  %10199 = vst.msk [vmem:[#allocation5 + $0x4] sm:$0xf] %vm10164_vm5, %v10197_v1 }
 0xe0c   : > { %v10162_v18 = vsel %vm8397_vm10, %v10159_v16, %v10160_v17 }
 0xe0d   : > { %10165 = vst.msk [vmem:[#allocation5] sm:$0xf] %vm10164_vm5, %v10162_v18 }
 0xe0e   : > { %10170 = vst.msk [vmem:[#allocation5] sm:$0xf] %vm10169_vm6, %v10167_v19 }
 0xe19   : > { %v10201_v20 = vpop.permute.xlu0 %10200 }
 0xe1a   : > { %10203 = vst.msk [vmem:[#allocation5 + $0x4] sm:$0xf] %vm10169_vm6, %v10201_v20 }
 0xe21   : > { %v10204_v21 = vld [vmem:[#allocation5] sm:$0xff] }
 0xe22   : > { %10205 = vst [vmem:[%s585_s25] sm:$0xff] %v10204_v21 }
 0xe23 PF: > { %s14857_s2 = sld [smem:[#allocation11_spill]]  ;;  %s14858_s24 = sld [smem:[#allocation9_spill]] }
 0xe29   : > { %p11923_p5 = scmp.ge.s32.totalorder %s14857_s2, 2  ;;  %s10247_s18 = sand.u32 1, %s14858_s24  }
 0xe2a   : > { %s10248_s4 = scalar_lea.sflag [#allocation7], %s10247_s18 }
 0xe2b   : > { %p11920_p1 = pnand %p11923_p5, %p12438_p6 }
 0xe2d   : > { %12232 = dma.done.wait (!%p11920_p1), %s10248_s4, 16  }
 0xe2e   : > { %12234 = vsyncadd (!%p11920_p1), %s10248_s4, 4294967280  ;;  %s14860_s30 = sld [smem:[#allocation13_spill]]  ;;  %s14861_s5 = sld [smem:[#allocation10_spill]] }
 0xe2f   : > { %s14862_s29 = sld [smem:[#allocation14_spill]]  ;;  %s14863_s27 = smov %s12241_s28 }
 0xe34   : > { %p29_p2 = scmp.ge.s32.totalorder %s14860_s30, 4   ;;  %s14864_s28 = smov %s14861_s5 }
 0xe36   :  { %31 = sbr.rel (!%p29_p2) target bundleno = 15 (0xf), region = 246 }
 0xe3d   :  { %10252 = vsyncpa [#allocation7], 1 }
 0xe3e   :  { %10254 = vsyncpa [#allocation7 + $0x1], 1 }

</bundles_post_ra>
